<compile_context>
chip_gen: v5e
topology: v5e:2x2
jax: 0.10.0
libtpu: 0.0.40
codegen_flags: <defaults>
</compile_context>

<pallas_src>
import functools

import jax
import jax.numpy as jnp
from jax.experimental import pallas as pl
from jax.experimental.pallas import tpu as pltpu

BN_EPS = 1e-5  # PyTorch BatchNorm2d default

# (phase r, window offset dh) -> kernel tap kh, for ConvTranspose k=4, s=2, p=1:
#   out[2q + r] = sum_dh x_pad[q + dh] * w[_PHASE_TAP[(r, dh)]]
_PHASE_TAP = {(0, 0): 3, (0, 1): 1, (1, 1): 2, (1, 2): 0}
# window offset dh -> output phases r it feeds
_DH_PHASES = {0: (0,), 1: (0, 1), 2: (1,)}
# canonical order of the 16 non-zero (dh, dw, r, s) tap/phase combinations
_TAPS = [(dh, dw, r, s)
         for dh in range(3) for dw in range(3)
         for r in _DH_PHASES[dh] for s in _DH_PHASES[dw]]


def _round_up(x, m):
    return ((x + m - 1) // m) * m


def _pick_tile(m, cap=1024):
    if m <= cap:
        return m
    for t in (cap, 512, 256, 128, 64, 32, 16, 8):
        if m % t == 0:
            return t
    return cap  # caller pads M up to a multiple of the tile


def _vmem_limit(block_bytes):
    # per-step footprint * (double buffering + in-kernel temporaries) + margin,
    # clamped so it is valid on v5e/v6e (128 MiB) and v7x (64 MiB) alike.
    est = 3 * int(block_bytes) + (4 << 20)
    return int(min(max(est, 32 << 20), 48 << 20))


# ----------------------- Pallas kernels -----------------------

def _matmul_stats_kernel(a_ref, b_ref, y_ref, sum_ref, ssq_ref):
    # y = a @ b (bf16 in, f32 acc).  Per-M-tile PARTIAL sum / sum^2 rows are
    # written to this tile's own output block, so the M axis is "parallel"
    # (v7x megacore) instead of a revisited accumulator.
    acc = jnp.dot(a_ref[...], b_ref[...], preferred_element_type=jnp.float32)
    y_ref[...] = acc.astype(y_ref.dtype)
    sum_ref[0] = jnp.sum(acc, axis=0, keepdims=True)
    ssq_ref[0] = jnp.sum(acc * acc, axis=0, keepdims=True)


def _affine_relu_kernel(y_ref, scale_ref, shift_ref, o_ref):
    # Folded BatchNorm (scale/shift from batch stats) + ReLU, bf16 in/out.
    y = y_ref[...].astype(jnp.float32)
    o_ref[...] = jnp.maximum(y * scale_ref[...] + shift_ref[...],
                             0.0).astype(o_ref.dtype)


def _s2_phase_accumulate(x_ref, w_ref, *, mrows, wpitch):
    # x_ref: (1, rows_pad, Cin) flattened zero-padded image (row pitch = wpitch)
    # w_ref: (16, Cin, cp) per-(tap, phase) weight slabs in _TAPS order.
    # Returns {(r, s): (mrows, cp) f32 accumulator}.
    accs = {}
    last = None
    xv = None
    for i, (dh, dw, r, s) in enumerate(_TAPS):
        if (dh, dw) != last:           # 9 distinct tap slices, loaded once each
            xv = x_ref[0, pl.ds(dh * wpitch + dw, mrows), :]
            last = (dh, dw)
        contrib = jnp.dot(xv, w_ref[i], preferred_element_type=jnp.float32)
        ph = (r, s)
        accs[ph] = contrib if ph not in accs else accs[ph] + contrib
    return accs


def _deconv_s2_stats_kernel(x_ref, w_ref, mask_ref, y_ref, sum_ref, ssq_ref,
                            *, mrows, wpitch, cp):
    accs = _s2_phase_accumulate(x_ref, w_ref, mrows=mrows, wpitch=wpitch)
    m = mask_ref[...]                  # (mrows, 1): 1.0 on valid rows, 0.0 on
    for (r, s), acc in accs.items():   # the (W+2)-pitch garbage rows
        c0 = (2 * r + s) * cp
        y_ref[0, :, c0:c0 + cp] = acc.astype(y_ref.dtype)
        am = acc * m
        sum_ref[0, :, c0:c0 + cp] = jnp.sum(am, axis=0, keepdims=True)
        ssq_ref[0, :, c0:c0 + cp] = jnp.sum(am * acc, axis=0, keepdims=True)


def _deconv_s2_tanh_kernel(x_ref, w_ref, y_ref, *, mrows, wpitch, cp):
    accs = _s2_phase_accumulate(x_ref, w_ref, mrows=mrows, wpitch=wpitch)
    for (r, s), acc in accs.items():
        c0 = (2 * r + s) * cp
        y_ref[0, :, c0:c0 + cp] = jnp.tanh(acc).astype(y_ref.dtype)


# ----------------------- pallas_call wrappers -----------------------

def matmul_stats(a, b):
    # a: (M, K), b: (K, L) -> y (M, L) bf16, per-lane sum / sum^2 (L,) f32.
    m, k = a.shape
    l = b.shape[1]
    tm = _pick_tile(m, cap=512)
    mp = _round_up(m, tm)
    if mp != m:
        a = jnp.pad(a, ((0, mp - m), (0, 0)))      # zero rows: no stats impact
    blk = tm * k * 2 + k * l * 2 + tm * l * 2 + 2 * l * 4
    y, ps, pss = pl.pallas_call(
        _matmul_stats_kernel,
        out_shape=(jax.ShapeDtypeStruct((mp, l), jnp.bfloat16),
                   jax.ShapeDtypeStruct((mp // tm, 1, l), jnp.float32),
                   jax.ShapeDtypeStruct((mp // tm, 1, l), jnp.float32)),
        grid=(mp // tm,),
        in_specs=[pl.BlockSpec((tm, k), lambda i: (i, 0)),
                  pl.BlockSpec((k, l), lambda i: (0, 0))],
        out_specs=(pl.BlockSpec((tm, l), lambda i: (i, 0)),
                   pl.BlockSpec((1, 1, l), lambda i: (i, 0, 0)),
                   pl.BlockSpec((1, 1, l), lambda i: (i, 0, 0))),
        compiler_params=pltpu.CompilerParams(
            dimension_semantics=("parallel",),
            vmem_limit_bytes=_vmem_limit(blk)),
    )(a, b)
    s = jnp.sum(ps, axis=0)[0]
    ss = jnp.sum(pss, axis=0)[0]
    return y[:m], s, ss


def affine_relu(y2d, scale, shift):
    m, l = y2d.shape
    tm = _pick_tile(m, cap=1024)
    mp = _round_up(m, tm)
    if mp != m:
        y2d = jnp.pad(y2d, ((0, mp - m), (0, 0)))
    blk = tm * l * (2 + 2) + 2 * l * 4
    out = pl.pallas_call(
        _affine_relu_kernel,
        out_shape=jax.ShapeDtypeStruct((mp, l), jnp.bfloat16),
        grid=(mp // tm,),
        in_specs=[pl.BlockSpec((tm, l), lambda i: (i, 0)),
                  pl.BlockSpec((1, l), lambda i: (0, 0)),
                  pl.BlockSpec((1, l), lambda i: (0, 0))],
        out_specs=pl.BlockSpec((tm, l), lambda i: (i, 0)),
        compiler_params=pltpu.CompilerParams(
            dimension_semantics=("parallel",),
            vmem_limit_bytes=_vmem_limit(blk)),
    )(y2d, scale.reshape(1, l).astype(jnp.float32),
      shift.reshape(1, l).astype(jnp.float32))
    return out[:m] if mp != m else out


def _run_deconv_s2(act, wpk, *, cp, with_stats, out_dtype):
    # act: (N, H, W, Cin) bf16 NHWC.  One fused kernel invocation per image.
    n, h, wd, cin = act.shape
    xf, rows_pad, wpitch = _prep_s2_input(act)
    mrows = h * wpitch
    l = 4 * cp
    blk = rows_pad * cin * 2 + wpk.size * 2 + mrows * l * 4 + mrows * 4
    cparams = pltpu.CompilerParams(dimension_semantics=("parallel",),
                                   vmem_limit_bytes=_vmem_limit(blk))
    if with_stats:
        kernel = functools.partial(_deconv_s2_stats_kernel,
                                   mrows=mrows, wpitch=wpitch, cp=cp)
        mask = (jnp.arange(mrows) % wpitch < wd).astype(jnp.float32)
        mask = mask.reshape(mrows, 1)
        return pl.pallas_call(
            kernel,
            out_shape=(jax.ShapeDtypeStruct((n, mrows, l), out_dtype),
                       jax.ShapeDtypeStruct((n, 1, l), jnp.float32),
                       jax.ShapeDtypeStruct((n, 1, l), jnp.float32)),
            grid=(n,),
            in_specs=[pl.BlockSpec((1, rows_pad, cin), lambda i: (i, 0, 0)),
                      pl.BlockSpec(wpk.shape, lambda i: (0, 0, 0)),
                      pl.BlockSpec((mrows, 1), lambda i: (0, 0))],
            out_specs=(pl.BlockSpec((1, mrows, l), lambda i: (i, 0, 0)),
                       pl.BlockSpec((1, 1, l), lambda i: (i, 0, 0)),
                       pl.BlockSpec((1, 1, l), lambda i: (i, 0, 0))),
            compiler_params=cparams,
        )(xf, wpk, mask)
    kernel = functools.partial(_deconv_s2_tanh_kernel,
                               mrows=mrows, wpitch=wpitch, cp=cp)
    return pl.pallas_call(
        kernel,
        out_shape=jax.ShapeDtypeStruct((n, mrows, l), out_dtype),
        grid=(n,),
        in_specs=[pl.BlockSpec((1, rows_pad, cin), lambda i: (i, 0, 0)),
                  pl.BlockSpec(wpk.shape, lambda i: (0, 0, 0))],
        out_specs=pl.BlockSpec((1, mrows, l), lambda i: (i, 0, 0)),
        compiler_params=cparams,
    )(xf, wpk)


# ----------------------- JAX glue (layout + small reductions only) -----------

def _prep_s2_input(act):
    # (N, H, W, C) -> zero-pad spatial by 1, flatten (H+2, W+2) into one row
    # axis (pitch W+2) and append >=2 zero tail rows so every in-kernel tap
    # slice of length H*(W+2) is in bounds.
    n, h, w, c = act.shape
    wpitch = w + 2
    rows = (h + 2) * wpitch
    rows_pad = _round_up(rows + 2, 8)
    xp = jnp.pad(act, ((0, 0), (1, 1), (1, 1), (0, 0)))
    xf = xp.reshape(n, rows, c)
    xf = jnp.pad(xf, ((0, 0), (0, rows_pad - rows), (0, 0)))
    return xf, rows_pad, wpitch


def _first_wmat(w, cp):
    # 1x1 input, stride 1, pad 0: y[n, kh, kw, co] = sum_ci x[n, ci] * w[ci, co, kh, kw]
    cin, cout, K, _ = w.shape
    b = jnp.zeros((cin, K, K, cp), jnp.float32)
    b = b.at[:, :, :, :cout].set(jnp.transpose(w, (0, 2, 3, 1)))
    return b.reshape(cin, K * K * cp)


def _pack_s2_weights(w, cin_pad, cp):
    # w: (Cin, Cout, 4, 4) -> (16, cin_pad, cp) per-(tap, phase) slabs,
    # zero-padded on input channels (carried pad channels) and output channels.
    cin, cout, _, _ = w.shape
    wp = jnp.zeros((len(_TAPS), cin_pad, cp), jnp.float32)
    for i, (dh, dw, r, s) in enumerate(_TAPS):
        kh = _PHASE_TAP[(r, dh)]
        kw = _PHASE_TAP[(s, dw)]
        wp = wp.at[i, :cin, :cout].set(w[:, :, kh, kw])
    return wp.astype(jnp.bfloat16)


def _depth_to_space(y, n, h, wd, wpitch, cp):
    # y: (N, H*Wp, 4*cp) lanes (r, s, c) -> (N, 2H, 2W, cp); drops garbage cols.
    t = y.reshape(n, h, wpitch, 2, 2, cp)[:, :, :wd]
    t = t.transpose(0, 1, 3, 2, 4, 5)
    return t.reshape(n, 2 * h, 2 * wd, cp)


def _bn_scale_shift(s, ss, gamma, beta, *, groups, cp, cout, count):
    # Training-mode batch stats (biased variance, like PyTorch BN).
    # Note: E[x^2]-E[x]^2 in f32 from per-image/per-tile partials; acceptable
    # for DCGAN-scale reductions.
    s = s.reshape(groups, cp).sum(0)
    ss = ss.reshape(groups, cp).sum(0)
    mean = s / count
    var = jnp.maximum(ss / count - mean * mean, 0.0)
    g = jnp.zeros((cp,), jnp.float32).at[:cout].set(gamma)
    b = jnp.zeros((cp,), jnp.float32).at[:cout].set(beta)
    inv = jax.lax.rsqrt(var + BN_EPS)
    scale = g * inv
    shift = b - mean * scale
    return scale, shift


def deconv_first_bn_relu(x2d, layer):
    # x2d: (N, nz).  ConvTranspose(k=4, s=1, p=0) on a 1x1 input + BN + ReLU.
    w = layer["w"]
    cout = w.shape[1]
    n = x2d.shape[0]
    cp = _round_up(cout, 32)
    a = x2d.astype(jnp.bfloat16)
    b = _first_wmat(w, cp).astype(jnp.bfloat16)       # (nz, 16*cp), lanes (kh,kw,c)
    y, s, ss = matmul_stats(a, b)
    scale, shift = _bn_scale_shift(s, ss, layer["gamma"], layer["beta"],
                                   groups=16, cp=cp, cout=cout, count=n * 16)
    y = affine_relu(y, jnp.tile(scale, 16), jnp.tile(shift, 16))
    return y.reshape(n, 4, 4, cp)                     # NHWC, carries cp channels


def deconv_s2_bn_relu(act, layer):
    # act: (N, H, W, Cin_pad) bf16 NHWC.  ConvTranspose(k=4,s=2,p=1) + BN + ReLU.
    w = layer["w"]
    cout = w.shape[1]
    n, h, wd, cin = act.shape
    cp = _round_up(cout, 32)
    wpk = _pack_s2_weights(w, cin, cp)
    y, ps, pss = _run_deconv_s2(act, wpk, cp=cp, with_stats=True,
                                out_dtype=jnp.bfloat16)
    s = jnp.sum(ps, axis=0)[0]
    ss = jnp.sum(pss, axis=0)[0]
    scale, shift = _bn_scale_shift(s, ss, layer["gamma"], layer["beta"],
                                   groups=4, cp=cp, cout=cout,
                                   count=n * h * wd * 4)
    mrows = h * (wd + 2)
    y2 = affine_relu(y.reshape(n * mrows, 4 * cp),
                     jnp.tile(scale, 4), jnp.tile(shift, 4))
    return _depth_to_space(y2.reshape(n, mrows, 4 * cp), n, h, wd, wd + 2, cp)


def deconv_s2_tanh(act, w):
    # Last layer: ConvTranspose(k=4, s=2, p=1) + tanh (no BN).
    cout = w.shape[1]
    n, h, wd, cin = act.shape
    cp = _round_up(cout, 32)
    wpk = _pack_s2_weights(w, cin, cp)
    y = _run_deconv_s2(act, wpk, cp=cp, with_stats=False, out_dtype=jnp.float32)
    img = _depth_to_space(y, n, h, wd, wd + 2, cp)
    return img[..., :cout]


# ----------------------- Generator -----------------------

def init_generator_params(key, nz, ngf, nc, num_stages):
    dim = 2 ** num_stages
    specs = [(nz, ngf * dim)]
    for i in range(num_stages, 0, -1):
        specs.append((ngf * 2 ** i, ngf * 2 ** (i - 1)))
    specs.append((ngf, nc))

    params = []
    for idx, (cin, cout) in enumerate(specs):
        key, wk, gk, bk = jax.random.split(key, 4)
        layer = {"w": 0.02 * jax.random.normal(wk, (cin, cout, 4, 4), jnp.float32)}
        if idx < len(specs) - 1:                      # all but last have BatchNorm2d
            layer["gamma"] = 1.0 + 0.1 * jax.random.normal(gk, (cout,), jnp.float32)
            layer["beta"] = 0.1 * jax.random.normal(bk, (cout,), jnp.float32)
        params.append(layer)
    return params


def generator_forward(params, x):
    # x: (N, nz, 1, 1) NCHW latent.  Layer roles are fixed by position
    # (first: s=1/p=0 + BN + ReLU, middle: s=2/p=1 + BN + ReLU, last: s=2/p=1 + tanh),
    # so the jitted pytree contains only arrays.
    n = x.shape[0]
    act = deconv_first_bn_relu(x.reshape(n, -1), params[0])
    for layer in params[1:-1]:
        act = deconv_s2_bn_relu(act, layer)
    img = deconv_s2_tanh(act, params[-1]["w"])        # (N, 2H, 2W, nc) f32 NHWC
    return jnp.transpose(img, (0, 3, 1, 2))           # NCHW only at the boundary


if __name__ == "__main__":
    # params = {'num_stages': 2, 'nz': 8, 'ngf': 4, 'nc': 3}, batch = 2
    num_stages, nz, ngf, nc, N = 2, 8, 4, 3, 2
    key = jax.random.PRNGKey(0)
    key, xk = jax.random.split(key)
    x = jax.random.normal(xk, (N, nz, 1, 1), jnp.float32)  # NCHW latent
    params = init_generator_params(key, nz, ngf, nc, num_stages)

    fwd = jax.jit(generator_forward)
    y = jax.block_until_ready(fwd(params, x))

    out_hw = 4 * (2 ** (num_stages + 1))  # 4 -> 8 -> 16 -> 32
    assert y.shape == (N, nc, out_hw, out_hw), y.shape
    assert bool(jnp.all(jnp.isfinite(y)))
    assert bool(jnp.all(jnp.abs(y) <= 1.0))  # tanh output range
    print("KERNEL_OK")
</pallas_src>

<mosaic_0001>
module attributes {stable_mosaic.version = 11 : i64} {
  func.func @_matmul_stats_kernel(%arg0: i32, %arg1: memref<2x8xbf16, #tpu.memory_space<vmem>>, %arg2: memref<8x512xbf16, #tpu.memory_space<vmem>>, %arg3: memref<2x512xbf16, #tpu.memory_space<vmem>>, %arg4: memref<1x1x512xf32, #tpu.memory_space<vmem>>, %arg5: memref<1x1x512xf32, #tpu.memory_space<vmem>>) attributes {dimension_semantics = [#tpu.dimension_semantics<parallel>], iteration_bounds = array<i64: 1>, scalar_prefetch = 0 : i64, scratch_operands = 0 : i64, tpu.core_type = #tpu.core_type<tc>, window_params = [{transform_indices = @transform_0, window_bounds = array<i64: 2, 8>}, {pipeline_mode = #tpu.pipeline_mode<synchronous>, transform_indices = @transform_1, window_bounds = array<i64: 8, 512>}, {transform_indices = @transform_2, window_bounds = array<i64: 2, 512>}, {transform_indices = @transform_3, window_bounds = array<i64: 1, 1, 512>}, {transform_indices = @transform_4, window_bounds = array<i64: 1, 1, 512>}]} {
    %c0 = arith.constant 0 : index
    %c0_0 = arith.constant 0 : index
    %0 = vector.load %arg1[%c0, %c0_0] : memref<2x8xbf16, #tpu.memory_space<vmem>>, vector<2x8xbf16>
    %c0_1 = arith.constant 0 : index
    %c0_2 = arith.constant 0 : index
    %1 = vector.load %arg2[%c0_1, %c0_2] : memref<8x512xbf16, #tpu.memory_space<vmem>>, vector<8x512xbf16>
    %cst = arith.constant dense<0.000000e+00> : vector<2x512xf32>
    %2 = tpu.matmul %0, %1, %cst {dimension_numbers = #tpu.dot_dimension_numbers<[1], [0], [0], [1], [0, 0, 1, 1], [], []>} : vector<2x8xbf16>, vector<8x512xbf16>, vector<2x512xf32> -> vector<2x512xf32>
    %3 = arith.truncf %2 : vector<2x512xf32> to vector<2x512xbf16>
    %c0_3 = arith.constant 0 : index
    %c0_4 = arith.constant 0 : index
    %4 = vector.load %arg3[%c0_3, %c0_4] : memref<2x512xbf16, #tpu.memory_space<vmem>>, vector<2x512xbf16>
    tpu.vector_store %arg3[%c0_3, %c0_4], %3 {strides = array<i32>} : memref<2x512xbf16, #tpu.memory_space<vmem>>, vector<2x512xbf16>,
    %cst_5 = arith.constant dense<0.000000e+00> : vector<512xf32>
    %5 = vector.multi_reduction <add>, %2, %cst_5 [0] : vector<2x512xf32> to vector<512xf32>
    %6 = vector.shape_cast %5 : vector<512xf32> to vector<1x512xf32>
    %c0_6 = arith.constant 0 : index
    %c0_7 = arith.constant 0 : index
    %c0_8 = arith.constant 0 : index
    %7 = vector.load %arg4[%c0_6, %c0_7, %c0_8] : memref<1x1x512xf32, #tpu.memory_space<vmem>>, vector<1x1x512xf32>
    %8 = vector.shape_cast %7 : vector<1x1x512xf32> to vector<1x512xf32>
    %9 = vector.shape_cast %6 : vector<1x512xf32> to vector<1x1x512xf32>
    tpu.vector_store %arg4[%c0_6, %c0_7, %c0_8], %9 {strides = array<i32>} : memref<1x1x512xf32, #tpu.memory_space<vmem>>, vector<1x1x512xf32>,
    %10 = arith.mulf %2, %2 : vector<2x512xf32>
    %cst_9 = arith.constant dense<0.000000e+00> : vector<512xf32>
    %11 = vector.multi_reduction <add>, %10, %cst_9 [0] : vector<2x512xf32> to vector<512xf32>
    %12 = vector.shape_cast %11 : vector<512xf32> to vector<1x512xf32>
    %c0_10 = arith.constant 0 : index
    %c0_11 = arith.constant 0 : index
    %c0_12 = arith.constant 0 : index
    %13 = vector.load %arg5[%c0_10, %c0_11, %c0_12] : memref<1x1x512xf32, #tpu.memory_space<vmem>>, vector<1x1x512xf32>
    %14 = vector.shape_cast %13 : vector<1x1x512xf32> to vector<1x512xf32>
    %15 = vector.shape_cast %12 : vector<1x512xf32> to vector<1x1x512xf32>
    tpu.vector_store %arg5[%c0_10, %c0_11, %c0_12], %15 {strides = array<i32>} : memref<1x1x512xf32, #tpu.memory_space<vmem>>, vector<1x1x512xf32>,
    return
  }
  func.func @transform_0(%arg0: i32) -> (i32, i32) {
    %c0_i32 = arith.constant 0 : i32
    %c0_i32_0 = arith.constant 0 : i32
    return %arg0, %c0_i32 : i32, i32
  }
  func.func @transform_1(%arg0: i32) -> (i32, i32) {
    %c0_i32 = arith.constant 0 : i32
    %c0_i32_0 = arith.constant 0 : i32
    %c0_i32_1 = arith.constant 0 : i32
    return %c0_i32, %c0_i32_0 : i32, i32
  }
  func.func @transform_2(%arg0: i32) -> (i32, i32) {
    %c0_i32 = arith.constant 0 : i32
    %c0_i32_0 = arith.constant 0 : i32
    return %arg0, %c0_i32 : i32, i32
  }
  func.func @transform_3(%arg0: i32) -> (i32, i32, i32) {
    %c0_i32 = arith.constant 0 : i32
    %c0_i32_0 = arith.constant 0 : i32
    %c0_i32_1 = arith.constant 0 : i32
    return %arg0, %c0_i32, %c0_i32_0 : i32, i32, i32
  }
  func.func @transform_4(%arg0: i32) -> (i32, i32, i32) {
    %c0_i32 = arith.constant 0 : i32
    %c0_i32_0 = arith.constant 0 : i32
    %c0_i32_1 = arith.constant 0 : i32
    return %arg0, %c0_i32, %c0_i32_0 : i32, i32, i32
  }
}

module attributes {stable_mosaic.version = 11 : i64} {
  func.func @_affine_relu_kernel(%arg0: i32, %arg1: memref<2x512xbf16, #tpu.memory_space<vmem>>, %arg2: memref<1x512xf32, #tpu.memory_space<vmem>>, %arg3: memref<1x512xf32, #tpu.memory_space<vmem>>, %arg4: memref<2x512xbf16, #tpu.memory_space<vmem>>) attributes {dimension_semantics = [#tpu.dimension_semantics<parallel>], iteration_bounds = array<i64: 1>, scalar_prefetch = 0 : i64, scratch_operands = 0 : i64, tpu.core_type = #tpu.core_type<tc>, window_params = [{transform_indices = @transform_0, window_bounds = array<i64: 2, 512>}, {pipeline_mode = #tpu.pipeline_mode<synchronous>, transform_indices = @transform_1, window_bounds = array<i64: 1, 512>}, {pipeline_mode = #tpu.pipeline_mode<synchronous>, transform_indices = @transform_2, window_bounds = array<i64: 1, 512>}, {transform_indices = @transform_3, window_bounds = array<i64: 2, 512>}]} {
    %c0 = arith.constant 0 : index
    %c0_0 = arith.constant 0 : index
    %0 = vector.load %arg1[%c0, %c0_0] : memref<2x512xbf16, #tpu.memory_space<vmem>>, vector<2x512xbf16>
    %1 = arith.extf %0 : vector<2x512xbf16> to vector<2x512xf32>
    %c0_1 = arith.constant 0 : index
    %c0_2 = arith.constant 0 : index
    %2 = vector.load %arg2[%c0_1, %c0_2] : memref<1x512xf32, #tpu.memory_space<vmem>>, vector<1x512xf32>
    %3 = vector.broadcast %2 : vector<1x512xf32> to vector<2x512xf32>
    %4 = arith.mulf %1, %3 : vector<2x512xf32>
    %c0_3 = arith.constant 0 : index
    %c0_4 = arith.constant 0 : index
    %5 = vector.load %arg3[%c0_3, %c0_4] : memref<1x512xf32, #tpu.memory_space<vmem>>, vector<1x512xf32>
    %6 = vector.broadcast %5 : vector<1x512xf32> to vector<2x512xf32>
    %7 = arith.addf %4, %6 : vector<2x512xf32>
    %cst = arith.constant 0.000000e+00 : f32
    %8 = vector.broadcast %cst : f32 to vector<2x512xf32>
    %9 = arith.maximumf %7, %8 : vector<2x512xf32>
    %10 = arith.truncf %9 : vector<2x512xf32> to vector<2x512xbf16>
    %c0_5 = arith.constant 0 : index
    %c0_6 = arith.constant 0 : index
    %11 = vector.load %arg4[%c0_5, %c0_6] : memref<2x512xbf16, #tpu.memory_space<vmem>>, vector<2x512xbf16>
    tpu.vector_store %arg4[%c0_5, %c0_6], %10 {strides = array<i32>} : memref<2x512xbf16, #tpu.memory_space<vmem>>, vector<2x512xbf16>,
    return
  }
  func.func @transform_0(%arg0: i32) -> (i32, i32) {
    %c0_i32 = arith.constant 0 : i32
    %c0_i32_0 = arith.constant 0 : i32
    return %arg0, %c0_i32 : i32, i32
  }
  func.func @transform_1(%arg0: i32) -> (i32, i32) {
    %c0_i32 = arith.constant 0 : i32
    %c0_i32_0 = arith.constant 0 : i32
    %c0_i32_1 = arith.constant 0 : i32
    return %c0_i32, %c0_i32_0 : i32, i32
  }
  func.func @transform_2(%arg0: i32) -> (i32, i32) {
    %c0_i32 = arith.constant 0 : i32
    %c0_i32_0 = arith.constant 0 : i32
    %c0_i32_1 = arith.constant 0 : i32
    return %c0_i32, %c0_i32_0 : i32, i32
  }
  func.func @transform_3(%arg0: i32) -> (i32, i32) {
    %c0_i32 = arith.constant 0 : i32
    %c0_i32_0 = arith.constant 0 : i32
    return %arg0, %c0_i32 : i32, i32
  }
}

module attributes {stable_mosaic.version = 11 : i64} {
  func.func @_deconv_s2_stats_kernel(%arg0: i32, %arg1: memref<1x40x32xbf16, #tpu.memory_space<vmem>>, %arg2: memref<16x32x32xbf16, #tpu.memory_space<vmem>>, %arg3: memref<24x1xf32, #tpu.memory_space<vmem>>, %arg4: memref<1x24x128xbf16, #tpu.memory_space<vmem>>, %arg5: memref<1x1x128xf32, #tpu.memory_space<vmem>>, %arg6: memref<1x1x128xf32, #tpu.memory_space<vmem>>) attributes {dimension_semantics = [#tpu.dimension_semantics<parallel>], iteration_bounds = array<i64: 2>, scalar_prefetch = 0 : i64, scratch_operands = 0 : i64, tpu.core_type = #tpu.core_type<tc>, window_params = [{transform_indices = @transform_0, window_bounds = array<i64: 1, 40, 32>}, {pipeline_mode = #tpu.pipeline_mode<synchronous>, transform_indices = @transform_1, window_bounds = array<i64: 16, 32, 32>}, {pipeline_mode = #tpu.pipeline_mode<synchronous>, transform_indices = @transform_2, window_bounds = array<i64: 24, 1>}, {transform_indices = @transform_3, window_bounds = array<i64: 1, 24, 128>}, {transform_indices = @transform_4, window_bounds = array<i64: 1, 1, 128>}, {transform_indices = @transform_5, window_bounds = array<i64: 1, 1, 128>}]} {
    %c0 = arith.constant 0 : index
    %c0_0 = arith.constant 0 : index
    %c0_1 = arith.constant 0 : index
    %0 = vector.load %arg1[%c0, %c0_0, %c0_1] : memref<1x40x32xbf16, #tpu.memory_space<vmem>>, vector<1x24x32xbf16>
    %1 = vector.shape_cast %0 : vector<1x24x32xbf16> to vector<24x32xbf16>
    %c0_2 = arith.constant 0 : index
    %c0_3 = arith.constant 0 : index
    %c0_4 = arith.constant 0 : index
    %2 = vector.load %arg2[%c0_2, %c0_3, %c0_4] : memref<16x32x32xbf16, #tpu.memory_space<vmem>>, vector<1x32x32xbf16>
    %3 = vector.shape_cast %2 : vector<1x32x32xbf16> to vector<32x32xbf16>
    %cst = arith.constant dense<0.000000e+00> : vector<24x32xf32>
    %4 = tpu.matmul %1, %3, %cst {dimension_numbers = #tpu.dot_dimension_numbers<[1], [0], [0], [1], [0, 0, 1, 1], [], []>} : vector<24x32xbf16>, vector<32x32xbf16>, vector<24x32xf32> -> vector<24x32xf32>
    %c0_5 = arith.constant 0 : index
    %c1 = arith.constant 1 : index
    %c0_6 = arith.constant 0 : index
    %5 = vector.load %arg1[%c0_5, %c1, %c0_6] : memref<1x40x32xbf16, #tpu.memory_space<vmem>>, vector<1x24x32xbf16>
    %6 = vector.shape_cast %5 : vector<1x24x32xbf16> to vector<24x32xbf16>
    %c1_7 = arith.constant 1 : index
    %c0_8 = arith.constant 0 : index
    %c0_9 = arith.constant 0 : index
    %7 = vector.load %arg2[%c1_7, %c0_8, %c0_9] : memref<16x32x32xbf16, #tpu.memory_space<vmem>>, vector<1x32x32xbf16>
    %8 = vector.shape_cast %7 : vector<1x32x32xbf16> to vector<32x32xbf16>
    %cst_10 = arith.constant dense<0.000000e+00> : vector<24x32xf32>
    %9 = tpu.matmul %6, %8, %cst_10 {dimension_numbers = #tpu.dot_dimension_numbers<[1], [0], [0], [1], [0, 0, 1, 1], [], []>} : vector<24x32xbf16>, vector<32x32xbf16>, vector<24x32xf32> -> vector<24x32xf32>
    %10 = arith.addf %4, %9 : vector<24x32xf32>
    %c2 = arith.constant 2 : index
    %c0_11 = arith.constant 0 : index
    %c0_12 = arith.constant 0 : index
    %11 = vector.load %arg2[%c2, %c0_11, %c0_12] : memref<16x32x32xbf16, #tpu.memory_space<vmem>>, vector<1x32x32xbf16>
    %12 = vector.shape_cast %11 : vector<1x32x32xbf16> to vector<32x32xbf16>
    %cst_13 = arith.constant dense<0.000000e+00> : vector<24x32xf32>
    %13 = tpu.matmul %6, %12, %cst_13 {dimension_numbers = #tpu.dot_dimension_numbers<[1], [0], [0], [1], [0, 0, 1, 1], [], []>} : vector<24x32xbf16>, vector<32x32xbf16>, vector<24x32xf32> -> vector<24x32xf32>
    %c0_14 = arith.constant 0 : index
    %c2_15 = arith.constant 2 : index
    %c0_16 = arith.constant 0 : index
    %14 = vector.load %arg1[%c0_14, %c2_15, %c0_16] : memref<1x40x32xbf16, #tpu.memory_space<vmem>>, vector<1x24x32xbf16>
    %15 = vector.shape_cast %14 : vector<1x24x32xbf16> to vector<24x32xbf16>
    %c3 = arith.constant 3 : index
    %c0_17 = arith.constant 0 : index
    %c0_18 = arith.constant 0 : index
    %16 = vector.load %arg2[%c3, %c0_17, %c0_18] : memref<16x32x32xbf16, #tpu.memory_space<vmem>>, vector<1x32x32xbf16>
    %17 = vector.shape_cast %16 : vector<1x32x32xbf16> to vector<32x32xbf16>
    %cst_19 = arith.constant dense<0.000000e+00> : vector<24x32xf32>
    %18 = tpu.matmul %15, %17, %cst_19 {dimension_numbers = #tpu.dot_dimension_numbers<[1], [0], [0], [1], [0, 0, 1, 1], [], []>} : vector<24x32xbf16>, vector<32x32xbf16>, vector<24x32xf32> -> vector<24x32xf32>
    %19 = arith.addf %13, %18 : vector<24x32xf32>
    %c0_20 = arith.constant 0 : index
    %c6 = arith.constant 6 : index
    %c0_21 = arith.constant 0 : index
    %20 = vector.load %arg1[%c0_20, %c6, %c0_21] : memref<1x40x32xbf16, #tpu.memory_space<vmem>>, vector<1x24x32xbf16>
    %21 = vector.shape_cast %20 : vector<1x24x32xbf16> to vector<24x32xbf16>
    %c4 = arith.constant 4 : index
    %c0_22 = arith.constant 0 : index
    %c0_23 = arith.constant 0 : index
    %22 = vector.load %arg2[%c4, %c0_22, %c0_23] : memref<16x32x32xbf16, #tpu.memory_space<vmem>>, vector<1x32x32xbf16>
    %23 = vector.shape_cast %22 : vector<1x32x32xbf16> to vector<32x32xbf16>
    %cst_24 = arith.constant dense<0.000000e+00> : vector<24x32xf32>
    %24 = tpu.matmul %21, %23, %cst_24 {dimension_numbers = #tpu.dot_dimension_numbers<[1], [0], [0], [1], [0, 0, 1, 1], [], []>} : vector<24x32xbf16>, vector<32x32xbf16>, vector<24x32xf32> -> vector<24x32xf32>
    %25 = arith.addf %10, %24 : vector<24x32xf32>
    %c5 = arith.constant 5 : index
    %c0_25 = arith.constant 0 : index
    %c0_26 = arith.constant 0 : index
    %26 = vector.load %arg2[%c5, %c0_25, %c0_26] : memref<16x32x32xbf16, #tpu.memory_space<vmem>>, vector<1x32x32xbf16>
    %27 = vector.shape_cast %26 : vector<1x32x32xbf16> to vector<32x32xbf16>
    %cst_27 = arith.constant dense<0.000000e+00> : vector<24x32xf32>
    %28 = tpu.matmul %21, %27, %cst_27 {dimension_numbers = #tpu.dot_dimension_numbers<[1], [0], [0], [1], [0, 0, 1, 1], [], []>} : vector<24x32xbf16>, vector<32x32xbf16>, vector<24x32xf32> -> vector<24x32xf32>
    %c0_28 = arith.constant 0 : index
    %c7 = arith.constant 7 : index
    %c0_29 = arith.constant 0 : index
    %29 = vector.load %arg1[%c0_28, %c7, %c0_29] : memref<1x40x32xbf16, #tpu.memory_space<vmem>>, vector<1x24x32xbf16>
    %30 = vector.shape_cast %29 : vector<1x24x32xbf16> to vector<24x32xbf16>
    %c6_30 = arith.constant 6 : index
    %c0_31 = arith.constant 0 : index
    %c0_32 = arith.constant 0 : index
    %31 = vector.load %arg2[%c6_30, %c0_31, %c0_32] : memref<16x32x32xbf16, #tpu.memory_space<vmem>>, vector<1x32x32xbf16>
    %32 = vector.shape_cast %31 : vector<1x32x32xbf16> to vector<32x32xbf16>
    %cst_33 = arith.constant dense<0.000000e+00> : vector<24x32xf32>
    %33 = tpu.matmul %30, %32, %cst_33 {dimension_numbers = #tpu.dot_dimension_numbers<[1], [0], [0], [1], [0, 0, 1, 1], [], []>} : vector<24x32xbf16>, vector<32x32xbf16>, vector<24x32xf32> -> vector<24x32xf32>
    %34 = arith.addf %25, %33 : vector<24x32xf32>
    %c7_34 = arith.constant 7 : index
    %c0_35 = arith.constant 0 : index
    %c0_36 = arith.constant 0 : index
    %35 = vector.load %arg2[%c7_34, %c0_35, %c0_36] : memref<16x32x32xbf16, #tpu.memory_space<vmem>>, vector<1x32x32xbf16>
    %36 = vector.shape_cast %35 : vector<1x32x32xbf16> to vector<32x32xbf16>
    %cst_37 = arith.constant dense<0.000000e+00> : vector<24x32xf32>
    %37 = tpu.matmul %30, %36, %cst_37 {dimension_numbers = #tpu.dot_dimension_numbers<[1], [0], [0], [1], [0, 0, 1, 1], [], []>} : vector<24x32xbf16>, vector<32x32xbf16>, vector<24x32xf32> -> vector<24x32xf32>
    %38 = arith.addf %19, %37 : vector<24x32xf32>
    %c8 = arith.constant 8 : index
    %c0_38 = arith.constant 0 : index
    %c0_39 = arith.constant 0 : index
    %39 = vector.load %arg2[%c8, %c0_38, %c0_39] : memref<16x32x32xbf16, #tpu.memory_space<vmem>>, vector<1x32x32xbf16>
    %40 = vector.shape_cast %39 : vector<1x32x32xbf16> to vector<32x32xbf16>
    %cst_40 = arith.constant dense<0.000000e+00> : vector<24x32xf32>
    %41 = tpu.matmul %30, %40, %cst_40 {dimension_numbers = #tpu.dot_dimension_numbers<[1], [0], [0], [1], [0, 0, 1, 1], [], []>} : vector<24x32xbf16>, vector<32x32xbf16>, vector<24x32xf32> -> vector<24x32xf32>
    %42 = arith.addf %28, %41 : vector<24x32xf32>
    %c9 = arith.constant 9 : index
    %c0_41 = arith.constant 0 : index
    %c0_42 = arith.constant 0 : index
    %43 = vector.load %arg2[%c9, %c0_41, %c0_42] : memref<16x32x32xbf16, #tpu.memory_space<vmem>>, vector<1x32x32xbf16>
    %44 = vector.shape_cast %43 : vector<1x32x32xbf16> to vector<32x32xbf16>
    %cst_43 = arith.constant dense<0.000000e+00> : vector<24x32xf32>
    %45 = tpu.matmul %30, %44, %cst_43 {dimension_numbers = #tpu.dot_dimension_numbers<[1], [0], [0], [1], [0, 0, 1, 1], [], []>} : vector<24x32xbf16>, vector<32x32xbf16>, vector<24x32xf32> -> vector<24x32xf32>
    %c0_44 = arith.constant 0 : index
    %c8_45 = arith.constant 8 : index
    %c0_46 = arith.constant 0 : index
    %46 = vector.load %arg1[%c0_44, %c8_45, %c0_46] : memref<1x40x32xbf16, #tpu.memory_space<vmem>>, vector<1x24x32xbf16>
    %47 = vector.shape_cast %46 : vector<1x24x32xbf16> to vector<24x32xbf16>
    %c10 = arith.constant 10 : index
    %c0_47 = arith.constant 0 : index
    %c0_48 = arith.constant 0 : index
    %48 = vector.load %arg2[%c10, %c0_47, %c0_48] : memref<16x32x32xbf16, #tpu.memory_space<vmem>>, vector<1x32x32xbf16>
    %49 = vector.shape_cast %48 : vector<1x32x32xbf16> to vector<32x32xbf16>
    %cst_49 = arith.constant dense<0.000000e+00> : vector<24x32xf32>
    %50 = tpu.matmul %47, %49, %cst_49 {dimension_numbers = #tpu.dot_dimension_numbers<[1], [0], [0], [1], [0, 0, 1, 1], [], []>} : vector<24x32xbf16>, vector<32x32xbf16>, vector<24x32xf32> -> vector<24x32xf32>
    %51 = arith.addf %38, %50 : vector<24x32xf32>
    %c11 = arith.constant 11 : index
    %c0_50 = arith.constant 0 : index
    %c0_51 = arith.constant 0 : index
    %52 = vector.load %arg2[%c11, %c0_50, %c0_51] : memref<16x32x32xbf16, #tpu.memory_space<vmem>>, vector<1x32x32xbf16>
    %53 = vector.shape_cast %52 : vector<1x32x32xbf16> to vector<32x32xbf16>
    %cst_52 = arith.constant dense<0.000000e+00> : vector<24x32xf32>
    %54 = tpu.matmul %47, %53, %cst_52 {dimension_numbers = #tpu.dot_dimension_numbers<[1], [0], [0], [1], [0, 0, 1, 1], [], []>} : vector<24x32xbf16>, vector<32x32xbf16>, vector<24x32xf32> -> vector<24x32xf32>
    %55 = arith.addf %45, %54 : vector<24x32xf32>
    %c0_53 = arith.constant 0 : index
    %c12 = arith.constant 12 : index
    %c0_54 = arith.constant 0 : index
    %56 = vector.load %arg1[%c0_53, %c12, %c0_54] : memref<1x40x32xbf16, #tpu.memory_space<vmem>>, vector<1x24x32xbf16>
    %57 = vector.shape_cast %56 : vector<1x24x32xbf16> to vector<24x32xbf16>
    %c12_55 = arith.constant 12 : index
    %c0_56 = arith.constant 0 : index
    %c0_57 = arith.constant 0 : index
    %58 = vector.load %arg2[%c12_55, %c0_56, %c0_57] : memref<16x32x32xbf16, #tpu.memory_space<vmem>>, vector<1x32x32xbf16>
    %59 = vector.shape_cast %58 : vector<1x32x32xbf16> to vector<32x32xbf16>
    %cst_58 = arith.constant dense<0.000000e+00> : vector<24x32xf32>
    %60 = tpu.matmul %57, %59, %cst_58 {dimension_numbers = #tpu.dot_dimension_numbers<[1], [0], [0], [1], [0, 0, 1, 1], [], []>} : vector<24x32xbf16>, vector<32x32xbf16>, vector<24x32xf32> -> vector<24x32xf32>
    %61 = arith.addf %42, %60 : vector<24x32xf32>
    %c0_59 = arith.constant 0 : index
    %c13 = arith.constant 13 : index
    %c0_60 = arith.constant 0 : index
    %62 = vector.load %arg1[%c0_59, %c13, %c0_60] : memref<1x40x32xbf16, #tpu.memory_space<vmem>>, vector<1x24x32xbf16>
    %63 = vector.shape_cast %62 : vector<1x24x32xbf16> to vector<24x32xbf16>
    %c13_61 = arith.constant 13 : index
    %c0_62 = arith.constant 0 : index
    %c0_63 = arith.constant 0 : index
    %64 = vector.load %arg2[%c13_61, %c0_62, %c0_63] : memref<16x32x32xbf16, #tpu.memory_space<vmem>>, vector<1x32x32xbf16>
    %65 = vector.shape_cast %64 : vector<1x32x32xbf16> to vector<32x32xbf16>
    %cst_64 = arith.constant dense<0.000000e+00> : vector<24x32xf32>
    %66 = tpu.matmul %63, %65, %cst_64 {dimension_numbers = #tpu.dot_dimension_numbers<[1], [0], [0], [1], [0, 0, 1, 1], [], []>} : vector<24x32xbf16>, vector<32x32xbf16>, vector<24x32xf32> -> vector<24x32xf32>
    %67 = arith.addf %61, %66 : vector<24x32xf32>
    %c14 = arith.constant 14 : index
    %c0_65 = arith.constant 0 : index
    %c0_66 = arith.constant 0 : index
    %68 = vector.load %arg2[%c14, %c0_65, %c0_66] : memref<16x32x32xbf16, #tpu.memory_space<vmem>>, vector<1x32x32xbf16>
    %69 = vector.shape_cast %68 : vector<1x32x32xbf16> to vector<32x32xbf16>
    %cst_67 = arith.constant dense<0.000000e+00> : vector<24x32xf32>
    %70 = tpu.matmul %63, %69, %cst_67 {dimension_numbers = #tpu.dot_dimension_numbers<[1], [0], [0], [1], [0, 0, 1, 1], [], []>} : vector<24x32xbf16>, vector<32x32xbf16>, vector<24x32xf32> -> vector<24x32xf32>
    %71 = arith.addf %55, %70 : vector<24x32xf32>
    %c0_68 = arith.constant 0 : index
    %c14_69 = arith.constant 14 : index
    %c0_70 = arith.constant 0 : index
    %72 = vector.load %arg1[%c0_68, %c14_69, %c0_70] : memref<1x40x32xbf16, #tpu.memory_space<vmem>>, vector<1x24x32xbf16>
    %73 = vector.shape_cast %72 : vector<1x24x32xbf16> to vector<24x32xbf16>
    %c15 = arith.constant 15 : index
    %c0_71 = arith.constant 0 : index
    %c0_72 = arith.constant 0 : index
    %74 = vector.load %arg2[%c15, %c0_71, %c0_72] : memref<16x32x32xbf16, #tpu.memory_space<vmem>>, vector<1x32x32xbf16>
    %75 = vector.shape_cast %74 : vector<1x32x32xbf16> to vector<32x32xbf16>
    %cst_73 = arith.constant dense<0.000000e+00> : vector<24x32xf32>
    %76 = tpu.matmul %73, %75, %cst_73 {dimension_numbers = #tpu.dot_dimension_numbers<[1], [0], [0], [1], [0, 0, 1, 1], [], []>} : vector<24x32xbf16>, vector<32x32xbf16>, vector<24x32xf32> -> vector<24x32xf32>
    %77 = arith.addf %71, %76 : vector<24x32xf32>
    %c0_74 = arith.constant 0 : index
    %c0_75 = arith.constant 0 : index
    %78 = vector.load %arg3[%c0_74, %c0_75] : memref<24x1xf32, #tpu.memory_space<vmem>>, vector<24x1xf32>
    %79 = arith.truncf %34 : vector<24x32xf32> to vector<24x32xbf16>
    %c0_76 = arith.constant 0 : index
    %c0_77 = arith.constant 0 : index
    %c0_78 = arith.constant 0 : index
    %80 = vector.load %arg4[%c0_76, %c0_77, %c0_78] : memref<1x24x128xbf16, #tpu.memory_space<vmem>>, vector<1x24x32xbf16>
    %81 = vector.shape_cast %80 : vector<1x24x32xbf16> to vector<24x32xbf16>
    %82 = vector.shape_cast %79 : vector<24x32xbf16> to vector<1x24x32xbf16>
    tpu.vector_store %arg4[%c0_76, %c0_77, %c0_78], %82 {strides = array<i32>} : memref<1x24x128xbf16, #tpu.memory_space<vmem>>, vector<1x24x32xbf16>,
    %83 = vector.broadcast %78 : vector<24x1xf32> to vector<24x32xf32>
    %84 = arith.mulf %34, %83 : vector<24x32xf32>
    %cst_79 = arith.constant dense<0.000000e+00> : vector<32xf32>
    %85 = vector.multi_reduction <add>, %84, %cst_79 [0] : vector<24x32xf32> to vector<32xf32>
    %86 = vector.shape_cast %85 : vector<32xf32> to vector<1x32xf32>
    %c0_80 = arith.constant 0 : index
    %c0_81 = arith.constant 0 : index
    %c0_82 = arith.constant 0 : index
    %87 = vector.load %arg5[%c0_80, %c0_81, %c0_82] : memref<1x1x128xf32, #tpu.memory_space<vmem>>, vector<1x1x32xf32>
    %88 = vector.shape_cast %87 : vector<1x1x32xf32> to vector<1x32xf32>
    %89 = vector.shape_cast %86 : vector<1x32xf32> to vector<1x1x32xf32>
    tpu.vector_store %arg5[%c0_80, %c0_81, %c0_82], %89 {strides = array<i32>} : memref<1x1x128xf32, #tpu.memory_space<vmem>>, vector<1x1x32xf32>,
    %90 = arith.mulf %84, %34 : vector<24x32xf32>
    %cst_83 = arith.constant dense<0.000000e+00> : vector<32xf32>
    %91 = vector.multi_reduction <add>, %90, %cst_83 [0] : vector<24x32xf32> to vector<32xf32>
    %92 = vector.shape_cast %91 : vector<32xf32> to vector<1x32xf32>
    %c0_84 = arith.constant 0 : index
    %c0_85 = arith.constant 0 : index
    %c0_86 = arith.constant 0 : index
    %93 = vector.load %arg6[%c0_84, %c0_85, %c0_86] : memref<1x1x128xf32, #tpu.memory_space<vmem>>, vector<1x1x32xf32>
    %94 = vector.shape_cast %93 : vector<1x1x32xf32> to vector<1x32xf32>
    %95 = vector.shape_cast %92 : vector<1x32xf32> to vector<1x1x32xf32>
    tpu.vector_store %arg6[%c0_84, %c0_85, %c0_86], %95 {strides = array<i32>} : memref<1x1x128xf32, #tpu.memory_space<vmem>>, vector<1x1x32xf32>,
    %96 = arith.truncf %51 : vector<24x32xf32> to vector<24x32xbf16>
    %c0_87 = arith.constant 0 : index
    %c0_88 = arith.constant 0 : index
    %c32 = arith.constant 32 : index
    %97 = vector.load %arg4[%c0_87, %c0_88, %c32] : memref<1x24x128xbf16, #tpu.memory_space<vmem>>, vector<1x24x32xbf16>
    %98 = vector.shape_cast %97 : vector<1x24x32xbf16> to vector<24x32xbf16>
    %99 = vector.shape_cast %96 : vector<24x32xbf16> to vector<1x24x32xbf16>
    tpu.vector_store %arg4[%c0_87, %c0_88, %c32], %99 {strides = array<i32>} : memref<1x24x128xbf16, #tpu.memory_space<vmem>>, vector<1x24x32xbf16>,
    %100 = vector.broadcast %78 : vector<24x1xf32> to vector<24x32xf32>
    %101 = arith.mulf %51, %100 : vector<24x32xf32>
    %cst_89 = arith.constant dense<0.000000e+00> : vector<32xf32>
    %102 = vector.multi_reduction <add>, %101, %cst_89 [0] : vector<24x32xf32> to vector<32xf32>
    %103 = vector.shape_cast %102 : vector<32xf32> to vector<1x32xf32>
    %c0_90 = arith.constant 0 : index
    %c0_91 = arith.constant 0 : index
    %c32_92 = arith.constant 32 : index
    %104 = vector.load %arg5[%c0_90, %c0_91, %c32_92] : memref<1x1x128xf32, #tpu.memory_space<vmem>>, vector<1x1x32xf32>
    %105 = vector.shape_cast %104 : vector<1x1x32xf32> to vector<1x32xf32>
    %106 = vector.shape_cast %103 : vector<1x32xf32> to vector<1x1x32xf32>
    tpu.vector_store %arg5[%c0_90, %c0_91, %c32_92], %106 {strides = array<i32>} : memref<1x1x128xf32, #tpu.memory_space<vmem>>, vector<1x1x32xf32>,
    %107 = arith.mulf %101, %51 : vector<24x32xf32>
    %cst_93 = arith.constant dense<0.000000e+00> : vector<32xf32>
    %108 = vector.multi_reduction <add>, %107, %cst_93 [0] : vector<24x32xf32> to vector<32xf32>
    %109 = vector.shape_cast %108 : vector<32xf32> to vector<1x32xf32>
    %c0_94 = arith.constant 0 : index
    %c0_95 = arith.constant 0 : index
    %c32_96 = arith.constant 32 : index
    %110 = vector.load %arg6[%c0_94, %c0_95, %c32_96] : memref<1x1x128xf32, #tpu.memory_space<vmem>>, vector<1x1x32xf32>
    %111 = vector.shape_cast %110 : vector<1x1x32xf32> to vector<1x32xf32>
    %112 = vector.shape_cast %109 : vector<1x32xf32> to vector<1x1x32xf32>
    tpu.vector_store %arg6[%c0_94, %c0_95, %c32_96], %112 {strides = array<i32>} : memref<1x1x128xf32, #tpu.memory_space<vmem>>, vector<1x1x32xf32>,
    %113 = arith.truncf %67 : vector<24x32xf32> to vector<24x32xbf16>
    %c0_97 = arith.constant 0 : index
    %c0_98 = arith.constant 0 : index
    %c64 = arith.constant 64 : index
    %114 = vector.load %arg4[%c0_97, %c0_98, %c64] : memref<1x24x128xbf16, #tpu.memory_space<vmem>>, vector<1x24x32xbf16>
    %115 = vector.shape_cast %114 : vector<1x24x32xbf16> to vector<24x32xbf16>
    %116 = vector.shape_cast %113 : vector<24x32xbf16> to vector<1x24x32xbf16>
    tpu.vector_store %arg4[%c0_97, %c0_98, %c64], %116 {strides = array<i32>} : memref<1x24x128xbf16, #tpu.memory_space<vmem>>, vector<1x24x32xbf16>,
    %117 = vector.broadcast %78 : vector<24x1xf32> to vector<24x32xf32>
    %118 = arith.mulf %67, %117 : vector<24x32xf32>
    %cst_99 = arith.constant dense<0.000000e+00> : vector<32xf32>
    %119 = vector.multi_reduction <add>, %118, %cst_99 [0] : vector<24x32xf32> to vector<32xf32>
    %120 = vector.shape_cast %119 : vector<32xf32> to vector<1x32xf32>
    %c0_100 = arith.constant 0 : index
    %c0_101 = arith.constant 0 : index
    %c64_102 = arith.constant 64 : index
    %121 = vector.load %arg5[%c0_100, %c0_101, %c64_102] : memref<1x1x128xf32, #tpu.memory_space<vmem>>, vector<1x1x32xf32>
    %122 = vector.shape_cast %121 : vector<1x1x32xf32> to vector<1x32xf32>
    %123 = vector.shape_cast %120 : vector<1x32xf32> to vector<1x1x32xf32>
    tpu.vector_store %arg5[%c0_100, %c0_101, %c64_102], %123 {strides = array<i32>} : memref<1x1x128xf32, #tpu.memory_space<vmem>>, vector<1x1x32xf32>,
    %124 = arith.mulf %118, %67 : vector<24x32xf32>
    %cst_103 = arith.constant dense<0.000000e+00> : vector<32xf32>
    %125 = vector.multi_reduction <add>, %124, %cst_103 [0] : vector<24x32xf32> to vector<32xf32>
    %126 = vector.shape_cast %125 : vector<32xf32> to vector<1x32xf32>
    %c0_104 = arith.constant 0 : index
    %c0_105 = arith.constant 0 : index
    %c64_106 = arith.constant 64 : index
    %127 = vector.load %arg6[%c0_104, %c0_105, %c64_106] : memref<1x1x128xf32, #tpu.memory_space<vmem>>, vector<1x1x32xf32>
    %128 = vector.shape_cast %127 : vector<1x1x32xf32> to vector<1x32xf32>
    %129 = vector.shape_cast %126 : vector<1x32xf32> to vector<1x1x32xf32>
    tpu.vector_store %arg6[%c0_104, %c0_105, %c64_106], %129 {strides = array<i32>} : memref<1x1x128xf32, #tpu.memory_space<vmem>>, vector<1x1x32xf32>,
    %130 = arith.truncf %77 : vector<24x32xf32> to vector<24x32xbf16>
    %c0_107 = arith.constant 0 : index
    %c0_108 = arith.constant 0 : index
    %c96 = arith.constant 96 : index
    %131 = vector.load %arg4[%c0_107, %c0_108, %c96] : memref<1x24x128xbf16, #tpu.memory_space<vmem>>, vector<1x24x32xbf16>
    %132 = vector.shape_cast %131 : vector<1x24x32xbf16> to vector<24x32xbf16>
    %133 = vector.shape_cast %130 : vector<24x32xbf16> to vector<1x24x32xbf16>
    tpu.vector_store %arg4[%c0_107, %c0_108, %c96], %133 {strides = array<i32>} : memref<1x24x128xbf16, #tpu.memory_space<vmem>>, vector<1x24x32xbf16>,
    %134 = vector.broadcast %78 : vector<24x1xf32> to vector<24x32xf32>
    %135 = arith.mulf %77, %134 : vector<24x32xf32>
    %cst_109 = arith.constant dense<0.000000e+00> : vector<32xf32>
    %136 = vector.multi_reduction <add>, %135, %cst_109 [0] : vector<24x32xf32> to vector<32xf32>
    %137 = vector.shape_cast %136 : vector<32xf32> to vector<1x32xf32>
    %c0_110 = arith.constant 0 : index
    %c0_111 = arith.constant 0 : index
    %c96_112 = arith.constant 96 : index
    %138 = vector.load %arg5[%c0_110, %c0_111, %c96_112] : memref<1x1x128xf32, #tpu.memory_space<vmem>>, vector<1x1x32xf32>
    %139 = vector.shape_cast %138 : vector<1x1x32xf32> to vector<1x32xf32>
    %140 = vector.shape_cast %137 : vector<1x32xf32> to vector<1x1x32xf32>
    tpu.vector_store %arg5[%c0_110, %c0_111, %c96_112], %140 {strides = array<i32>} : memref<1x1x128xf32, #tpu.memory_space<vmem>>, vector<1x1x32xf32>,
    %141 = arith.mulf %135, %77 : vector<24x32xf32>
    %cst_113 = arith.constant dense<0.000000e+00> : vector<32xf32>
    %142 = vector.multi_reduction <add>, %141, %cst_113 [0] : vector<24x32xf32> to vector<32xf32>
    %143 = vector.shape_cast %142 : vector<32xf32> to vector<1x32xf32>
    %c0_114 = arith.constant 0 : index
    %c0_115 = arith.constant 0 : index
    %c96_116 = arith.constant 96 : index
    %144 = vector.load %arg6[%c0_114, %c0_115, %c96_116] : memref<1x1x128xf32, #tpu.memory_space<vmem>>, vector<1x1x32xf32>
    %145 = vector.shape_cast %144 : vector<1x1x32xf32> to vector<1x32xf32>
    %146 = vector.shape_cast %143 : vector<1x32xf32> to vector<1x1x32xf32>
    tpu.vector_store %arg6[%c0_114, %c0_115, %c96_116], %146 {strides = array<i32>} : memref<1x1x128xf32, #tpu.memory_space<vmem>>, vector<1x1x32xf32>,
    return
  }
  func.func @transform_0(%arg0: i32) -> (i32, i32, i32) {
    %c0_i32 = arith.constant 0 : i32
    %c0_i32_0 = arith.constant 0 : i32
    %c0_i32_1 = arith.constant 0 : i32
    return %arg0, %c0_i32, %c0_i32_0 : i32, i32, i32
  }
  func.func @transform_1(%arg0: i32) -> (i32, i32, i32) {
    %c0_i32 = arith.constant 0 : i32
    %c0_i32_0 = arith.constant 0 : i32
    %c0_i32_1 = arith.constant 0 : i32
    %c0_i32_2 = arith.constant 0 : i32
    return %c0_i32, %c0_i32_0, %c0_i32_1 : i32, i32, i32
  }
  func.func @transform_2(%arg0: i32) -> (i32, i32) {
    %c0_i32 = arith.constant 0 : i32
    %c0_i32_0 = arith.constant 0 : i32
    %c0_i32_1 = arith.constant 0 : i32
    return %c0_i32, %c0_i32_0 : i32, i32
  }
  func.func @transform_3(%arg0: i32) -> (i32, i32, i32) {
    %c0_i32 = arith.constant 0 : i32
    %c0_i32_0 = arith.constant 0 : i32
    %c0_i32_1 = arith.constant 0 : i32
    return %arg0, %c0_i32, %c0_i32_0 : i32, i32, i32
  }
  func.func @transform_4(%arg0: i32) -> (i32, i32, i32) {
    %c0_i32 = arith.constant 0 : i32
    %c0_i32_0 = arith.constant 0 : i32
    %c0_i32_1 = arith.constant 0 : i32
    return %arg0, %c0_i32, %c0_i32_0 : i32, i32, i32
  }
  func.func @transform_5(%arg0: i32) -> (i32, i32, i32) {
    %c0_i32 = arith.constant 0 : i32
    %c0_i32_0 = arith.constant 0 : i32
    %c0_i32_1 = arith.constant 0 : i32
    return %arg0, %c0_i32, %c0_i32_0 : i32, i32, i32
  }
}

module attributes {stable_mosaic.version = 11 : i64} {
  func.func @_affine_relu_kernel(%arg0: i32, %arg1: memref<48x128xbf16, #tpu.memory_space<vmem>>, %arg2: memref<1x128xf32, #tpu.memory_space<vmem>>, %arg3: memref<1x128xf32, #tpu.memory_space<vmem>>, %arg4: memref<48x128xbf16, #tpu.memory_space<vmem>>) attributes {dimension_semantics = [#tpu.dimension_semantics<parallel>], iteration_bounds = array<i64: 1>, scalar_prefetch = 0 : i64, scratch_operands = 0 : i64, tpu.core_type = #tpu.core_type<tc>, window_params = [{transform_indices = @transform_0, window_bounds = array<i64: 48, 128>}, {pipeline_mode = #tpu.pipeline_mode<synchronous>, transform_indices = @transform_1, window_bounds = array<i64: 1, 128>}, {pipeline_mode = #tpu.pipeline_mode<synchronous>, transform_indices = @transform_2, window_bounds = array<i64: 1, 128>}, {transform_indices = @transform_3, window_bounds = array<i64: 48, 128>}]} {
    %c0 = arith.constant 0 : index
    %c0_0 = arith.constant 0 : index
    %0 = vector.load %arg1[%c0, %c0_0] : memref<48x128xbf16, #tpu.memory_space<vmem>>, vector<48x128xbf16>
    %1 = arith.extf %0 : vector<48x128xbf16> to vector<48x128xf32>
    %c0_1 = arith.constant 0 : index
    %c0_2 = arith.constant 0 : index
    %2 = vector.load %arg2[%c0_1, %c0_2] : memref<1x128xf32, #tpu.memory_space<vmem>>, vector<1x128xf32>
    %3 = vector.broadcast %2 : vector<1x128xf32> to vector<48x128xf32>
    %4 = arith.mulf %1, %3 : vector<48x128xf32>
    %c0_3 = arith.constant 0 : index
    %c0_4 = arith.constant 0 : index
    %5 = vector.load %arg3[%c0_3, %c0_4] : memref<1x128xf32, #tpu.memory_space<vmem>>, vector<1x128xf32>
    %6 = vector.broadcast %5 : vector<1x128xf32> to vector<48x128xf32>
    %7 = arith.addf %4, %6 : vector<48x128xf32>
    %cst = arith.constant 0.000000e+00 : f32
    %8 = vector.broadcast %cst : f32 to vector<48x128xf32>
    %9 = arith.maximumf %7, %8 : vector<48x128xf32>
    %10 = arith.truncf %9 : vector<48x128xf32> to vector<48x128xbf16>
    %c0_5 = arith.constant 0 : index
    %c0_6 = arith.constant 0 : index
    %11 = vector.load %arg4[%c0_5, %c0_6] : memref<48x128xbf16, #tpu.memory_space<vmem>>, vector<48x128xbf16>
    tpu.vector_store %arg4[%c0_5, %c0_6], %10 {strides = array<i32>} : memref<48x128xbf16, #tpu.memory_space<vmem>>, vector<48x128xbf16>,
    return
  }
  func.func @transform_0(%arg0: i32) -> (i32, i32) {
    %c0_i32 = arith.constant 0 : i32
    %c0_i32_0 = arith.constant 0 : i32
    return %arg0, %c0_i32 : i32, i32
  }
  func.func @transform_1(%arg0: i32) -> (i32, i32) {
    %c0_i32 = arith.constant 0 : i32
    %c0_i32_0 = arith.constant 0 : i32
    %c0_i32_1 = arith.constant 0 : i32
    return %c0_i32, %c0_i32_0 : i32, i32
  }
  func.func @transform_2(%arg0: i32) -> (i32, i32) {
    %c0_i32 = arith.constant 0 : i32
    %c0_i32_0 = arith.constant 0 : i32
    %c0_i32_1 = arith.constant 0 : i32
    return %c0_i32, %c0_i32_0 : i32, i32
  }
  func.func @transform_3(%arg0: i32) -> (i32, i32) {
    %c0_i32 = arith.constant 0 : i32
    %c0_i32_0 = arith.constant 0 : i32
    return %arg0, %c0_i32 : i32, i32
  }
}

module attributes {stable_mosaic.version = 11 : i64} {
  func.func @_deconv_s2_stats_kernel(%arg0: i32, %arg1: memref<1x104x32xbf16, #tpu.memory_space<vmem>>, %arg2: memref<16x32x32xbf16, #tpu.memory_space<vmem>>, %arg3: memref<80x1xf32, #tpu.memory_space<vmem>>, %arg4: memref<1x80x128xbf16, #tpu.memory_space<vmem>>, %arg5: memref<1x1x128xf32, #tpu.memory_space<vmem>>, %arg6: memref<1x1x128xf32, #tpu.memory_space<vmem>>) attributes {dimension_semantics = [#tpu.dimension_semantics<parallel>], iteration_bounds = array<i64: 2>, scalar_prefetch = 0 : i64, scratch_operands = 0 : i64, tpu.core_type = #tpu.core_type<tc>, window_params = [{transform_indices = @transform_0, window_bounds = array<i64: 1, 104, 32>}, {pipeline_mode = #tpu.pipeline_mode<synchronous>, transform_indices = @transform_1, window_bounds = array<i64: 16, 32, 32>}, {pipeline_mode = #tpu.pipeline_mode<synchronous>, transform_indices = @transform_2, window_bounds = array<i64: 80, 1>}, {transform_indices = @transform_3, window_bounds = array<i64: 1, 80, 128>}, {transform_indices = @transform_4, window_bounds = array<i64: 1, 1, 128>}, {transform_indices = @transform_5, window_bounds = array<i64: 1, 1, 128>}]} {
    %c0 = arith.constant 0 : index
    %c0_0 = arith.constant 0 : index
    %c0_1 = arith.constant 0 : index
    %0 = vector.load %arg1[%c0, %c0_0, %c0_1] : memref<1x104x32xbf16, #tpu.memory_space<vmem>>, vector<1x80x32xbf16>
    %1 = vector.shape_cast %0 : vector<1x80x32xbf16> to vector<80x32xbf16>
    %c0_2 = arith.constant 0 : index
    %c0_3 = arith.constant 0 : index
    %c0_4 = arith.constant 0 : index
    %2 = vector.load %arg2[%c0_2, %c0_3, %c0_4] : memref<16x32x32xbf16, #tpu.memory_space<vmem>>, vector<1x32x32xbf16>
    %3 = vector.shape_cast %2 : vector<1x32x32xbf16> to vector<32x32xbf16>
    %cst = arith.constant dense<0.000000e+00> : vector<80x32xf32>
    %4 = tpu.matmul %1, %3, %cst {dimension_numbers = #tpu.dot_dimension_numbers<[1], [0], [0], [1], [0, 0, 1, 1], [], []>} : vector<80x32xbf16>, vector<32x32xbf16>, vector<80x32xf32> -> vector<80x32xf32>
    %c0_5 = arith.constant 0 : index
    %c1 = arith.constant 1 : index
    %c0_6 = arith.constant 0 : index
    %5 = vector.load %arg1[%c0_5, %c1, %c0_6] : memref<1x104x32xbf16, #tpu.memory_space<vmem>>, vector<1x80x32xbf16>
    %6 = vector.shape_cast %5 : vector<1x80x32xbf16> to vector<80x32xbf16>
    %c1_7 = arith.constant 1 : index
    %c0_8 = arith.constant 0 : index
    %c0_9 = arith.constant 0 : index
    %7 = vector.load %arg2[%c1_7, %c0_8, %c0_9] : memref<16x32x32xbf16, #tpu.memory_space<vmem>>, vector<1x32x32xbf16>
    %8 = vector.shape_cast %7 : vector<1x32x32xbf16> to vector<32x32xbf16>
    %cst_10 = arith.constant dense<0.000000e+00> : vector<80x32xf32>
    %9 = tpu.matmul %6, %8, %cst_10 {dimension_numbers = #tpu.dot_dimension_numbers<[1], [0], [0], [1], [0, 0, 1, 1], [], []>} : vector<80x32xbf16>, vector<32x32xbf16>, vector<80x32xf32> -> vector<80x32xf32>
    %10 = arith.addf %4, %9 : vector<80x32xf32>
    %c2 = arith.constant 2 : index
    %c0_11 = arith.constant 0 : index
    %c0_12 = arith.constant 0 : index
    %11 = vector.load %arg2[%c2, %c0_11, %c0_12] : memref<16x32x32xbf16, #tpu.memory_space<vmem>>, vector<1x32x32xbf16>
    %12 = vector.shape_cast %11 : vector<1x32x32xbf16> to vector<32x32xbf16>
    %cst_13 = arith.constant dense<0.000000e+00> : vector<80x32xf32>
    %13 = tpu.matmul %6, %12, %cst_13 {dimension_numbers = #tpu.dot_dimension_numbers<[1], [0], [0], [1], [0, 0, 1, 1], [], []>} : vector<80x32xbf16>, vector<32x32xbf16>, vector<80x32xf32> -> vector<80x32xf32>
    %c0_14 = arith.constant 0 : index
    %c2_15 = arith.constant 2 : index
    %c0_16 = arith.constant 0 : index
    %14 = vector.load %arg1[%c0_14, %c2_15, %c0_16] : memref<1x104x32xbf16, #tpu.memory_space<vmem>>, vector<1x80x32xbf16>
    %15 = vector.shape_cast %14 : vector<1x80x32xbf16> to vector<80x32xbf16>
    %c3 = arith.constant 3 : index
    %c0_17 = arith.constant 0 : index
    %c0_18 = arith.constant 0 : index
    %16 = vector.load %arg2[%c3, %c0_17, %c0_18] : memref<16x32x32xbf16, #tpu.memory_space<vmem>>, vector<1x32x32xbf16>
    %17 = vector.shape_cast %16 : vector<1x32x32xbf16> to vector<32x32xbf16>
    %cst_19 = arith.constant dense<0.000000e+00> : vector<80x32xf32>
    %18 = tpu.matmul %15, %17, %cst_19 {dimension_numbers = #tpu.dot_dimension_numbers<[1], [0], [0], [1], [0, 0, 1, 1], [], []>} : vector<80x32xbf16>, vector<32x32xbf16>, vector<80x32xf32> -> vector<80x32xf32>
    %19 = arith.addf %13, %18 : vector<80x32xf32>
    %c0_20 = arith.constant 0 : index
    %c10 = arith.constant 10 : index
    %c0_21 = arith.constant 0 : index
    %20 = vector.load %arg1[%c0_20, %c10, %c0_21] : memref<1x104x32xbf16, #tpu.memory_space<vmem>>, vector<1x80x32xbf16>
    %21 = vector.shape_cast %20 : vector<1x80x32xbf16> to vector<80x32xbf16>
    %c4 = arith.constant 4 : index
    %c0_22 = arith.constant 0 : index
    %c0_23 = arith.constant 0 : index
    %22 = vector.load %arg2[%c4, %c0_22, %c0_23] : memref<16x32x32xbf16, #tpu.memory_space<vmem>>, vector<1x32x32xbf16>
    %23 = vector.shape_cast %22 : vector<1x32x32xbf16> to vector<32x32xbf16>
    %cst_24 = arith.constant dense<0.000000e+00> : vector<80x32xf32>
    %24 = tpu.matmul %21, %23, %cst_24 {dimension_numbers = #tpu.dot_dimension_numbers<[1], [0], [0], [1], [0, 0, 1, 1], [], []>} : vector<80x32xbf16>, vector<32x32xbf16>, vector<80x32xf32> -> vector<80x32xf32>
    %25 = arith.addf %10, %24 : vector<80x32xf32>
    %c5 = arith.constant 5 : index
    %c0_25 = arith.constant 0 : index
    %c0_26 = arith.constant 0 : index
    %26 = vector.load %arg2[%c5, %c0_25, %c0_26] : memref<16x32x32xbf16, #tpu.memory_space<vmem>>, vector<1x32x32xbf16>
    %27 = vector.shape_cast %26 : vector<1x32x32xbf16> to vector<32x32xbf16>
    %cst_27 = arith.constant dense<0.000000e+00> : vector<80x32xf32>
    %28 = tpu.matmul %21, %27, %cst_27 {dimension_numbers = #tpu.dot_dimension_numbers<[1], [0], [0], [1], [0, 0, 1, 1], [], []>} : vector<80x32xbf16>, vector<32x32xbf16>, vector<80x32xf32> -> vector<80x32xf32>
    %c0_28 = arith.constant 0 : index
    %c11 = arith.constant 11 : index
    %c0_29 = arith.constant 0 : index
    %29 = vector.load %arg1[%c0_28, %c11, %c0_29] : memref<1x104x32xbf16, #tpu.memory_space<vmem>>, vector<1x80x32xbf16>
    %30 = vector.shape_cast %29 : vector<1x80x32xbf16> to vector<80x32xbf16>
    %c6 = arith.constant 6 : index
    %c0_30 = arith.constant 0 : index
    %c0_31 = arith.constant 0 : index
    %31 = vector.load %arg2[%c6, %c0_30, %c0_31] : memref<16x32x32xbf16, #tpu.memory_space<vmem>>, vector<1x32x32xbf16>
    %32 = vector.shape_cast %31 : vector<1x32x32xbf16> to vector<32x32xbf16>
    %cst_32 = arith.constant dense<0.000000e+00> : vector<80x32xf32>
    %33 = tpu.matmul %30, %32, %cst_32 {dimension_numbers = #tpu.dot_dimension_numbers<[1], [0], [0], [1], [0, 0, 1, 1], [], []>} : vector<80x32xbf16>, vector<32x32xbf16>, vector<80x32xf32> -> vector<80x32xf32>
    %34 = arith.addf %25, %33 : vector<80x32xf32>
    %c7 = arith.constant 7 : index
    %c0_33 = arith.constant 0 : index
    %c0_34 = arith.constant 0 : index
    %35 = vector.load %arg2[%c7, %c0_33, %c0_34] : memref<16x32x32xbf16, #tpu.memory_space<vmem>>, vector<1x32x32xbf16>
    %36 = vector.shape_cast %35 : vector<1x32x32xbf16> to vector<32x32xbf16>
    %cst_35 = arith.constant dense<0.000000e+00> : vector<80x32xf32>
    %37 = tpu.matmul %30, %36, %cst_35 {dimension_numbers = #tpu.dot_dimension_numbers<[1], [0], [0], [1], [0, 0, 1, 1], [], []>} : vector<80x32xbf16>, vector<32x32xbf16>, vector<80x32xf32> -> vector<80x32xf32>
    %38 = arith.addf %19, %37 : vector<80x32xf32>
    %c8 = arith.constant 8 : index
    %c0_36 = arith.constant 0 : index
    %c0_37 = arith.constant 0 : index
    %39 = vector.load %arg2[%c8, %c0_36, %c0_37] : memref<16x32x32xbf16, #tpu.memory_space<vmem>>, vector<1x32x32xbf16>
    %40 = vector.shape_cast %39 : vector<1x32x32xbf16> to vector<32x32xbf16>
    %cst_38 = arith.constant dense<0.000000e+00> : vector<80x32xf32>
    %41 = tpu.matmul %30, %40, %cst_38 {dimension_numbers = #tpu.dot_dimension_numbers<[1], [0], [0], [1], [0, 0, 1, 1], [], []>} : vector<80x32xbf16>, vector<32x32xbf16>, vector<80x32xf32> -> vector<80x32xf32>
    %42 = arith.addf %28, %41 : vector<80x32xf32>
    %c9 = arith.constant 9 : index
    %c0_39 = arith.constant 0 : index
    %c0_40 = arith.constant 0 : index
    %43 = vector.load %arg2[%c9, %c0_39, %c0_40] : memref<16x32x32xbf16, #tpu.memory_space<vmem>>, vector<1x32x32xbf16>
    %44 = vector.shape_cast %43 : vector<1x32x32xbf16> to vector<32x32xbf16>
    %cst_41 = arith.constant dense<0.000000e+00> : vector<80x32xf32>
    %45 = tpu.matmul %30, %44, %cst_41 {dimension_numbers = #tpu.dot_dimension_numbers<[1], [0], [0], [1], [0, 0, 1, 1], [], []>} : vector<80x32xbf16>, vector<32x32xbf16>, vector<80x32xf32> -> vector<80x32xf32>
    %c0_42 = arith.constant 0 : index
    %c12 = arith.constant 12 : index
    %c0_43 = arith.constant 0 : index
    %46 = vector.load %arg1[%c0_42, %c12, %c0_43] : memref<1x104x32xbf16, #tpu.memory_space<vmem>>, vector<1x80x32xbf16>
    %47 = vector.shape_cast %46 : vector<1x80x32xbf16> to vector<80x32xbf16>
    %c10_44 = arith.constant 10 : index
    %c0_45 = arith.constant 0 : index
    %c0_46 = arith.constant 0 : index
    %48 = vector.load %arg2[%c10_44, %c0_45, %c0_46] : memref<16x32x32xbf16, #tpu.memory_space<vmem>>, vector<1x32x32xbf16>
    %49 = vector.shape_cast %48 : vector<1x32x32xbf16> to vector<32x32xbf16>
    %cst_47 = arith.constant dense<0.000000e+00> : vector<80x32xf32>
    %50 = tpu.matmul %47, %49, %cst_47 {dimension_numbers = #tpu.dot_dimension_numbers<[1], [0], [0], [1], [0, 0, 1, 1], [], []>} : vector<80x32xbf16>, vector<32x32xbf16>, vector<80x32xf32> -> vector<80x32xf32>
    %51 = arith.addf %38, %50 : vector<80x32xf32>
    %c11_48 = arith.constant 11 : index
    %c0_49 = arith.constant 0 : index
    %c0_50 = arith.constant 0 : index
    %52 = vector.load %arg2[%c11_48, %c0_49, %c0_50] : memref<16x32x32xbf16, #tpu.memory_space<vmem>>, vector<1x32x32xbf16>
    %53 = vector.shape_cast %52 : vector<1x32x32xbf16> to vector<32x32xbf16>
    %cst_51 = arith.constant dense<0.000000e+00> : vector<80x32xf32>
    %54 = tpu.matmul %47, %53, %cst_51 {dimension_numbers = #tpu.dot_dimension_numbers<[1], [0], [0], [1], [0, 0, 1, 1], [], []>} : vector<80x32xbf16>, vector<32x32xbf16>, vector<80x32xf32> -> vector<80x32xf32>
    %55 = arith.addf %45, %54 : vector<80x32xf32>
    %c0_52 = arith.constant 0 : index
    %c20 = arith.constant 20 : index
    %c0_53 = arith.constant 0 : index
    %56 = vector.load %arg1[%c0_52, %c20, %c0_53] : memref<1x104x32xbf16, #tpu.memory_space<vmem>>, vector<1x80x32xbf16>
    %57 = vector.shape_cast %56 : vector<1x80x32xbf16> to vector<80x32xbf16>
    %c12_54 = arith.constant 12 : index
    %c0_55 = arith.constant 0 : index
    %c0_56 = arith.constant 0 : index
    %58 = vector.load %arg2[%c12_54, %c0_55, %c0_56] : memref<16x32x32xbf16, #tpu.memory_space<vmem>>, vector<1x32x32xbf16>
    %59 = vector.shape_cast %58 : vector<1x32x32xbf16> to vector<32x32xbf16>
    %cst_57 = arith.constant dense<0.000000e+00> : vector<80x32xf32>
    %60 = tpu.matmul %57, %59, %cst_57 {dimension_numbers = #tpu.dot_dimension_numbers<[1], [0], [0], [1], [0, 0, 1, 1], [], []>} : vector<80x32xbf16>, vector<32x32xbf16>, vector<80x32xf32> -> vector<80x32xf32>
    %61 = arith.addf %42, %60 : vector<80x32xf32>
    %c0_58 = arith.constant 0 : index
    %c21 = arith.constant 21 : index
    %c0_59 = arith.constant 0 : index
    %62 = vector.load %arg1[%c0_58, %c21, %c0_59] : memref<1x104x32xbf16, #tpu.memory_space<vmem>>, vector<1x80x32xbf16>
    %63 = vector.shape_cast %62 : vector<1x80x32xbf16> to vector<80x32xbf16>
    %c13 = arith.constant 13 : index
    %c0_60 = arith.constant 0 : index
    %c0_61 = arith.constant 0 : index
    %64 = vector.load %arg2[%c13, %c0_60, %c0_61] : memref<16x32x32xbf16, #tpu.memory_space<vmem>>, vector<1x32x32xbf16>
    %65 = vector.shape_cast %64 : vector<1x32x32xbf16> to vector<32x32xbf16>
    %cst_62 = arith.constant dense<0.000000e+00> : vector<80x32xf32>
    %66 = tpu.matmul %63, %65, %cst_62 {dimension_numbers = #tpu.dot_dimension_numbers<[1], [0], [0], [1], [0, 0, 1, 1], [], []>} : vector<80x32xbf16>, vector<32x32xbf16>, vector<80x32xf32> -> vector<80x32xf32>
    %67 = arith.addf %61, %66 : vector<80x32xf32>
    %c14 = arith.constant 14 : index
    %c0_63 = arith.constant 0 : index
    %c0_64 = arith.constant 0 : index
    %68 = vector.load %arg2[%c14, %c0_63, %c0_64] : memref<16x32x32xbf16, #tpu.memory_space<vmem>>, vector<1x32x32xbf16>
    %69 = vector.shape_cast %68 : vector<1x32x32xbf16> to vector<32x32xbf16>
    %cst_65 = arith.constant dense<0.000000e+00> : vector<80x32xf32>
    %70 = tpu.matmul %63, %69, %cst_65 {dimension_numbers = #tpu.dot_dimension_numbers<[1], [0], [0], [1], [0, 0, 1, 1], [], []>} : vector<80x32xbf16>, vector<32x32xbf16>, vector<80x32xf32> -> vector<80x32xf32>
    %71 = arith.addf %55, %70 : vector<80x32xf32>
    %c0_66 = arith.constant 0 : index
    %c22 = arith.constant 22 : index
    %c0_67 = arith.constant 0 : index
    %72 = vector.load %arg1[%c0_66, %c22, %c0_67] : memref<1x104x32xbf16, #tpu.memory_space<vmem>>, vector<1x80x32xbf16>
    %73 = vector.shape_cast %72 : vector<1x80x32xbf16> to vector<80x32xbf16>
    %c15 = arith.constant 15 : index
    %c0_68 = arith.constant 0 : index
    %c0_69 = arith.constant 0 : index
    %74 = vector.load %arg2[%c15, %c0_68, %c0_69] : memref<16x32x32xbf16, #tpu.memory_space<vmem>>, vector<1x32x32xbf16>
    %75 = vector.shape_cast %74 : vector<1x32x32xbf16> to vector<32x32xbf16>
    %cst_70 = arith.constant dense<0.000000e+00> : vector<80x32xf32>
    %76 = tpu.matmul %73, %75, %cst_70 {dimension_numbers = #tpu.dot_dimension_numbers<[1], [0], [0], [1], [0, 0, 1, 1], [], []>} : vector<80x32xbf16>, vector<32x32xbf16>, vector<80x32xf32> -> vector<80x32xf32>
    %77 = arith.addf %71, %76 : vector<80x32xf32>
    %c0_71 = arith.constant 0 : index
    %c0_72 = arith.constant 0 : index
    %78 = vector.load %arg3[%c0_71, %c0_72] : memref<80x1xf32, #tpu.memory_space<vmem>>, vector<80x1xf32>
    %79 = arith.truncf %34 : vector<80x32xf32> to vector<80x32xbf16>
    %c0_73 = arith.constant 0 : index
    %c0_74 = arith.constant 0 : index
    %c0_75 = arith.constant 0 : index
    %80 = vector.load %arg4[%c0_73, %c0_74, %c0_75] : memref<1x80x128xbf16, #tpu.memory_space<vmem>>, vector<1x80x32xbf16>
    %81 = vector.shape_cast %80 : vector<1x80x32xbf16> to vector<80x32xbf16>
    %82 = vector.shape_cast %79 : vector<80x32xbf16> to vector<1x80x32xbf16>
    tpu.vector_store %arg4[%c0_73, %c0_74, %c0_75], %82 {strides = array<i32>} : memref<1x80x128xbf16, #tpu.memory_space<vmem>>, vector<1x80x32xbf16>,
    %83 = vector.broadcast %78 : vector<80x1xf32> to vector<80x32xf32>
    %84 = arith.mulf %34, %83 : vector<80x32xf32>
    %cst_76 = arith.constant dense<0.000000e+00> : vector<32xf32>
    %85 = vector.multi_reduction <add>, %84, %cst_76 [0] : vector<80x32xf32> to vector<32xf32>
    %86 = vector.shape_cast %85 : vector<32xf32> to vector<1x32xf32>
    %c0_77 = arith.constant 0 : index
    %c0_78 = arith.constant 0 : index
    %c0_79 = arith.constant 0 : index
    %87 = vector.load %arg5[%c0_77, %c0_78, %c0_79] : memref<1x1x128xf32, #tpu.memory_space<vmem>>, vector<1x1x32xf32>
    %88 = vector.shape_cast %87 : vector<1x1x32xf32> to vector<1x32xf32>
    %89 = vector.shape_cast %86 : vector<1x32xf32> to vector<1x1x32xf32>
    tpu.vector_store %arg5[%c0_77, %c0_78, %c0_79], %89 {strides = array<i32>} : memref<1x1x128xf32, #tpu.memory_space<vmem>>, vector<1x1x32xf32>,
    %90 = arith.mulf %84, %34 : vector<80x32xf32>
    %cst_80 = arith.constant dense<0.000000e+00> : vector<32xf32>
    %91 = vector.multi_reduction <add>, %90, %cst_80 [0] : vector<80x32xf32> to vector<32xf32>
    %92 = vector.shape_cast %91 : vector<32xf32> to vector<1x32xf32>
    %c0_81 = arith.constant 0 : index
    %c0_82 = arith.constant 0 : index
    %c0_83 = arith.constant 0 : index
    %93 = vector.load %arg6[%c0_81, %c0_82, %c0_83] : memref<1x1x128xf32, #tpu.memory_space<vmem>>, vector<1x1x32xf32>
    %94 = vector.shape_cast %93 : vector<1x1x32xf32> to vector<1x32xf32>
    %95 = vector.shape_cast %92 : vector<1x32xf32> to vector<1x1x32xf32>
    tpu.vector_store %arg6[%c0_81, %c0_82, %c0_83], %95 {strides = array<i32>} : memref<1x1x128xf32, #tpu.memory_space<vmem>>, vector<1x1x32xf32>,
    %96 = arith.truncf %51 : vector<80x32xf32> to vector<80x32xbf16>
    %c0_84 = arith.constant 0 : index
    %c0_85 = arith.constant 0 : index
    %c32 = arith.constant 32 : index
    %97 = vector.load %arg4[%c0_84, %c0_85, %c32] : memref<1x80x128xbf16, #tpu.memory_space<vmem>>, vector<1x80x32xbf16>
    %98 = vector.shape_cast %97 : vector<1x80x32xbf16> to vector<80x32xbf16>
    %99 = vector.shape_cast %96 : vector<80x32xbf16> to vector<1x80x32xbf16>
    tpu.vector_store %arg4[%c0_84, %c0_85, %c32], %99 {strides = array<i32>} : memref<1x80x128xbf16, #tpu.memory_space<vmem>>, vector<1x80x32xbf16>,
    %100 = vector.broadcast %78 : vector<80x1xf32> to vector<80x32xf32>
    %101 = arith.mulf %51, %100 : vector<80x32xf32>
    %cst_86 = arith.constant dense<0.000000e+00> : vector<32xf32>
    %102 = vector.multi_reduction <add>, %101, %cst_86 [0] : vector<80x32xf32> to vector<32xf32>
    %103 = vector.shape_cast %102 : vector<32xf32> to vector<1x32xf32>
    %c0_87 = arith.constant 0 : index
    %c0_88 = arith.constant 0 : index
    %c32_89 = arith.constant 32 : index
    %104 = vector.load %arg5[%c0_87, %c0_88, %c32_89] : memref<1x1x128xf32, #tpu.memory_space<vmem>>, vector<1x1x32xf32>
    %105 = vector.shape_cast %104 : vector<1x1x32xf32> to vector<1x32xf32>
    %106 = vector.shape_cast %103 : vector<1x32xf32> to vector<1x1x32xf32>
    tpu.vector_store %arg5[%c0_87, %c0_88, %c32_89], %106 {strides = array<i32>} : memref<1x1x128xf32, #tpu.memory_space<vmem>>, vector<1x1x32xf32>,
    %107 = arith.mulf %101, %51 : vector<80x32xf32>
    %cst_90 = arith.constant dense<0.000000e+00> : vector<32xf32>
    %108 = vector.multi_reduction <add>, %107, %cst_90 [0] : vector<80x32xf32> to vector<32xf32>
    %109 = vector.shape_cast %108 : vector<32xf32> to vector<1x32xf32>
    %c0_91 = arith.constant 0 : index
    %c0_92 = arith.constant 0 : index
    %c32_93 = arith.constant 32 : index
    %110 = vector.load %arg6[%c0_91, %c0_92, %c32_93] : memref<1x1x128xf32, #tpu.memory_space<vmem>>, vector<1x1x32xf32>
    %111 = vector.shape_cast %110 : vector<1x1x32xf32> to vector<1x32xf32>
    %112 = vector.shape_cast %109 : vector<1x32xf32> to vector<1x1x32xf32>
    tpu.vector_store %arg6[%c0_91, %c0_92, %c32_93], %112 {strides = array<i32>} : memref<1x1x128xf32, #tpu.memory_space<vmem>>, vector<1x1x32xf32>,
    %113 = arith.truncf %67 : vector<80x32xf32> to vector<80x32xbf16>
    %c0_94 = arith.constant 0 : index
    %c0_95 = arith.constant 0 : index
    %c64 = arith.constant 64 : index
    %114 = vector.load %arg4[%c0_94, %c0_95, %c64] : memref<1x80x128xbf16, #tpu.memory_space<vmem>>, vector<1x80x32xbf16>
    %115 = vector.shape_cast %114 : vector<1x80x32xbf16> to vector<80x32xbf16>
    %116 = vector.shape_cast %113 : vector<80x32xbf16> to vector<1x80x32xbf16>
    tpu.vector_store %arg4[%c0_94, %c0_95, %c64], %116 {strides = array<i32>} : memref<1x80x128xbf16, #tpu.memory_space<vmem>>, vector<1x80x32xbf16>,
    %117 = vector.broadcast %78 : vector<80x1xf32> to vector<80x32xf32>
    %118 = arith.mulf %67, %117 : vector<80x32xf32>
    %cst_96 = arith.constant dense<0.000000e+00> : vector<32xf32>
    %119 = vector.multi_reduction <add>, %118, %cst_96 [0] : vector<80x32xf32> to vector<32xf32>
    %120 = vector.shape_cast %119 : vector<32xf32> to vector<1x32xf32>
    %c0_97 = arith.constant 0 : index
    %c0_98 = arith.constant 0 : index
    %c64_99 = arith.constant 64 : index
    %121 = vector.load %arg5[%c0_97, %c0_98, %c64_99] : memref<1x1x128xf32, #tpu.memory_space<vmem>>, vector<1x1x32xf32>
    %122 = vector.shape_cast %121 : vector<1x1x32xf32> to vector<1x32xf32>
    %123 = vector.shape_cast %120 : vector<1x32xf32> to vector<1x1x32xf32>
    tpu.vector_store %arg5[%c0_97, %c0_98, %c64_99], %123 {strides = array<i32>} : memref<1x1x128xf32, #tpu.memory_space<vmem>>, vector<1x1x32xf32>,
    %124 = arith.mulf %118, %67 : vector<80x32xf32>
    %cst_100 = arith.constant dense<0.000000e+00> : vector<32xf32>
    %125 = vector.multi_reduction <add>, %124, %cst_100 [0] : vector<80x32xf32> to vector<32xf32>
    %126 = vector.shape_cast %125 : vector<32xf32> to vector<1x32xf32>
    %c0_101 = arith.constant 0 : index
    %c0_102 = arith.constant 0 : index
    %c64_103 = arith.constant 64 : index
    %127 = vector.load %arg6[%c0_101, %c0_102, %c64_103] : memref<1x1x128xf32, #tpu.memory_space<vmem>>, vector<1x1x32xf32>
    %128 = vector.shape_cast %127 : vector<1x1x32xf32> to vector<1x32xf32>
    %129 = vector.shape_cast %126 : vector<1x32xf32> to vector<1x1x32xf32>
    tpu.vector_store %arg6[%c0_101, %c0_102, %c64_103], %129 {strides = array<i32>} : memref<1x1x128xf32, #tpu.memory_space<vmem>>, vector<1x1x32xf32>,
    %130 = arith.truncf %77 : vector<80x32xf32> to vector<80x32xbf16>
    %c0_104 = arith.constant 0 : index
    %c0_105 = arith.constant 0 : index
    %c96 = arith.constant 96 : index
    %131 = vector.load %arg4[%c0_104, %c0_105, %c96] : memref<1x80x128xbf16, #tpu.memory_space<vmem>>, vector<1x80x32xbf16>
    %132 = vector.shape_cast %131 : vector<1x80x32xbf16> to vector<80x32xbf16>
    %133 = vector.shape_cast %130 : vector<80x32xbf16> to vector<1x80x32xbf16>
    tpu.vector_store %arg4[%c0_104, %c0_105, %c96], %133 {strides = array<i32>} : memref<1x80x128xbf16, #tpu.memory_space<vmem>>, vector<1x80x32xbf16>,
    %134 = vector.broadcast %78 : vector<80x1xf32> to vector<80x32xf32>
    %135 = arith.mulf %77, %134 : vector<80x32xf32>
    %cst_106 = arith.constant dense<0.000000e+00> : vector<32xf32>
    %136 = vector.multi_reduction <add>, %135, %cst_106 [0] : vector<80x32xf32> to vector<32xf32>
    %137 = vector.shape_cast %136 : vector<32xf32> to vector<1x32xf32>
    %c0_107 = arith.constant 0 : index
    %c0_108 = arith.constant 0 : index
    %c96_109 = arith.constant 96 : index
    %138 = vector.load %arg5[%c0_107, %c0_108, %c96_109] : memref<1x1x128xf32, #tpu.memory_space<vmem>>, vector<1x1x32xf32>
    %139 = vector.shape_cast %138 : vector<1x1x32xf32> to vector<1x32xf32>
    %140 = vector.shape_cast %137 : vector<1x32xf32> to vector<1x1x32xf32>
    tpu.vector_store %arg5[%c0_107, %c0_108, %c96_109], %140 {strides = array<i32>} : memref<1x1x128xf32, #tpu.memory_space<vmem>>, vector<1x1x32xf32>,
    %141 = arith.mulf %135, %77 : vector<80x32xf32>
    %cst_110 = arith.constant dense<0.000000e+00> : vector<32xf32>
    %142 = vector.multi_reduction <add>, %141, %cst_110 [0] : vector<80x32xf32> to vector<32xf32>
    %143 = vector.shape_cast %142 : vector<32xf32> to vector<1x32xf32>
    %c0_111 = arith.constant 0 : index
    %c0_112 = arith.constant 0 : index
    %c96_113 = arith.constant 96 : index
    %144 = vector.load %arg6[%c0_111, %c0_112, %c96_113] : memref<1x1x128xf32, #tpu.memory_space<vmem>>, vector<1x1x32xf32>
    %145 = vector.shape_cast %144 : vector<1x1x32xf32> to vector<1x32xf32>
    %146 = vector.shape_cast %143 : vector<1x32xf32> to vector<1x1x32xf32>
    tpu.vector_store %arg6[%c0_111, %c0_112, %c96_113], %146 {strides = array<i32>} : memref<1x1x128xf32, #tpu.memory_space<vmem>>, vector<1x1x32xf32>,
    return
  }
  func.func @transform_0(%arg0: i32) -> (i32, i32, i32) {
    %c0_i32 = arith.constant 0 : i32
    %c0_i32_0 = arith.constant 0 : i32
    %c0_i32_1 = arith.constant 0 : i32
    return %arg0, %c0_i32, %c0_i32_0 : i32, i32, i32
  }
  func.func @transform_1(%arg0: i32) -> (i32, i32, i32) {
    %c0_i32 = arith.constant 0 : i32
    %c0_i32_0 = arith.constant 0 : i32
    %c0_i32_1 = arith.constant 0 : i32
    %c0_i32_2 = arith.constant 0 : i32
    return %c0_i32, %c0_i32_0, %c0_i32_1 : i32, i32, i32
  }
  func.func @transform_2(%arg0: i32) -> (i32, i32) {
    %c0_i32 = arith.constant 0 : i32
    %c0_i32_0 = arith.constant 0 : i32
    %c0_i32_1 = arith.constant 0 : i32
    return %c0_i32, %c0_i32_0 : i32, i32
  }
  func.func @transform_3(%arg0: i32) -> (i32, i32, i32) {
    %c0_i32 = arith.constant 0 : i32
    %c0_i32_0 = arith.constant 0 : i32
    %c0_i32_1 = arith.constant 0 : i32
    return %arg0, %c0_i32, %c0_i32_0 : i32, i32, i32
  }
  func.func @transform_4(%arg0: i32) -> (i32, i32, i32) {
    %c0_i32 = arith.constant 0 : i32
    %c0_i32_0 = arith.constant 0 : i32
    %c0_i32_1 = arith.constant 0 : i32
    return %arg0, %c0_i32, %c0_i32_0 : i32, i32, i32
  }
  func.func @transform_5(%arg0: i32) -> (i32, i32, i32) {
    %c0_i32 = arith.constant 0 : i32
    %c0_i32_0 = arith.constant 0 : i32
    %c0_i32_1 = arith.constant 0 : i32
    return %arg0, %c0_i32, %c0_i32_0 : i32, i32, i32
  }
}

module attributes {stable_mosaic.version = 11 : i64} {
  func.func @_affine_relu_kernel(%arg0: i32, %arg1: memref<160x128xbf16, #tpu.memory_space<vmem>>, %arg2: memref<1x128xf32, #tpu.memory_space<vmem>>, %arg3: memref<1x128xf32, #tpu.memory_space<vmem>>, %arg4: memref<160x128xbf16, #tpu.memory_space<vmem>>) attributes {dimension_semantics = [#tpu.dimension_semantics<parallel>], iteration_bounds = array<i64: 1>, scalar_prefetch = 0 : i64, scratch_operands = 0 : i64, tpu.core_type = #tpu.core_type<tc>, window_params = [{transform_indices = @transform_0, window_bounds = array<i64: 160, 128>}, {pipeline_mode = #tpu.pipeline_mode<synchronous>, transform_indices = @transform_1, window_bounds = array<i64: 1, 128>}, {pipeline_mode = #tpu.pipeline_mode<synchronous>, transform_indices = @transform_2, window_bounds = array<i64: 1, 128>}, {transform_indices = @transform_3, window_bounds = array<i64: 160, 128>}]} {
    %c0 = arith.constant 0 : index
    %c0_0 = arith.constant 0 : index
    %0 = vector.load %arg1[%c0, %c0_0] : memref<160x128xbf16, #tpu.memory_space<vmem>>, vector<160x128xbf16>
    %1 = arith.extf %0 : vector<160x128xbf16> to vector<160x128xf32>
    %c0_1 = arith.constant 0 : index
    %c0_2 = arith.constant 0 : index
    %2 = vector.load %arg2[%c0_1, %c0_2] : memref<1x128xf32, #tpu.memory_space<vmem>>, vector<1x128xf32>
    %3 = vector.broadcast %2 : vector<1x128xf32> to vector<160x128xf32>
    %4 = arith.mulf %1, %3 : vector<160x128xf32>
    %c0_3 = arith.constant 0 : index
    %c0_4 = arith.constant 0 : index
    %5 = vector.load %arg3[%c0_3, %c0_4] : memref<1x128xf32, #tpu.memory_space<vmem>>, vector<1x128xf32>
    %6 = vector.broadcast %5 : vector<1x128xf32> to vector<160x128xf32>
    %7 = arith.addf %4, %6 : vector<160x128xf32>
    %cst = arith.constant 0.000000e+00 : f32
    %8 = vector.broadcast %cst : f32 to vector<160x128xf32>
    %9 = arith.maximumf %7, %8 : vector<160x128xf32>
    %10 = arith.truncf %9 : vector<160x128xf32> to vector<160x128xbf16>
    %c0_5 = arith.constant 0 : index
    %c0_6 = arith.constant 0 : index
    %11 = vector.load %arg4[%c0_5, %c0_6] : memref<160x128xbf16, #tpu.memory_space<vmem>>, vector<160x128xbf16>
    tpu.vector_store %arg4[%c0_5, %c0_6], %10 {strides = array<i32>} : memref<160x128xbf16, #tpu.memory_space<vmem>>, vector<160x128xbf16>,
    return
  }
  func.func @transform_0(%arg0: i32) -> (i32, i32) {
    %c0_i32 = arith.constant 0 : i32
    %c0_i32_0 = arith.constant 0 : i32
    return %arg0, %c0_i32 : i32, i32
  }
  func.func @transform_1(%arg0: i32) -> (i32, i32) {
    %c0_i32 = arith.constant 0 : i32
    %c0_i32_0 = arith.constant 0 : i32
    %c0_i32_1 = arith.constant 0 : i32
    return %c0_i32, %c0_i32_0 : i32, i32
  }
  func.func @transform_2(%arg0: i32) -> (i32, i32) {
    %c0_i32 = arith.constant 0 : i32
    %c0_i32_0 = arith.constant 0 : i32
    %c0_i32_1 = arith.constant 0 : i32
    return %c0_i32, %c0_i32_0 : i32, i32
  }
  func.func @transform_3(%arg0: i32) -> (i32, i32) {
    %c0_i32 = arith.constant 0 : i32
    %c0_i32_0 = arith.constant 0 : i32
    return %arg0, %c0_i32 : i32, i32
  }
}

module attributes {stable_mosaic.version = 11 : i64} {
  func.func @_deconv_s2_tanh_kernel(%arg0: i32, %arg1: memref<1x328x32xbf16, #tpu.memory_space<vmem>>, %arg2: memref<16x32x32xbf16, #tpu.memory_space<vmem>>, %arg3: memref<1x288x128xf32, #tpu.memory_space<vmem>>) attributes {dimension_semantics = [#tpu.dimension_semantics<parallel>], iteration_bounds = array<i64: 2>, scalar_prefetch = 0 : i64, scratch_operands = 0 : i64, tpu.core_type = #tpu.core_type<tc>, window_params = [{transform_indices = @transform_0, window_bounds = array<i64: 1, 328, 32>}, {pipeline_mode = #tpu.pipeline_mode<synchronous>, transform_indices = @transform_1, window_bounds = array<i64: 16, 32, 32>}, {transform_indices = @transform_2, window_bounds = array<i64: 1, 288, 128>}]} {
    %c0 = arith.constant 0 : index
    %c0_0 = arith.constant 0 : index
    %c0_1 = arith.constant 0 : index
    %0 = vector.load %arg1[%c0, %c0_0, %c0_1] : memref<1x328x32xbf16, #tpu.memory_space<vmem>>, vector<1x288x32xbf16>
    %1 = vector.shape_cast %0 : vector<1x288x32xbf16> to vector<288x32xbf16>
    %c0_2 = arith.constant 0 : index
    %c0_3 = arith.constant 0 : index
    %c0_4 = arith.constant 0 : index
    %2 = vector.load %arg2[%c0_2, %c0_3, %c0_4] : memref<16x32x32xbf16, #tpu.memory_space<vmem>>, vector<1x32x32xbf16>
    %3 = vector.shape_cast %2 : vector<1x32x32xbf16> to vector<32x32xbf16>
    %cst = arith.constant dense<0.000000e+00> : vector<288x32xf32>
    %4 = tpu.matmul %1, %3, %cst {dimension_numbers = #tpu.dot_dimension_numbers<[1], [0], [0], [1], [0, 0, 1, 1], [], []>} : vector<288x32xbf16>, vector<32x32xbf16>, vector<288x32xf32> -> vector<288x32xf32>
    %c0_5 = arith.constant 0 : index
    %c1 = arith.constant 1 : index
    %c0_6 = arith.constant 0 : index
    %5 = vector.load %arg1[%c0_5, %c1, %c0_6] : memref<1x328x32xbf16, #tpu.memory_space<vmem>>, vector<1x288x32xbf16>
    %6 = vector.shape_cast %5 : vector<1x288x32xbf16> to vector<288x32xbf16>
    %c1_7 = arith.constant 1 : index
    %c0_8 = arith.constant 0 : index
    %c0_9 = arith.constant 0 : index
    %7 = vector.load %arg2[%c1_7, %c0_8, %c0_9] : memref<16x32x32xbf16, #tpu.memory_space<vmem>>, vector<1x32x32xbf16>
    %8 = vector.shape_cast %7 : vector<1x32x32xbf16> to vector<32x32xbf16>
    %cst_10 = arith.constant dense<0.000000e+00> : vector<288x32xf32>
    %9 = tpu.matmul %6, %8, %cst_10 {dimension_numbers = #tpu.dot_dimension_numbers<[1], [0], [0], [1], [0, 0, 1, 1], [], []>} : vector<288x32xbf16>, vector<32x32xbf16>, vector<288x32xf32> -> vector<288x32xf32>
    %10 = arith.addf %4, %9 : vector<288x32xf32>
    %c2 = arith.constant 2 : index
    %c0_11 = arith.constant 0 : index
    %c0_12 = arith.constant 0 : index
    %11 = vector.load %arg2[%c2, %c0_11, %c0_12] : memref<16x32x32xbf16, #tpu.memory_space<vmem>>, vector<1x32x32xbf16>
    %12 = vector.shape_cast %11 : vector<1x32x32xbf16> to vector<32x32xbf16>
    %cst_13 = arith.constant dense<0.000000e+00> : vector<288x32xf32>
    %13 = tpu.matmul %6, %12, %cst_13 {dimension_numbers = #tpu.dot_dimension_numbers<[1], [0], [0], [1], [0, 0, 1, 1], [], []>} : vector<288x32xbf16>, vector<32x32xbf16>, vector<288x32xf32> -> vector<288x32xf32>
    %c0_14 = arith.constant 0 : index
    %c2_15 = arith.constant 2 : index
    %c0_16 = arith.constant 0 : index
    %14 = vector.load %arg1[%c0_14, %c2_15, %c0_16] : memref<1x328x32xbf16, #tpu.memory_space<vmem>>, vector<1x288x32xbf16>
    %15 = vector.shape_cast %14 : vector<1x288x32xbf16> to vector<288x32xbf16>
    %c3 = arith.constant 3 : index
    %c0_17 = arith.constant 0 : index
    %c0_18 = arith.constant 0 : index
    %16 = vector.load %arg2[%c3, %c0_17, %c0_18] : memref<16x32x32xbf16, #tpu.memory_space<vmem>>, vector<1x32x32xbf16>
    %17 = vector.shape_cast %16 : vector<1x32x32xbf16> to vector<32x32xbf16>
    %cst_19 = arith.constant dense<0.000000e+00> : vector<288x32xf32>
    %18 = tpu.matmul %15, %17, %cst_19 {dimension_numbers = #tpu.dot_dimension_numbers<[1], [0], [0], [1], [0, 0, 1, 1], [], []>} : vector<288x32xbf16>, vector<32x32xbf16>, vector<288x32xf32> -> vector<288x32xf32>
    %19 = arith.addf %13, %18 : vector<288x32xf32>
    %c0_20 = arith.constant 0 : index
    %c18 = arith.constant 18 : index
    %c0_21 = arith.constant 0 : index
    %20 = vector.load %arg1[%c0_20, %c18, %c0_21] : memref<1x328x32xbf16, #tpu.memory_space<vmem>>, vector<1x288x32xbf16>
    %21 = vector.shape_cast %20 : vector<1x288x32xbf16> to vector<288x32xbf16>
    %c4 = arith.constant 4 : index
    %c0_22 = arith.constant 0 : index
    %c0_23 = arith.constant 0 : index
    %22 = vector.load %arg2[%c4, %c0_22, %c0_23] : memref<16x32x32xbf16, #tpu.memory_space<vmem>>, vector<1x32x32xbf16>
    %23 = vector.shape_cast %22 : vector<1x32x32xbf16> to vector<32x32xbf16>
    %cst_24 = arith.constant dense<0.000000e+00> : vector<288x32xf32>
    %24 = tpu.matmul %21, %23, %cst_24 {dimension_numbers = #tpu.dot_dimension_numbers<[1], [0], [0], [1], [0, 0, 1, 1], [], []>} : vector<288x32xbf16>, vector<32x32xbf16>, vector<288x32xf32> -> vector<288x32xf32>
    %25 = arith.addf %10, %24 : vector<288x32xf32>
    %c5 = arith.constant 5 : index
    %c0_25 = arith.constant 0 : index
    %c0_26 = arith.constant 0 : index
    %26 = vector.load %arg2[%c5, %c0_25, %c0_26] : memref<16x32x32xbf16, #tpu.memory_space<vmem>>, vector<1x32x32xbf16>
    %27 = vector.shape_cast %26 : vector<1x32x32xbf16> to vector<32x32xbf16>
    %cst_27 = arith.constant dense<0.000000e+00> : vector<288x32xf32>
    %28 = tpu.matmul %21, %27, %cst_27 {dimension_numbers = #tpu.dot_dimension_numbers<[1], [0], [0], [1], [0, 0, 1, 1], [], []>} : vector<288x32xbf16>, vector<32x32xbf16>, vector<288x32xf32> -> vector<288x32xf32>
    %c0_28 = arith.constant 0 : index
    %c19 = arith.constant 19 : index
    %c0_29 = arith.constant 0 : index
    %29 = vector.load %arg1[%c0_28, %c19, %c0_29] : memref<1x328x32xbf16, #tpu.memory_space<vmem>>, vector<1x288x32xbf16>
    %30 = vector.shape_cast %29 : vector<1x288x32xbf16> to vector<288x32xbf16>
    %c6 = arith.constant 6 : index
    %c0_30 = arith.constant 0 : index
    %c0_31 = arith.constant 0 : index
    %31 = vector.load %arg2[%c6, %c0_30, %c0_31] : memref<16x32x32xbf16, #tpu.memory_space<vmem>>, vector<1x32x32xbf16>
    %32 = vector.shape_cast %31 : vector<1x32x32xbf16> to vector<32x32xbf16>
    %cst_32 = arith.constant dense<0.000000e+00> : vector<288x32xf32>
    %33 = tpu.matmul %30, %32, %cst_32 {dimension_numbers = #tpu.dot_dimension_numbers<[1], [0], [0], [1], [0, 0, 1, 1], [], []>} : vector<288x32xbf16>, vector<32x32xbf16>, vector<288x32xf32> -> vector<288x32xf32>
    %34 = arith.addf %25, %33 : vector<288x32xf32>
    %c7 = arith.constant 7 : index
    %c0_33 = arith.constant 0 : index
    %c0_34 = arith.constant 0 : index
    %35 = vector.load %arg2[%c7, %c0_33, %c0_34] : memref<16x32x32xbf16, #tpu.memory_space<vmem>>, vector<1x32x32xbf16>
    %36 = vector.shape_cast %35 : vector<1x32x32xbf16> to vector<32x32xbf16>
    %cst_35 = arith.constant dense<0.000000e+00> : vector<288x32xf32>
    %37 = tpu.matmul %30, %36, %cst_35 {dimension_numbers = #tpu.dot_dimension_numbers<[1], [0], [0], [1], [0, 0, 1, 1], [], []>} : vector<288x32xbf16>, vector<32x32xbf16>, vector<288x32xf32> -> vector<288x32xf32>
    %38 = arith.addf %19, %37 : vector<288x32xf32>
    %c8 = arith.constant 8 : index
    %c0_36 = arith.constant 0 : index
    %c0_37 = arith.constant 0 : index
    %39 = vector.load %arg2[%c8, %c0_36, %c0_37] : memref<16x32x32xbf16, #tpu.memory_space<vmem>>, vector<1x32x32xbf16>
    %40 = vector.shape_cast %39 : vector<1x32x32xbf16> to vector<32x32xbf16>
    %cst_38 = arith.constant dense<0.000000e+00> : vector<288x32xf32>
    %41 = tpu.matmul %30, %40, %cst_38 {dimension_numbers = #tpu.dot_dimension_numbers<[1], [0], [0], [1], [0, 0, 1, 1], [], []>} : vector<288x32xbf16>, vector<32x32xbf16>, vector<288x32xf32> -> vector<288x32xf32>
    %42 = arith.addf %28, %41 : vector<288x32xf32>
    %c9 = arith.constant 9 : index
    %c0_39 = arith.constant 0 : index
    %c0_40 = arith.constant 0 : index
    %43 = vector.load %arg2[%c9, %c0_39, %c0_40] : memref<16x32x32xbf16, #tpu.memory_space<vmem>>, vector<1x32x32xbf16>
    %44 = vector.shape_cast %43 : vector<1x32x32xbf16> to vector<32x32xbf16>
    %cst_41 = arith.constant dense<0.000000e+00> : vector<288x32xf32>
    %45 = tpu.matmul %30, %44, %cst_41 {dimension_numbers = #tpu.dot_dimension_numbers<[1], [0], [0], [1], [0, 0, 1, 1], [], []>} : vector<288x32xbf16>, vector<32x32xbf16>, vector<288x32xf32> -> vector<288x32xf32>
    %c0_42 = arith.constant 0 : index
    %c20 = arith.constant 20 : index
    %c0_43 = arith.constant 0 : index
    %46 = vector.load %arg1[%c0_42, %c20, %c0_43] : memref<1x328x32xbf16, #tpu.memory_space<vmem>>, vector<1x288x32xbf16>
    %47 = vector.shape_cast %46 : vector<1x288x32xbf16> to vector<288x32xbf16>
    %c10 = arith.constant 10 : index
    %c0_44 = arith.constant 0 : index
    %c0_45 = arith.constant 0 : index
    %48 = vector.load %arg2[%c10, %c0_44, %c0_45] : memref<16x32x32xbf16, #tpu.memory_space<vmem>>, vector<1x32x32xbf16>
    %49 = vector.shape_cast %48 : vector<1x32x32xbf16> to vector<32x32xbf16>
    %cst_46 = arith.constant dense<0.000000e+00> : vector<288x32xf32>
    %50 = tpu.matmul %47, %49, %cst_46 {dimension_numbers = #tpu.dot_dimension_numbers<[1], [0], [0], [1], [0, 0, 1, 1], [], []>} : vector<288x32xbf16>, vector<32x32xbf16>, vector<288x32xf32> -> vector<288x32xf32>
    %51 = arith.addf %38, %50 : vector<288x32xf32>
    %c11 = arith.constant 11 : index
    %c0_47 = arith.constant 0 : index
    %c0_48 = arith.constant 0 : index
    %52 = vector.load %arg2[%c11, %c0_47, %c0_48] : memref<16x32x32xbf16, #tpu.memory_space<vmem>>, vector<1x32x32xbf16>
    %53 = vector.shape_cast %52 : vector<1x32x32xbf16> to vector<32x32xbf16>
    %cst_49 = arith.constant dense<0.000000e+00> : vector<288x32xf32>
    %54 = tpu.matmul %47, %53, %cst_49 {dimension_numbers = #tpu.dot_dimension_numbers<[1], [0], [0], [1], [0, 0, 1, 1], [], []>} : vector<288x32xbf16>, vector<32x32xbf16>, vector<288x32xf32> -> vector<288x32xf32>
    %55 = arith.addf %45, %54 : vector<288x32xf32>
    %c0_50 = arith.constant 0 : index
    %c36 = arith.constant 36 : index
    %c0_51 = arith.constant 0 : index
    %56 = vector.load %arg1[%c0_50, %c36, %c0_51] : memref<1x328x32xbf16, #tpu.memory_space<vmem>>, vector<1x288x32xbf16>
    %57 = vector.shape_cast %56 : vector<1x288x32xbf16> to vector<288x32xbf16>
    %c12 = arith.constant 12 : index
    %c0_52 = arith.constant 0 : index
    %c0_53 = arith.constant 0 : index
    %58 = vector.load %arg2[%c12, %c0_52, %c0_53] : memref<16x32x32xbf16, #tpu.memory_space<vmem>>, vector<1x32x32xbf16>
    %59 = vector.shape_cast %58 : vector<1x32x32xbf16> to vector<32x32xbf16>
    %cst_54 = arith.constant dense<0.000000e+00> : vector<288x32xf32>
    %60 = tpu.matmul %57, %59, %cst_54 {dimension_numbers = #tpu.dot_dimension_numbers<[1], [0], [0], [1], [0, 0, 1, 1], [], []>} : vector<288x32xbf16>, vector<32x32xbf16>, vector<288x32xf32> -> vector<288x32xf32>
    %61 = arith.addf %42, %60 : vector<288x32xf32>
    %c0_55 = arith.constant 0 : index
    %c37 = arith.constant 37 : index
    %c0_56 = arith.constant 0 : index
    %62 = vector.load %arg1[%c0_55, %c37, %c0_56] : memref<1x328x32xbf16, #tpu.memory_space<vmem>>, vector<1x288x32xbf16>
    %63 = vector.shape_cast %62 : vector<1x288x32xbf16> to vector<288x32xbf16>
    %c13 = arith.constant 13 : index
    %c0_57 = arith.constant 0 : index
    %c0_58 = arith.constant 0 : index
    %64 = vector.load %arg2[%c13, %c0_57, %c0_58] : memref<16x32x32xbf16, #tpu.memory_space<vmem>>, vector<1x32x32xbf16>
    %65 = vector.shape_cast %64 : vector<1x32x32xbf16> to vector<32x32xbf16>
    %cst_59 = arith.constant dense<0.000000e+00> : vector<288x32xf32>
    %66 = tpu.matmul %63, %65, %cst_59 {dimension_numbers = #tpu.dot_dimension_numbers<[1], [0], [0], [1], [0, 0, 1, 1], [], []>} : vector<288x32xbf16>, vector<32x32xbf16>, vector<288x32xf32> -> vector<288x32xf32>
    %67 = arith.addf %61, %66 : vector<288x32xf32>
    %c14 = arith.constant 14 : index
    %c0_60 = arith.constant 0 : index
    %c0_61 = arith.constant 0 : index
    %68 = vector.load %arg2[%c14, %c0_60, %c0_61] : memref<16x32x32xbf16, #tpu.memory_space<vmem>>, vector<1x32x32xbf16>
    %69 = vector.shape_cast %68 : vector<1x32x32xbf16> to vector<32x32xbf16>
    %cst_62 = arith.constant dense<0.000000e+00> : vector<288x32xf32>
    %70 = tpu.matmul %63, %69, %cst_62 {dimension_numbers = #tpu.dot_dimension_numbers<[1], [0], [0], [1], [0, 0, 1, 1], [], []>} : vector<288x32xbf16>, vector<32x32xbf16>, vector<288x32xf32> -> vector<288x32xf32>
    %71 = arith.addf %55, %70 : vector<288x32xf32>
    %c0_63 = arith.constant 0 : index
    %c38 = arith.constant 38 : index
    %c0_64 = arith.constant 0 : index
    %72 = vector.load %arg1[%c0_63, %c38, %c0_64] : memref<1x328x32xbf16, #tpu.memory_space<vmem>>, vector<1x288x32xbf16>
    %73 = vector.shape_cast %72 : vector<1x288x32xbf16> to vector<288x32xbf16>
    %c15 = arith.constant 15 : index
    %c0_65 = arith.constant 0 : index
    %c0_66 = arith.constant 0 : index
    %74 = vector.load %arg2[%c15, %c0_65, %c0_66] : memref<16x32x32xbf16, #tpu.memory_space<vmem>>, vector<1x32x32xbf16>
    %75 = vector.shape_cast %74 : vector<1x32x32xbf16> to vector<32x32xbf16>
    %cst_67 = arith.constant dense<0.000000e+00> : vector<288x32xf32>
    %76 = tpu.matmul %73, %75, %cst_67 {dimension_numbers = #tpu.dot_dimension_numbers<[1], [0], [0], [1], [0, 0, 1, 1], [], []>} : vector<288x32xbf16>, vector<32x32xbf16>, vector<288x32xf32> -> vector<288x32xf32>
    %77 = arith.addf %71, %76 : vector<288x32xf32>
    %78 = math.tanh %34 : vector<288x32xf32>
    %c0_68 = arith.constant 0 : index
    %c0_69 = arith.constant 0 : index
    %c0_70 = arith.constant 0 : index
    %79 = vector.load %arg3[%c0_68, %c0_69, %c0_70] : memref<1x288x128xf32, #tpu.memory_space<vmem>>, vector<1x288x32xf32>
    %80 = vector.shape_cast %79 : vector<1x288x32xf32> to vector<288x32xf32>
    %81 = vector.shape_cast %78 : vector<288x32xf32> to vector<1x288x32xf32>
    tpu.vector_store %arg3[%c0_68, %c0_69, %c0_70], %81 {strides = array<i32>} : memref<1x288x128xf32, #tpu.memory_space<vmem>>, vector<1x288x32xf32>,
    %82 = math.tanh %51 : vector<288x32xf32>
    %c0_71 = arith.constant 0 : index
    %c0_72 = arith.constant 0 : index
    %c32 = arith.constant 32 : index
    %83 = vector.load %arg3[%c0_71, %c0_72, %c32] : memref<1x288x128xf32, #tpu.memory_space<vmem>>, vector<1x288x32xf32>
    %84 = vector.shape_cast %83 : vector<1x288x32xf32> to vector<288x32xf32>
    %85 = vector.shape_cast %82 : vector<288x32xf32> to vector<1x288x32xf32>
    tpu.vector_store %arg3[%c0_71, %c0_72, %c32], %85 {strides = array<i32>} : memref<1x288x128xf32, #tpu.memory_space<vmem>>, vector<1x288x32xf32>,
    %86 = math.tanh %67 : vector<288x32xf32>
    %c0_73 = arith.constant 0 : index
    %c0_74 = arith.constant 0 : index
    %c64 = arith.constant 64 : index
    %87 = vector.load %arg3[%c0_73, %c0_74, %c64] : memref<1x288x128xf32, #tpu.memory_space<vmem>>, vector<1x288x32xf32>
    %88 = vector.shape_cast %87 : vector<1x288x32xf32> to vector<288x32xf32>
    %89 = vector.shape_cast %86 : vector<288x32xf32> to vector<1x288x32xf32>
    tpu.vector_store %arg3[%c0_73, %c0_74, %c64], %89 {strides = array<i32>} : memref<1x288x128xf32, #tpu.memory_space<vmem>>, vector<1x288x32xf32>,
    %90 = math.tanh %77 : vector<288x32xf32>
    %c0_75 = arith.constant 0 : index
    %c0_76 = arith.constant 0 : index
    %c96 = arith.constant 96 : index
    %91 = vector.load %arg3[%c0_75, %c0_76, %c96] : memref<1x288x128xf32, #tpu.memory_space<vmem>>, vector<1x288x32xf32>
    %92 = vector.shape_cast %91 : vector<1x288x32xf32> to vector<288x32xf32>
    %93 = vector.shape_cast %90 : vector<288x32xf32> to vector<1x288x32xf32>
    tpu.vector_store %arg3[%c0_75, %c0_76, %c96], %93 {strides = array<i32>} : memref<1x288x128xf32, #tpu.memory_space<vmem>>, vector<1x288x32xf32>,
    return
  }
  func.func @transform_0(%arg0: i32) -> (i32, i32, i32) {
    %c0_i32 = arith.constant 0 : i32
    %c0_i32_0 = arith.constant 0 : i32
    %c0_i32_1 = arith.constant 0 : i32
    return %arg0, %c0_i32, %c0_i32_0 : i32, i32, i32
  }
  func.func @transform_1(%arg0: i32) -> (i32, i32, i32) {
    %c0_i32 = arith.constant 0 : i32
    %c0_i32_0 = arith.constant 0 : i32
    %c0_i32_1 = arith.constant 0 : i32
    %c0_i32_2 = arith.constant 0 : i32
    return %c0_i32, %c0_i32_0, %c0_i32_1 : i32, i32, i32
  }
  func.func @transform_2(%arg0: i32) -> (i32, i32, i32) {
    %c0_i32 = arith.constant 0 : i32
    %c0_i32_0 = arith.constant 0 : i32
    %c0_i32_1 = arith.constant 0 : i32
    return %arg0, %c0_i32, %c0_i32_0 : i32, i32, i32
  }
}

</mosaic_0001>

<bundles_post_ra>
// kernel: squeeze.54
= control target key start
LH: loop header
LB: loop body
LE: loop exit
PB: predicated region body
PF: predicated region fallthrough
CT: control target
= control target key end

     0   :  { %s34_s8 = smov 32   ;;  %s35_s9 = smov 64   ;;  %vm7_vm0 = vcmask 261120   ;;  %s61_s0 = inlined_call_operand.vmem [shape: f32[512], index: 0, kind: input, shape index: {}]   ;;  %s62_s1 = inlined_call_operand.vmem [shape: f32[16,32], index: 1, kind: output, shape index: {}]  }
   0x1   :  { %v4_v0 = vld [vmem:[%s61_s0] sm:$0xf]  ;;  %s33_s0 = smov 96  }
   0x2   :  { %5 = vst [vmem:[#allocation0] sm:$0xf] %v4_v0 }
   0x9   :  { %v9_v1 = vld [vmem:[#allocation0] sm:$0xf]  }
   0xa   :  { %v21_v2 = vld [vmem:[#allocation0] sm:$0xf]   ;;  %10 = vrot.lane.b32.xlu0 %v9_v1, %s33_s0 }
   0xb   :  { %22 = vrot.lane.b32.xlu1 %v21_v2, %s34_s8  ;;  %v15_v3 = vld [vmem:[#allocation0] sm:$0xf]  }
   0xc   :  { %v6_v4 = vld [vmem:[#allocation0] sm:$0xf]  }
   0xd   :  { %8 = vst.msk [vmem:[%s62_s1] ss:$4 sm:$0xf] %vm7_vm0, %v6_v4  }
  0x12   :  { %16 = vrot.lane.b32.xlu0 %v15_v3, %s35_s9 }
  0x7c   :  { %v11_v5 = vpop.permute.xlu0 %10  }
  0x7d   :  { %v23_v6 = vpop.permute.xlu1 %22   ;;  %27 = vst.msk [vmem:[%s62_s1 + $0x1] ss:$4 sm:$0xf] %vm7_vm0, %v11_v5  }
  0x7e   :  { %29 = vst.msk [vmem:[%s62_s1 + $0x3] ss:$4 sm:$0xf] %vm7_vm0, %v23_v6  }
  0x84   :  { %v17_v7 = vpop.permute.xlu0 %16  }
  0x85   :  { %28 = vst.msk [vmem:[%s62_s1 + $0x2] ss:$4 sm:$0xf] %vm7_vm0, %v17_v7  }

// kernel: tile.37
= control target key start
LH: loop header
LB: loop body
LE: loop exit
PB: predicated region body
PF: predicated region fallthrough
CT: control target
= control target key end

     0   :  { %s28_s0 = inlined_call_operand.vmem [shape: f32[32], index: 0, kind: input, shape index: {}]   ;;  %s29_s1 = inlined_call_operand.vmem [shape: f32[16,32], index: 1, kind: output, shape index: {}]  }
   0x1   :  { %v4_v0 = vld [vmem:[%s28_s0] ss:$0 sm:$0xff] }
   0x2   :  { %5 = vst [vmem:[%s29_s1] sm:$0xff] %v4_v0 }
   0x3   :  { %8 = vst [vmem:[%s29_s1 + $0x8] sm:$0xff] %v4_v0 }

// kernel: tile.39
= control target key start
LH: loop header
LB: loop body
LE: loop exit
PB: predicated region body
PF: predicated region fallthrough
CT: control target
= control target key end

     0   :  { %s56_s8 = smov 96   ;;  %s57_s11 = smov 32   ;;  %vm3_vm0 = vcmask 261120   ;;  %vm9_vm1 = vcmask 1048320   ;;  %vm15_vm2 = vcmask 785920   ;;  %vm21_vm3 = vcmask 523520   ;;  %s93_s0 = inlined_call_operand.vmem [shape: f32[16,32], index: 0, kind: input, shape index: {}]   ;;  %s94_s1 = inlined_call_operand.vmem [shape: f32[1,512], index: 1, kind: output, shape index: {}]  }
   0x1   :  { %v47_v0 = vld [vmem:[%s93_s0 + $0x3] ss:$4 sm:$0xf]   ;;  %v49_v1 = vld [vmem:[%s93_s0 + $0x1] ss:$4 sm:$0xf]  }
   0x2   :  { %7 = vrot.lane.b32.xlu0 %v47_v0, %s56_s8  ;;  %19 = vrot.lane.b32.xlu1 %v49_v1, %s57_s11  ;;  %v48_v2 = vld [vmem:[%s93_s0 + $0x2] ss:$4 sm:$0xf]   ;;  %s58_s14 = smov 64  }
   0x3   :  { %v2_v3 = vld [vmem:[%s93_s0] ss:$4 sm:$0xf]  }
   0x4   :  { %4 = vst.msk [vmem:[#allocation0] ss:$8 sm:$0xf] %vm3_vm0, %v2_v3  }
   0xa   :  { %13 = vrot.lane.b32.xlu0 %v48_v2, %s58_s14 }
  0x74   :  { %v8_v4 = vpop.permute.xlu0 %7   ;;  %v20_v5 = vpop.permute.xlu1 %19  }
  0x75   :  { %10 = vst.msk [vmem:[#allocation0] ss:$8 sm:$0xf] %vm9_vm1, %v8_v4  }
  0x7c   :  { %v14_v6 = vpop.permute.xlu0 %13  }
  0x7d   :  { %16 = vst.msk [vmem:[#allocation0] ss:$8 sm:$0xf] %vm15_vm2, %v14_v6  }
  0x7e   :  { %22 = vst.msk [vmem:[#allocation0] ss:$8 sm:$0xf] %vm21_vm3, %v20_v5  }
  0x85   :  { %v25_v7 = vld [vmem:[#allocation0] sm:$0x1]  ;;  %v30_v8 = vld [vmem:[#allocation0 + $0x8] sm:$0x1]  ;;  %v36_v9 = vld [vmem:[#allocation0 + $0x10] sm:$0x1] }
  0x86   :  { %28 = vst [vmem:[%s94_s1] sm:$0x1] %v25_v7  ;;  %v42_v10 = vld [vmem:[#allocation0 + $0x18] sm:$0x1] }
  0x87   :  { %50 = vst [vmem:[%s94_s1 + $0x1] sm:$0x1] %v30_v8 }
  0x88   :  { %51 = vst [vmem:[%s94_s1 + $0x2] sm:$0x1] %v36_v9 }
  0x89   :  { %52 = vst [vmem:[%s94_s1 + $0x3] sm:$0x1] %v42_v10 }

// kernel: generator_forward.7
= control target key start
LH: loop header
LB: loop body
LE: loop exit
PB: predicated region body
PF: predicated region fallthrough
CT: control target
= control target key end

     0   :  { %vm32_vm0 = vcmask 1043456   ;;  %vm28_vm1 = vcmask 64512   ;;  %vm112_vm2 = vcmask 1041408   ;;  %vm104_vm3 = vcmask 1040384   ;;  %s280_s1 = inlined_call_operand.vmem [shape: bf16[8,512], index: 1, kind: input, shape index: {}]   ;;  %s281_s0 = inlined_call_operand.vmem [shape: bf16[2,8], index: 0, kind: input, shape index: {}]   ;;  %s282_s2 = inlined_call_operand.vmem [shape: bf16[2,512], index: 2, kind: output, shape index: {0}]   ;;  %s283_s3 = inlined_call_operand.vmem [shape: f32[1,1,512], index: 3, kind: output, shape index: {1}]   ;;  %s284_s4 = inlined_call_operand.vmem [shape: f32[1,1,512], index: 4, kind: output, shape index: {2}]  }
   0x1   :  { %v16_v0 = vld [vmem:[%s280_s1] sm:$0xff]  ;;  %v17_v1 = vld [vmem:[%s280_s1 + $0x8] sm:$0xff]  ;;  %vm108_vm4 = vcmask 1042434  }
   0x2   :  { %v20_v2 = vunpack.c.l.b16 %v16_v0  ;;  %v21_v3 = vunpack.c.h.b16 %v16_v0  ;;  %v22_v4 = vunpack.c.l.b16 %v17_v1  ;;  %v23_v5 = vunpack.c.h.b16 %v17_v1  ;;  %v15_v14 = vld [vmem:[%s281_s0] sm:$0x1] }
   0x4   :  { %v24_v6 = vpack.c.b16 %v20_v2, %v20_v2  ;;  %v25_v7 = vpack.c.b16 %v21_v3, %v21_v3  ;;  %v26_v8 = vpack.c.b16 %v22_v4, %v22_v4  ;;  %v27_v9 = vpack.c.b16 %v23_v5, %v23_v5 }
   0x6   :  { %v34_v10 = vsel %vm32_vm0, %v24_v6, 0  ;;  %v37_v11 = vsel %vm32_vm0, %v25_v7, 0  ;;  %v40_v12 = vsel %vm32_vm0, %v26_v8, 0  ;;  %v43_v13 = vsel %vm32_vm0, %v27_v9, 0 }
   0x7   :  { %52 = vmatpush.bf16.msra.mxu0 %v34_v10  ;;  %65 = vmatpush.bf16.msra.mxu1 %v37_v11 }
   0x8   :  { %78 = vmatpush.bf16.msra.mxu2 %v40_v12  ;;  %91 = vmatpush.bf16.msra.mxu3 %v43_v13 }
   0xa   :  { %216 = vmatmul.msk.bf16.vlgmr.msra.gmra.mxu0 %vm28_vm1, %v15_v14  ;;  %217 = vmatmul.msk.bf16.vlgmr.msra.gmra.mxu1 %vm28_vm1, %v15_v14 }
   0xb   :  { %218 = vmatmul.msk.bf16.vlgmr.msra.gmra.mxu2 %vm28_vm1, %v15_v14  ;;  %219 = vmatmul.msk.bf16.vlgmr.msra.gmra.mxu3 %vm28_vm1, %v15_v14 }
  0x87   :  { %v54_v15 = vpop.f32.mrf.mxu0  ;;  %v67_v16 = vpop.f32.mrf.mxu1 }
  0x88   :  { %v116_v17 = vsel %vm112_vm2, %v54_v15, 0.0  ;;  %v160_v18 = vmul.f32 %v54_v15, %v54_v15  ;;  %v123_v19 = vsel %vm112_vm2, %v67_v16, 0.0  ;;  %v161_v22 = vmul.f32 %v67_v16, %v67_v16 }
  0x89   :  { %v117_v20 = vrot.slane %v116_v17, 4  ;;  %v124_v21 = vrot.slane %v123_v19, 4  ;;  %v97_v30 = vpack.c.bf16 %v67_v16, %v54_v15 }
  0x8a   :  { %v164_v23 = vsel %vm112_vm2, %v160_v18, 0.0  ;;  %v171_v26 = vsel %vm112_vm2, %v161_v22, 0.0 }
  0x8b   :  { %v118_v24 = vadd.f32 %v117_v20, %v116_v17  ;;  %v125_v25 = vadd.f32 %v124_v21, %v123_v19  ;;  %v165_v27 = vrot.slane %v164_v23, 4  ;;  %v172_v28 = vrot.slane %v171_v26, 4 }
  0x8c   :  { %v101_v45 = vrot.slane %v97_v30, 3  ;;  %v155_v17 = vlaneseq }
  0x8d   :  { %v126_v29 = vrot.slane %v125_v25, 2  ;;  %v173_v31 = vadd.f32 %v172_v28, %v171_v26  ;;  %v119_v34 = vrot.slane %v118_v24, 2  ;;  %v166_v38 = vadd.f32 %v165_v27, %v164_v23 }
  0x8e   :  { %v80_v32 = vpop.f32.mrf.mxu2  ;;  %v93_v33 = vpop.f32.mrf.mxu3  ;;  %v107_v59 = vsel %vm104_vm3, %v97_v30, %v101_v45  ;;  %vm157_vm5 = vcmp.lt.s32.totalorder %v155_v17, 512 }
  0x8f   :  { %v130_v35 = vsel %vm112_vm2, %v80_v32, 0.0  ;;  %v56_v36 = vpop.f32.mrf.mxu0  ;;  %v69_v37 = vpop.f32.mrf.mxu1  ;;  %v162_v40 = vmul.f32 %v80_v32, %v80_v32  ;;  %v98_v41 = vpack.c.bf16 %v93_v33, %v80_v32  ;;  %v127_v42 = vadd.f32 %v126_v29, %v125_v25 }
  0x90   :  { %v131_v39 = vrot.slane %v130_v35, 4  ;;  %v174_v43 = vrot.slane %v173_v31, 2  ;;  %v137_v44 = vsel %vm112_vm2, %v93_v33, 0.0  ;;  %v120_v49 = vadd.f32 %v119_v34, %v118_v24 }
  0x91   :  { %v178_v47 = vsel %vm112_vm2, %v162_v40, 0.0  ;;  %v102_v48 = vrot.slane %v98_v41, 6  ;;  %v167_v51 = vrot.slane %v166_v38, 2  ;;  %v103_v53 = vrot.slane %v98_v41, 1 }
  0x92   :  { %v132_v46 = vadd.f32 %v131_v39, %v130_v35  ;;  %v179_v50 = vrot.slane %v178_v47, 4  ;;  %v138_v54 = vrot.slane %v137_v44, 4  ;;  %v128_v55 = vrot.slane %v127_v42, 1 }
  0x93   :  { %v175_v56 = vadd.f32 %v174_v43, %v173_v31  ;;  %v163_v58 = vmul.f32 %v93_v33, %v93_v33  ;;  %v111_v61 = vsel %vm108_vm4, %v102_v48, %v103_v53  ;;  %v121_v4 = vrot.slane %v120_v49, 1 }
  0x94   :  { %v133_v52 = vrot.slane %v132_v46, 2  ;;  %v180_v57 = vadd.f32 %v179_v50, %v178_v47  ;;  %v139_v62 = vadd.f32 %v138_v54, %v137_v44  ;;  %v113_v2 = vsel %vm112_vm2, %v107_v59, %v111_v61 }
  0x95   :  { %v185_v3 = vsel %vm112_vm2, %v163_v58, 0.0  ;;  %115 = vst [vmem:[%s282_s2] sm:$0xf] %v113_v2  ;;  %v168_v8 = vadd.f32 %v167_v51, %v166_v38  ;;  %v129_v9 = vadd.f32 %v128_v55, %v127_v42  ;;  %v176_v10 = vrot.slane %v175_v56, 1 }
  0x96   :  { %v134_v60 = vadd.f32 %v133_v52, %v132_v46  ;;  %v82_v63 = vpop.f32.mrf.mxu2  ;;  %v95_v0 = vpop.f32.mrf.mxu3  ;;  %v181_v1 = vrot.slane %v180_v57, 2  ;;  %v140_v6 = vrot.slane %v139_v62, 2  ;;  %v186_v7 = vrot.slane %v185_v3, 4 }
  0x97   :  { %v122_v19 = vadd.f32 %v121_v4, %v120_v49  ;;  %v169_v20 = vrot.slane %v168_v8, 1  ;;  %v148_v21 = vrot.slane %v129_v9, 7  ;;  %v177_v22 = vadd.f32 %v176_v10, %v175_v56 }
  0x98   :  { %v135_v5 = vrot.slane %v134_v60, 1  ;;  %v182_v11 = vadd.f32 %v181_v1, %v180_v57  ;;  %v141_v13 = vadd.f32 %v140_v6, %v139_v62  ;;  %v187_v14 = vadd.f32 %v186_v7, %v185_v3 }
  0x99   :  { %v170_v29 = vadd.f32 %v169_v20, %v168_v8  ;;  %v151_v30 = vsel %vm104_vm3, %v122_v19, %v148_v21  ;;  %v196_v31 = vrot.slane %v177_v22, 7 }
  0x9a   :  { %v136_v12 = vadd.f32 %v135_v5, %v134_v60  ;;  %v183_v15 = vrot.slane %v182_v11, 1  ;;  %v142_v16 = vrot.slane %v141_v13, 1  ;;  %v188_v18 = vrot.slane %v187_v14, 2 }
  0x9b   :  { %v199_v37 = vsel %vm104_vm3, %v170_v29, %v196_v31 }
  0x9c   :  { %v149_v23 = vrot.slane %v136_v12, 6  ;;  %v184_v24 = vadd.f32 %v183_v15, %v182_v11  ;;  %v143_v25 = vadd.f32 %v142_v16, %v141_v13  ;;  %v189_v26 = vadd.f32 %v188_v18, %v187_v14 }
  0x9e   :  { %v150_v27 = vrot.slane %v143_v25, 5  ;;  %v190_v28 = vrot.slane %v189_v26, 1  ;;  %v197_v32 = vrot.slane %v184_v24, 6 }
  0xa0   :  { %v152_v33 = vsel %vm108_vm4, %v149_v23, %v150_v27  ;;  %v191_v34 = vadd.f32 %v190_v28, %v189_v26 }
  0xa1   :  { %v153_v35 = vsel %vm112_vm2, %v151_v30, %v152_v33 }
  0xa2   :  { %159 = vst.msk [vmem:[%s283_s3] sm:$0xf] %vm157_vm5, %v153_v35  ;;  %v198_v36 = vrot.slane %v191_v34, 5 }
  0xa4   :  { %v200_v38 = vsel %vm108_vm4, %v197_v32, %v198_v36 }
  0xa5   :  { %v201_v39 = vsel %vm112_vm2, %v199_v37, %v200_v38 }
  0xa6   :  { %203 = vst.msk [vmem:[%s284_s4] sm:$0xf] %vm157_vm5, %v201_v39 }

// kernel: generator_forward.8
= control target key start
LH: loop header
LB: loop body
LE: loop exit
PB: predicated region body
PF: predicated region fallthrough
CT: control target
= control target key end

     0   :  { %vm25_vm0 = vcmask 1041408   ;;  %vm27_vm1 = vcmask 1045508   ;;  %vm29_vm2 = vcmask 1043456   ;;  %vm65_vm3 = vcmask 1040384   ;;  %s117_s0 = inlined_call_operand.vmem [shape: bf16[2,512], index: 0, kind: input, shape index: {}]   ;;  %s118_s1 = inlined_call_operand.vmem [shape: f32[1,512], index: 1, kind: input, shape index: {}]   ;;  %s119_s2 = inlined_call_operand.vmem [shape: f32[1,512], index: 2, kind: input, shape index: {}]   ;;  %s120_s3 = inlined_call_operand.vmem [shape: bf16[2,512], index: 3, kind: output, shape index: {}]  }
   0x1   :  { %v16_v0 = vld [vmem:[%s118_s1] sm:$0xf]  ;;  %vm69_vm4 = vcmask 1042434  }
   0x2   :  { %v33_v1 = vld [vmem:[%s119_s2] sm:$0xf]  ;;  %v18_v3 = vperm.slane %v16_v0, 0  ;;  %v19_v4 = vperm.slane %v16_v0, 1  ;;  %v20_v5 = vperm.slane %v16_v0, 2  ;;  %v21_v6 = vperm.slane %v16_v0, 3 }
   0x3   :  { %v14_v2 = vld [vmem:[%s117_s0] sm:$0xf]  ;;  %v35_v7 = vperm.slane %v33_v1, 0  ;;  %v36_v8 = vperm.slane %v33_v1, 1  ;;  %v37_v9 = vperm.slane %v33_v1, 2  ;;  %v38_v12 = vperm.slane %v33_v1, 3 }
   0x4   :  { %v22_v10 = vrot.slane %v19_v4, 6  ;;  %v23_v11 = vrot.slane %v20_v5, 4  ;;  %v15_v13 = vunpack.c.l.bf16 %v14_v2  ;;  %v24_v14 = vrot.slane %v21_v6, 2 }
   0x5   :  { %v39_v15 = vrot.slane %v36_v8, 6  ;;  %v40_v16 = vrot.slane %v37_v9, 4  ;;  %v41_v18 = vrot.slane %v38_v12, 2 }
   0x6   :  { %v26_v17 = vsel %vm25_vm0, %v18_v3, %v22_v10  ;;  %v28_v19 = vsel %vm27_vm1, %v23_v11, %v24_v14 }
   0x7   :  { %v42_v20 = vsel %vm25_vm0, %v35_v7, %v39_v15  ;;  %v30_v21 = vsel %vm29_vm2, %v26_v17, %v28_v19  ;;  %v43_v22 = vsel %vm27_vm1, %v40_v16, %v41_v18 }
   0x8   :  { %v32_v23 = vmul.f32 %v30_v21, %v15_v13  ;;  %v44_v24 = vsel %vm29_vm2, %v42_v20, %v43_v22 }
   0xa   :  { %v46_v25 = vadd.f32 %v44_v24, %v32_v23 }
   0xc   :  { %v47_v26 = vmax.f32 %v46_v25, 0.0 }
   0xe   :  { %49 = vst [vmem:[#allocation1] ss:$4 sm:$0xff] %v47_v26 }
  0x15   :  { %v50_v27 = vld.sshfl [vmem:[#allocation1] sm:$0xff pattern:$0x73625140]  ;;  %v51_v28 = vld.sshfl [vmem:[#allocation1 + $0x8] sm:$0xff pattern:$0x73625140] }
  0x16   :  { %v52_v29 = vld.sshfl [vmem:[#allocation1 + $0x10] sm:$0xff pattern:$0x73625140]  ;;  %v53_v30 = vld.sshfl [vmem:[#allocation1 + $0x18] sm:$0xff pattern:$0x73625140]  ;;  %v58_v31 = vpack.c.bf16 %v51_v28, %v50_v27 }
  0x17   :  { %v59_v32 = vpack.c.bf16 %v53_v30, %v52_v29 }
  0x18   :  { %v62_v33 = vrot.slane %v58_v31, 3 }
  0x19   :  { %v63_v34 = vrot.slane %v59_v32, 6  ;;  %v64_v35 = vrot.slane %v59_v32, 1 }
  0x1a   :  { %v68_v36 = vsel %vm65_vm3, %v58_v31, %v62_v33 }
  0x1b   :  { %v72_v37 = vsel %vm69_vm4, %v63_v34, %v64_v35 }
  0x1c   :  { %v73_v38 = vsel %vm25_vm0, %v68_v36, %v72_v37 }
  0x1d   :  { %75 = vst [vmem:[%s120_s3] sm:$0xf] %v73_v38 }

// kernel: squeeze.72
= control target key start
LH: loop header
LB: loop body
LE: loop exit
PB: predicated region body
PF: predicated region fallthrough
CT: control target
= control target key end

     0   :  { %s37_s8 = smov 32   ;;  %s38_s9 = smov 64   ;;  %vm7_vm0 = vcmask 261120   ;;  %s55_s0 = inlined_call_operand.vmem [shape: f32[128], index: 0, kind: input, shape index: {}]   ;;  %s56_s1 = inlined_call_operand.vmem [shape: f32[4,32], index: 1, kind: output, shape index: {}]  }
   0x1   :  { %v4_v0 = vld [vmem:[%s55_s0] sm:$0x1]  ;;  %s36_s0 = smov 96  }
   0x2   :  { %5 = vst [vmem:[#allocation1] sm:$0x1] %v4_v0 }
   0x9   :  { %v9_v1 = vld [vmem:[#allocation1] sm:$0x1]  }
   0xa   :  { %v21_v2 = vld [vmem:[#allocation1] sm:$0x1]   ;;  %10 = vrot.lane.b32.xlu0 %v9_v1, %s36_s0 }
   0xb   :  { %22 = vrot.lane.b32.xlu1 %v21_v2, %s37_s8  ;;  %v15_v3 = vld [vmem:[#allocation1] sm:$0x1]  }
   0xc   :  { %v6_v4 = vld [vmem:[#allocation1] sm:$0x1]  }
   0xd   :  { %8 = vst.msk [vmem:[#allocation0] sm:$0x1] %vm7_vm0, %v6_v4  }
  0x12   :  { %16 = vrot.lane.b32.xlu0 %v15_v3, %s38_s9 }
  0x7c   :  { %v11_v5 = vpop.permute.xlu0 %10  }
  0x7d   :  { %v23_v6 = vpop.permute.xlu1 %22   ;;  %14 = vst.msk [vmem:[#allocation0 + $0x1] sm:$0x1] %vm7_vm0, %v11_v5  }
  0x7e   :  { %26 = vst.msk [vmem:[#allocation0 + $0x3] sm:$0x1] %vm7_vm0, %v23_v6  }
  0x84   :  { %v17_v7 = vpop.permute.xlu0 %16  }
  0x85   :  { %20 = vst.msk [vmem:[#allocation0 + $0x2] sm:$0x1] %vm7_vm0, %v17_v7  }
  0x8c   :  { %v29_v8 = vld [vmem:[#allocation0] sm:$0xf] }
  0x8d   :  { %32 = vst [vmem:[%s56_s1] sm:$0xf] %v29_v8 }

// kernel: tile.47
= control target key start
LH: loop header
LB: loop body
LE: loop exit
PB: predicated region body
PF: predicated region fallthrough
CT: control target
= control target key end

     0   :  { %s22_s0 = inlined_call_operand.vmem [shape: f32[32], index: 0, kind: input, shape index: {}]   ;;  %s23_s1 = inlined_call_operand.vmem [shape: f32[4,32], index: 1, kind: output, shape index: {}]  }
   0x1   :  { %v4_v0 = vld [vmem:[%s22_s0] ss:$0 sm:$0xff] }
   0x2   :  { %5 = vst [vmem:[%s23_s1] sm:$0xf] %v4_v0 }

// kernel: tile.49
= control target key start
LH: loop header
LB: loop body
LE: loop exit
PB: predicated region body
PF: predicated region fallthrough
CT: control target
= control target key end

     0   :  { %s37_s8 = smov 32   ;;  %s38_s9 = smov 64   ;;  %vm7_vm0 = vcmask 261120   ;;  %vm13_vm1 = vcmask 1048320   ;;  %vm19_vm2 = vcmask 785920   ;;  %vm25_vm3 = vcmask 523520   ;;  %s55_s0 = inlined_call_operand.vmem [shape: f32[4,32], index: 0, kind: input, shape index: {}]   ;;  %s56_s1 = inlined_call_operand.vmem [shape: f32[1,128], index: 1, kind: output, shape index: {}]  }
   0x1   :  { %v4_v0 = vld [vmem:[%s55_s0] sm:$0xf]  ;;  %s36_s0 = smov 96  }
   0x2   :  { %5 = vst [vmem:[#allocation1] sm:$0xf] %v4_v0 }
   0x9   :  { %v10_v1 = vld [vmem:[#allocation1 + $0x3] sm:$0x1]   ;;  %v22_v2 = vld [vmem:[#allocation1 + $0x1] sm:$0x1]   ;;  %v16_v3 = vld [vmem:[#allocation1 + $0x2] sm:$0x1]  }
   0xa   :  { %11 = vrot.lane.b32.xlu0 %v10_v1, %s36_s0  ;;  %23 = vrot.lane.b32.xlu1 %v22_v2, %s37_s8  ;;  %v6_v4 = vld [vmem:[#allocation1] sm:$0x1]  }
   0xb   :  { %8 = vst.msk [vmem:[#allocation0] sm:$0x1] %vm7_vm0, %v6_v4  }
  0x12   :  { %17 = vrot.lane.b32.xlu0 %v16_v3, %s38_s9 }
  0x7c   :  { %v12_v5 = vpop.permute.xlu0 %11   ;;  %v24_v6 = vpop.permute.xlu1 %23  }
  0x7d   :  { %14 = vst.msk [vmem:[#allocation0] sm:$0x1] %vm13_vm1, %v12_v5  }
  0x84   :  { %v18_v7 = vpop.permute.xlu0 %17  }
  0x85   :  { %20 = vst.msk [vmem:[#allocation0] sm:$0x1] %vm19_vm2, %v18_v7  }
  0x86   :  { %26 = vst.msk [vmem:[#allocation0] sm:$0x1] %vm25_vm3, %v24_v6  }
  0x8d   :  { %v29_v8 = vld [vmem:[#allocation0] sm:$0x1] }
  0x8e   :  { %32 = vst [vmem:[%s56_s1] sm:$0x1] %v29_v8 }

// kernel: generator_forward.9
= control target key start
LH: loop header
LB: loop body
LE: loop exit
PB: predicated region body
PF: predicated region fallthrough
CT: control target
= control target key end

     0   :  { %s1665_s18 = smov 0   ;;  %s1992_s0 = inlined_call_operand.vmem [shape: bf16[2,40,32], index: 0, kind: input, shape index: {}]   ;;  %s1993_s1 = inlined_call_operand.vmem [shape: bf16[16,32,32], index: 1, kind: input, shape index: {}]   ;;  %s1994_s2 = inlined_call_operand.vmem [shape: f32[24,1], index: 2, kind: input, shape index: {}]   ;;  %s1995_s3 = inlined_call_operand.vmem [shape: bf16[2,24,128], index: 3, kind: output, shape index: {0}]   ;;  %s1996_s4 = inlined_call_operand.vmem [shape: f32[2,1,128], index: 4, kind: output, shape index: {1}]   ;;  %s1997_s5 = inlined_call_operand.vmem [shape: f32[2,1,128], index: 5, kind: output, shape index: {2}]  }
   0x1 LB: > { %s1337_s19 = sadd.s32 4294967295, %s1629_s18   ;;  %p1341_p0 = scmp.ge.s32.totalorder %s1629_s18, 1  ;;  %s1629_s18 = sphi %s1665_s18, %s16_s18  }
   0x2   : > { %p192_p1 = scmp.lt.s32.totalorder %s1629_s18, 3 }
   0x4   : > { %p193_p2 = pnand %p1341_p0, %p192_p1 }
   0x5   : > { %p226_p3 = scmp.lt.s32.totalorder (!%p193_p2), %s1337_s19, 1  ;;  %s1632_s30 = smov (!%p193_p2), 32  }
   0x6   : > { %196 = sbr.rel (%p193_p2) target bundleno = 412 (0x19c), region = 32  ;;  %s1634_s12 = smov (!%p193_p2), 96  }
   0xb   : > { %v1567_v0 = vld [vmem:[%s1993_s1 + $0x8] sm:$0xff]  ;;  %v1573_v1 = vld [vmem:[%s1993_s1 + $0x38] sm:$0xff]  ;;  %v1566_v4 = vld [vmem:[%s1993_s1] sm:$0xff]  ;;  %s1999_s19 = smov (!%p226_p3, %s1337_s19), 1  ;;  %vm294_vm0 = vcmask 261120   ;;  %vm369_vm1 = vcmask 1046528  }
   0xc   : > { %v1569_v2 = vld [vmem:[%s1993_s1 + $0x18] sm:$0xff]  ;;  %v1571_v3 = vld [vmem:[%s1993_s1 + $0x28] sm:$0xff]  ;;  %343 = vmatpush.bf16.msra.mxu1 %v1567_v0  ;;  %397 = vmatpush.bf16.msra.mxu2 %v1573_v1  ;;  %v1572_v5 = vld [vmem:[%s1993_s1 + $0x30] sm:$0xff]  ;;  %s1607_s11 = smul.u32 20, %s1999_s19  ;;  %vm266_vm2 = vsmask.f32 7424  ;;  %s1910_s8 = scalar_lea.vmem %s1996_s4, %s1999_s19 }
   0xd   : > { %307 = vmatpush.bf16.msra.mxu0 %v1569_v2  ;;  %427 = vmatpush.bf16.msra.mxu3 %v1571_v3  ;;  %v1568_v6 = vld [vmem:[%s1993_s1 + $0x10] sm:$0xff]  ;;  %v1570_v7 = vld [vmem:[%s1993_s1 + $0x20] sm:$0xff]  ;;  %v1575_v8 = vld [vmem:[%s1993_s1 + $0x48] sm:$0xff]  ;;  %v1631_v50 = vmov 0   ;;  %vm509_vm3 = vsmask.f32 4352 }
   0xe   : > { %v1579_v9 = vld [vmem:[%s1993_s1 + $0x68] sm:$0xff]  ;;  %v1581_v10 = vld [vmem:[%s1993_s1 + $0x78] sm:$0xff]  ;;  %s1712_s22 = scalar_lea.vmem %s1992_s0, %s1607_s11  ;;  %v1574_v14 = vld [vmem:[%s1993_s1 + $0x40] sm:$0xff]  ;;  %1621 = vset.pattern.permute.xlu0 %v1631_v50  ;;  %1622 = vset.pattern.permute.xlu1 %v1631_v50  ;;  %vm452_vm4 = vcmask 1044480   ;;  %vm856_vm5 = vsmask.f32 5376  ;;  %s1920_s11 = scalar_lea.vmem %s1997_s5, %s1999_s19 }
   0xf   : > { %v1583_v11 = vld [vmem:[%s1993_s1 + $0x88] sm:$0xff]  ;;  %v1599_v12 = vld [vmem:[%s1712_s22] sm:$0xff]   ;;  %v1580_v24 = vld [vmem:[%s1993_s1 + $0x70] sm:$0xff]  ;;  %vm804_vm6 = vcmask 1045504   ;;  %vm1008_vm7 = vcmask 257024   ;;  %vm1041_vm8 = vcmask 253952  }
  0x10   : > { %344 = vmatpush.bf16.msra.mxu1 %v1566_v4  ;;  %398 = vmatpush.bf16.msra.mxu2 %v1572_v5  ;;  %v1719_v13 = vld [vmem:[%s1712_s22 + $0x8] sm:$0xff]   ;;  %v1724_v15 = vunpack.c.h.b16 %v1599_v12  ;;  %v270_v16 = vshll.u32 %v1599_v12, 16  ;;  %v360_v18 = vld [vmem:[%s1712_s22] sm:$0xe]  ;;  %v268_v20 = vshrl.u32 %v1599_v12, 16  ;;  %v1577_v39 = vld [vmem:[%s1993_s1 + $0x58] sm:$0xff] }
  0x11   : > { %308 = vmatpush.bf16.msra.mxu0 %v1568_v6  ;;  %428 = vmatpush.bf16.msra.mxu3 %v1570_v7  ;;  %v250_v17 = vld [vmem:[%s1712_s22 + $0xc] sm:$0x1]  ;;  %v1578_v19 = vld [vmem:[%s1993_s1 + $0x60] sm:$0xff]  ;;  %v1733_v21 = vunpack.c.l.b16 %v1719_v13  ;;  %v367_v23 = vunpack.c.l.b16 %v360_v18  ;;  %v507_v38 = vunpack.c.h.b16 %v1719_v13  ;;  %v1589_v41 = vld [vmem:[%s1993_s1 + $0xb8] sm:$0xff]  ;;  %v519_v48 = vshrl.u32 %v1719_v13, 16 }
  0x12   : > { %v263_v22 = vunpack.c.l.b16 %v250_v17  ;;  %v272_v25 = vrot.slane %v270_v16, 1  ;;  %v1582_v26 = vld [vmem:[%s1993_s1 + $0x80] sm:$0xff]  ;;  %v1587_v40 = vld [vmem:[%s1993_s1 + $0xa8] sm:$0xff]  ;;  %v1585_v42 = vld [vmem:[%s1993_s1 + $0x98] sm:$0xff]  ;;  %v522_v49 = vshll.u32 %v1719_v13, 16  ;;  %vm1073_vm9 = vcmask 519424  }
  0x13   : > { %1366 = vmatmul.msk.bf16.vlgmr.msra.gmra.mxu1 %vm294_vm0, %v1599_v12  ;;  %v368_v28 = vpack.c.b16 %v1724_v15, %v367_v23  ;;  %v439_v33 = vld [vmem:[%s1712_s22] sm:$0x8]  ;;  %v319_v44 = vpack.c.b16 %v1733_v21, %v1733_v21  ;;  %v521_v54 = vrot.slane %v519_v48, 3  ;;  %v440_v56 = vld [vmem:[%s1712_s22 + $0xc] sm:$0x7]  ;;  %v1576_v60 = vld [vmem:[%s1993_s1 + $0x50] sm:$0xff]  ;;  %v679_v18 = vpack.c.b16 %v1733_v21, %v1724_v15 }
  0x14   : > { %551 = vmatpush.bf16.msrb.mxu1 %v1579_v9  ;;  %589 = vmatpush.bf16.msrb.mxu2 %v1581_v10  ;;  %v265_v27 = vpack.c.b16 %v263_v22, %v1733_v21  ;;  %v273_v31 = vor.u32 %v272_v25, %v268_v20  ;;  %v448_v36 = vunpack.c.l.b16 %v439_v33  ;;  %v524_v55 = vrot.slane %v522_v49, 4  ;;  %v1002_v57 = vld [vmem:[%s1994_s2] sm:$0xff]  ;;  %v1588_v62 = vld [vmem:[%s1993_s1 + $0xb0] sm:$0xff]  ;;  %v1003_v2 = vld [vmem:[%s1994_s2 + $0x8] sm:$0xff] }
  0x15   : > { %480 = vmatpush.bf16.msrb.mxu0 %v1575_v8  ;;  %627 = vmatpush.bf16.msrb.mxu3 %v1583_v11  ;;  %v370_v29 = vrot.slane %v368_v28, 1  ;;  %v1586_v61 = vld [vmem:[%s1993_s1 + $0xa0] sm:$0xff]  ;;  %v449_v63 = vunpack.c.l.b16 %v440_v56  ;;  %v1584_v0 = vld [vmem:[%s1993_s1 + $0x90] sm:$0xff]  ;;  %v1591_v8 = vld [vmem:[%s1993_s1 + $0xc8] sm:$0xff]  ;;  %vm1131_vm10 = vcmask 781824   ;;  %vm1095_vm11 = vcmask 516352  }
  0x16   : > { %v371_v30 = vrot.slane %v265_v27, 1  ;;  %v275_v32 = vshll.u32 %v265_v27, 16  ;;  %v450_v43 = vpack.c.b16 %v1724_v15, %v448_v36  ;;  %v279_v46 = vshrl.u32 %v265_v27, 16  ;;  %1014 = vperm.xlu0 %1621, %v1002_v57   ;;  %v1004_v7 = vld [vmem:[%s1994_s2 + $0x10] sm:$0xff]  ;;  %v1593_v9 = vld [vmem:[%s1993_s1 + $0xd8] sm:$0xff]  ;;  %v1595_v10 = vld [vmem:[%s1993_s1 + $0xe8] sm:$0xff] }
  0x17   : > { %v1773_v59 = vor.u32 %v524_v55, %v521_v54  ;;  %v451_v3 = vpack.c.b16 %v449_v63, %v1733_v21  ;;  %1024 = vperm.xlu1 %1622, %v1004_v7   ;;  %v1597_v11 = vld [vmem:[%s1993_s1 + $0xf8] sm:$0xff]  ;;  %v1590_v12 = vld [vmem:[%s1993_s1 + $0xc0] sm:$0xff]  ;;  %v1596_v17 = vld [vmem:[%s1993_s1 + $0xf0] sm:$0xff]  ;;  %v680_v15 = vpack.c.b16 %v507_v38, %v507_v38  ;;  %vm1189_vm12 = vcmask 1044224  }
  0x18   : > { %552 = vmatpush.bf16.msrb.mxu1 %v1578_v19  ;;  %590 = vmatpush.bf16.msrb.mxu2 %v1580_v24  ;;  %v372_v34 = vsel %vm369_vm1, %v370_v29, %v371_v30  ;;  %v277_v35 = vrot.slane %v275_v32, 1  ;;  %v511_v45 = vshrl.u32 %v450_v43, 16  ;;  %v514_v47 = vshll.u32 %v450_v43, 16  ;;  %v1594_v16 = vld [vmem:[%s1993_s1 + $0xe0] sm:$0xff]  ;;  %v1606_v20 = vld [vmem:[%s1712_s22 + $0x8] sm:$0xff]  }
  0x19   : > { %481 = vmatpush.bf16.msrb.mxu0 %v1574_v14  ;;  %628 = vmatpush.bf16.msrb.mxu3 %v1582_v26  ;;  %v453_v4 = vrot.slane %v450_v43, 3  ;;  %v454_v5 = vrot.slane %v451_v3, 3  ;;  %v1592_v14 = vld [vmem:[%s1993_s1 + $0xd0] sm:$0xff]  ;;  %v785_v19 = vld [vmem:[%s1712_s22 + $0x4] sm:$0xc]  ;;  %v1604_v23 = vunpack.c.l.b16 %v1606_v20  ;;  %v1605_v24 = vunpack.c.h.b16 %v1606_v20 }
  0x1a   : > { %1384 = vmatmul.msk.bf16.vlgmr.msra.gmra.mxu2 %vm294_vm0, %v372_v34  ;;  %v278_v37 = vsel %vm266_vm2, %v273_v31, %v277_v35  ;;  %v513_v51 = vrot.slane %v511_v45, 3  ;;  %v281_v52 = vor.u32 %v279_v46, %v277_v35  ;;  %v516_v53 = vrot.slane %v514_v47, 4  ;;  %v847_v22 = vld [vmem:[%s1712_s22 + $0x10] sm:$0x7] }
  0x1b   : > { %1356 = vmatmul.msk.bf16.vlgmr.msra.gmra.mxu0 %vm294_vm0, %v278_v37  ;;  %1394 = vmatmul.msk.bf16.vlgmr.msra.gmra.mxu3 %vm294_vm0, %v278_v37  ;;  %v455_v6 = vsel %vm452_vm4, %v453_v4, %v454_v5  ;;  %v798_v25 = vunpack.c.l.b16 %v785_v19  ;;  %v854_v26 = vunpack.c.l.b16 %v847_v22  ;;  %v788_v36 = vld [vmem:[%s1712_s22 + $0x10] sm:$0x3]  ;;  %v951_v37 = vld [vmem:[%s1712_s22 + $0x4] sm:$0x8]  ;;  %s1608_s22 = smul.u32 12, %s1999_s19  ;;  %s1633_s19 = smov 64  }
  0x1c   : > { %705 = vmatpush.bf16.msra.mxu1 %v1587_v40  ;;  %743 = vmatpush.bf16.msra.mxu2 %v1589_v41  ;;  %v517_v58 = vor.u32 %v516_v53, %v513_v51  ;;  %v958_v40 = vunpack.c.l.b16 %v951_v37  ;;  %vm1153_vm13 = vcmask 778752   ;;  %vm1211_vm14 = vcmask 1041152  }
  0x1d   : > { %657 = vmatpush.bf16.msra.mxu0 %v1577_v39  ;;  %773 = vmatpush.bf16.msra.mxu3 %v1585_v42  ;;  %v802_v21 = vpack.c.b16 %v1604_v23, %v798_v25  ;;  %v855_v27 = vpack.c.b16 %v854_v26, %v1605_v24  ;;  %v801_v39 = vunpack.c.l.b16 %v788_v36  ;;  %s1873_s29 = scalar_lea.vmem %s1995_s3, %s1608_s22 }
  0x1e   : > { %v526_v1 = vsel %vm509_vm3, %v517_v58, %v1773_v59  ;;  %1019 = vperm.xlu0 %1621, %v1003_v2   ;;  %v959_v43 = vpack.c.b16 %v1604_v23, %v958_v40 }
  0x1f   : > { %v858_v28 = vshrl.u32 %v802_v21, 16  ;;  %v861_v29 = vshll.u32 %v802_v21, 16  ;;  %v869_v31 = vshll.u32 %v855_v27, 16  ;;  %v803_v42 = vpack.c.b16 %v801_v39, %v1605_v24 }
  0x20   : > { %706 = vmatpush.bf16.msra.mxu1 %v1586_v61  ;;  %744 = vmatpush.bf16.msra.mxu2 %v1588_v62  ;;  %v960_v46 = vrot.slane %v959_v43, 3  ;;  %v961_v47 = vrot.slane %v855_v27, 3 }
  0x21   : > { %658 = vmatpush.bf16.msra.mxu0 %v1576_v60  ;;  %774 = vmatpush.bf16.msra.mxu3 %v1584_v0  ;;  %v860_v32 = vrot.slane %v858_v28, 2  ;;  %v863_v33 = vrot.slane %v861_v29, 3  ;;  %v871_v35 = vrot.slane %v869_v31, 3  ;;  %v806_v45 = vrot.slane %v803_v42, 2 }
  0x22   : > { %v962_v49 = vsel %vm452_vm4, %v960_v46, %v961_v47 }
  0x23   : > { %1367 = vmatmul.msk.bf16.gmra.mxu1 %vm294_vm0, %v319_v44  ;;  %v864_v13 = vor.u32 %v863_v33, %v860_v32  ;;  %v805_v44 = vrot.slane %v802_v21, 2 }
  0x25   : > { %v807_v48 = vsel %vm804_vm6, %v805_v44, %v806_v45 }
  0x2a   : > { %1385 = vmatmul.msk.bf16.gmra.mxu2 %vm294_vm0, %v371_v30  ;;  %v866_v30 = vshrl.u32 %v855_v27, 16 }
  0x2b   : > { %1357 = vmatmul.msk.bf16.gmra.mxu0 %vm294_vm0, %v281_v52  ;;  %1395 = vmatmul.msk.bf16.gmra.mxu3 %vm294_vm0, %v281_v52 }
  0x2c   : > { %v868_v34 = vrot.slane %v866_v30, 2 }
  0x2e   : > { %v872_v38 = vor.u32 %v871_v35, %v868_v34 }
  0x30   : > { %v873_v41 = vsel %vm856_vm5, %v864_v13, %v872_v38 }
  0x33   : > { %1426 = vmatmul.msk.bf16.vlgmr.msrb.gmra.mxu1 %vm294_vm0, %v526_v1 }
  0x34   : > { %898 = vmatpush.bf16.msrb.mxu1 %v1593_v9 }
  0x38   : > { %899 = vmatpush.bf16.msrb.mxu1 %v1592_v14 }
  0x3a   : > { %1440 = vmatmul.msk.bf16.vlgmr.msrb.gmra.mxu2 %vm294_vm0, %v526_v1 }
  0x3b   : > { %1408 = vmatmul.msk.bf16.vlgmr.msrb.gmra.mxu0 %vm294_vm0, %v455_v6  ;;  %1454 = vmatmul.msk.bf16.vlgmr.msrb.gmra.mxu3 %vm294_vm0, %v526_v1 }
  0x3c   : > { %832 = vmatpush.bf16.msrb.mxu0 %v1591_v8  ;;  %936 = vmatpush.bf16.msrb.mxu2 %v1595_v10 }
  0x3d   : > { %987 = vmatpush.bf16.msrb.mxu3 %v1597_v11 }
  0x40   : > { %833 = vmatpush.bf16.msrb.mxu0 %v1590_v12  ;;  %937 = vmatpush.bf16.msrb.mxu2 %v1594_v16 }
  0x41   : > { %988 = vmatpush.bf16.msrb.mxu3 %v1596_v17 }
  0x43   : > { %1427 = vmatmul.msk.bf16.gmra.mxu1 %vm294_vm0, %v1773_v59 }
  0x4a   : > { %1441 = vmatmul.msk.bf16.gmra.mxu2 %vm294_vm0, %v1773_v59 }
  0x4b   : > { %1409 = vmatmul.msk.bf16.gmra.mxu0 %vm294_vm0, %v454_v5  ;;  %1455 = vmatmul.msk.bf16.gmra.mxu3 %vm294_vm0, %v1773_v59 }
  0x53   : > { %1482 = vmatmul.msk.bf16.vlgmr.msra.gmra.mxu1 %vm294_vm0, %v679_v18 }
  0x5a   : > { %1496 = vmatmul.msk.bf16.vlgmr.msra.gmra.mxu2 %vm294_vm0, %v679_v18 }
  0x5b   : > { %1464 = vmatmul.msk.bf16.vlgmr.msra.gmra.mxu0 %vm294_vm0, %v455_v6  ;;  %1506 = vmatmul.msk.bf16.vlgmr.msra.gmra.mxu3 %vm294_vm0, %v526_v1 }
  0x63   : > { %1483 = vmatmul.msk.bf16.gmra.mxu1 %vm294_vm0, %v680_v15 }
  0x6a   : > { %1497 = vmatmul.msk.bf16.gmra.mxu2 %vm294_vm0, %v680_v15 }
  0x6b   : > { %1465 = vmatmul.msk.bf16.gmra.mxu0 %vm294_vm0, %v454_v5  ;;  %1507 = vmatmul.msk.bf16.gmra.mxu3 %vm294_vm0, %v1773_v59 }
  0x73   : > { %1534 = vmatmul.msk.bf16.vlgmr.msrb.gmra.mxu1 %vm294_vm0, %v873_v41 }
  0x7a   : > { %1548 = vmatmul.msk.bf16.vlgmr.msrb.gmra.mxu2 %vm294_vm0, %v873_v41 }
  0x7b   : > { %1520 = vmatmul.msk.bf16.vlgmr.msrb.gmra.mxu0 %vm294_vm0, %v807_v48  ;;  %1562 = vmatmul.msk.bf16.vlgmr.msrb.gmra.mxu3 %vm294_vm0, %v962_v49 }
  0x83   : > { %1535 = vmatmul.msk.bf16.gmra.mxu1 %vm294_vm0, %v872_v38 }
  0x88   : > { %v1867_v6 = vpop.permute.xlu0 %1014 }
  0x89   : > { %v1887_v29 = vpop.permute.xlu1 %1024 }
  0x8a   : > { %1549 = vmatmul.msk.bf16.gmra.mxu2 %vm294_vm0, %v872_v38 }
  0x8b   : > { %1521 = vmatmul.msk.bf16.gmra.mxu0 %vm294_vm0, %v806_v45  ;;  %1563 = vmatmul.msk.bf16.gmra.mxu3 %vm294_vm0, %v961_v47 }
  0x90   : > { %v346_v50 = vpop.f32.mrf.mxu1  ;;  %v1879_v18 = vpop.permute.xlu0 %1019 }
  0x98   : > { %v348_v51 = vpop.f32.mrf.mxu1  ;;  %v310_v52 = vpop.f32.mrf.mxu0 }
  0x99   : > { %v347_v3 = vadd.f32 %v346_v50, %v310_v52 }
  0x9d   : > { %v400_v53 = vpop.f32.mrf.mxu2 }
  0x9e   : > { %v430_v54 = vpop.f32.mrf.mxu3 }
  0x9f   : > { %v431_v33 = vadd.f32 %v430_v54, %v400_v53 }
  0xa0   : > { %v351_v55 = vpop.f32.mrf.mxu1  ;;  %v312_v56 = vpop.f32.mrf.mxu0 }
  0xa1   : > { %v349_v12 = vadd.f32 %v348_v51, %v312_v56 }
  0xa5   : > { %v1859_v57 = vpop.f32.mrf.mxu2 }
  0xa6   : > { %v1861_v58 = vpop.f32.mrf.mxu3 }
  0xa7   : > { %v433_v53 = vadd.f32 %v1861_v58, %v1859_v57 }
  0xa8   : > { %v353_v59 = vpop.f32.mrf.mxu1  ;;  %v315_v60 = vpop.f32.mrf.mxu0 }
  0xa9   : > { %v352_v25 = vadd.f32 %v351_v55, %v315_v60 }
  0xad   : > { %v1863_v61 = vpop.f32.mrf.mxu2 }
  0xae   : > { %v1865_v62 = vpop.f32.mrf.mxu3 }
  0xb0   : > { %v554_v63 = vpop.f32.mrf.mxu1  ;;  %v317_v0 = vpop.f32.mrf.mxu0 }
  0xb5   : > { %v407_v1 = vpop.f32.mrf.mxu2 }
  0xb6   : > { %v437_v2 = vpop.f32.mrf.mxu3 }
  0xb8   : > { %v556_v4 = vpop.f32.mrf.mxu1  ;;  %v483_v5 = vpop.f32.mrf.mxu0 }
  0xb9   : > { %v492_v7 = vadd.f32 %v483_v5, %v347_v3 }
  0xbb   : > { %v563_v8 = vadd.f32 %v554_v63, %v492_v7 }
  0xbd   : > { %v592_v9 = vpop.f32.mrf.mxu2  ;;  %v1005_v10 = vpack.c.bf16 %v563_v8, %v563_v8  ;;  %v1027_v26 = vmul.f32 %v1867_v6, %v563_v8 }
  0xbe   : > { %v1875_v11 = vpop.f32.mrf.mxu3  ;;  %v601_v38 = vadd.f32 %v592_v9, %v431_v33  ;;  %v436_v9 = vadd.f32 %v1865_v62, %v1863_v61 }
  0xbf   : > { %1009 = vst.msk [vmem:[%s1873_s29] sm:$0xf] %vm1008_vm7, %v1005_v10  ;;  %v1043_v30 = vmul.f32 %v1027_v26, %v563_v8  ;;  %v1030_v35 = vsel %vm294_vm0, %v1027_v26, 0.0 }
  0xc0   : > { %v559_v14 = vpop.f32.mrf.mxu1  ;;  %v485_v16 = vpop.f32.mrf.mxu0 }
  0xc1   : > { %v493_v17 = vadd.f32 %v485_v16, %v349_v12  ;;  %v1046_v41 = vsel %vm294_vm0, %v1043_v30, 0.0 }
  0xc3   : > { %v564_v19 = vadd.f32 %v556_v4, %v493_v17 }
  0xc5   : > { %v594_v20 = vpop.f32.mrf.mxu2  ;;  %v1006_v22 = vpack.c.bf16 %v564_v19, %v564_v19  ;;  %v1028_v23 = vmul.f32 %v1879_v18, %v564_v19 }
  0xc6   : > { %v1882_v24 = vpop.f32.mrf.mxu3  ;;  %v602_v59 = vadd.f32 %v594_v20, %v433_v53 }
  0xc7   : > { %1010 = vst.msk [vmem:[%s1873_s29 + $0x4] sm:$0xf] %vm1008_vm7, %v1006_v22  ;;  %v1044_v27 = vmul.f32 %v1028_v23, %v564_v19  ;;  %v1031_v31 = vsel %vm294_vm0, %v1028_v23, 0.0 }
  0xc8   : > { %v561_v15 = vpop.f32.mrf.mxu1  ;;  %v488_v21 = vpop.f32.mrf.mxu0  ;;  %v1032_v39 = vadd.f32 %v1031_v31, %v1030_v35 }
  0xc9   : > { %v494_v28 = vadd.f32 %v488_v21, %v352_v25  ;;  %v1047_v36 = vsel %vm294_vm0, %v1044_v27, 0.0 }
  0xca   : > { %v1048_v45 = vadd.f32 %v1047_v36, %v1046_v41 }
  0xcb   : > { %v565_v32 = vadd.f32 %v559_v14, %v494_v28 }
  0xcd   : > { %v597_v34 = vpop.f32.mrf.mxu2  ;;  %v1007_v37 = vpack.c.bf16 %v565_v32, %v565_v32  ;;  %v1029_v13 = vmul.f32 %v1887_v29, %v565_v32 }
  0xce   : > { %v1893_v40 = vpop.f32.mrf.mxu3  ;;  %v603_v17 = vadd.f32 %v597_v34, %v436_v9 }
  0xcf   : > { %v1033_v42 = vsel %vm294_vm0, %v1029_v13, 0.0  ;;  %v1045_v43 = vmul.f32 %v1029_v13, %v565_v32  ;;  %1011 = vst.msk [vmem:[%s1873_s29 + $0x8] sm:$0xf] %vm1008_vm7, %v1007_v37 }
  0xd0   : > { %v708_v44 = vpop.f32.mrf.mxu1  ;;  %v1034_v46 = vadd.f32 %v1033_v42, %v1032_v39  ;;  %v490_v47 = vpop.f32.mrf.mxu0 }
  0xd1   : > { %v717_v48 = vadd.f32 %v708_v44, %v601_v38  ;;  %v1049_v49 = vsel %vm294_vm0, %v1045_v43, 0.0 }
  0xd2   : > { %v1035_v50 = vrot.slane %v1034_v46, 4  ;;  %v1050_v51 = vadd.f32 %v1049_v49, %v1048_v45 }
  0xd3   : > { %v1058_v52 = vpack.c.bf16 %v717_v48, %v717_v48  ;;  %v1077_v10 = vmul.f32 %v1867_v6, %v717_v48 }
  0xd4   : > { %v1036_v54 = vadd.f32 %v1035_v50, %v1034_v46  ;;  %v1051_v55 = vrot.slane %v1050_v51, 4 }
  0xd5   : > { %v599_v56 = vpop.f32.mrf.mxu2  ;;  %1064 = vrot.lane.b32.xlu1 %v1058_v52, %s1632_s30  ;;  %v1097_v62 = vmul.f32 %v1077_v10, %v717_v48  ;;  %v1080_v15 = vsel %vm294_vm0, %v1077_v10, 0.0 }
  0xd6   : > { %v1037_v60 = vrot.slane %v1036_v54, 2  ;;  %v1052_v63 = vadd.f32 %v1051_v55, %v1050_v51  ;;  %v637_v0 = vpop.f32.mrf.mxu3 }
  0xd7   : > { %v1100_v31 = vsel %vm294_vm0, %v1097_v62, 0.0 }
  0xd8   : > { %v710_v1 = vpop.f32.mrf.mxu1  ;;  %v1038_v2 = vadd.f32 %v1037_v60, %v1036_v54  ;;  %v1053_v3 = vrot.slane %v1052_v63, 2  ;;  %v1903_v4 = vpop.f32.mrf.mxu0 }
  0xd9   : > { %v718_v5 = vadd.f32 %v710_v1, %v602_v59  ;;  %v661_v0 = vadd.f32 %v1903_v4, %v1875_v11 }
  0xda   : > { %v1039_v7 = vrot.slane %v1038_v2, 1  ;;  %v1054_v8 = vadd.f32 %v1053_v3, %v1052_v63 }
  0xdb   : > { %v1078_v57 = vmul.f32 %v1879_v18, %v718_v5  ;;  %v1059_v58 = vpack.c.bf16 %v718_v5, %v718_v5 }
  0xdc   : > { %v1040_v14 = vadd.f32 %v1039_v7, %v1038_v2  ;;  %v1055_v16 = vrot.slane %v1054_v8, 1 }
  0xdd   : > { %v746_v12 = vpop.f32.mrf.mxu2  ;;  %1066 = vrot.lane.b32.xlu2 %v1059_v58, %s1632_s30  ;;  %v1098_v19 = vmul.f32 %v1078_v57, %v718_v5  ;;  %v1081_v23 = vsel %vm294_vm0, %v1078_v57, 0.0 }
  0xde   : > { %v776_v20 = vpop.f32.mrf.mxu3  ;;  %1042 = vst.msk [vmem:[%s1910_s8] sm:$0x1] %vm1041_vm8, %v1040_v14  ;;  %v1056_v22 = vadd.f32 %v1055_v16, %v1054_v8  ;;  %v1082_v30 = vadd.f32 %v1081_v23, %v1080_v15 }
  0xdf   : > { %v1101_v21 = vsel %vm294_vm0, %v1098_v19, 0.0  ;;  %v777_v5 = vadd.f32 %v776_v20, %v746_v12 }
  0xe0   : > { %v713_v61 = vpop.f32.mrf.mxu1  ;;  %v662_v25 = vpop.f32.mrf.mxu0  ;;  %1057 = vst.msk [vmem:[%s1920_s11] sm:$0x1] %vm1041_vm8, %v1056_v22  ;;  %v1102_v35 = vadd.f32 %v1101_v21, %v1100_v31 }
  0xe1   : > { %v719_v26 = vadd.f32 %v713_v61, %v603_v17  ;;  %v663_v10 = vadd.f32 %v662_v25, %v1882_v24 }
  0xe3   : > { %v1079_v27 = vmul.f32 %v1887_v29, %v719_v26  ;;  %v1060_v28 = vpack.c.bf16 %v719_v26, %v719_v26 }
  0xe5   : > { %v1083_v32 = vsel %vm294_vm0, %v1079_v27, 0.0  ;;  %v1099_v33 = vmul.f32 %v1079_v27, %v719_v26  ;;  %v748_v34 = vpop.f32.mrf.mxu2  ;;  %1068 = vrot.lane.b32.xlu2 %v1060_v28, %s1632_s30 }
  0xe6   : > { %v1084_v36 = vadd.f32 %v1083_v32, %v1082_v30  ;;  %v778_v13 = vpop.f32.mrf.mxu3 }
  0xe7   : > { %v1103_v37 = vsel %vm294_vm0, %v1099_v33, 0.0  ;;  %v779_v11 = vadd.f32 %v778_v13, %v748_v34 }
  0xe8   : > { %v1104_v38 = vadd.f32 %v1103_v37, %v1102_v35  ;;  %v715_v39 = vpop.f32.mrf.mxu1  ;;  %v1085_v41 = vrot.slane %v1084_v36, 4  ;;  %v665_v42 = vpop.f32.mrf.mxu0 }
  0xe9   : > { %v666_v25 = vadd.f32 %v665_v42, %v1893_v40 }
  0xea   : > { %v1086_v43 = vadd.f32 %v1085_v41, %v1084_v36  ;;  %v1105_v44 = vrot.slane %v1104_v38, 4 }
  0xec   : > { %v1087_v45 = vrot.slane %v1086_v43, 2  ;;  %v1106_v46 = vadd.f32 %v1105_v44, %v1104_v38 }
  0xed   : > { %v751_v47 = vpop.f32.mrf.mxu2 }
  0xee   : > { %v1088_v48 = vadd.f32 %v1087_v45, %v1086_v43  ;;  %v1107_v49 = vrot.slane %v1106_v46, 2  ;;  %v781_v50 = vpop.f32.mrf.mxu3 }
  0xef   : > { %v782_v34 = vadd.f32 %v781_v50, %v751_v47 }
  0xf0   : > { %v901_v51 = vpop.f32.mrf.mxu1  ;;  %v1089_v52 = vrot.slane %v1088_v48, 1  ;;  %v1108_v53 = vadd.f32 %v1107_v49, %v1106_v46  ;;  %v667_v54 = vpop.f32.mrf.mxu0 }
  0xf2   : > { %v1090_v55 = vadd.f32 %v1089_v52, %v1088_v48  ;;  %v1109_v56 = vrot.slane %v1108_v53, 1 }
  0xf4   : > { %1092 = vrot.lane.b32.xlu0 %v1090_v55, %s1632_s30  ;;  %v1110_v59 = vadd.f32 %v1109_v56, %v1108_v53 }
  0xf5   : > { %v753_v60 = vpop.f32.mrf.mxu2 }
  0xf6   : > { %1112 = vrot.lane.b32.xlu1 %v1110_v59, %s1632_s30  ;;  %v783_v63 = vpop.f32.mrf.mxu3 }
  0xf8   : > { %v903_v1 = vpop.f32.mrf.mxu1  ;;  %v835_v2 = vpop.f32.mrf.mxu0 }
  0xf9   : > { %v844_v3 = vadd.f32 %v835_v2, %v661_v0 }
  0xfb   : > { %v910_v57 = vadd.f32 %v901_v51, %v844_v3 }
  0xfd   : > { %v939_v58 = vpop.f32.mrf.mxu2  ;;  %v1116_v8 = vpack.c.bf16 %v910_v57, %v910_v57  ;;  %v1135_v24 = vmul.f32 %v1867_v6, %v910_v57 }
  0xfe   : > { %v948_v7 = vadd.f32 %v939_v58, %v777_v5  ;;  %v990_v9 = vpop.f32.mrf.mxu3 }
  0xff   : > { %1122 = vrot.lane.b32.xlu2 %v1116_v8, %s1633_s19  ;;  %v1155_v32 = vmul.f32 %v1135_v24, %v910_v57  ;;  %v1138_v40 = vsel %vm294_vm0, %v1135_v24, 0.0 }
 0x100   : > { %v999_v14 = vadd.f32 %v990_v9, %v948_v7  ;;  %v906_v16 = vpop.f32.mrf.mxu1  ;;  %v837_v17 = vpop.f32.mrf.mxu0 }
 0x101   : > { %v845_v19 = vadd.f32 %v837_v17, %v663_v10  ;;  %v1158_v42 = vsel %vm294_vm0, %v1155_v32, 0.0 }
 0x102   : > { %v1174_v22 = vpack.c.bf16 %v999_v14, %v999_v14  ;;  %v1193_v33 = vmul.f32 %v1867_v6, %v999_v14 }
 0x103   : > { %v911_v4 = vadd.f32 %v903_v1, %v845_v19 }
 0x104   : > { %1180 = vrot.lane.b32.xlu1 %v1174_v22, %s1634_s12  ;;  %v1213_v43 = vmul.f32 %v1193_v33, %v999_v14  ;;  %v1196_v52 = vsel %vm294_vm0, %v1193_v33, 0.0 }
 0x105   : > { %v941_v12 = vpop.f32.mrf.mxu2  ;;  %v1136_v20 = vmul.f32 %v1879_v18, %v911_v4  ;;  %v1117_v62 = vpack.c.bf16 %v911_v4, %v911_v4 }
 0x106   : > { %v949_v61 = vadd.f32 %v941_v12, %v779_v11  ;;  %v992_v23 = vpop.f32.mrf.mxu3  ;;  %v1216_v63 = vsel %vm294_vm0, %v1213_v43, 0.0 }
 0x107   : > { %1124 = vrot.lane.b32.xlu0 %v1117_v62, %s1633_s19  ;;  %v1156_v21 = vmul.f32 %v1136_v20, %v911_v4  ;;  %v1139_v35 = vsel %vm294_vm0, %v1136_v20, 0.0 }
 0x108   : > { %v1000_v26 = vadd.f32 %v992_v23, %v949_v61  ;;  %v908_v15 = vpop.f32.mrf.mxu1  ;;  %v840_v27 = vpop.f32.mrf.mxu0  ;;  %v1140_v6 = vadd.f32 %v1139_v35, %v1138_v40 }
 0x109   : > { %v846_v30 = vadd.f32 %v840_v27, %v666_v25  ;;  %v1159_v37 = vsel %vm294_vm0, %v1156_v21, 0.0 }
 0x10a   : > { %v1194_v28 = vmul.f32 %v1879_v18, %v1000_v26  ;;  %v1175_v31 = vpack.c.bf16 %v1000_v26, %v1000_v26  ;;  %v1160_v49 = vadd.f32 %v1159_v37, %v1158_v42 }
 0x10b   : > { %v912_v36 = vadd.f32 %v906_v16, %v846_v30 }
 0x10c   : > { %1182 = vrot.lane.b32.xlu2 %v1175_v31, %s1634_s12  ;;  %v1214_v38 = vmul.f32 %v1194_v28, %v1000_v26  ;;  %v1197_v45 = vsel %vm294_vm0, %v1194_v28, 0.0 }
 0x10d   : > { %v944_v13 = vpop.f32.mrf.mxu2  ;;  %v1137_v39 = vmul.f32 %v1887_v29, %v912_v36  ;;  %v1118_v41 = vpack.c.bf16 %v912_v36, %v912_v36  ;;  %v1198_v56 = vadd.f32 %v1197_v45, %v1196_v52 }
 0x10e   : > { %v950_v18 = vadd.f32 %v944_v13, %v782_v34  ;;  %v995_v44 = vpop.f32.mrf.mxu3  ;;  %v1217_v53 = vsel %vm294_vm0, %v1214_v38, 0.0 }
 0x10f   : > { %v1141_v46 = vsel %vm294_vm0, %v1137_v39, 0.0  ;;  %v1157_v47 = vmul.f32 %v1137_v39, %v912_v36  ;;  %1126 = vrot.lane.b32.xlu1 %v1118_v41, %s1633_s19  ;;  %v1218_v2 = vadd.f32 %v1217_v53, %v1216_v63 }
 0x110   : > { %v1001_v48 = vadd.f32 %v995_v44, %v950_v18  ;;  %v842_v50 = vpop.f32.mrf.mxu0  ;;  %v1142_v51 = vadd.f32 %v1141_v46, %v1140_v6 }
 0x111   : > { %v1161_v54 = vsel %vm294_vm0, %v1157_v47, 0.0 }
 0x112   : > { %v1195_v55 = vmul.f32 %v1887_v29, %v1001_v48  ;;  %v1143_v59 = vrot.slane %v1142_v51, 4  ;;  %v1162_v60 = vadd.f32 %v1161_v54, %v1160_v49  ;;  %v1176_v30 = vpack.c.bf16 %v1001_v48, %v1001_v48 }
 0x114   : > { %v1199_v0 = vsel %vm294_vm0, %v1195_v55, 0.0  ;;  %v1215_v1 = vmul.f32 %v1195_v55, %v1001_v48  ;;  %v1144_v57 = vadd.f32 %v1143_v59, %v1142_v51  ;;  %v1163_v58 = vrot.slane %v1162_v60, 4 }
 0x115   : > { %v1200_v3 = vadd.f32 %v1199_v0, %v1198_v56  ;;  %v946_v5 = vpop.f32.mrf.mxu2 }
 0x116   : > { %v1219_v7 = vsel %vm294_vm0, %v1215_v1, 0.0  ;;  %v997_v9 = vpop.f32.mrf.mxu3  ;;  %v1145_v10 = vrot.slane %v1144_v57, 2  ;;  %v1164_v14 = vadd.f32 %v1163_v58, %v1162_v60 }
 0x117   : > { %v1220_v8 = vadd.f32 %v1219_v7, %v1218_v2  ;;  %v1201_v29 = vrot.slane %v1200_v3, 4 }
 0x118   : > { %v1146_v16 = vadd.f32 %v1145_v10, %v1144_v57  ;;  %v1165_v17 = vrot.slane %v1164_v14, 2 }
 0x119   : > { %v1202_v19 = vadd.f32 %v1201_v29, %v1200_v3  ;;  %v1221_v22 = vrot.slane %v1220_v8, 4 }
 0x11a   : > { %v1147_v11 = vrot.slane %v1146_v16, 1  ;;  %v1166_v4 = vadd.f32 %v1165_v17, %v1164_v14 }
 0x11b   : > { %v1203_v12 = vrot.slane %v1202_v19, 2  ;;  %v1222_v20 = vadd.f32 %v1221_v22, %v1220_v8 }
 0x11c   : > { %v1148_v61 = vadd.f32 %v1147_v11, %v1146_v16  ;;  %v1167_v62 = vrot.slane %v1166_v4, 1 }
 0x11d   : > { %v1204_v24 = vadd.f32 %v1203_v12, %v1202_v19  ;;  %v1223_v23 = vrot.slane %v1222_v20, 2 }
 0x11e   : > { %1150 = vrot.lane.b32.xlu2 %v1148_v61, %s1633_s19  ;;  %v1168_v25 = vadd.f32 %v1167_v62, %v1166_v4 }
 0x11f   : > { %v1205_v26 = vrot.slane %v1204_v24, 1  ;;  %v1224_v15 = vadd.f32 %v1223_v23, %v1222_v20 }
 0x120   : > { %1170 = vrot.lane.b32.xlu0 %v1168_v25, %s1633_s19 }
 0x121   : > { %v1206_v21 = vadd.f32 %v1205_v26, %v1204_v24  ;;  %v1225_v27 = vrot.slane %v1224_v15, 1 }
 0x123   : > { %1208 = vrot.lane.b32.xlu1 %v1206_v21, %s1634_s12  ;;  %v1226_v28 = vadd.f32 %v1225_v27, %v1224_v15 }
 0x126   : > { %1228 = vrot.lane.b32.xlu2 %v1226_v28, %s1634_s12 }
 0x128   : > { %1184 = vrot.lane.b32.xlu0 %v1176_v30, %s1634_s12 }
 0x137   : > { %v1067_v31 = vpop.permute.xlu2 %1066 }
 0x138   : > { %1075 = vst.msk [vmem:[%s1873_s29 + $0x4] sm:$0xf] %vm1073_vm9, %v1067_v31 }
 0x13f   : > { %v1069_v32 = vpop.permute.xlu2 %1068 }
 0x140   : > { %1076 = vst.msk [vmem:[%s1873_s29 + $0x8] sm:$0xf] %vm1073_vm9, %v1069_v32 }
 0x147   : > { %v1065_v33 = vpop.permute.xlu1 %1064 }
 0x148   : > { %1074 = vst.msk [vmem:[%s1873_s29] sm:$0xf] %vm1073_vm9, %v1065_v33 }
 0x159   : > { %v1123_v34 = vpop.permute.xlu2 %1122 }
 0x15a   : > { %1132 = vst.msk [vmem:[%s1873_s29] sm:$0xf] %vm1131_vm10, %v1123_v34 }
 0x166   : > { %v1093_v35 = vpop.permute.xlu0 %1092  ;;  %v1183_v40 = vpop.permute.xlu2 %1182 }
 0x167   : > { %1096 = vst.msk [vmem:[%s1910_s8] sm:$0x1] %vm1095_vm11, %v1093_v35 }
 0x168   : > { %v1113_v36 = vpop.permute.xlu1 %1112 }
 0x169   : > { %1115 = vst.msk [vmem:[%s1920_s11] sm:$0x1] %vm1095_vm11, %v1113_v36 }
 0x176   : > { %v1181_v37 = vpop.permute.xlu1 %1180 }
 0x177   : > { %1190 = vst.msk [vmem:[%s1873_s29] sm:$0xf] %vm1189_vm12, %v1181_v37 }
 0x178   : > { %v1151_v13 = vpop.permute.xlu2 %1150 }
 0x179   : > { %1154 = vst.msk [vmem:[%s1910_s8] sm:$0x1] %vm1153_vm13, %v1151_v13  ;;  %v1125_v38 = vpop.permute.xlu0 %1124 }
 0x17a   : > { %1133 = vst.msk [vmem:[%s1873_s29 + $0x4] sm:$0xf] %vm1131_vm10, %v1125_v38 }
 0x17b   : > { %1191 = vst.msk [vmem:[%s1873_s29 + $0x4] sm:$0xf] %vm1189_vm12, %v1183_v40 }
 0x180   : > { %v1229_v41 = vpop.permute.xlu2 %1228 }
 0x181   : > { %v1127_v39 = vpop.permute.xlu1 %1126 }
 0x182   : > { %1134 = vst.msk [vmem:[%s1873_s29 + $0x8] sm:$0xf] %vm1131_vm10, %v1127_v39 }
 0x192   : > { %v1171_v18 = vpop.permute.xlu0 %1170 }
 0x193   : > { %1173 = vst.msk [vmem:[%s1920_s11] sm:$0x1] %vm1153_vm13, %v1171_v18 }
 0x194   : > { %1231 = vst.msk [vmem:[%s1920_s11] sm:$0x1] %vm1211_vm14, %v1229_v41 }
 0x195   : > { %v1209_v42 = vpop.permute.xlu1 %1208 }
 0x196   : > { %1212 = vst.msk [vmem:[%s1910_s8] sm:$0x1] %vm1211_vm14, %v1209_v42 }
 0x19a   : > { %v1185_v43 = vpop.permute.xlu0 %1184 }
 0x19b   : > { %1192 = vst.msk [vmem:[%s1873_s29 + $0x8] sm:$0xf] %vm1189_vm12, %v1185_v43 }
 0x19c PF: > { %s16_s18 = sadd.s32 1, %s1629_s18  }
 0x19d   : > { %p13_p4 = scmp.ge.s32.totalorder %s16_s18, 4  }
 0x19f   :  { %15 = sbr.rel (!%p13_p4) target bundleno = 1 (0x1), region = 101 }

// kernel: generator_forward.10
= control target key start
LH: loop header
LB: loop body
LE: loop exit
PB: predicated region body
PF: predicated region fallthrough
CT: control target
= control target key end

     0   :  { %s145_s0 = inlined_call_operand.vmem [shape: bf16[48,128], index: 0, kind: input, shape index: {}]   ;;  %s146_s1 = inlined_call_operand.vmem [shape: f32[1,128], index: 1, kind: input, shape index: {}]   ;;  %s147_s2 = inlined_call_operand.vmem [shape: f32[1,128], index: 2, kind: input, shape index: {}]   ;;  %s148_s3 = inlined_call_operand.vmem [shape: bf16[48,128], index: 3, kind: output, shape index: {}]  }
   0x1   :  { %v69_v0 = vld [vmem:[%s145_s0] sm:$0xff]   ;;  %v95_v5 = vld [vmem:[%s145_s0 + $0x8] sm:$0xff]   ;;  %v96_v8 = vld [vmem:[%s145_s0 + $0x10] sm:$0xff]  }
   0x2   :  { %v99_v1 = vld [vmem:[%s146_s1] ss:$0 sm:$0xff]  ;;  %v70_v2 = vunpack.c.l.bf16 %v69_v0  ;;  %v71_v3 = vunpack.c.h.bf16 %v69_v0  ;;  %v74_v6 = vunpack.c.l.bf16 %v95_v5  ;;  %v75_v7 = vunpack.c.h.bf16 %v95_v5 }
   0x3   :  { %v100_v4 = vld [vmem:[%s147_s2] ss:$0 sm:$0xff]  ;;  %v78_v11 = vunpack.c.l.bf16 %v96_v8  ;;  %v79_v12 = vunpack.c.h.bf16 %v96_v8 }
   0x4   :  { %v30_v9 = vmul.f32 %v99_v1, %v70_v2  ;;  %v31_v10 = vmul.f32 %v99_v1, %v71_v3  ;;  %v32_v13 = vmul.f32 %v99_v1, %v74_v6  ;;  %v33_v14 = vmul.f32 %v99_v1, %v75_v7 }
   0x5   :  { %v34_v17 = vmul.f32 %v99_v1, %v78_v11  ;;  %v35_v18 = vmul.f32 %v99_v1, %v79_v12 }
   0x6   :  { %v40_v15 = vadd.f32 %v100_v4, %v30_v9  ;;  %v41_v16 = vadd.f32 %v100_v4, %v31_v10  ;;  %v42_v19 = vadd.f32 %v100_v4, %v32_v13  ;;  %v43_v20 = vadd.f32 %v100_v4, %v33_v14 }
   0x7   :  { %v44_v23 = vadd.f32 %v100_v4, %v34_v17  ;;  %v45_v24 = vadd.f32 %v100_v4, %v35_v18 }
   0x8   :  { %v46_v21 = vmax.f32 %v40_v15, 0.0  ;;  %v47_v22 = vmax.f32 %v41_v16, 0.0  ;;  %v48_v25 = vmax.f32 %v42_v19, 0.0  ;;  %v49_v26 = vmax.f32 %v43_v20, 0.0 }
   0x9   :  { %v50_v28 = vmax.f32 %v44_v23, 0.0  ;;  %v51_v29 = vmax.f32 %v45_v24, 0.0 }
   0xa   :  { %v83_v27 = vpack.c.bf16 %v47_v22, %v46_v21  ;;  %v88_v30 = vpack.c.bf16 %v49_v26, %v48_v25 }
   0xb   :  { %v93_v31 = vpack.c.bf16 %v51_v29, %v50_v28 }
   0xc   :  { %84 = vst [vmem:[%s148_s3] sm:$0xff] %v83_v27  }
   0xd   :  { %97 = vst [vmem:[%s148_s3 + $0x8] sm:$0xff] %v88_v30  }
   0xe   :  { %98 = vst [vmem:[%s148_s3 + $0x10] sm:$0xff] %v93_v31  }

// kernel: generator_forward.12
= control target key start
LH: loop header
LB: loop body
LE: loop exit
PB: predicated region body
PF: predicated region fallthrough
CT: control target
= control target key end

     0   :  { %s406_s0 = inlined_call_operand.vmem [shape: bf16[160,128], index: 0, kind: input, shape index: {}]   ;;  %s407_s1 = inlined_call_operand.vmem [shape: f32[1,128], index: 1, kind: input, shape index: {}]   ;;  %s408_s2 = inlined_call_operand.vmem [shape: f32[1,128], index: 2, kind: input, shape index: {}]   ;;  %s409_s3 = inlined_call_operand.vmem [shape: bf16[160,128], index: 3, kind: output, shape index: {}]  }
   0x1   :  { %v167_v0 = vld [vmem:[%s406_s0] sm:$0xff]   ;;  %v256_v5 = vld [vmem:[%s406_s0 + $0x8] sm:$0xff]   ;;  %v257_v8 = vld [vmem:[%s406_s0 + $0x10] sm:$0xff]  }
   0x2   :  { %v302_v1 = vld [vmem:[%s407_s1] ss:$0 sm:$0xff]  ;;  %v168_v2 = vunpack.c.l.bf16 %v167_v0  ;;  %v169_v3 = vunpack.c.h.bf16 %v167_v0  ;;  %v172_v6 = vunpack.c.l.bf16 %v256_v5  ;;  %v173_v7 = vunpack.c.h.bf16 %v256_v5  ;;  %v258_v9 = vld [vmem:[%s406_s0 + $0x18] sm:$0xff]   ;;  %v260_v35 = vld [vmem:[%s406_s0 + $0x28] sm:$0xff]  }
   0x3   :  { %v307_v4 = vld [vmem:[%s408_s2] ss:$0 sm:$0xff]  ;;  %v176_v12 = vunpack.c.l.bf16 %v257_v8  ;;  %v177_v13 = vunpack.c.h.bf16 %v257_v8  ;;  %v180_v16 = vunpack.c.l.bf16 %v258_v9  ;;  %v181_v17 = vunpack.c.h.bf16 %v258_v9  ;;  %v261_v40 = vld [vmem:[%s406_s0 + $0x30] sm:$0xff]   ;;  %v262_v45 = vld [vmem:[%s406_s0 + $0x38] sm:$0xff]  }
   0x4   :  { %v58_v10 = vmul.f32 %v302_v1, %v168_v2  ;;  %v59_v11 = vmul.f32 %v302_v1, %v169_v3  ;;  %v60_v14 = vmul.f32 %v302_v1, %v172_v6  ;;  %v61_v15 = vmul.f32 %v302_v1, %v173_v7  ;;  %v259_v26 = vld [vmem:[%s406_s0 + $0x20] sm:$0xff]  }
   0x5   :  { %v62_v20 = vmul.f32 %v302_v1, %v176_v12  ;;  %v63_v21 = vmul.f32 %v302_v1, %v177_v13  ;;  %v64_v24 = vmul.f32 %v302_v1, %v180_v16  ;;  %v65_v25 = vmul.f32 %v302_v1, %v181_v17  ;;  %v263_v62 = vld [vmem:[%s406_s0 + $0x40] sm:$0xff]   ;;  %v264_v13 = vld [vmem:[%s406_s0 + $0x48] sm:$0xff]  }
   0x6   :  { %v82_v18 = vadd.f32 %v307_v4, %v58_v10  ;;  %v83_v19 = vadd.f32 %v307_v4, %v59_v11  ;;  %v84_v22 = vadd.f32 %v307_v4, %v60_v14  ;;  %v85_v23 = vadd.f32 %v307_v4, %v61_v15 }
   0x7   :  { %v86_v29 = vadd.f32 %v307_v4, %v62_v20  ;;  %v87_v30 = vadd.f32 %v307_v4, %v63_v21  ;;  %v88_v33 = vadd.f32 %v307_v4, %v64_v24  ;;  %v89_v34 = vadd.f32 %v307_v4, %v65_v25 }
   0x8   :  { %v102_v27 = vmax.f32 %v82_v18, 0.0  ;;  %v103_v28 = vmax.f32 %v83_v19, 0.0  ;;  %v104_v31 = vmax.f32 %v84_v22, 0.0  ;;  %v105_v32 = vmax.f32 %v85_v23, 0.0 }
   0x9   :  { %v106_v37 = vmax.f32 %v86_v29, 0.0  ;;  %v107_v38 = vmax.f32 %v87_v30, 0.0  ;;  %v184_v39 = vunpack.c.l.bf16 %v259_v26  ;;  %v108_v42 = vmax.f32 %v88_v33, 0.0 }
   0xa   :  { %v209_v36 = vpack.c.bf16 %v103_v28, %v102_v27  ;;  %v214_v41 = vpack.c.bf16 %v105_v32, %v104_v31  ;;  %v109_v43 = vmax.f32 %v89_v34, 0.0  ;;  %v185_v44 = vunpack.c.h.bf16 %v259_v26 }
   0xb   :  { %v219_v46 = vpack.c.bf16 %v107_v38, %v106_v37  ;;  %v66_v47 = vmul.f32 %v302_v1, %v184_v39  ;;  %v188_v48 = vunpack.c.l.bf16 %v260_v35  ;;  %v189_v49 = vunpack.c.h.bf16 %v260_v35 }
   0xc   :  { %210 = vst [vmem:[%s409_s3] sm:$0xff] %v209_v36   ;;  %v224_v50 = vpack.c.bf16 %v109_v43, %v108_v42  ;;  %v67_v51 = vmul.f32 %v302_v1, %v185_v44  ;;  %v192_v52 = vunpack.c.l.bf16 %v261_v40  ;;  %v193_v53 = vunpack.c.h.bf16 %v261_v40 }
   0xd   :  { %265 = vst [vmem:[%s409_s3 + $0x8] sm:$0xff] %v214_v41   ;;  %v90_v54 = vadd.f32 %v307_v4, %v66_v47  ;;  %v68_v55 = vmul.f32 %v302_v1, %v188_v48  ;;  %v69_v56 = vmul.f32 %v302_v1, %v189_v49  ;;  %v196_v57 = vunpack.c.l.bf16 %v262_v45 }
   0xe   :  { %266 = vst [vmem:[%s409_s3 + $0x10] sm:$0xff] %v219_v46   ;;  %v91_v58 = vadd.f32 %v307_v4, %v67_v51  ;;  %v70_v59 = vmul.f32 %v302_v1, %v192_v52  ;;  %v71_v60 = vmul.f32 %v302_v1, %v193_v53  ;;  %v197_v61 = vunpack.c.h.bf16 %v262_v45 }
   0xf   :  { %267 = vst [vmem:[%s409_s3 + $0x18] sm:$0xff] %v224_v50   ;;  %v110_v63 = vmax.f32 %v90_v54, 0.0  ;;  %v92_v0 = vadd.f32 %v307_v4, %v68_v55  ;;  %v93_v2 = vadd.f32 %v307_v4, %v69_v56  ;;  %v72_v3 = vmul.f32 %v302_v1, %v196_v57 }
  0x10   :  { %v111_v5 = vmax.f32 %v91_v58, 0.0  ;;  %v94_v6 = vadd.f32 %v307_v4, %v70_v59  ;;  %v95_v7 = vadd.f32 %v307_v4, %v71_v60  ;;  %v73_v8 = vmul.f32 %v302_v1, %v197_v61 }
  0x11   :  { %v112_v9 = vmax.f32 %v92_v0, 0.0  ;;  %v113_v10 = vmax.f32 %v93_v2, 0.0  ;;  %v96_v11 = vadd.f32 %v307_v4, %v72_v3  ;;  %v200_v12 = vunpack.c.l.bf16 %v263_v62 }
  0x12   :  { %v229_v14 = vpack.c.bf16 %v111_v5, %v110_v63  ;;  %v114_v15 = vmax.f32 %v94_v6, 0.0  ;;  %v115_v16 = vmax.f32 %v95_v7, 0.0  ;;  %v97_v17 = vadd.f32 %v307_v4, %v73_v8 }
  0x13   :  { %v234_v18 = vpack.c.bf16 %v113_v10, %v112_v9  ;;  %v116_v19 = vmax.f32 %v96_v11, 0.0  ;;  %v201_v20 = vunpack.c.h.bf16 %v263_v62  ;;  %v74_v21 = vmul.f32 %v302_v1, %v200_v12 }
  0x14   :  { %268 = vst [vmem:[%s409_s3 + $0x20] sm:$0xff] %v229_v14   ;;  %v239_v22 = vpack.c.bf16 %v115_v16, %v114_v15  ;;  %v117_v23 = vmax.f32 %v97_v17, 0.0  ;;  %v204_v24 = vunpack.c.l.bf16 %v264_v13  ;;  %v205_v25 = vunpack.c.h.bf16 %v264_v13 }
  0x15   :  { %269 = vst [vmem:[%s409_s3 + $0x28] sm:$0xff] %v234_v18   ;;  %v75_v26 = vmul.f32 %v302_v1, %v201_v20  ;;  %v98_v27 = vadd.f32 %v307_v4, %v74_v21 }
  0x16   :  { %270 = vst [vmem:[%s409_s3 + $0x30] sm:$0xff] %v239_v22   ;;  %v244_v28 = vpack.c.bf16 %v117_v23, %v116_v19  ;;  %v76_v29 = vmul.f32 %v302_v1, %v204_v24  ;;  %v77_v30 = vmul.f32 %v302_v1, %v205_v25 }
  0x17   :  { %v99_v31 = vadd.f32 %v307_v4, %v75_v26  ;;  %v118_v32 = vmax.f32 %v98_v27, 0.0 }
  0x18   :  { %271 = vst [vmem:[%s409_s3 + $0x38] sm:$0xff] %v244_v28   ;;  %v100_v33 = vadd.f32 %v307_v4, %v76_v29  ;;  %v101_v34 = vadd.f32 %v307_v4, %v77_v30 }
  0x19   :  { %v119_v35 = vmax.f32 %v99_v31, 0.0 }
  0x1a   :  { %v120_v36 = vmax.f32 %v100_v33, 0.0  ;;  %v121_v37 = vmax.f32 %v101_v34, 0.0 }
  0x1b   :  { %v249_v38 = vpack.c.bf16 %v119_v35, %v118_v32 }
  0x1c   :  { %v254_v39 = vpack.c.bf16 %v121_v37, %v120_v36 }
  0x1d   :  { %272 = vst [vmem:[%s409_s3 + $0x40] sm:$0xff] %v249_v38  }
  0x1e   :  { %273 = vst [vmem:[%s409_s3 + $0x48] sm:$0xff] %v254_v39  }

// kernel: generator_forward.11
= control target key start
LH: loop header
LB: loop body
LE: loop exit
PB: predicated region body
PF: predicated region fallthrough
CT: control target
= control target key end

     0   :  { %s2737_s18 = smov 0   ;;  %s3657_s0 = inlined_call_operand.vmem [shape: bf16[2,104,32], index: 0, kind: input, shape index: {}]   ;;  %s3658_s1 = inlined_call_operand.vmem [shape: bf16[16,32,32], index: 1, kind: input, shape index: {}]   ;;  %s3659_s2 = inlined_call_operand.vmem [shape: f32[80,1], index: 2, kind: input, shape index: {}]   ;;  %s3660_s3 = inlined_call_operand.vmem [shape: bf16[2,80,128], index: 3, kind: output, shape index: {0}]   ;;  %s3661_s4 = inlined_call_operand.vmem [shape: f32[2,1,128], index: 4, kind: output, shape index: {1}]   ;;  %s3662_s5 = inlined_call_operand.vmem [shape: f32[2,1,128], index: 5, kind: output, shape index: {2}]  }
   0x1 LB: > { %s2302_s19 = sadd.s32 4294967295, %s2701_s18   ;;  %p2306_p0 = scmp.ge.s32.totalorder %s2701_s18, 1  ;;  %s2701_s18 = sphi %s2737_s18, %s16_s18  }
   0x2   : > { %p192_p1 = scmp.lt.s32.totalorder %s2701_s18, 3 }
   0x4   : > { %p193_p2 = pnand %p2306_p0, %p192_p1 }
   0x5   : > { %p226_p3 = scmp.lt.s32.totalorder (!%p193_p2), %s2302_s19, 1  ;;  %s2704_s23 = smov (!%p193_p2), 32  }
   0x6   : > { %196 = sbr.rel (%p193_p2) target bundleno = 608 (0x260), region = 32  ;;  %s2706_s29 = smov (!%p193_p2), 96  }
   0xb   : > { %v2632_v0 = vld [vmem:[%s3658_s1 + $0x8] sm:$0xff]  ;;  %v2638_v1 = vld [vmem:[%s3658_s1 + $0x38] sm:$0xff]  ;;  %v2631_v4 = vld [vmem:[%s3658_s1] sm:$0xff]  ;;  %s3664_s19 = smov (!%p226_p3, %s2302_s19), 1  ;;  %vm348_vm0 = vcmask 261120   ;;  %vm468_vm1 = vcmask 1046528  }
   0xc   : > { %v2634_v2 = vld [vmem:[%s3658_s1 + $0x18] sm:$0xff]  ;;  %v2636_v3 = vld [vmem:[%s3658_s1 + $0x28] sm:$0xff]  ;;  %426 = vmatpush.bf16.msra.mxu1 %v2632_v0  ;;  %513 = vmatpush.bf16.msra.mxu2 %v2638_v1  ;;  %v2637_v5 = vld [vmem:[%s3658_s1 + $0x30] sm:$0xff]  ;;  %s2678_s11 = smul.u32 52, %s3664_s19  ;;  %vm291_vm2 = vsmask.f32 7424  ;;  %s3374_s25 = scalar_lea.vmem %s3661_s4, %s3664_s19 }
   0xd   : > { %370 = vmatpush.bf16.msra.mxu0 %v2634_v2  ;;  %559 = vmatpush.bf16.msra.mxu3 %v2636_v3  ;;  %v2633_v6 = vld [vmem:[%s3658_s1 + $0x10] sm:$0xff]  ;;  %v2635_v7 = vld [vmem:[%s3658_s1 + $0x20] sm:$0xff]  ;;  %v2644_v8 = vld [vmem:[%s3658_s1 + $0x48] sm:$0xff]  ;;  %vm727_vm3 = vsmask.f32 6400  ;;  %vm1024_vm4 = vcmask 1045504   ;;  %s3383_s28 = scalar_lea.vmem %s3662_s5, %s3664_s19 }
   0xe   : > { %v2648_v9 = vld [vmem:[%s3658_s1 + $0x68] sm:$0xff]  ;;  %v2650_v10 = vld [vmem:[%s3658_s1 + $0x78] sm:$0xff]  ;;  %s2784_s22 = scalar_lea.vmem %s3657_s0, %s2678_s11  ;;  %v2643_v27 = vld [vmem:[%s3658_s1 + $0x40] sm:$0xff]  ;;  %s2679_s16 = smul.u32 40, %s3664_s19  ;;  %vm1637_vm5 = vcmask 257024   ;;  %vm1534_vm7 = vcmask 1044480  }
   0xf   : > { %v2652_v11 = vld [vmem:[%s3658_s1 + $0x88] sm:$0xff]  ;;  %v2672_v12 = vld [vmem:[%s2784_s22] sm:$0xff]   ;;  %v2649_v29 = vld [vmem:[%s3658_s1 + $0x70] sm:$0xff]  ;;  %vm1339_vm6 = vsmask.f32 5376  ;;  %vm1733_vm8 = vcmask 253952  }
  0x10   : > { %427 = vmatpush.bf16.msra.mxu1 %v2631_v4  ;;  %514 = vmatpush.bf16.msra.mxu2 %v2637_v5  ;;  %v2675_v13 = vld [vmem:[%s2784_s22] sm:$0xf0]  ;;  %v2627_v14 = vld [vmem:[%s2784_s22 + $0x8] sm:$0xff]  ;;  %v293_v15 = vshrl.u32 %v2672_v12, 16  ;;  %v295_v16 = vshll.u32 %v2672_v12, 16  ;;  %v2628_v30 = vld [vmem:[%s2784_s22 + $0x10] sm:$0xff]  ;;  %s3110_s21 = scalar_lea.vmem %s3660_s3, %s2679_s16 }
  0x11   : > { %371 = vmatpush.bf16.msra.mxu0 %v2633_v6  ;;  %560 = vmatpush.bf16.msra.mxu3 %v2635_v7  ;;  %v2676_v17 = vld [vmem:[%s2784_s22] sm:$0xe]  ;;  %v470_v19 = vrot.slane %v2627_v14, 1  ;;  %v300_v20 = vshll.u32 %v2627_v14, 16  ;;  %v304_v31 = vshrl.u32 %v2627_v14, 16  ;;  %v308_v32 = vshll.u32 %v2628_v30, 16 }
  0x12   : > { %v2677_v18 = vor.u32 %v2676_v17, %v2675_v13  ;;  %v297_v21 = vrot.slane %v295_v16, 1  ;;  %v2647_v28 = vld [vmem:[%s3658_s1 + $0x60] sm:$0xff]  ;;  %v472_v33 = vrot.slane %v2628_v30, 1  ;;  %v2629_v39 = vld [vmem:[%s2784_s22 + $0x18] sm:$0xff]  ;;  %v312_v40 = vshrl.u32 %v2628_v30, 16  ;;  %v2656_v60 = vld [vmem:[%s3658_s1 + $0xa8] sm:$0xff] }
  0x13   : > { %2350 = vmatmul.msk.bf16.vlgmr.msra.gmra.mxu1 %vm348_vm0, %v2672_v12  ;;  %v302_v23 = vrot.slane %v300_v20, 1  ;;  %v310_v35 = vrot.slane %v308_v32, 1  ;;  %v2651_v36 = vld [vmem:[%s3658_s1 + $0x80] sm:$0xff]  ;;  %v316_v41 = vshll.u32 %v2629_v39, 16  ;;  %v474_v42 = vrot.slane %v2629_v39, 1  ;;  %v2646_v59 = vld [vmem:[%s3658_s1 + $0x58] sm:$0xff] }
  0x14   : > { %814 = vmatpush.bf16.msrb.mxu1 %v2648_v9  ;;  %875 = vmatpush.bf16.msrb.mxu2 %v2650_v10  ;;  %v469_v22 = vrot.slane %v2677_v18, 1  ;;  %v298_v24 = vor.u32 %v297_v21, %v293_v15  ;;  %v473_v37 = vsel %vm468_vm1, %v470_v19, %v472_v33  ;;  %v2630_v47 = vld [vmem:[%s2784_s22 + $0x20] sm:$0xff]  ;;  %v320_v48 = vshrl.u32 %v2629_v39, 16  ;;  %v257_v53 = vld [vmem:[%s2784_s22 + $0x28] sm:$0x1]  ;;  %v2658_v61 = vld [vmem:[%s3658_s1 + $0xb8] sm:$0xff] }
  0x15   : > { %675 = vmatpush.bf16.msrb.mxu0 %v2644_v8  ;;  %936 = vmatpush.bf16.msrb.mxu3 %v2652_v11  ;;  %v306_v34 = vor.u32 %v304_v31, %v302_v23  ;;  %v314_v43 = vor.u32 %v312_v40, %v310_v35  ;;  %v318_v44 = vrot.slane %v316_v41, 1  ;;  %v475_v45 = vsel %vm468_vm1, %v472_v33, %v474_v42  ;;  %v587_v57 = vld [vmem:[%s2784_s22 + $0x4] sm:$0xe]  ;;  %v2833_v58 = vld [vmem:[%s2784_s22 + $0x8] sm:$0xf]  ;;  %v2654_v63 = vld [vmem:[%s3658_s1 + $0x98] sm:$0xff] }
  0x16   : > { %v471_v25 = vsel %vm468_vm1, %v469_v22, %v470_v19  ;;  %v303_v26 = vsel %vm291_vm2, %v298_v24, %v302_v23  ;;  %v324_v49 = vshll.u32 %v2630_v47, 16  ;;  %v476_v50 = vrot.slane %v2630_v47, 1  ;;  %v2851_v4 = vld [vmem:[%s2784_s22 + $0xc] sm:$0xff]  ;;  %v1617_v20 = vld [vmem:[%s3659_s2] sm:$0xff]  ;;  %s2705_s19 = smov 64  }
  0x17   : > { %2371 = vmatmul.msk.bf16.vlgmr.msra.gmra.mxu2 %vm348_vm0, %v471_v25  ;;  %2337 = vmatmul.msk.bf16.vlgmr.msra.gmra.mxu0 %vm348_vm0, %v303_v26  ;;  %v311_v38 = vsel %vm291_vm2, %v306_v34, %v310_v35  ;;  %v319_v46 = vsel %vm291_vm2, %v314_v43, %v318_v44  ;;  %v322_v51 = vor.u32 %v320_v48, %v318_v44  ;;  %v284_v56 = vunpack.c.l.b16 %v257_v53  ;;  %v1618_v23 = vld [vmem:[%s3659_s2 + $0x8] sm:$0xff]  ;;  %v2873_v25 = vld [vmem:[%s2784_s22 + $0x14] sm:$0xff]  ;;  %v2893_v35 = vld [vmem:[%s2784_s22 + $0x1c] sm:$0xff] }
  0x18   : > { %2384 = vmatmul.msk.bf16.vlgmr.msra.gmra.mxu3 %vm348_vm0, %v303_v26  ;;  %815 = vmatpush.bf16.msrb.mxu1 %v2647_v28  ;;  %v326_v52 = vrot.slane %v324_v49, 1  ;;  %v477_v54 = vsel %vm468_vm1, %v474_v42, %v476_v50  ;;  %v614_v0 = vunpack.c.l.b16 %v587_v57  ;;  %v615_v1 = vunpack.c.l.b16 %v2833_v58  ;;  %v1619_v33 = vld [vmem:[%s3659_s2 + $0x10] sm:$0xff]  ;;  %v1625_v58 = vld [vmem:[%s3659_s2 + $0x40] sm:$0xff] }
  0x19   : > { %676 = vmatpush.bf16.msrb.mxu0 %v2643_v27  ;;  %876 = vmatpush.bf16.msrb.mxu2 %v2649_v29  ;;  %v290_v62 = vpack.c.b16 %v284_v56, %v284_v56  ;;  %v328_v2 = vshrl.u32 %v2630_v47, 16  ;;  %v737_v11 = vshrl.u32 %v2851_v4, 16  ;;  %v740_v12 = vshll.u32 %v2851_v4, 16  ;;  %v2657_v40 = vld [vmem:[%s3658_s1 + $0xb0] sm:$0xff] }
  0x1a   : > { %937 = vmatpush.bf16.msrb.mxu3 %v2651_v36  ;;  %v327_v55 = vsel %vm291_vm2, %v322_v51, %v326_v52  ;;  %v625_v5 = vpack.c.b16 %v615_v1, %v614_v0  ;;  %v2703_v13 = vmov 0   ;;  %v632_v27 = vrot.slane %v2851_v4, 1  ;;  %v1620_v36 = vld [vmem:[%s3659_s2 + $0x18] sm:$0xff]  ;;  %v2653_v42 = vld [vmem:[%s3658_s1 + $0x90] sm:$0xff] }
  0x1b   : > { %v332_v3 = vshll.u32 %v290_v62, 16  ;;  %v478_v6 = vrot.slane %v290_v62, 1  ;;  %v330_v7 = vor.u32 %v328_v2, %v326_v52  ;;  %2692 = vset.pattern.permute.xlu0 %v2703_v13  ;;  %2693 = vset.pattern.permute.xlu1 %v2703_v13  ;;  %v739_v18 = vrot.slane %v737_v11, 1  ;;  %v1623_v57 = vld [vmem:[%s3659_s2 + $0x30] sm:$0xff]  ;;  %v1621_v62 = vld [vmem:[%s3659_s2 + $0x20] sm:$0xff] }
  0x1c   : > { %1069 = vmatpush.bf16.msra.mxu1 %v2656_v60  ;;  %v729_v9 = vshrl.u32 %v625_v5, 16  ;;  %v732_v10 = vshll.u32 %v625_v5, 16  ;;  %2694 = vset.pattern.permute.xlu2 %v2703_v13  ;;  %v742_v19 = vrot.slane %v740_v12, 2  ;;  %v631_v26 = vrot.slane %v625_v5, 1  ;;  %v597_v11 = vld [vmem:[%s2784_s22 + $0x2c] sm:$0x1] }
  0x1d   : > { %982 = vmatpush.bf16.msra.mxu0 %v2646_v59  ;;  %1130 = vmatpush.bf16.msra.mxu2 %v2658_v61  ;;  %v334_v8 = vrot.slane %v332_v3, 1  ;;  %v746_v28 = vshrl.u32 %v2873_v25, 16  ;;  %v749_v29 = vshll.u32 %v2873_v25, 16  ;;  %v634_v41 = vrot.slane %v2873_v25, 1  ;;  %v718_v59 = vld [vmem:[%s2784_s22 + $0x2c] sm:$0x3] }
  0x1e   : > { %1176 = vmatpush.bf16.msra.mxu3 %v2654_v63  ;;  %v731_v16 = vrot.slane %v729_v9, 1  ;;  %v734_v17 = vrot.slane %v732_v10, 2  ;;  %1650 = vperm.xlu0 %2692, %v1617_v20   ;;  %v743_v22 = vor.u32 %v742_v19, %v739_v18  ;;  %v755_v43 = vshrl.u32 %v2893_v35, 16  ;;  %v1624_v63 = vld [vmem:[%s3659_s2 + $0x38] sm:$0xff]  ;;  %v2668_v20 = vld [vmem:[%s3658_s1 + $0xe8] sm:$0xff] }
  0x1f   : > { %v335_v15 = vsel %vm291_vm2, %v330_v7, %v334_v8  ;;  %v748_v31 = vrot.slane %v746_v28, 1  ;;  %v751_v32 = vrot.slane %v749_v29, 2  ;;  %1660 = vperm.xlu1 %2693, %v1619_v33   ;;  %v758_v44 = vshll.u32 %v2893_v35, 16  ;;  %1670 = vperm.xlu2 %2694, %v1621_v62   ;;  %v2666_v19 = vld [vmem:[%s3658_s1 + $0xd8] sm:$0xff] }
  0x20   : > { %v735_v21 = vor.u32 %v734_v17, %v731_v16  ;;  %v636_v51 = vrot.slane %v2893_v35, 1  ;;  %v725_v61 = vunpack.c.l.b16 %v718_v59  ;;  %v2664_v16 = vld [vmem:[%s3658_s1 + $0xc8] sm:$0xff]  ;;  %v624_v17 = vunpack.c.l.b16 %v597_v11 }
  0x21   : > { %v752_v34 = vor.u32 %v751_v32, %v748_v31  ;;  %1131 = vmatpush.bf16.msra.mxu2 %v2657_v40  ;;  %v1626_v31 = vld [vmem:[%s3659_s2 + $0x48] sm:$0xff]  ;;  %vm1821_vm9 = vcmask 519424   ;;  %vm1871_vm10 = vcmask 516352   ;;  %vm1963_vm11 = vcmask 781824  }
  0x22   : > { %v2870_v24 = vsel %vm727_vm3, %v735_v21, %v743_v22  ;;  %1177 = vmatpush.bf16.msra.mxu3 %v2653_v42  ;;  %v2960_v3 = vpack.c.b16 %v725_v61, %v725_v61  ;;  %v630_v28 = vpack.c.b16 %v624_v17, %v624_v17  ;;  %vm2105_vm12 = vcmask 1044224  }
  0x23   : > { %2351 = vmatmul.msk.bf16.gmra.mxu1 %vm348_vm0, %v2627_v14  ;;  %v479_v14 = vsel %vm468_vm1, %v476_v50, %v478_v6  ;;  %v2931_v50 = vld [vmem:[%s2784_s22 + $0x24] sm:$0xff]  ;;  %vm2013_vm13 = vcmask 778752   ;;  %vm2155_vm14 = vcmask 1041152  }
  0x24   : > { %v764_v52 = vshrl.u32 %v2931_v50, 16  ;;  %v767_v53 = vshll.u32 %v2931_v50, 16  ;;  %v638_v5 = vrot.slane %v2931_v50, 1  ;;  %v773_v6 = vshrl.u32 %v2960_v3, 16 }
  0x25   : > { %v776_v7 = vshll.u32 %v2960_v3, 16 }
  0x26   : > { %1655 = vperm.xlu0 %2692, %v1618_v23   ;;  %v769_v56 = vrot.slane %v767_v53, 2  ;;  %v2968_v9 = vsel %vm468_vm1, %v636_v51, %v638_v5  ;;  %v775_v13 = vrot.slane %v773_v6, 1  ;;  %v1026_v53 = vrot.slane %v2851_v4, 2 }
  0x27   : > { %2372 = vmatmul.msk.bf16.gmra.mxu2 %vm348_vm0, %v473_v37  ;;  %2338 = vmatmul.msk.bf16.gmra.mxu0 %vm348_vm0, %v311_v38  ;;  %v2899_v37 = vsel %vm727_vm3, %v743_v22, %v752_v34 }
  0x28   : > { %2385 = vmatmul.msk.bf16.gmra.mxu3 %vm348_vm0, %v311_v38  ;;  %v2645_v38 = vld [vmem:[%s3658_s1 + $0x50] sm:$0xff]  ;;  %1665 = vperm.xlu1 %2693, %v1620_v36   ;;  %v640_v36 = vrot.slane %v630_v28, 1 }
  0x29   : > { %983 = vmatpush.bf16.msra.mxu0 %v2645_v38 }
  0x2e   : > { %1680 = vperm.xlu0 %2692, %v1623_v57  }
  0x30   : > { %1685 = vperm.xlu1 %2693, %v1624_v63  }
  0x33   : > { %2352 = vmatmul.msk.bf16.gmra.mxu1 %vm348_vm0, %v2628_v30  ;;  %v2881_v30 = vsel %vm468_vm1, %v631_v26, %v632_v27  ;;  %v2670_v26 = vld [vmem:[%s3658_s1 + $0xf8] sm:$0xff] }
  0x36   : > { %1695 = vperm.xlu0 %2692, %v1626_v31  }
  0x37   : > { %2373 = vmatmul.msk.bf16.gmra.mxu2 %vm348_vm0, %v475_v45  ;;  %2339 = vmatmul.msk.bf16.gmra.mxu0 %vm348_vm0, %v319_v46  ;;  %v2919_v45 = vsel %vm468_vm1, %v632_v27, %v634_v41 }
  0x38   : > { %2386 = vmatmul.msk.bf16.gmra.mxu3 %vm348_vm0, %v319_v46  ;;  %v757_v46 = vrot.slane %v755_v43, 1  ;;  %v3010_v43 = vsel %vm468_vm1, %v638_v5, %v640_v36 }
  0x43   : > { %2353 = vmatmul.msk.bf16.gmra.mxu1 %vm348_vm0, %v2629_v39  ;;  %v2655_v39 = vld [vmem:[%s3658_s1 + $0xa0] sm:$0xff] }
  0x44   : > { %1070 = vmatpush.bf16.msra.mxu1 %v2655_v39 }
  0x47   : > { %2374 = vmatmul.msk.bf16.gmra.mxu2 %vm348_vm0, %v477_v54  ;;  %2340 = vmatmul.msk.bf16.gmra.mxu0 %vm348_vm0, %v327_v55  ;;  %v2939_v54 = vsel %vm468_vm1, %v634_v41, %v636_v51 }
  0x48   : > { %2387 = vmatmul.msk.bf16.gmra.mxu3 %vm348_vm0, %v327_v55  ;;  %v766_v55 = vrot.slane %v764_v52, 1 }
  0x4a   : > { %v770_v60 = vor.u32 %v769_v56, %v766_v55 }
  0x53   : > { %2354 = vmatmul.msk.bf16.gmra.mxu1 %vm348_vm0, %v2630_v47  ;;  %v760_v47 = vrot.slane %v758_v44, 2 }
  0x55   : > { %v761_v48 = vor.u32 %v760_v47, %v757_v46 }
  0x57   : > { %2375 = vmatmul.msk.bf16.gmra.mxu2 %vm348_vm0, %v479_v14  ;;  %2341 = vmatmul.msk.bf16.gmra.mxu0 %vm348_vm0, %v335_v15  ;;  %v2928_v49 = vsel %vm727_vm3, %v752_v34, %v761_v48  ;;  %v2958_v2 = vsel %vm727_vm3, %v761_v48, %v770_v60  ;;  %v778_v14 = vrot.slane %v776_v7, 2  ;;  %v1015_v34 = vld [vmem:[%s2784_s22 + $0x4] sm:$0xc]  ;;  %v1028_v7 = vrot.slane %v2873_v25, 2 }
  0x58   : > { %2388 = vmatmul.msk.bf16.gmra.mxu3 %vm348_vm0, %v335_v15  ;;  %v1622_v15 = vld [vmem:[%s3659_s2 + $0x28] sm:$0xff]  ;;  %v1022_v40 = vunpack.c.l.b16 %v1015_v34  ;;  %v2667_v25 = vld [vmem:[%s3658_s1 + $0xe0] sm:$0xff] }
  0x59   : > { %1675 = vperm.xlu2 %2694, %v1622_v15   ;;  %v779_v22 = vor.u32 %v778_v14, %v775_v13  ;;  %v1029_v14 = vsel %vm1024_vm4, %v1026_v53, %v1028_v7  ;;  %v2663_v15 = vld [vmem:[%s3658_s1 + $0xc0] sm:$0xff] }
  0x5a   : > { %v1023_v47 = vpack.c.b16 %v615_v1, %v1022_v40 }
  0x5b   : > { %v3002_v33 = vsel %vm727_vm3, %v770_v60, %v779_v22 }
  0x5c   : > { %v1025_v52 = vrot.slane %v1023_v47, 2  ;;  %v1032_v47 = vrot.slane %v2931_v50, 2 }
  0x5e   : > { %v1027_v59 = vsel %vm1024_vm4, %v1025_v52, %v1026_v53 }
  0x61   : > { %1690 = vperm.xlu2 %2694, %v1625_v58  }
  0x63   : > { %2438 = vmatmul.msk.bf16.vlgmr.msrb.gmra.mxu1 %vm348_vm0, %v2870_v24 }
  0x64   : > { %1426 = vmatpush.bf16.msrb.mxu1 %v2666_v19 }
  0x67   : > { %2455 = vmatmul.msk.bf16.vlgmr.msrb.gmra.mxu2 %vm348_vm0, %v2870_v24  ;;  %2417 = vmatmul.msk.bf16.vlgmr.msrb.gmra.mxu0 %vm348_vm0, %v2881_v30 }
  0x68   : > { %2472 = vmatmul.msk.bf16.vlgmr.msrb.gmra.mxu3 %vm348_vm0, %v2870_v24  ;;  %1292 = vmatpush.bf16.msrb.mxu0 %v2664_v16 }
  0x69   : > { %1487 = vmatpush.bf16.msrb.mxu2 %v2668_v20  ;;  %1579 = vmatpush.bf16.msrb.mxu3 %v2670_v26 }
  0x6c   : > { %1293 = vmatpush.bf16.msrb.mxu0 %v2663_v15 }
  0x6d   : > { %1488 = vmatpush.bf16.msrb.mxu2 %v2667_v25 }
  0x73   : > { %2439 = vmatmul.msk.bf16.gmra.mxu1 %vm348_vm0, %v2899_v37 }
  0x77   : > { %2456 = vmatmul.msk.bf16.gmra.mxu2 %vm348_vm0, %v2899_v37  ;;  %2418 = vmatmul.msk.bf16.gmra.mxu0 %vm348_vm0, %v2919_v45 }
  0x78   : > { %2473 = vmatmul.msk.bf16.gmra.mxu3 %vm348_vm0, %v2899_v37 }
  0x83   : > { %2440 = vmatmul.msk.bf16.gmra.mxu1 %vm348_vm0, %v2928_v49 }
  0x87   : > { %2457 = vmatmul.msk.bf16.gmra.mxu2 %vm348_vm0, %v2928_v49  ;;  %2419 = vmatmul.msk.bf16.gmra.mxu0 %vm348_vm0, %v2939_v54 }
  0x88   : > { %2474 = vmatmul.msk.bf16.gmra.mxu3 %vm348_vm0, %v2928_v49 }
  0x90   : > { %v429_v0 = vpop.f32.mrf.mxu1 }
  0x93   : > { %2441 = vmatmul.msk.bf16.gmra.mxu1 %vm348_vm0, %v2958_v2 }
  0x94   : > { %v373_v8 = vpop.f32.mrf.mxu0 }
  0x95   : > { %v2970_v10 = vadd.f32 %v429_v0, %v373_v8 }
  0x97   : > { %2458 = vmatmul.msk.bf16.gmra.mxu2 %vm348_vm0, %v2958_v2  ;;  %2420 = vmatmul.msk.bf16.gmra.mxu0 %vm348_vm0, %v2968_v9 }
  0x98   : > { %v431_v12 = vpop.f32.mrf.mxu1  ;;  %2475 = vmatmul.msk.bf16.gmra.mxu3 %vm348_vm0, %v2958_v2 }
  0x9a   : > { %v516_v18 = vpop.f32.mrf.mxu2 }
  0x9b   : > { %v562_v21 = vpop.f32.mrf.mxu3 }
  0x9c   : > { %v2991_v23 = vadd.f32 %v562_v21, %v516_v18  ;;  %v375_v27 = vpop.f32.mrf.mxu0  ;;  %v2669_v18 = vld [vmem:[%s3658_s1 + $0xf0] sm:$0xff] }
  0x9d   : > { %v2996_v29 = vadd.f32 %v431_v12, %v375_v27  ;;  %1580 = vmatpush.bf16.msrb.mxu3 %v2669_v18  ;;  %v1030_v27 = vrot.slane %v2893_v35, 2 }
  0x9f   : > { %v1031_v36 = vsel %vm1024_vm4, %v1028_v7, %v1030_v27 }
  0xa0   : > { %v434_v32 = vpop.f32.mrf.mxu1 }
  0xa2   : > { %v518_v38 = vpop.f32.mrf.mxu2 }
  0xa3   : > { %2442 = vmatmul.msk.bf16.gmra.mxu1 %vm348_vm0, %v3002_v33  ;;  %v564_v39 = vpop.f32.mrf.mxu3 }
  0xa4   : > { %v3007_v41 = vadd.f32 %v564_v39, %v518_v38  ;;  %v378_v42 = vpop.f32.mrf.mxu0 }
  0xa5   : > { %v3012_v44 = vadd.f32 %v434_v32, %v378_v42 }
  0xa7   : > { %2459 = vmatmul.msk.bf16.gmra.mxu2 %vm348_vm0, %v3002_v33  ;;  %2421 = vmatmul.msk.bf16.gmra.mxu0 %vm348_vm0, %v3010_v43 }
  0xa8   : > { %v436_v46 = vpop.f32.mrf.mxu1  ;;  %2476 = vmatmul.msk.bf16.gmra.mxu3 %vm348_vm0, %v3002_v33 }
  0xaa   : > { %v521_v48 = vpop.f32.mrf.mxu2 }
  0xab   : > { %v567_v51 = vpop.f32.mrf.mxu3 }
  0xac   : > { %v3023_v55 = vadd.f32 %v567_v51, %v521_v48  ;;  %v380_v56 = vpop.f32.mrf.mxu0 }
  0xad   : > { %v3025_v57 = vadd.f32 %v436_v46, %v380_v56  ;;  %v1033_v56 = vsel %vm1024_vm4, %v1030_v27, %v1032_v47 }
  0xb0   : > { %v439_v1 = vpop.f32.mrf.mxu1 }
  0xb2   : > { %v523_v60 = vpop.f32.mrf.mxu2 }
  0xb3   : > { %2506 = vmatmul.msk.bf16.vlgmr.msra.gmra.mxu1 %vm348_vm0, %v1027_v59  ;;  %v569_v61 = vpop.f32.mrf.mxu3 }
  0xb4   : > { %v3032_v62 = vadd.f32 %v569_v61, %v523_v60  ;;  %v383_v4 = vpop.f32.mrf.mxu0  ;;  %v1204_v61 = vld [vmem:[%s2784_s22 + $0x8] sm:$0xc] }
  0xb5   : > { %v3034_v63 = vadd.f32 %v439_v1, %v383_v4  ;;  %v3101_v4 = vld [vmem:[%s2784_s22 + $0xc] sm:$0xf] }
  0xb6   : > { %v1232_v7 = vunpack.c.l.b16 %v3101_v4 }
  0xb7   : > { %2523 = vmatmul.msk.bf16.vlgmr.msra.gmra.mxu2 %vm348_vm0, %v1027_v59  ;;  %2485 = vmatmul.msk.bf16.vlgmr.msra.gmra.mxu0 %vm348_vm0, %v2881_v30  ;;  %v3095_v59 = vpop.permute.xlu0 %1650 }
  0xb8   : > { %v441_v0 = vpop.f32.mrf.mxu1  ;;  %2536 = vmatmul.msk.bf16.vlgmr.msra.gmra.mxu3 %vm348_vm0, %v2870_v24  ;;  %v2665_v24 = vld [vmem:[%s3658_s1 + $0xd0] sm:$0xff] }
  0xb9   : > { %1427 = vmatpush.bf16.msrb.mxu1 %v2665_v24 }
  0xba   : > { %v526_v5 = vpop.f32.mrf.mxu2 }
  0xbb   : > { %v572_v6 = vpop.f32.mrf.mxu3 }
  0xbc   : > { %v3042_v8 = vadd.f32 %v572_v6, %v526_v5  ;;  %v385_v11 = vpop.f32.mrf.mxu0  ;;  %v1231_v6 = vunpack.c.l.b16 %v1204_v61 }
  0xbd   : > { %v3044_v12 = vadd.f32 %v441_v0, %v385_v11 }
  0xbf   : > { %v3125_v25 = vpop.permute.xlu0 %1655 }
  0xc0   : > { %v444_v13 = vpop.f32.mrf.mxu1 }
  0xc2   : > { %v528_v30 = vpop.f32.mrf.mxu2 }
  0xc3   : > { %2507 = vmatmul.msk.bf16.gmra.mxu1 %vm348_vm0, %v1029_v14  ;;  %v574_v16 = vpop.f32.mrf.mxu3 }
  0xc4   : > { %v3057_v17 = vadd.f32 %v574_v16, %v528_v30  ;;  %v388_v19 = vpop.f32.mrf.mxu0  ;;  %v3123_v30 = vpack.c.b16 %v1232_v7, %v1231_v6 }
  0xc5   : > { %v3062_v20 = vadd.f32 %v444_v13, %v388_v19 }
  0xc7   : > { %2524 = vmatmul.msk.bf16.gmra.mxu2 %vm348_vm0, %v1029_v14  ;;  %2486 = vmatmul.msk.bf16.gmra.mxu0 %vm348_vm0, %v2919_v45 }
  0xc8   : > { %v446_v21 = vpop.f32.mrf.mxu1  ;;  %2537 = vmatmul.msk.bf16.gmra.mxu3 %vm348_vm0, %v2899_v37 }
  0xca   : > { %v531_v22 = vpop.f32.mrf.mxu2 }
  0xcb   : > { %v577_v26 = vpop.f32.mrf.mxu3 }
  0xcc   : > { %v3070_v28 = vadd.f32 %v577_v26, %v531_v22  ;;  %v390_v31 = vpop.f32.mrf.mxu0 }
  0xcd   : > { %v3072_v32 = vadd.f32 %v446_v21, %v390_v31  ;;  %v1344_v31 = vshll.u32 %v3123_v30, 16 }
  0xd0   : > { %v449_v34 = vpop.f32.mrf.mxu1 }
  0xd2   : > { %v533_v38 = vpop.f32.mrf.mxu2 }
  0xd3   : > { %2508 = vmatmul.msk.bf16.gmra.mxu1 %vm348_vm0, %v1031_v36  ;;  %v579_v39 = vpop.f32.mrf.mxu3 }
  0xd4   : > { %v3076_v45 = vadd.f32 %v579_v39, %v533_v38  ;;  %v393_v40 = vpop.f32.mrf.mxu0 }
  0xd5   : > { %v3078_v37 = vadd.f32 %v449_v34, %v393_v40 }
  0xd7   : > { %2525 = vmatmul.msk.bf16.gmra.mxu2 %vm348_vm0, %v1031_v36  ;;  %2487 = vmatmul.msk.bf16.gmra.mxu0 %vm348_vm0, %v2939_v54 }
  0xd8   : > { %v451_v35 = vpop.f32.mrf.mxu1  ;;  %2538 = vmatmul.msk.bf16.gmra.mxu3 %vm348_vm0, %v2928_v49 }
  0xda   : > { %v536_v42 = vpop.f32.mrf.mxu2 }
  0xdb   : > { %v582_v46 = vpop.f32.mrf.mxu3 }
  0xdc   : > { %v3086_v48 = vadd.f32 %v582_v46, %v536_v42  ;;  %v395_v51 = vpop.f32.mrf.mxu0 }
  0xdd   : > { %v3088_v52 = vadd.f32 %v451_v35, %v395_v51 }
  0xe0   : > { %v817_v53 = vpop.f32.mrf.mxu1 }
  0xe2   : > { %v538_v58 = vpop.f32.mrf.mxu2 }
  0xe3   : > { %2509 = vmatmul.msk.bf16.gmra.mxu1 %vm348_vm0, %v1033_v56  ;;  %v584_v54 = vpop.f32.mrf.mxu3 }
  0xe4   : > { %v3092_v1 = vadd.f32 %v584_v54, %v538_v58  ;;  %v678_v49 = vpop.f32.mrf.mxu0 }
  0xe5   : > { %v703_v50 = vadd.f32 %v678_v49, %v2970_v10  ;;  %v1346_v49 = vrot.slane %v1344_v31, 3  ;;  %v1248_v31 = vrot.slane %v3123_v30, 2 }
  0xe7   : > { %2526 = vmatmul.msk.bf16.gmra.mxu2 %vm348_vm0, %v1033_v56  ;;  %v842_v0 = vadd.f32 %v817_v53, %v703_v50  ;;  %2488 = vmatmul.msk.bf16.gmra.mxu0 %vm348_vm0, %v2968_v9  ;;  %v1525_v56 = vld [vmem:[%s2784_s22 + $0x8] sm:$0x8] }
  0xe8   : > { %v819_v60 = vpop.f32.mrf.mxu1  ;;  %2539 = vmatmul.msk.bf16.gmra.mxu3 %vm348_vm0, %v2958_v2  ;;  %v1034_v2 = vrot.slane %v2960_v3, 2  ;;  %v1532_v4 = vunpack.c.l.b16 %v1525_v56 }
  0xe9   : > { %v1627_v10 = vpack.c.bf16 %v842_v0, %v842_v0  ;;  %v1698_v14 = vmul.f32 %v3095_v59, %v842_v0 }
  0xea   : > { %v878_v5 = vpop.f32.mrf.mxu2  ;;  %v1035_v16 = vsel %vm1024_vm4, %v1032_v47, %v1034_v2 }
  0xeb   : > { %v3114_v11 = vadd.f32 %v878_v5, %v2991_v23  ;;  %v3116_v9 = vpop.f32.mrf.mxu3  ;;  %1638 = vst.msk [vmem:[%s3110_s21] sm:$0xf] %vm1637_vm5, %v1627_v10  ;;  %v3129_v23 = vld [vmem:[%s2784_s22 + $0x10] sm:$0xff]  ;;  %v1735_v19 = vmul.f32 %v1698_v14, %v842_v0  ;;  %v1708_v38 = vsel %vm348_vm0, %v1698_v14, 0.0 }
  0xec   : > { %v680_v13 = vpop.f32.mrf.mxu0  ;;  %v1349_v34 = vshrl.u32 %v3129_v23, 16  ;;  %v1352_v36 = vshll.u32 %v3129_v23, 16 }
  0xed   : > { %v704_v15 = vadd.f32 %v680_v13, %v2996_v29  ;;  %v1341_v29 = vshrl.u32 %v3123_v30, 16  ;;  %v1745_v46 = vsel %vm348_vm0, %v1735_v19, 0.0 }
  0xee   : > { %v1351_v50 = vrot.slane %v1349_v34, 2  ;;  %v1249_v34 = vrot.slane %v3129_v23, 2 }
  0xef   : > { %v843_v18 = vadd.f32 %v819_v60, %v704_v15  ;;  %v1343_v53 = vrot.slane %v1341_v29, 2  ;;  %v1354_v60 = vrot.slane %v1352_v36, 3  ;;  %v1536_v36 = vrot.slane %v3129_v23, 3 }
  0xf0   : > { %v822_v24 = vpop.f32.mrf.mxu1  ;;  %v1250_v56 = vsel %vm1024_vm4, %v1248_v31, %v1249_v34  ;;  %v3221_v31 = vld [vmem:[%s2784_s22 + $0x20] sm:$0xff] }
  0xf1   : > { %v1628_v3 = vpack.c.bf16 %v843_v18, %v843_v18  ;;  %v1699_v21 = vmul.f32 %v3125_v25, %v843_v18  ;;  %v1347_v2 = vor.u32 %v1346_v49, %v1343_v53  ;;  %v3163_v13 = vor.u32 %v1354_v60, %v1351_v50 }
  0xf2   : > { %v880_v22 = vpop.f32.mrf.mxu2 }
  0xf3   : > { %2510 = vmatmul.msk.bf16.gmra.mxu1 %vm348_vm0, %v1035_v16  ;;  %v3135_v26 = vadd.f32 %v880_v22, %v3007_v41  ;;  %v3137_v27 = vpop.f32.mrf.mxu3  ;;  %v1709_v39 = vsel %vm348_vm0, %v1699_v21, 0.0  ;;  %v1736_v40 = vmul.f32 %v1699_v21, %v843_v18  ;;  %1639 = vst.msk [vmem:[%s3110_s21 + $0x4] sm:$0xf] %vm1637_vm5, %v1628_v3  ;;  %v3146_v41 = vpop.permute.xlu1 %1660  ;;  %v1356_v21 = vsel %vm1339_vm6, %v1347_v2, %v3163_v13  ;;  %v3175_v22 = vld [vmem:[%s2784_s22 + $0x18] sm:$0xff] }
  0xf4   : > { %v1710_v35 = vadd.f32 %v1709_v39, %v1708_v38  ;;  %v683_v42 = vpop.f32.mrf.mxu0  ;;  %v1361_v30 = vshll.u32 %v3175_v22, 16 }
  0xf5   : > { %v1746_v47 = vsel %vm348_vm0, %v1736_v40, 0.0  ;;  %v705_v51 = vadd.f32 %v683_v42, %v3012_v44  ;;  %v1358_v42 = vshrl.u32 %v3175_v22, 16 }
  0xf6   : > { %v1747_v58 = vadd.f32 %v1746_v47, %v1745_v46 }
  0xf7   : > { %2527 = vmatmul.msk.bf16.gmra.mxu2 %vm348_vm0, %v1035_v16  ;;  %v844_v61 = vadd.f32 %v822_v24, %v705_v51  ;;  %2489 = vmatmul.msk.bf16.gmra.mxu0 %vm348_vm0, %v3010_v43  ;;  %v1533_v24 = vpack.c.b16 %v1232_v7, %v1532_v4  ;;  %v1363_v4 = vrot.slane %v1361_v30, 3 }
  0xf8   : > { %v824_v54 = vpop.f32.mrf.mxu1  ;;  %2540 = vmatmul.msk.bf16.gmra.mxu3 %vm348_vm0, %v3002_v33 }
  0xf9   : > { %v1629_v0 = vpack.c.bf16 %v844_v61, %v844_v61  ;;  %v1700_v44 = vmul.f32 %v3146_v41, %v844_v61  ;;  %v1535_v7 = vrot.slane %v1533_v24, 3 }
  0xfa   : > { %v883_v10 = vpop.f32.mrf.mxu2 }
  0xfb   : > { %v3159_v5 = vadd.f32 %v883_v10, %v3023_v55  ;;  %v3161_v6 = vpop.f32.mrf.mxu3  ;;  %v1711_v14 = vsel %vm348_vm0, %v1700_v44, 0.0  ;;  %v1737_v43 = vmul.f32 %v1700_v44, %v844_v61  ;;  %1640 = vst.msk [vmem:[%s3110_s21 + $0x8] sm:$0xf] %vm1637_vm5, %v1629_v0  ;;  %v3170_v3 = vpop.permute.xlu1 %1665  ;;  %v1360_v61 = vrot.slane %v1358_v42, 2 }
  0xfc   : > { %v1712_v33 = vadd.f32 %v1711_v14, %v1710_v35  ;;  %v685_v15 = vpop.f32.mrf.mxu0 }
  0xfd   : > { %v1748_v16 = vsel %vm348_vm0, %v1737_v43, 0.0  ;;  %v706_v55 = vadd.f32 %v685_v15, %v3025_v57  ;;  %v1364_v43 = vor.u32 %v1363_v4, %v1360_v61  ;;  %v3250_v4 = vpop.permute.xlu0 %1680 }
  0xfe   : > { %v1749_v18 = vadd.f32 %v1748_v16, %v1747_v58  ;;  %v3198_v58 = vpop.permute.xlu2 %1670 }
  0xff   : > { %v845_v29 = vadd.f32 %v824_v54, %v706_v55 }
 0x100   : > { %v827_v19 = vpop.f32.mrf.mxu1 }
 0x101   : > { %v1630_v38 = vpack.c.bf16 %v845_v29, %v845_v29  ;;  %v1701_v57 = vmul.f32 %v3170_v3, %v845_v29 }
 0x102   : > { %v885_v39 = vpop.f32.mrf.mxu2 }
 0x103   : > { %2586 = vmatmul.msk.bf16.vlgmr.msrb.gmra.mxu1 %vm348_vm0, %v1356_v21  ;;  %v3183_v40 = vadd.f32 %v885_v39, %v3032_v62  ;;  %v3185_v35 = vpop.f32.mrf.mxu3  ;;  %v1713_v46 = vsel %vm348_vm0, %v1701_v57, 0.0  ;;  %v1738_v47 = vmul.f32 %v1701_v57, %v845_v29  ;;  %1641 = vst.msk [vmem:[%s3110_s21 + $0xc] sm:$0xf] %vm1637_vm5, %v1630_v38  ;;  %v1537_v62 = vsel %vm1534_vm7, %v1535_v7, %v1536_v36 }
 0x104   : > { %v1714_v51 = vadd.f32 %v1713_v46, %v1712_v33  ;;  %v688_v53 = vpop.f32.mrf.mxu0  ;;  %v1251_v38 = vrot.slane %v3175_v22, 2  ;;  %v1538_v57 = vrot.slane %v3175_v22, 3  ;;  %v1330_v22 = vld [vmem:[%s2784_s22 + $0x30] sm:$0x7] }
 0x105   : > { %v1750_v54 = vsel %vm348_vm0, %v1738_v47, 0.0  ;;  %v707_v49 = vadd.f32 %v688_v53, %v3034_v63  ;;  %v1370_v47 = vshll.u32 %v3221_v31, 16 }
 0x106   : > { %v1751_v50 = vadd.f32 %v1750_v54, %v1749_v18  ;;  %v3216_v29 = vpop.permute.xlu2 %1675  ;;  %v1539_v54 = vsel %vm1534_vm7, %v1536_v36, %v1538_v57 }
 0x107   : > { %2603 = vmatmul.msk.bf16.vlgmr.msrb.gmra.mxu2 %vm348_vm0, %v1356_v21  ;;  %v846_v0 = vadd.f32 %v827_v19, %v707_v49  ;;  %2569 = vmatmul.msk.bf16.vlgmr.msrb.gmra.mxu0 %vm348_vm0, %v1250_v56 }
 0x108   : > { %v829_v60 = vpop.f32.mrf.mxu1  ;;  %2620 = vmatmul.msk.bf16.vlgmr.msrb.gmra.mxu3 %vm348_vm0, %v1537_v62 }
 0x109   : > { %v1631_v44 = vpack.c.bf16 %v846_v0, %v846_v0  ;;  %v1702_v10 = vmul.f32 %v3198_v58, %v846_v0 }
 0x10a   : > { %v888_v2 = vpop.f32.mrf.mxu2 }
 0x10b   : > { %v3207_v14 = vadd.f32 %v888_v2, %v3042_v8  ;;  %v3209_v63 = vpop.f32.mrf.mxu3  ;;  %v1715_v33 = vsel %vm348_vm0, %v1702_v10, 0.0  ;;  %v1739_v15 = vmul.f32 %v1702_v10, %v846_v0  ;;  %1642 = vst.msk [vmem:[%s3110_s21 + $0x10] sm:$0xf] %vm1637_vm5, %v1631_v44  ;;  %v1365_v8 = vsel %vm1339_vm6, %v3163_v13, %v1364_v43 }
 0x10c   : > { %v1716_v24 = vadd.f32 %v1715_v33, %v1714_v51  ;;  %v690_v16 = vpop.f32.mrf.mxu0  ;;  %v1367_v13 = vshrl.u32 %v3221_v31, 16  ;;  %v1372_v44 = vrot.slane %v1370_v47, 3 }
 0x10d   : > { %v1752_v55 = vsel %vm348_vm0, %v1739_v15, 0.0  ;;  %v708_v18 = vadd.f32 %v690_v16, %v3044_v12 }
 0x10e   : > { %v1753_v19 = vadd.f32 %v1752_v55, %v1751_v50  ;;  %v1369_v0 = vrot.slane %v1367_v13, 2  ;;  %v1540_v13 = vrot.slane %v3221_v31, 3 }
 0x10f   : > { %v847_v7 = vadd.f32 %v829_v60, %v708_v18 }
 0x110   : > { %v832_v21 = vpop.f32.mrf.mxu1  ;;  %v1373_v33 = vor.u32 %v1372_v44, %v1369_v0 }
 0x111   : > { %v1632_v39 = vpack.c.bf16 %v847_v7, %v847_v7  ;;  %v1703_v42 = vmul.f32 %v3216_v29, %v847_v7 }
 0x112   : > { %v890_v30 = vpop.f32.mrf.mxu2 }
 0x113   : > { %2587 = vmatmul.msk.bf16.gmra.mxu1 %vm348_vm0, %v1365_v8  ;;  %v3228_v12 = vadd.f32 %v890_v30, %v3057_v17  ;;  %v3230_v46 = vpop.f32.mrf.mxu3  ;;  %v1717_v51 = vsel %vm348_vm0, %v1703_v42, 0.0  ;;  %v1740_v53 = vmul.f32 %v1703_v42, %v847_v7  ;;  %1643 = vst.msk [vmem:[%s3110_s21 + $0x14] sm:$0xf] %vm1637_vm5, %v1632_v39  ;;  %v1252_v17 = vsel %vm1024_vm4, %v1249_v34, %v1251_v38  ;;  %v3265_v7 = vpop.permute.xlu1 %1685  ;;  %v3269_v39 = vld [vmem:[%s2784_s22 + $0x28] sm:$0xff] }
 0x114   : > { %v1718_v56 = vadd.f32 %v1717_v51, %v1716_v24  ;;  %v693_v62 = vpop.f32.mrf.mxu0  ;;  %v1253_v30 = vrot.slane %v3221_v31, 2 }
 0x115   : > { %v1754_v49 = vsel %vm348_vm0, %v1740_v53, 0.0  ;;  %v709_v50 = vadd.f32 %v693_v62, %v3062_v20  ;;  %v1379_v62 = vshll.u32 %v3269_v39, 16 }
 0x116   : > { %v1755_v60 = vadd.f32 %v1754_v49, %v1753_v19 }
 0x117   : > { %2604 = vmatmul.msk.bf16.gmra.mxu2 %vm348_vm0, %v1365_v8  ;;  %v848_v34 = vadd.f32 %v832_v21, %v709_v50  ;;  %2570 = vmatmul.msk.bf16.gmra.mxu0 %vm348_vm0, %v1252_v17 }
 0x118   : > { %v834_v61 = vpop.f32.mrf.mxu1  ;;  %2621 = vmatmul.msk.bf16.gmra.mxu3 %vm348_vm0, %v1539_v54 }
 0x119   : > { %v1633_v23 = vpack.c.bf16 %v848_v34, %v848_v34  ;;  %v1704_v36 = vmul.f32 %v3250_v4, %v848_v34 }
 0x11a   : > { %v893_v10 = vpop.f32.mrf.mxu2 }
 0x11b   : > { %v3256_v20 = vadd.f32 %v893_v10, %v3070_v28  ;;  %v3258_v2 = vpop.f32.mrf.mxu3  ;;  %v1719_v15 = vsel %vm348_vm0, %v1704_v36, 0.0  ;;  %v1741_v24 = vmul.f32 %v1704_v36, %v848_v34  ;;  %1644 = vst.msk [vmem:[%s3110_s21 + $0x18] sm:$0xf] %vm1637_vm5, %v1633_v23  ;;  %v1374_v28 = vsel %vm1339_vm6, %v1364_v43, %v1373_v33  ;;  %v3298_v23 = vpop.permute.xlu2 %1690 }
 0x11c   : > { %v1720_v16 = vadd.f32 %v1719_v15, %v1718_v56  ;;  %v695_v55 = vpop.f32.mrf.mxu0  ;;  %v1376_v43 = vshrl.u32 %v3269_v39, 16  ;;  %v1381_v10 = vrot.slane %v1379_v62, 3 }
 0x11d   : > { %v1756_v18 = vsel %vm348_vm0, %v1741_v24, 0.0  ;;  %v710_v19 = vadd.f32 %v695_v55, %v3072_v32 }
 0x11e   : > { %v1757_v21 = vadd.f32 %v1756_v18, %v1755_v60  ;;  %v1541_v60 = vsel %vm1534_vm7, %v1538_v57, %v1540_v13  ;;  %v1378_v36 = vrot.slane %v1376_v43, 2  ;;  %v1337_v18 = vunpack.c.l.b16 %v1330_v22 }
 0x11f   : > { %v849_v42 = vadd.f32 %v834_v61, %v710_v19 }
 0x120   : > { %v837_v8 = vpop.f32.mrf.mxu1  ;;  %v3309_v55 = vor.u32 %v1381_v10, %v1378_v36  ;;  %v3320_v62 = vpack.c.b16 %v1337_v18, %v1337_v18 }
 0x121   : > { %v1634_v47 = vpack.c.bf16 %v849_v42, %v849_v42  ;;  %v1705_v51 = vmul.f32 %v3265_v7, %v849_v42 }
 0x122   : > { %v895_v53 = vpop.f32.mrf.mxu2  ;;  %v1383_v43 = vsel %vm1339_vm6, %v1373_v33, %v3309_v55 }
 0x123   : > { %2588 = vmatmul.msk.bf16.gmra.mxu1 %vm348_vm0, %v1374_v28  ;;  %v3276_v32 = vadd.f32 %v895_v53, %v3076_v45  ;;  %v3278_v56 = vpop.f32.mrf.mxu3  ;;  %v1721_v17 = vsel %vm348_vm0, %v1705_v51, 0.0  ;;  %v1742_v54 = vmul.f32 %v1705_v51, %v849_v42  ;;  %1645 = vst.msk [vmem:[%s3110_s21 + $0x1c] sm:$0xf] %vm1637_vm5, %v1634_v47  ;;  %v1254_v45 = vsel %vm1024_vm4, %v1251_v38, %v1253_v30 }
 0x124   : > { %v1722_v49 = vadd.f32 %v1721_v17, %v1720_v16  ;;  %v698_v50 = vpop.f32.mrf.mxu0 }
 0x125   : > { %v1758_v61 = vsel %vm348_vm0, %v1742_v54, 0.0  ;;  %v711_v0 = vadd.f32 %v698_v50, %v3078_v37  ;;  %v1542_v50 = vrot.slane %v3269_v39, 3 }
 0x126   : > { %v1759_v44 = vadd.f32 %v1758_v61, %v1757_v21 }
 0x127   : > { %2605 = vmatmul.msk.bf16.gmra.mxu2 %vm348_vm0, %v1374_v28  ;;  %v850_v38 = vadd.f32 %v837_v8, %v711_v0  ;;  %2571 = vmatmul.msk.bf16.gmra.mxu0 %vm348_vm0, %v1254_v45  ;;  %v1543_v22 = vsel %vm1534_vm7, %v1540_v13, %v1542_v50 }
 0x128   : > { %v839_v34 = vpop.f32.mrf.mxu1  ;;  %2622 = vmatmul.msk.bf16.gmra.mxu3 %vm348_vm0, %v1541_v60 }
 0x129   : > { %v1635_v57 = vpack.c.bf16 %v850_v38, %v850_v38  ;;  %v1706_v15 = vmul.f32 %v3298_v23, %v850_v38 }
 0x12a   : > { %v898_v24 = vpop.f32.mrf.mxu2 }
 0x12b   : > { %v3305_v37 = vadd.f32 %v898_v24, %v3086_v48  ;;  %v3307_v16 = vpop.f32.mrf.mxu3  ;;  %v1723_v19 = vsel %vm348_vm0, %v1706_v15, 0.0  ;;  %v1743_v21 = vmul.f32 %v1706_v15, %v850_v38  ;;  %1646 = vst.msk [vmem:[%s3110_s21 + $0x20] sm:$0xf] %vm1637_vm5, %v1635_v57  ;;  %v3316_v48 = vpop.permute.xlu0 %1695  ;;  %v1214_v24 = vld [vmem:[%s2784_s22 + $0x30] sm:$0x3] }
 0x12c   : > { %v1724_v8 = vadd.f32 %v1723_v19, %v1722_v49  ;;  %v700_v28 = vpop.f32.mrf.mxu0  ;;  %v1255_v49 = vrot.slane %v3269_v39, 2 }
 0x12d   : > { %v1760_v42 = vsel %vm348_vm0, %v1743_v21, 0.0  ;;  %v712_v47 = vadd.f32 %v700_v28, %v3088_v52 }
 0x12e   : > { %v1761_v51 = vadd.f32 %v1760_v42, %v1759_v44  ;;  %v1388_v44 = vshll.u32 %v3320_v62, 16  ;;  %v1241_v42 = vunpack.c.l.b16 %v1214_v24 }
 0x12f   : > { %v851_v17 = vadd.f32 %v839_v34, %v712_v47 }
 0x130   : > { %v1072_v53 = vpop.f32.mrf.mxu1  ;;  %v1390_v28 = vrot.slane %v1388_v44, 3 }
 0x131   : > { %v1097_v54 = vadd.f32 %v1072_v53, %v3114_v11  ;;  %v1636_v45 = vpack.c.bf16 %v851_v17, %v851_v17  ;;  %v1707_v52 = vmul.f32 %v3316_v48, %v851_v17  ;;  %v1385_v11 = vshrl.u32 %v3320_v62, 16 }
 0x132   : > { %v900_v60 = vpop.f32.mrf.mxu2 }
 0x133   : > { %2589 = vmatmul.msk.bf16.gmra.mxu1 %vm348_vm0, %v1383_v43  ;;  %v1771_v61 = vpack.c.bf16 %v1097_v54, %v1097_v54  ;;  %v3328_v33 = vadd.f32 %v900_v60, %v3092_v1  ;;  %v3330_v0 = vpop.f32.mrf.mxu3  ;;  %v1725_v34 = vsel %vm348_vm0, %v1707_v52, 0.0  ;;  %v1744_v36 = vmul.f32 %v1707_v52, %v851_v17  ;;  %1647 = vst.msk [vmem:[%s3110_s21 + $0x24] sm:$0xf] %vm1637_vm5, %v1636_v45 }
 0x134   : > { %v1726_v10 = vadd.f32 %v1725_v34, %v1724_v8  ;;  %v3338_v38 = vpop.f32.mrf.mxu0  ;;  %v1256_v1 = vsel %vm1024_vm4, %v1253_v30, %v1255_v49  ;;  %v1832_v57 = vmul.f32 %v3095_v59, %v1097_v54  ;;  %v1387_v8 = vrot.slane %v1385_v11, 2 }
 0x135   : > { %1791 = vrot.lane.b32.xlu1 %v1771_v61, %s2704_s23  ;;  %v1762_v15 = vsel %vm348_vm0, %v1744_v36, 0.0 }
 0x136   : > { %v1727_v18 = vrot.slane %v1726_v10, 4  ;;  %v1763_v19 = vadd.f32 %v1762_v15, %v1761_v51  ;;  %v1873_v47 = vmul.f32 %v1832_v57, %v1097_v54  ;;  %v1391_v60 = vor.u32 %v1390_v28, %v1387_v8 }
 0x137   : > { %2606 = vmatmul.msk.bf16.gmra.mxu2 %vm348_vm0, %v1383_v43  ;;  %2572 = vmatmul.msk.bf16.gmra.mxu0 %vm348_vm0, %v1256_v1  ;;  %v1842_v61 = vsel %vm348_vm0, %v1832_v57, 0.0  ;;  %v1247_v1 = vpack.c.b16 %v1241_v42, %v1241_v42 }
 0x138   : > { %v1074_v21 = vpop.f32.mrf.mxu1  ;;  %2623 = vmatmul.msk.bf16.gmra.mxu3 %vm348_vm0, %v1543_v22  ;;  %v1728_v31 = vadd.f32 %v1727_v18, %v1726_v10  ;;  %v1764_v13 = vrot.slane %v1763_v19, 4  ;;  %v1883_v22 = vsel %vm348_vm0, %v1873_v47, 0.0  ;;  %v1392_v18 = vsel %vm1339_vm6, %v3309_v55, %v1391_v60 }
 0x139   : > { %v1098_v30 = vadd.f32 %v1074_v21, %v3135_v26  ;;  %v1257_v28 = vrot.slane %v1247_v1, 2 }
 0x13a   : > { %v1133_v17 = vpop.f32.mrf.mxu2  ;;  %v1729_v51 = vrot.slane %v1728_v31, 2  ;;  %v1765_v52 = vadd.f32 %v1764_v13, %v1763_v19 }
 0x13b   : > { %v1833_v53 = vmul.f32 %v3125_v25, %v1098_v30  ;;  %v1772_v45 = vpack.c.bf16 %v1098_v30, %v1098_v30  ;;  %v1179_v43 = vpop.f32.mrf.mxu3 }
 0x13c   : > { %v3360_v44 = vadd.f32 %v1179_v43, %v1133_v17  ;;  %v1730_v34 = vadd.f32 %v1729_v51, %v1728_v31  ;;  %v1766_v54 = vrot.slane %v1765_v52, 2  ;;  %v3363_v10 = vpop.f32.mrf.mxu0  ;;  %v1258_v43 = vsel %vm1024_vm4, %v1255_v49, %v1257_v28 }
 0x13d   : > { %v1843_v26 = vsel %vm348_vm0, %v1833_v53, 0.0  ;;  %v1874_v11 = vmul.f32 %v1833_v53, %v1098_v30  ;;  %1793 = vrot.lane.b32.xlu2 %v1772_v45, %s2704_s23  ;;  %v1544_v30 = vrot.slane %v3320_v62, 3 }
 0x13e   : > { %v1844_v36 = vadd.f32 %v1843_v26, %v1842_v61  ;;  %v1731_v19 = vrot.slane %v1730_v34, 1  ;;  %v1767_v21 = vadd.f32 %v1766_v54, %v1765_v52 }
 0x13f   : > { %v1884_v15 = vsel %vm348_vm0, %v1874_v11, 0.0  ;;  %v1545_v60 = vsel %vm1534_vm7, %v1542_v50, %v1544_v30 }
 0x140   : > { %v1885_v24 = vadd.f32 %v1884_v15, %v1883_v22  ;;  %v1077_v57 = vpop.f32.mrf.mxu1  ;;  %v1732_v31 = vadd.f32 %v1731_v19, %v1730_v34  ;;  %v1768_v13 = vrot.slane %v1767_v21, 1 }
 0x141   : > { %v1099_v8 = vadd.f32 %v1077_v57, %v3159_v5 }
 0x142   : > { %v1135_v47 = vpop.f32.mrf.mxu2  ;;  %1734 = vst.msk [vmem:[%s3374_s25] sm:$0x1] %vm1733_vm8, %v1732_v31  ;;  %v1769_v53 = vadd.f32 %v1768_v13, %v1767_v21 }
 0x143   : > { %v1834_v42 = vmul.f32 %v3146_v41, %v1099_v8  ;;  %2590 = vmatmul.msk.bf16.gmra.mxu1 %vm348_vm0, %v1392_v18  ;;  %v1773_v55 = vpack.c.bf16 %v1099_v8, %v1099_v8  ;;  %v1181_v5 = vpop.f32.mrf.mxu3 }
 0x144   : > { %v3388_v45 = vadd.f32 %v1181_v5, %v1135_v47  ;;  %v3391_v52 = vpop.f32.mrf.mxu0  ;;  %1770 = vst.msk [vmem:[%s3383_s28] sm:$0x1] %vm1733_vm8, %v1769_v53 }
 0x145   : > { %v1845_v62 = vsel %vm348_vm0, %v1834_v42, 0.0  ;;  %v1875_v17 = vmul.f32 %v1834_v42, %v1099_v8  ;;  %1795 = vrot.lane.b32.xlu0 %v1773_v55, %s2704_s23 }
 0x146   : > { %v1846_v51 = vadd.f32 %v1845_v62, %v1844_v36 }
 0x147   : > { %v1886_v61 = vsel %vm348_vm0, %v1875_v17, 0.0  ;;  %2607 = vmatmul.msk.bf16.gmra.mxu2 %vm348_vm0, %v1392_v18  ;;  %2573 = vmatmul.msk.bf16.gmra.mxu0 %vm348_vm0, %v1258_v43 }
 0x148   : > { %v1887_v26 = vadd.f32 %v1886_v61, %v1885_v24  ;;  %v1079_v11 = vpop.f32.mrf.mxu1  ;;  %2624 = vmatmul.msk.bf16.gmra.mxu3 %vm348_vm0, %v1545_v60 }
 0x149   : > { %v1100_v34 = vadd.f32 %v1079_v11, %v3183_v40 }
 0x14a   : > { %v1138_v54 = vpop.f32.mrf.mxu2 }
 0x14b   : > { %v1835_v49 = vmul.f32 %v3170_v3, %v1100_v34  ;;  %v1774_v39 = vpack.c.bf16 %v1100_v34, %v1100_v34  ;;  %v1184_v36 = vpop.f32.mrf.mxu3 }
 0x14c   : > { %v3408_v22 = vadd.f32 %v1184_v36, %v1138_v54  ;;  %v3411_v24 = vpop.f32.mrf.mxu0 }
 0x14d   : > { %v1847_v50 = vsel %vm348_vm0, %v1835_v49, 0.0  ;;  %v1876_v1 = vmul.f32 %v1835_v49, %v1100_v34  ;;  %1797 = vrot.lane.b32.xlu1 %v1774_v39, %s2704_s23 }
 0x14e   : > { %v1848_v15 = vadd.f32 %v1847_v50, %v1846_v51 }
 0x14f   : > { %v1888_v40 = vsel %vm348_vm0, %v1876_v1, 0.0 }
 0x150   : > { %v1889_v57 = vadd.f32 %v1888_v40, %v1887_v26  ;;  %v1082_v18 = vpop.f32.mrf.mxu1 }
 0x151   : > { %v1101_v19 = vadd.f32 %v1082_v18, %v3207_v14 }
 0x152   : > { %v1140_v8 = vpop.f32.mrf.mxu2 }
 0x153   : > { %v1836_v21 = vmul.f32 %v3198_v58, %v1101_v19  ;;  %v1775_v28 = vpack.c.bf16 %v1101_v19, %v1101_v19  ;;  %v1186_v30 = vpop.f32.mrf.mxu3 }
 0x154   : > { %v3417_v42 = vadd.f32 %v1186_v30, %v1140_v8  ;;  %v3420_v55 = vpop.f32.mrf.mxu0 }
 0x155   : > { %v1849_v31 = vsel %vm348_vm0, %v1836_v21, 0.0  ;;  %v1877_v13 = vmul.f32 %v1836_v21, %v1101_v19  ;;  %1799 = vrot.lane.b32.xlu2 %v1775_v28, %s2704_s23 }
 0x156   : > { %v1850_v47 = vadd.f32 %v1849_v31, %v1848_v15 }
 0x157   : > { %v1890_v5 = vsel %vm348_vm0, %v1877_v13, 0.0 }
 0x158   : > { %v1891_v53 = vadd.f32 %v1890_v5, %v1889_v57  ;;  %v1084_v62 = vpop.f32.mrf.mxu1 }
 0x159   : > { %v1102_v14 = vadd.f32 %v1084_v62, %v3228_v12 }
 0x15a   : > { %v1143_v51 = vpop.f32.mrf.mxu2 }
 0x15b   : > { %v1837_v17 = vmul.f32 %v3216_v29, %v1102_v14  ;;  %v1776_v43 = vpack.c.bf16 %v1102_v14, %v1102_v14  ;;  %v1189_v60 = vpop.f32.mrf.mxu3 }
 0x15c   : > { %v3426_v11 = vadd.f32 %v1189_v60, %v1143_v51  ;;  %v3429_v49 = vpop.f32.mrf.mxu0 }
 0x15d   : > { %v1851_v61 = vsel %vm348_vm0, %v1837_v17, 0.0  ;;  %v1878_v26 = vmul.f32 %v1837_v17, %v1102_v14  ;;  %1801 = vrot.lane.b32.xlu0 %v1776_v43, %s2704_s23 }
 0x15e   : > { %v1852_v34 = vadd.f32 %v1851_v61, %v1850_v47 }
 0x15f   : > { %v1892_v54 = vsel %vm348_vm0, %v1878_v26, 0.0 }
 0x160   : > { %v1893_v39 = vadd.f32 %v1892_v54, %v1891_v53  ;;  %v1087_v36 = vpop.f32.mrf.mxu1 }
 0x161   : > { %v1103_v12 = vadd.f32 %v1087_v36, %v3256_v20 }
 0x162   : > { %v1145_v1 = vpop.f32.mrf.mxu2 }
 0x163   : > { %v1838_v50 = vmul.f32 %v3250_v4, %v1103_v12  ;;  %v1777_v15 = vpack.c.bf16 %v1103_v12, %v1103_v12  ;;  %v1191_v40 = vpop.f32.mrf.mxu3 }
 0x164   : > { %v3435_v19 = vadd.f32 %v1191_v40, %v1145_v1  ;;  %v3438_v8 = vpop.f32.mrf.mxu0 }
 0x165   : > { %v1853_v57 = vsel %vm348_vm0, %v1838_v50, 0.0  ;;  %v1879_v18 = vmul.f32 %v1838_v50, %v1103_v12  ;;  %1803 = vrot.lane.b32.xlu1 %v1777_v15, %s2704_s23 }
 0x166   : > { %v1854_v21 = vadd.f32 %v1853_v57, %v1852_v34 }
 0x167   : > { %v1894_v28 = vsel %vm348_vm0, %v1879_v18, 0.0 }
 0x168   : > { %v1895_v30 = vadd.f32 %v1894_v28, %v1893_v39  ;;  %v1089_v31 = vpop.f32.mrf.mxu1 }
 0x169   : > { %v1104_v20 = vadd.f32 %v1089_v31, %v3276_v32 }
 0x16a   : > { %v1148_v47 = vpop.f32.mrf.mxu2 }
 0x16b   : > { %v1839_v13 = vmul.f32 %v3265_v7, %v1104_v20  ;;  %v1778_v5 = vpack.c.bf16 %v1104_v20, %v1104_v20  ;;  %v1194_v53 = vpop.f32.mrf.mxu3 }
 0x16c   : > { %v3444_v17 = vadd.f32 %v1194_v53, %v1148_v47  ;;  %v3447_v43 = vpop.f32.mrf.mxu0 }
 0x16d   : > { %v1855_v62 = vsel %vm348_vm0, %v1839_v13, 0.0  ;;  %v1880_v14 = vmul.f32 %v1839_v13, %v1104_v20  ;;  %1805 = vrot.lane.b32.xlu2 %v1778_v5, %s2704_s23 }
 0x16e   : > { %v1856_v51 = vadd.f32 %v1855_v62, %v1854_v21 }
 0x16f   : > { %v1896_v60 = vsel %vm348_vm0, %v1880_v14, 0.0 }
 0x170   : > { %v1897_v61 = vadd.f32 %v1896_v60, %v1895_v30  ;;  %v1092_v26 = vpop.f32.mrf.mxu1 }
 0x171   : > { %v1105_v32 = vadd.f32 %v1092_v26, %v3305_v37 }
 0x172   : > { %v1150_v54 = vpop.f32.mrf.mxu2 }
 0x173   : > { %v1840_v34 = vmul.f32 %v3298_v23, %v1105_v32  ;;  %v1779_v39 = vpack.c.bf16 %v1105_v32, %v1105_v32  ;;  %v1196_v36 = vpop.f32.mrf.mxu3 }
 0x174   : > { %v3453_v1 = vadd.f32 %v1196_v36, %v1150_v54  ;;  %v3456_v40 = vpop.f32.mrf.mxu0  ;;  %v986_v36 = vadd.f32 %v3338_v38, %v3116_v9  ;;  %v988_v38 = vadd.f32 %v3363_v10, %v3137_v27  ;;  %v991_v27 = vadd.f32 %v3391_v52, %v3161_v6 }
 0x175   : > { %v1857_v12 = vsel %vm348_vm0, %v1840_v34, 0.0  ;;  %v1881_v50 = vmul.f32 %v1840_v34, %v1105_v32  ;;  %1807 = vrot.lane.b32.xlu0 %v1779_v39, %s2704_s23 }
 0x176   : > { %v1858_v15 = vadd.f32 %v1857_v12, %v1856_v51 }
 0x177   : > { %v1898_v57 = vsel %vm348_vm0, %v1881_v50, 0.0 }
 0x178   : > { %v1899_v18 = vadd.f32 %v1898_v57, %v1897_v61  ;;  %v1094_v21 = vpop.f32.mrf.mxu1 }
 0x179   : > { %v1106_v37 = vadd.f32 %v1094_v21, %v3328_v33 }
 0x17a   : > { %v1153_v30 = vpop.f32.mrf.mxu2 }
 0x17b   : > { %v1841_v28 = vmul.f32 %v3316_v48, %v1106_v37  ;;  %v1780_v31 = vpack.c.bf16 %v1106_v37, %v1106_v37  ;;  %v1199_v20 = vpop.f32.mrf.mxu3 }
 0x17c   : > { %v3462_v5 = vadd.f32 %v1199_v20, %v1153_v30  ;;  %v3465_v62 = vpop.f32.mrf.mxu0 }
 0x17d   : > { %v1859_v13 = vsel %vm348_vm0, %v1841_v28, 0.0  ;;  %v1882_v47 = vmul.f32 %v1841_v28, %v1106_v37  ;;  %1809 = vrot.lane.b32.xlu1 %v1780_v31, %s2704_s23 }
 0x17e   : > { %v1860_v53 = vadd.f32 %v1859_v13, %v1858_v15 }
 0x17f   : > { %v1900_v14 = vsel %vm348_vm0, %v1882_v47, 0.0 }
 0x180   : > { %v1901_v51 = vadd.f32 %v1900_v14, %v1899_v18  ;;  %v1429_v60 = vpop.f32.mrf.mxu1  ;;  %v1861_v33 = vrot.slane %v1860_v53, 4 }
 0x182   : > { %v1862_v61 = vadd.f32 %v1861_v33, %v1860_v53  ;;  %v1902_v26 = vrot.slane %v1901_v51, 4  ;;  %v1155_v32 = vpop.f32.mrf.mxu2 }
 0x183   : > { %v1201_v34 = vpop.f32.mrf.mxu3 }
 0x184   : > { %v1863_v54 = vrot.slane %v1862_v61, 2  ;;  %v1903_v39 = vadd.f32 %v1902_v26, %v1901_v51  ;;  %v3470_v12 = vadd.f32 %v1201_v34, %v1155_v32  ;;  %v1295_v50 = vpop.f32.mrf.mxu0 }
 0x185   : > { %v1320_v21 = vadd.f32 %v1295_v50, %v986_v36 }
 0x186   : > { %v1864_v15 = vadd.f32 %v1863_v54, %v1862_v61  ;;  %v1904_v57 = vrot.slane %v1903_v39, 2 }
 0x187   : > { %v1454_v30 = vadd.f32 %v1429_v60, %v1320_v21 }
 0x188   : > { %v1431_v37 = vpop.f32.mrf.mxu1  ;;  %v1865_v28 = vrot.slane %v1864_v15, 1  ;;  %v1905_v18 = vadd.f32 %v1904_v57, %v1903_v39 }
 0x189   : > { %v1913_v47 = vpack.c.bf16 %v1454_v30, %v1454_v30  ;;  %v1974_v60 = vmul.f32 %v3095_v59, %v1454_v30 }
 0x18a   : > { %v1866_v31 = vadd.f32 %v1865_v28, %v1864_v15  ;;  %v1906_v20 = vrot.slane %v1905_v18, 1  ;;  %v1490_v13 = vpop.f32.mrf.mxu2 }
 0x18b   : > { %v1515_v53 = vadd.f32 %v1490_v13, %v3360_v44  ;;  %v1582_v14 = vpop.f32.mrf.mxu3  ;;  %1933 = vrot.lane.b32.xlu1 %v1913_v47, %s2705_s19  ;;  %v2015_v44 = vmul.f32 %v1974_v60, %v1454_v30  ;;  %v1984_v57 = vsel %vm348_vm0, %v1974_v60, 0.0 }
 0x18c   : > { %1868 = vrot.lane.b32.xlu2 %v1866_v31, %s2704_s23  ;;  %v1907_v9 = vadd.f32 %v1906_v20, %v1905_v18  ;;  %v1297_v51 = vpop.f32.mrf.mxu0 }
 0x18d   : > { %v1607_v33 = vadd.f32 %v1582_v14, %v1515_v53  ;;  %v1321_v61 = vadd.f32 %v1297_v51, %v988_v38 }
 0x18e   : > { %1909 = vrot.lane.b32.xlu0 %v1907_v9, %s2704_s23 }
 0x18f   : > { %v1455_v32 = vadd.f32 %v1431_v37, %v1321_v61  ;;  %v2055_v36 = vpack.c.bf16 %v1607_v33, %v1607_v33  ;;  %v2116_v10 = vmul.f32 %v3095_v59, %v1607_v33  ;;  %v2025_v59 = vsel %vm348_vm0, %v2015_v44, 0.0 }
 0x190   : > { %v1434_v26 = vpop.f32.mrf.mxu1 }
 0x191   : > { %v1975_v34 = vmul.f32 %v3125_v25, %v1455_v32  ;;  %v1914_v39 = vpack.c.bf16 %v1455_v32, %v1455_v32  ;;  %v2157_v31 = vmul.f32 %v2116_v10, %v1607_v33  ;;  %v2126_v14 = vsel %vm348_vm0, %v2116_v10, 0.0 }
 0x192   : > { %v1492_v54 = vpop.f32.mrf.mxu2 }
 0x193   : > { %v1516_v50 = vadd.f32 %v1492_v54, %v3388_v45  ;;  %v1584_v15 = vpop.f32.mrf.mxu3  ;;  %v1985_v21 = vsel %vm348_vm0, %v1975_v34, 0.0  ;;  %v2016_v37 = vmul.f32 %v1975_v34, %v1455_v32  ;;  %2075 = vrot.lane.b32.xlu1 %v2055_v36, %s2706_s29  ;;  %v2167_v33 = vsel %vm348_vm0, %v2157_v31, 0.0 }
 0x194   : > { %1935 = vrot.lane.b32.xlu2 %v1914_v39, %s2705_s19  ;;  %v1986_v28 = vadd.f32 %v1985_v21, %v1984_v57  ;;  %v1300_v6 = vpop.f32.mrf.mxu0 }
 0x195   : > { %v1608_v18 = vadd.f32 %v1584_v15, %v1516_v50  ;;  %v2026_v45 = vsel %vm348_vm0, %v2016_v37, 0.0  ;;  %v1322_v52 = vadd.f32 %v1300_v6, %v991_v27 }
 0x196   : > { %v2027_v20 = vadd.f32 %v2026_v45, %v2025_v59 }
 0x197   : > { %v1794_v30 = vpop.permute.xlu2 %1793  ;;  %v2117_v13 = vmul.f32 %v3125_v25, %v1608_v18  ;;  %v1456_v53 = vadd.f32 %v1434_v26, %v1322_v52  ;;  %v2056_v44 = vpack.c.bf16 %v1608_v18, %v1608_v18  ;;  %v993_v26 = vadd.f32 %v3411_v24, %v3185_v35 }
 0x198   : > { %1823 = vst.msk [vmem:[%s3110_s21 + $0x4] sm:$0xf] %vm1821_vm9, %v1794_v30  ;;  %v1436_v47 = vpop.f32.mrf.mxu1 }
 0x199   : > { %v2127_v9 = vsel %vm348_vm0, %v2117_v13, 0.0  ;;  %v2158_v38 = vmul.f32 %v2117_v13, %v1608_v18  ;;  %v1976_v60 = vmul.f32 %v3146_v41, %v1456_v53  ;;  %v1915_v32 = vpack.c.bf16 %v1456_v53, %v1456_v53 }
 0x19a   : > { %v2128_v51 = vadd.f32 %v2127_v9, %v2126_v14  ;;  %v1495_v61 = vpop.f32.mrf.mxu2 }
 0x19b   : > { %v2168_v34 = vsel %vm348_vm0, %v2158_v38, 0.0  ;;  %v1517_v25 = vadd.f32 %v1495_v61, %v3408_v22  ;;  %v1587_v54 = vpop.f32.mrf.mxu3  ;;  %v1987_v36 = vsel %vm348_vm0, %v1976_v60, 0.0  ;;  %v2017_v27 = vmul.f32 %v1976_v60, %v1456_v53  ;;  %1937 = vrot.lane.b32.xlu0 %v1915_v32, %s2705_s19 }
 0x19c   : > { %v2169_v39 = vadd.f32 %v2168_v34, %v2167_v33  ;;  %2077 = vrot.lane.b32.xlu2 %v2056_v44, %s2706_s29  ;;  %v1988_v10 = vadd.f32 %v1987_v36, %v1986_v28  ;;  %v1302_v15 = vpop.f32.mrf.mxu0 }
 0x19d   : > { %v1609_v50 = vadd.f32 %v1587_v54, %v1517_v25  ;;  %v2028_v57 = vsel %vm348_vm0, %v2017_v27, 0.0  ;;  %v1323_v21 = vadd.f32 %v1302_v15, %v993_v26 }
 0x19e   : > { %v2029_v37 = vadd.f32 %v2028_v57, %v2027_v20 }
 0x19f   : > { %v2118_v22 = vmul.f32 %v3146_v41, %v1609_v50  ;;  %v1457_v6 = vadd.f32 %v1436_v47, %v1323_v21  ;;  %v2057_v30 = vpack.c.bf16 %v1609_v50, %v1609_v50  ;;  %v996_v41 = vadd.f32 %v3420_v55, %v3209_v63 }
 0x1a0   : > { %v1439_v18 = vpop.f32.mrf.mxu1 }
 0x1a1   : > { %v2129_v35 = vsel %vm348_vm0, %v2118_v22, 0.0  ;;  %v2159_v24 = vmul.f32 %v2118_v22, %v1609_v50  ;;  %v1977_v45 = vmul.f32 %v3170_v3, %v1457_v6  ;;  %v1916_v31 = vpack.c.bf16 %v1457_v6, %v1457_v6 }
 0x1a2   : > { %v2130_v59 = vadd.f32 %v2129_v35, %v2128_v51  ;;  %v1497_v52 = vpop.f32.mrf.mxu2 }
 0x1a3   : > { %v2170_v28 = vsel %vm348_vm0, %v2159_v24, 0.0  ;;  %v1518_v13 = vadd.f32 %v1497_v52, %v3417_v42  ;;  %v1589_v53 = vpop.f32.mrf.mxu3  ;;  %v1989_v47 = vsel %vm348_vm0, %v1977_v45, 0.0  ;;  %v2018_v14 = vmul.f32 %v1977_v45, %v1457_v6  ;;  %2079 = vrot.lane.b32.xlu0 %v2057_v30, %s2706_s29  ;;  %1939 = vrot.lane.b32.xlu1 %v1916_v31, %s2705_s19 }
 0x1a4   : > { %v2171_v20 = vadd.f32 %v2170_v28, %v2169_v39  ;;  %v1990_v9 = vadd.f32 %v1989_v47, %v1988_v10  ;;  %v1305_v51 = vpop.f32.mrf.mxu0 }
 0x1a5   : > { %v1610_v38 = vadd.f32 %v1589_v53, %v1518_v13  ;;  %v2030_v60 = vsel %vm348_vm0, %v2018_v14, 0.0  ;;  %v1324_v61 = vadd.f32 %v1305_v51, %v996_v41 }
 0x1a6   : > { %v2031_v32 = vadd.f32 %v2030_v60, %v2029_v37 }
 0x1a7   : > { %v1792_v42 = vpop.permute.xlu1 %1791  ;;  %v2119_v44 = vmul.f32 %v3170_v3, %v1610_v38  ;;  %v1458_v55 = vadd.f32 %v1439_v18, %v1324_v61  ;;  %v2058_v36 = vpack.c.bf16 %v1610_v38, %v1610_v38  ;;  %v998_v3 = vadd.f32 %v3429_v49, %v3230_v46 }
 0x1a8   : > { %1822 = vst.msk [vmem:[%s3110_s21] sm:$0xf] %vm1821_vm9, %v1792_v42  ;;  %v1441_v63 = vpop.f32.mrf.mxu1 }
 0x1a9   : > { %v2131_v33 = vsel %vm348_vm0, %v2119_v44, 0.0  ;;  %v2160_v34 = vmul.f32 %v2119_v44, %v1610_v38  ;;  %v1978_v54 = vmul.f32 %v3198_v58, %v1458_v55  ;;  %v1917_v39 = vpack.c.bf16 %v1458_v55, %v1458_v55 }
 0x1aa   : > { %v2132_v25 = vadd.f32 %v2131_v33, %v2130_v59  ;;  %v1500_v26 = vpop.f32.mrf.mxu2 }
 0x1ab   : > { %v2172_v27 = vsel %vm348_vm0, %v2160_v34, 0.0  ;;  %v1519_v10 = vadd.f32 %v1500_v26, %v3426_v11  ;;  %v1592_v50 = vpop.f32.mrf.mxu3  ;;  %v1991_v57 = vsel %vm348_vm0, %v1978_v54, 0.0  ;;  %v2019_v21 = vmul.f32 %v1978_v54, %v1458_v55  ;;  %1941 = vrot.lane.b32.xlu2 %v1917_v39, %s2705_s19  ;;  %2081 = vrot.lane.b32.xlu1 %v2058_v36, %s2706_s29 }
 0x1ac   : > { %v2173_v15 = vadd.f32 %v2172_v27, %v2171_v20  ;;  %v1992_v37 = vadd.f32 %v1991_v57, %v1990_v9  ;;  %v1307_v18 = vpop.f32.mrf.mxu0 }
 0x1ad   : > { %v1611_v22 = vadd.f32 %v1592_v50, %v1519_v10  ;;  %v2032_v6 = vsel %vm348_vm0, %v2019_v21, 0.0  ;;  %v1325_v35 = vadd.f32 %v1307_v18, %v998_v3 }
 0x1ae   : > { %v2033_v24 = vadd.f32 %v2032_v6, %v2031_v32 }
 0x1af   : > { %v1800_v11 = vpop.permute.xlu2 %1799  ;;  %v2120_v59 = vmul.f32 %v3198_v58, %v1611_v22  ;;  %v1459_v46 = vadd.f32 %v1441_v63, %v1325_v35  ;;  %v2059_v53 = vpack.c.bf16 %v1611_v22, %v1611_v22  ;;  %v1001_v58 = vadd.f32 %v3438_v8, %v3258_v2 }
 0x1b0   : > { %1826 = vst.msk [vmem:[%s3110_s21 + $0x10] sm:$0xf] %vm1821_vm9, %v1800_v11  ;;  %v1444_v52 = vpop.f32.mrf.mxu1 }
 0x1b1   : > { %v2133_v49 = vsel %vm348_vm0, %v2120_v59, 0.0  ;;  %v2161_v45 = vmul.f32 %v2120_v59, %v1611_v22  ;;  %v1979_v31 = vmul.f32 %v3216_v29, %v1459_v46  ;;  %v1918_v13 = vpack.c.bf16 %v1459_v46, %v1459_v46 }
 0x1b2   : > { %v2134_v30 = vadd.f32 %v2133_v49, %v2132_v25  ;;  %v1502_v28 = vpop.f32.mrf.mxu2 }
 0x1b3   : > { %v2174_v41 = vsel %vm348_vm0, %v2161_v45, 0.0  ;;  %v1520_v20 = vadd.f32 %v1502_v28, %v3435_v19  ;;  %v1594_v47 = vpop.f32.mrf.mxu3  ;;  %v1993_v9 = vsel %vm348_vm0, %v1979_v31, 0.0  ;;  %v2020_v38 = vmul.f32 %v1979_v31, %v1459_v46  ;;  %1943 = vrot.lane.b32.xlu0 %v1918_v13, %s2705_s19  ;;  %2083 = vrot.lane.b32.xlu2 %v2059_v53, %s2706_s29 }
 0x1b4   : > { %v2175_v14 = vadd.f32 %v2174_v41, %v2173_v15  ;;  %v1994_v51 = vadd.f32 %v1993_v9, %v1992_v37  ;;  %v1310_v61 = vpop.f32.mrf.mxu0 }
 0x1b5   : > { %v1612_v60 = vadd.f32 %v1594_v47, %v1520_v20  ;;  %v2034_v42 = vsel %vm348_vm0, %v2020_v38, 0.0  ;;  %v1326_v32 = vadd.f32 %v1310_v61, %v1001_v58 }
 0x1b6   : > { %v2035_v44 = vadd.f32 %v2034_v42, %v2033_v24 }
 0x1b7   : > { %v1796_v19 = vpop.permute.xlu0 %1795  ;;  %v2121_v63 = vmul.f32 %v3216_v29, %v1612_v60  ;;  %v1460_v2 = vadd.f32 %v1444_v52, %v1326_v32  ;;  %v2060_v54 = vpack.c.bf16 %v1612_v60, %v1612_v60  ;;  %v1003_v29 = vadd.f32 %v3447_v43, %v3278_v56 }
 0x1b8   : > { %1824 = vst.msk [vmem:[%s3110_s21 + $0x8] sm:$0xf] %vm1821_vm9, %v1796_v19  ;;  %v1446_v36 = vpop.f32.mrf.mxu1 }
 0x1b9   : > { %v2135_v8 = vsel %vm348_vm0, %v2121_v63, 0.0  ;;  %v2162_v55 = vmul.f32 %v2121_v63, %v1612_v60  ;;  %v1980_v34 = vmul.f32 %v3250_v4, %v1460_v2  ;;  %v1919_v26 = vpack.c.bf16 %v1460_v2, %v1460_v2 }
 0x1ba   : > { %v2136_v33 = vadd.f32 %v2135_v8, %v2134_v30  ;;  %v1505_v25 = vpop.f32.mrf.mxu2 }
 0x1bb   : > { %v2176_v39 = vsel %vm348_vm0, %v2162_v55, 0.0  ;;  %v1521_v27 = vadd.f32 %v1505_v25, %v3444_v17  ;;  %v1597_v10 = vpop.f32.mrf.mxu3  ;;  %v1995_v3 = vsel %vm348_vm0, %v1980_v34, 0.0  ;;  %v2021_v15 = vmul.f32 %v1980_v34, %v1460_v2  ;;  %2085 = vrot.lane.b32.xlu0 %v2060_v54, %s2706_s29  ;;  %1945 = vrot.lane.b32.xlu1 %v1919_v26, %s2705_s19 }
 0x1bc   : > { %v2177_v50 = vadd.f32 %v2176_v39, %v2175_v14  ;;  %v1996_v57 = vadd.f32 %v1995_v3, %v1994_v51  ;;  %v1312_v37 = vpop.f32.mrf.mxu0 }
 0x1bd   : > { %v1613_v21 = vadd.f32 %v1597_v10, %v1521_v27  ;;  %v2036_v22 = vsel %vm348_vm0, %v2021_v15, 0.0  ;;  %v1327_v18 = vadd.f32 %v1312_v37, %v1003_v29 }
 0x1be   : > { %v2037_v6 = vadd.f32 %v2036_v22, %v2035_v44 }
 0x1bf   : > { %v1798_v17 = vpop.permute.xlu1 %1797  ;;  %v2122_v35 = vmul.f32 %v3250_v4, %v1613_v21  ;;  %v1461_v56 = vadd.f32 %v1446_v36, %v1327_v18  ;;  %v2061_v45 = vpack.c.bf16 %v1613_v21, %v1613_v21  ;;  %v1006_v4 = vadd.f32 %v3456_v40, %v3307_v16 }
 0x1c0   : > { %1825 = vst.msk [vmem:[%s3110_s21 + $0xc] sm:$0xf] %vm1821_vm9, %v1798_v17  ;;  %v1449_v20 = vpop.f32.mrf.mxu1 }
 0x1c1   : > { %v2137_v43 = vsel %vm348_vm0, %v2122_v35, 0.0  ;;  %v2163_v11 = vmul.f32 %v2122_v35, %v1613_v21  ;;  %v1981_v59 = vmul.f32 %v3265_v7, %v1461_v56  ;;  %v1920_v49 = vpack.c.bf16 %v1461_v56, %v1461_v56 }
 0x1c2   : > { %v2138_v24 = vadd.f32 %v2137_v43, %v2136_v33  ;;  %v1507_v46 = vpop.f32.mrf.mxu2 }
 0x1c3   : > { %v2178_v52 = vsel %vm348_vm0, %v2163_v11, 0.0  ;;  %v1522_v30 = vadd.f32 %v1507_v46, %v3453_v1  ;;  %v1599_v31 = vpop.f32.mrf.mxu3  ;;  %v1997_v13 = vsel %vm348_vm0, %v1981_v59, 0.0  ;;  %v2022_v53 = vmul.f32 %v1981_v59, %v1461_v56  ;;  %1947 = vrot.lane.b32.xlu2 %v1920_v49, %s2705_s19  ;;  %2087 = vrot.lane.b32.xlu1 %v2061_v45, %s2706_s29 }
 0x1c4   : > { %v2179_v28 = vadd.f32 %v2178_v52, %v2177_v50  ;;  %v1998_v41 = vadd.f32 %v1997_v13, %v1996_v57  ;;  %v1315_v58 = vpop.f32.mrf.mxu0 }
 0x1c5   : > { %v1614_v47 = vadd.f32 %v1599_v31, %v1522_v30  ;;  %v2038_v14 = vsel %vm348_vm0, %v2022_v53, 0.0  ;;  %v1328_v1 = vadd.f32 %v1315_v58, %v1006_v4 }
 0x1c6   : > { %v2039_v38 = vadd.f32 %v2038_v14, %v2037_v6 }
 0x1c7   : > { %v1806_v9 = vpop.permute.xlu2 %1805  ;;  %v2123_v51 = vmul.f32 %v3265_v7, %v1614_v47  ;;  %v1462_v16 = vadd.f32 %v1449_v20, %v1328_v1  ;;  %v2062_v44 = vpack.c.bf16 %v1614_v47, %v1614_v47  ;;  %v1008_v7 = vadd.f32 %v3465_v62, %v3330_v0 }
 0x1c8   : > { %1829 = vst.msk [vmem:[%s3110_s21 + $0x1c] sm:$0xf] %vm1821_vm9, %v1806_v9  ;;  %v1451_v10 = vpop.f32.mrf.mxu1 }
 0x1c9   : > { %v2139_v40 = vsel %vm348_vm0, %v2123_v51, 0.0  ;;  %v2164_v60 = vmul.f32 %v2123_v51, %v1614_v47  ;;  %v1982_v42 = vmul.f32 %v3298_v23, %v1462_v16  ;;  %v1921_v19 = vpack.c.bf16 %v1462_v16, %v1462_v16 }
 0x1ca   : > { %v2140_v61 = vadd.f32 %v2139_v40, %v2138_v24  ;;  %v1510_v32 = vpop.f32.mrf.mxu2 }
 0x1cb   : > { %v2180_v63 = vsel %vm348_vm0, %v2164_v60, 0.0  ;;  %v1523_v2 = vadd.f32 %v1510_v32, %v3462_v5  ;;  %v1602_v8 = vpop.f32.mrf.mxu3  ;;  %v1999_v33 = vsel %vm348_vm0, %v1982_v42, 0.0  ;;  %v2023_v34 = vmul.f32 %v1982_v42, %v1462_v16  ;;  %1949 = vrot.lane.b32.xlu0 %v1921_v19, %s2705_s19  ;;  %2089 = vrot.lane.b32.xlu2 %v2062_v44, %s2706_s29 }
 0x1cc   : > { %v2181_v55 = vadd.f32 %v2180_v63, %v2179_v28  ;;  %v2000_v25 = vadd.f32 %v1999_v33, %v1998_v41  ;;  %v1317_v26 = vpop.f32.mrf.mxu0 }
 0x1cd   : > { %v1615_v54 = vadd.f32 %v1602_v8, %v1523_v2  ;;  %v2040_v39 = vsel %vm348_vm0, %v2023_v34, 0.0  ;;  %v1329_v36 = vadd.f32 %v1317_v26, %v1008_v7 }
 0x1ce   : > { %v2041_v27 = vadd.f32 %v2040_v39, %v2039_v38 }
 0x1cf   : > { %v1802_v5 = vpop.permute.xlu0 %1801  ;;  %v2124_v29 = vmul.f32 %v3298_v23, %v1615_v54  ;;  %v1463_v0 = vadd.f32 %v1451_v10, %v1329_v36  ;;  %v2063_v21 = vpack.c.bf16 %v1615_v54, %v1615_v54 }
 0x1d0   : > { %1827 = vst.msk [vmem:[%s3110_s21 + $0x14] sm:$0xf] %vm1821_vm9, %v1802_v5 }
 0x1d1   : > { %v2141_v62 = vsel %vm348_vm0, %v2124_v29, 0.0  ;;  %v2165_v50 = vmul.f32 %v2124_v29, %v1615_v54  ;;  %v1983_v15 = vmul.f32 %v3316_v48, %v1463_v0  ;;  %v1922_v37 = vpack.c.bf16 %v1463_v0, %v1463_v0 }
 0x1d2   : > { %v2142_v3 = vadd.f32 %v2141_v62, %v2140_v61  ;;  %v1512_v57 = vpop.f32.mrf.mxu2 }
 0x1d3   : > { %v2182_v22 = vsel %vm348_vm0, %v2165_v50, 0.0  ;;  %v1524_v18 = vadd.f32 %v1512_v57, %v3470_v12  ;;  %v1604_v17 = vpop.f32.mrf.mxu3  ;;  %v2001_v23 = vsel %vm348_vm0, %v1983_v15, 0.0  ;;  %v2024_v35 = vmul.f32 %v1983_v15, %v1463_v0  ;;  %2091 = vrot.lane.b32.xlu0 %v2063_v21, %s2706_s29  ;;  %1951 = vrot.lane.b32.xlu1 %v1922_v37, %s2705_s19 }
 0x1d4   : > { %v2183_v6 = vadd.f32 %v2182_v22, %v2181_v55  ;;  %v2002_v43 = vadd.f32 %v2001_v23, %v2000_v25 }
 0x1d5   : > { %v1616_v56 = vadd.f32 %v1604_v17, %v1524_v18  ;;  %v2042_v11 = vsel %vm348_vm0, %v2024_v35, 0.0 }
 0x1d6   : > { %v2003_v46 = vrot.slane %v2002_v43, 4  ;;  %v2043_v12 = vadd.f32 %v2042_v11, %v2041_v27 }
 0x1d7   : > { %v1804_v24 = vpop.permute.xlu1 %1803  ;;  %v2125_v59 = vmul.f32 %v3316_v48, %v1616_v56  ;;  %v2064_v4 = vpack.c.bf16 %v1616_v56, %v1616_v56 }
 0x1d8   : > { %1828 = vst.msk [vmem:[%s3110_s21 + $0x18] sm:$0xf] %vm1821_vm9, %v1804_v24  ;;  %v2004_v52 = vadd.f32 %v2003_v46, %v2002_v43  ;;  %v2044_v30 = vrot.slane %v2043_v12, 4 }
 0x1d9   : > { %v2143_v49 = vsel %vm348_vm0, %v2125_v59, 0.0  ;;  %v2166_v45 = vmul.f32 %v2125_v59, %v1616_v56 }
 0x1da   : > { %v2144_v31 = vadd.f32 %v2143_v49, %v2142_v3  ;;  %v2005_v13 = vrot.slane %v2004_v52, 2  ;;  %v2045_v53 = vadd.f32 %v2044_v30, %v2043_v12 }
 0x1db   : > { %v2184_v28 = vsel %vm348_vm0, %v2166_v45, 0.0  ;;  %2093 = vrot.lane.b32.xlu1 %v2064_v4, %s2706_s29 }
 0x1dc   : > { %v2185_v41 = vadd.f32 %v2184_v28, %v2183_v6  ;;  %v2145_v20 = vrot.slane %v2144_v31, 4  ;;  %v2006_v48 = vadd.f32 %v2005_v13, %v2004_v52  ;;  %v2046_v47 = vrot.slane %v2045_v53, 2 }
 0x1de   : > { %v2146_v58 = vadd.f32 %v2145_v20, %v2144_v31  ;;  %v2186_v14 = vrot.slane %v2185_v41, 4  ;;  %v2007_v1 = vrot.slane %v2006_v48, 1  ;;  %v2047_v9 = vadd.f32 %v2046_v47, %v2045_v53 }
 0x1e0   : > { %v2147_v38 = vrot.slane %v2146_v58, 2  ;;  %v2187_v51 = vadd.f32 %v2186_v14, %v2185_v41  ;;  %v2008_v16 = vadd.f32 %v2007_v1, %v2006_v48  ;;  %v2048_v40 = vrot.slane %v2047_v9, 1 }
 0x1e2   : > { %v2148_v60 = vadd.f32 %v2147_v38, %v2146_v58  ;;  %v2188_v61 = vrot.slane %v2187_v51, 2  ;;  %2010 = vrot.lane.b32.xlu2 %v2008_v16, %s2705_s19  ;;  %v2049_v42 = vadd.f32 %v2048_v40, %v2047_v9 }
 0x1e4   : > { %v2189_v32 = vadd.f32 %v2188_v61, %v2187_v51  ;;  %2051 = vrot.lane.b32.xlu0 %v2049_v42, %s2705_s19  ;;  %v2149_v44 = vrot.slane %v2148_v60, 1 }
 0x1e6   : > { %v1869_v19 = vpop.permute.xlu2 %1868  ;;  %v2190_v2 = vrot.slane %v2189_v32, 1  ;;  %v2150_v8 = vadd.f32 %v2149_v44, %v2148_v60 }
 0x1e7   : > { %1872 = vst.msk [vmem:[%s3374_s25] sm:$0x1] %vm1871_vm10, %v1869_v19  ;;  %v1808_v63 = vpop.permute.xlu0 %1807 }
 0x1e8   : > { %1830 = vst.msk [vmem:[%s3110_s21 + $0x20] sm:$0xf] %vm1821_vm9, %v1808_v63  ;;  %v2191_v7 = vadd.f32 %v2190_v2, %v2189_v32 }
 0x1ea   : > { %2152 = vrot.lane.b32.xlu2 %v2150_v8, %s2706_s29 }
 0x1ec   : > { %2193 = vrot.lane.b32.xlu0 %v2191_v7, %s2706_s29 }
 0x1ee   : > { %v1936_v55 = vpop.permute.xlu2 %1935 }
 0x1ef   : > { %v1810_v33 = vpop.permute.xlu1 %1809  ;;  %1965 = vst.msk [vmem:[%s3110_s21 + $0x4] sm:$0xf] %vm1963_vm11, %v1936_v55 }
 0x1f0   : > { %1831 = vst.msk [vmem:[%s3110_s21 + $0x24] sm:$0xf] %vm1821_vm9, %v1810_v33 }
 0x1f6   : > { %v2078_v34 = vpop.permute.xlu2 %2077 }
 0x1f7   : > { %2107 = vst.msk [vmem:[%s3110_s21 + $0x4] sm:$0xf] %vm2105_vm12, %v2078_v34 }
 0x1fd   : > { %v1934_v25 = vpop.permute.xlu1 %1933 }
 0x1fe   : > { %1964 = vst.msk [vmem:[%s3110_s21] sm:$0xf] %vm1963_vm11, %v1934_v25 }
 0x200   : > { %v1910_v54 = vpop.permute.xlu0 %1909 }
 0x201   : > { %1912 = vst.msk [vmem:[%s3383_s28] sm:$0x1] %vm1871_vm10, %v1910_v54 }
 0x205   : > { %v1942_v26 = vpop.permute.xlu2 %1941  ;;  %v2076_v39 = vpop.permute.xlu1 %2075 }
 0x206   : > { %1968 = vst.msk [vmem:[%s3110_s21 + $0x10] sm:$0xf] %vm1963_vm11, %v1942_v26 }
 0x207   : > { %2106 = vst.msk [vmem:[%s3110_s21] sm:$0xf] %vm2105_vm12, %v2076_v39 }
 0x20d   : > { %v1938_v36 = vpop.permute.xlu0 %1937  ;;  %v2084_v5 = vpop.permute.xlu2 %2083 }
 0x20e   : > { %1966 = vst.msk [vmem:[%s3110_s21 + $0x8] sm:$0xf] %vm1963_vm11, %v1938_v36 }
 0x20f   : > { %2110 = vst.msk [vmem:[%s3110_s21 + $0x10] sm:$0xf] %vm2105_vm12, %v2084_v5 }
 0x215   : > { %v2080_v27 = vpop.permute.xlu0 %2079  ;;  %v1940_v10 = vpop.permute.xlu1 %1939 }
 0x216   : > { %2108 = vst.msk [vmem:[%s3110_s21 + $0x8] sm:$0xf] %vm2105_vm12, %v2080_v27 }
 0x217   : > { %1967 = vst.msk [vmem:[%s3110_s21 + $0xc] sm:$0xf] %vm1963_vm11, %v1940_v10 }
 0x21d   : > { %v1948_v29 = vpop.permute.xlu2 %1947  ;;  %v2082_v0 = vpop.permute.xlu1 %2081 }
 0x21e   : > { %1971 = vst.msk [vmem:[%s3110_s21 + $0x1c] sm:$0xf] %vm1963_vm11, %v1948_v29 }
 0x21f   : > { %2109 = vst.msk [vmem:[%s3110_s21 + $0xc] sm:$0xf] %vm2105_vm12, %v2082_v0 }
 0x225   : > { %v1944_v62 = vpop.permute.xlu0 %1943  ;;  %v2090_v50 = vpop.permute.xlu2 %2089 }
 0x226   : > { %1969 = vst.msk [vmem:[%s3110_s21 + $0x14] sm:$0xf] %vm1963_vm11, %v1944_v62 }
 0x227   : > { %2113 = vst.msk [vmem:[%s3110_s21 + $0x1c] sm:$0xf] %vm2105_vm12, %v2090_v50 }
 0x22d   : > { %v2086_v3 = vpop.permute.xlu0 %2085  ;;  %v1946_v15 = vpop.permute.xlu1 %1945 }
 0x22e   : > { %2111 = vst.msk [vmem:[%s3110_s21 + $0x14] sm:$0xf] %vm2105_vm12, %v2086_v3 }
 0x22f   : > { %1970 = vst.msk [vmem:[%s3110_s21 + $0x18] sm:$0xf] %vm1963_vm11, %v1946_v15 }
 0x235   : > { %v2088_v57 = vpop.permute.xlu1 %2087 }
 0x236   : > { %2112 = vst.msk [vmem:[%s3110_s21 + $0x18] sm:$0xf] %vm2105_vm12, %v2088_v57 }
 0x23c   : > { %v2011_v21 = vpop.permute.xlu2 %2010 }
 0x23d   : > { %2014 = vst.msk [vmem:[%s3374_s25] sm:$0x1] %vm2013_vm13, %v2011_v21  ;;  %v1950_v37 = vpop.permute.xlu0 %1949 }
 0x23e   : > { %1972 = vst.msk [vmem:[%s3110_s21 + $0x20] sm:$0xf] %vm1963_vm11, %v1950_v37 }
 0x244   : > { %v2153_v22 = vpop.permute.xlu2 %2152 }
 0x245   : > { %2156 = vst.msk [vmem:[%s3374_s25] sm:$0x1] %vm2155_vm14, %v2153_v22  ;;  %v2092_v18 = vpop.permute.xlu0 %2091  ;;  %v1952_v17 = vpop.permute.xlu1 %1951 }
 0x246   : > { %2114 = vst.msk [vmem:[%s3110_s21 + $0x20] sm:$0xf] %vm2105_vm12, %v2092_v18 }
 0x247   : > { %1973 = vst.msk [vmem:[%s3110_s21 + $0x24] sm:$0xf] %vm1963_vm11, %v1952_v17 }
 0x24d   : > { %v2094_v6 = vpop.permute.xlu1 %2093 }
 0x24e   : > { %2115 = vst.msk [vmem:[%s3110_s21 + $0x24] sm:$0xf] %vm2105_vm12, %v2094_v6 }
 0x256   : > { %v2052_v23 = vpop.permute.xlu0 %2051 }
 0x257   : > { %2054 = vst.msk [vmem:[%s3383_s28] sm:$0x1] %vm2013_vm13, %v2052_v23 }
 0x25e   : > { %v2194_v35 = vpop.permute.xlu0 %2193 }
 0x25f   : > { %2196 = vst.msk [vmem:[%s3383_s28] sm:$0x1] %vm2155_vm14, %v2194_v35 }
 0x260 PF: > { %s16_s18 = sadd.s32 1, %s2701_s18  }
 0x261   : > { %p13_p4 = scmp.ge.s32.totalorder %s16_s18, 4  }
 0x263   :  { %15 = sbr.rel (!%p13_p4) target bundleno = 1 (0x1), region = 101 }

// kernel: generator_forward.13
= control target key start
LH: loop header
LB: loop body
LE: loop exit
PB: predicated region body
PF: predicated region fallthrough
CT: control target
= control target key end

     0   :  { %s5747_s9 = smov 0   ;;  %s7840_s0 = inlined_call_operand.vmem [shape: bf16[2,328,32], index: 0, kind: input, shape index: {}]   ;;  %s7841_s1 = inlined_call_operand.vmem [shape: bf16[16,32,32], index: 1, kind: input, shape index: {}]   ;;  %s7842_s2 = inlined_call_operand.vmem [shape: f32[2,288,128], index: 2, kind: output, shape index: {}]  }
   0x1 LB: > { %s4624_s10 = sadd.s32 4294967295, %s5727_s9   ;;  %p4628_p0 = scmp.ge.s32.totalorder %s5727_s9, 1  ;;  %s5727_s9 = sphi %s5747_s9, %s12_s9  }
   0x2   : > { %p112_p1 = scmp.lt.s32.totalorder %s5727_s9, 3 }
   0x4   : > { %p113_p2 = pnand %p4628_p0, %p112_p1 }
   0x6   : > { %116 = sbr.rel (%p113_p2) target bundleno = 1422 (0x58e), region = 28 }
   0xb   : > { %v5331_v0 = vld [vmem:[%s7841_s1 + $0x8] sm:$0xff]  ;;  %v5337_v1 = vld [vmem:[%s7841_s1 + $0x38] sm:$0xff]  ;;  %p134_p3 = scmp.lt.s32.totalorder %s4624_s10, 1  ;;  %v5330_v4 = vld [vmem:[%s7841_s1] sm:$0xff]  ;;  %vm445_vm0 = vcmask 261120   ;;  %vm760_vm1 = vcmask 1046528  }
   0xc   : > { %v5333_v2 = vld [vmem:[%s7841_s1 + $0x18] sm:$0xff]  ;;  %v5335_v3 = vld [vmem:[%s7841_s1 + $0x28] sm:$0xff]  ;;  %653 = vmatpush.bf16.msra.mxu1 %v5331_v0  ;;  %870 = vmatpush.bf16.msra.mxu2 %v5337_v1  ;;  %v5336_v5 = vld [vmem:[%s7841_s1 + $0x30] sm:$0xff]  ;;  %vm284_vm2 = vsmask.f32 7424  ;;  %vm2226_vm4 = vcmask 1045504  }
   0xd   : > { %s8107_s10 = smov (!%p134_p3, %s4624_s10), 1  ;;  %506 = vmatpush.bf16.msra.mxu0 %v5333_v2  ;;  %981 = vmatpush.bf16.msra.mxu3 %v5335_v3  ;;  %v5332_v6 = vld [vmem:[%s7841_s1 + $0x10] sm:$0xff]  ;;  %v5334_v7 = vld [vmem:[%s7841_s1 + $0x20] sm:$0xff]  ;;  %v5356_v8 = vld [vmem:[%s7841_s1 + $0x48] sm:$0xff]  ;;  %vm1461_vm3 = vsmask.f32 6400 }
   0xe   : > { %s5403_s27 = smul.u32 164, %s8107_s10  ;;  %v5360_v9 = vld [vmem:[%s7841_s1 + $0x68] sm:$0xff]  ;;  %v5362_v10 = vld [vmem:[%s7841_s1 + $0x78] sm:$0xff]  ;;  %s5729_s3 = smov 32   ;;  %vm4098_vm5 = vcmask 523520   ;;  %vm3607_vm7 = vcmask 1044480  }
   0xf   : > { %v5364_v11 = vld [vmem:[%s7841_s1 + $0x88] sm:$0xff]  ;;  %s5404_s12 = smul.u32 288, %s8107_s10  ;;  %vm3074_vm6 = vsmask.f32 5376  ;;  %s5730_s4 = smov 64   ;;  %vm4315_vm8 = vcmask 785920  }
  0x10   : > { %654 = vmatpush.bf16.msra.mxu1 %v5330_v4  ;;  %s5794_s8 = scalar_lea.vmem %s7840_s0, %s5403_s27  ;;  %871 = vmatpush.bf16.msra.mxu2 %v5336_v5  ;;  %s5731_s5 = smov 96   ;;  %vm4532_vm9 = vcmask 1048320  }
  0x11   : > { %v5397_v12 = vld [vmem:[%s5794_s8] sm:$0xff]   ;;  %507 = vmatpush.bf16.msra.mxu0 %v5332_v6  ;;  %982 = vmatpush.bf16.msra.mxu3 %v5334_v7  ;;  %v5313_v14 = vld [vmem:[%s5794_s8 + $0x8] sm:$0xff]  ;;  %v5314_v27 = vld [vmem:[%s5794_s8 + $0x10] sm:$0xff]  ;;  %s6280_s15 = scalar_lea.vmem %s7842_s2, %s5404_s12 }
  0x12   : > { %v5400_v13 = vld [vmem:[%s5794_s8] sm:$0xf0]  ;;  %v286_v15 = vshrl.u32 %v5397_v12, 16  ;;  %v288_v16 = vshll.u32 %v5397_v12, 16  ;;  %v5401_v17 = vld [vmem:[%s5794_s8] sm:$0xe] }
  0x13   : > { %4737 = vmatmul.msk.bf16.vlgmr.msra.gmra.mxu1 %vm445_vm0, %v5397_v12  ;;  %v5402_v18 = vor.u32 %v5401_v17, %v5400_v13  ;;  %v762_v19 = vrot.slane %v5313_v14, 1  ;;  %v293_v20 = vshll.u32 %v5313_v14, 16  ;;  %v297_v28 = vshrl.u32 %v5313_v14, 16  ;;  %v5315_v35 = vld [vmem:[%s5794_s8 + $0x18] sm:$0xff]  ;;  %v5316_v43 = vld [vmem:[%s5794_s8 + $0x20] sm:$0xff]  ;;  %v5317_v51 = vld [vmem:[%s5794_s8 + $0x28] sm:$0xff] }
  0x14   : > { %1704 = vmatpush.bf16.msrb.mxu1 %v5360_v9  ;;  %1856 = vmatpush.bf16.msrb.mxu2 %v5362_v10  ;;  %v290_v21 = vrot.slane %v288_v16, 1  ;;  %v301_v29 = vshll.u32 %v5314_v27, 16  ;;  %v764_v30 = vrot.slane %v5314_v27, 1  ;;  %v305_v36 = vshrl.u32 %v5314_v27, 16  ;;  %v5318_v59 = vld [vmem:[%s5794_s8 + $0x30] sm:$0xff]  ;;  %v5319_v3 = vld [vmem:[%s5794_s8 + $0x38] sm:$0xff] }
  0x15   : > { %1318 = vmatpush.bf16.msrb.mxu0 %v5356_v8  ;;  %2008 = vmatpush.bf16.msrb.mxu3 %v5364_v11  ;;  %v761_v22 = vrot.slane %v5402_v18, 1  ;;  %v295_v23 = vrot.slane %v293_v20, 1  ;;  %v309_v37 = vshll.u32 %v5315_v35, 16  ;;  %v766_v38 = vrot.slane %v5315_v35, 1  ;;  %v5320_v11 = vld [vmem:[%s5794_s8 + $0x40] sm:$0xff]  ;;  %v5321_v20 = vld [vmem:[%s5794_s8 + $0x48] sm:$0xff] }
  0x16   : > { %v291_v24 = vor.u32 %v290_v21, %v286_v15  ;;  %v303_v32 = vrot.slane %v301_v29, 1  ;;  %v765_v33 = vsel %vm760_vm1, %v762_v19, %v764_v30  ;;  %v313_v44 = vshrl.u32 %v5315_v35, 16  ;;  %v5359_v21 = vld [vmem:[%s7841_s1 + $0x60] sm:$0xff] }
  0x17   : > { %v763_v25 = vsel %vm760_vm1, %v761_v22, %v762_v19  ;;  %v299_v31 = vor.u32 %v297_v28, %v295_v23  ;;  %v311_v40 = vrot.slane %v309_v37, 1  ;;  %v767_v41 = vsel %vm760_vm1, %v764_v30, %v766_v38  ;;  %v5355_v19 = vld [vmem:[%s7841_s1 + $0x40] sm:$0xff]  ;;  %v5361_v22 = vld [vmem:[%s7841_s1 + $0x70] sm:$0xff] }
  0x18   : > { %4771 = vmatmul.msk.bf16.vlgmr.msra.gmra.mxu2 %vm445_vm0, %v763_v25  ;;  %v296_v26 = vsel %vm284_vm2, %v291_v24, %v295_v23  ;;  %v307_v39 = vor.u32 %v305_v36, %v303_v32  ;;  %v317_v45 = vshll.u32 %v5316_v43, 16  ;;  %v768_v46 = vrot.slane %v5316_v43, 1  ;;  %1705 = vmatpush.bf16.msrb.mxu1 %v5359_v21  ;;  %v5363_v23 = vld [vmem:[%s7841_s1 + $0x80] sm:$0xff] }
  0x19   : > { %4711 = vmatmul.msk.bf16.vlgmr.msra.gmra.mxu0 %vm445_vm0, %v296_v26  ;;  %4797 = vmatmul.msk.bf16.vlgmr.msra.gmra.mxu3 %vm445_vm0, %v296_v26  ;;  %v304_v34 = vsel %vm284_vm2, %v299_v31, %v303_v32  ;;  %v315_v47 = vor.u32 %v313_v44, %v311_v40  ;;  %v321_v52 = vshrl.u32 %v5316_v43, 16  ;;  %v325_v53 = vshll.u32 %v5317_v51, 16 }
  0x1a   : > { %v312_v42 = vsel %vm284_vm2, %v307_v39, %v311_v40  ;;  %v319_v48 = vrot.slane %v317_v45, 1  ;;  %v769_v49 = vsel %vm760_vm1, %v766_v38, %v768_v46  ;;  %v770_v54 = vrot.slane %v5317_v51, 1  ;;  %1319 = vmatpush.bf16.msrb.mxu0 %v5355_v19  ;;  %1857 = vmatpush.bf16.msrb.mxu2 %v5361_v22 }
  0x1b   : > { %v327_v56 = vrot.slane %v325_v53, 1  ;;  %v329_v60 = vshrl.u32 %v5317_v51, 16  ;;  %v333_v61 = vshll.u32 %v5318_v59, 16  ;;  %v772_v62 = vrot.slane %v5318_v59, 1  ;;  %2009 = vmatpush.bf16.msrb.mxu3 %v5363_v23 }
  0x1c   : > { %v320_v50 = vsel %vm284_vm2, %v315_v47, %v319_v48  ;;  %v323_v55 = vor.u32 %v321_v52, %v319_v48  ;;  %v771_v57 = vsel %vm760_vm1, %v768_v46, %v770_v54  ;;  %v337_v4 = vshrl.u32 %v5318_v59, 16 }
  0x1d   : > { %v331_v63 = vor.u32 %v329_v60, %v327_v56  ;;  %v335_v0 = vrot.slane %v333_v61, 1  ;;  %v773_v1 = vsel %vm760_vm1, %v770_v54, %v772_v62  ;;  %v341_v5 = vshll.u32 %v5319_v3, 16 }
  0x1e   : > { %v328_v58 = vsel %vm284_vm2, %v323_v55, %v327_v56  ;;  %v774_v6 = vrot.slane %v5319_v3, 1  ;;  %v345_v12 = vshrl.u32 %v5319_v3, 16  ;;  %v349_v13 = vshll.u32 %v5320_v11, 16  ;;  %v5323_v55 = vld [vmem:[%s5794_s8 + $0x58] sm:$0xff] }
  0x1f   : > { %v336_v2 = vsel %vm284_vm2, %v331_v63, %v335_v0  ;;  %v339_v7 = vor.u32 %v337_v4, %v335_v0  ;;  %v343_v8 = vrot.slane %v341_v5, 1  ;;  %v353_v24 = vshrl.u32 %v5320_v11, 16 }
  0x20   : > { %v775_v9 = vsel %vm760_vm1, %v772_v62, %v774_v6  ;;  %v351_v16 = vrot.slane %v349_v13, 1  ;;  %v357_v25 = vshll.u32 %v5321_v20, 16  ;;  %v361_v40 = vshrl.u32 %v5321_v20, 16 }
  0x21   : > { %v344_v10 = vsel %vm284_vm2, %v339_v7, %v343_v8  ;;  %v347_v15 = vor.u32 %v345_v12, %v343_v8  ;;  %v373_v61 = vshll.u32 %v5323_v55, 16  ;;  %v782_v0 = vrot.slane %v5323_v55, 1 }
  0x22   : > { %v355_v28 = vor.u32 %v353_v24, %v351_v16  ;;  %v359_v29 = vrot.slane %v357_v25, 1 }
  0x23   : > { %4738 = vmatmul.msk.bf16.gmra.mxu1 %vm445_vm0, %v5313_v14  ;;  %v776_v14 = vrot.slane %v5320_v11, 1  ;;  %v352_v18 = vsel %vm284_vm2, %v347_v15, %v351_v16  ;;  %v377_v16 = vshrl.u32 %v5323_v55, 16 }
  0x24   : > { %v360_v32 = vsel %vm284_vm2, %v355_v28, %v359_v29  ;;  %v363_v45 = vor.u32 %v361_v40, %v359_v29 }
  0x25   : > { %v777_v17 = vsel %vm760_vm1, %v774_v6, %v776_v14 }
  0x28   : > { %4772 = vmatmul.msk.bf16.gmra.mxu2 %vm445_vm0, %v765_v33 }
  0x29   : > { %4712 = vmatmul.msk.bf16.gmra.mxu0 %vm445_vm0, %v304_v34  ;;  %4798 = vmatmul.msk.bf16.gmra.mxu3 %vm445_vm0, %v304_v34 }
  0x33   : > { %4739 = vmatmul.msk.bf16.gmra.mxu1 %vm445_vm0, %v5314_v27  ;;  %v778_v27 = vrot.slane %v5321_v20, 1 }
  0x35   : > { %v779_v30 = vsel %vm760_vm1, %v776_v14, %v778_v27 }
  0x38   : > { %4773 = vmatmul.msk.bf16.gmra.mxu2 %vm445_vm0, %v767_v41 }
  0x39   : > { %4713 = vmatmul.msk.bf16.gmra.mxu0 %vm445_vm0, %v312_v42  ;;  %4799 = vmatmul.msk.bf16.gmra.mxu3 %vm445_vm0, %v312_v42 }
  0x43   : > { %4740 = vmatmul.msk.bf16.gmra.mxu1 %vm445_vm0, %v5315_v35  ;;  %v5322_v35 = vld [vmem:[%s5794_s8 + $0x50] sm:$0xff] }
  0x44   : > { %v365_v41 = vshll.u32 %v5322_v35, 16  ;;  %v780_v44 = vrot.slane %v5322_v35, 1  ;;  %v369_v60 = vshrl.u32 %v5322_v35, 16 }
  0x46   : > { %v367_v46 = vrot.slane %v365_v41, 1  ;;  %v783_v6 = vsel %vm760_vm1, %v780_v44, %v782_v0 }
  0x48   : > { %4774 = vmatmul.msk.bf16.gmra.mxu2 %vm445_vm0, %v769_v49  ;;  %v368_v52 = vsel %vm284_vm2, %v363_v45, %v367_v46 }
  0x49   : > { %4714 = vmatmul.msk.bf16.gmra.mxu0 %vm445_vm0, %v320_v50  ;;  %4800 = vmatmul.msk.bf16.gmra.mxu3 %vm445_vm0, %v320_v50  ;;  %v781_v50 = vsel %vm760_vm1, %v778_v27, %v780_v44 }
  0x53   : > { %4741 = vmatmul.msk.bf16.gmra.mxu1 %vm445_vm0, %v5316_v43 }
  0x58   : > { %4775 = vmatmul.msk.bf16.gmra.mxu2 %vm445_vm0, %v771_v57 }
  0x59   : > { %4715 = vmatmul.msk.bf16.gmra.mxu0 %vm445_vm0, %v328_v58  ;;  %4801 = vmatmul.msk.bf16.gmra.mxu3 %vm445_vm0, %v328_v58 }
  0x63   : > { %4742 = vmatmul.msk.bf16.gmra.mxu1 %vm445_vm0, %v5317_v51 }
  0x68   : > { %4776 = vmatmul.msk.bf16.gmra.mxu2 %vm445_vm0, %v773_v1  ;;  %v371_v1 = vor.u32 %v369_v60, %v367_v46 }
  0x69   : > { %4716 = vmatmul.msk.bf16.gmra.mxu0 %vm445_vm0, %v336_v2  ;;  %4802 = vmatmul.msk.bf16.gmra.mxu3 %vm445_vm0, %v336_v2  ;;  %v375_v2 = vrot.slane %v373_v61, 1 }
  0x6b   : > { %v376_v8 = vsel %vm284_vm2, %v371_v1, %v375_v2  ;;  %v379_v21 = vor.u32 %v377_v16, %v375_v2 }
  0x73   : > { %4743 = vmatmul.msk.bf16.gmra.mxu1 %vm445_vm0, %v5318_v59 }
  0x78   : > { %4777 = vmatmul.msk.bf16.gmra.mxu2 %vm445_vm0, %v775_v9 }
  0x79   : > { %4717 = vmatmul.msk.bf16.gmra.mxu0 %vm445_vm0, %v344_v10  ;;  %4803 = vmatmul.msk.bf16.gmra.mxu3 %vm445_vm0, %v344_v10 }
  0x83   : > { %4744 = vmatmul.msk.bf16.gmra.mxu1 %vm445_vm0, %v5319_v3 }
  0x88   : > { %4778 = vmatmul.msk.bf16.gmra.mxu2 %vm445_vm0, %v777_v17 }
  0x89   : > { %4718 = vmatmul.msk.bf16.gmra.mxu0 %vm445_vm0, %v352_v18  ;;  %4804 = vmatmul.msk.bf16.gmra.mxu3 %vm445_vm0, %v352_v18 }
  0x90   : > { %v656_v26 = vpop.f32.mrf.mxu1 }
  0x93   : > { %4745 = vmatmul.msk.bf16.gmra.mxu1 %vm445_vm0, %v5320_v11  ;;  %v5324_v11 = vld [vmem:[%s5794_s8 + $0x60] sm:$0xff] }
  0x94   : > { %v381_v17 = vshll.u32 %v5324_v11, 16 }
  0x96   : > { %v509_v31 = vpop.f32.mrf.mxu0  ;;  %v383_v22 = vrot.slane %v381_v17, 1  ;;  %v5327_v17 = vld [vmem:[%s5794_s8 + $0x78] sm:$0xff] }
  0x97   : > { %v5874_v33 = vadd.f32 %v656_v26, %v509_v31  ;;  %v5325_v31 = vld [vmem:[%s5794_s8 + $0x68] sm:$0xff] }
  0x98   : > { %4779 = vmatmul.msk.bf16.gmra.mxu2 %vm445_vm0, %v779_v30  ;;  %v658_v34 = vpop.f32.mrf.mxu1  ;;  %v384_v28 = vsel %vm284_vm2, %v379_v21, %v383_v22 }
  0x99   : > { %4719 = vmatmul.msk.bf16.gmra.mxu0 %vm445_vm0, %v360_v32  ;;  %4805 = vmatmul.msk.bf16.gmra.mxu3 %vm445_vm0, %v360_v32 }
  0x9b   : > { %v873_v36 = vpop.f32.mrf.mxu2 }
  0x9c   : > { %v984_v37 = vpop.f32.mrf.mxu3 }
  0x9d   : > { %v5880_v38 = vadd.f32 %v984_v37, %v873_v36  ;;  %v385_v37 = vshrl.u32 %v5324_v11, 16 }
  0x9e   : > { %v511_v39 = vpop.f32.mrf.mxu0 }
  0x9f   : > { %v5882_v42 = vadd.f32 %v658_v34, %v511_v39  ;;  %v389_v39 = vshll.u32 %v5325_v31, 16  ;;  %v387_v44 = vor.u32 %v385_v37, %v383_v22 }
  0xa0   : > { %v661_v43 = vpop.f32.mrf.mxu1 }
  0xa1   : > { %v391_v45 = vrot.slane %v389_v39, 1 }
  0xa3   : > { %v875_v47 = vpop.f32.mrf.mxu2  ;;  %4746 = vmatmul.msk.bf16.gmra.mxu1 %vm445_vm0, %v5321_v20  ;;  %v784_v20 = vrot.slane %v5324_v11, 1 }
  0xa4   : > { %v986_v48 = vpop.f32.mrf.mxu3 }
  0xa5   : > { %v5885_v49 = vadd.f32 %v986_v48, %v875_v47  ;;  %v785_v26 = vsel %vm760_vm1, %v782_v0, %v784_v20 }
  0xa6   : > { %v514_v51 = vpop.f32.mrf.mxu0 }
  0xa7   : > { %v5889_v53 = vadd.f32 %v661_v43, %v514_v51  ;;  %v786_v43 = vrot.slane %v5325_v31, 1 }
  0xa8   : > { %4780 = vmatmul.msk.bf16.gmra.mxu2 %vm445_vm0, %v781_v50  ;;  %v663_v54 = vpop.f32.mrf.mxu1 }
  0xa9   : > { %4720 = vmatmul.msk.bf16.gmra.mxu0 %vm445_vm0, %v368_v52  ;;  %4806 = vmatmul.msk.bf16.gmra.mxu3 %vm445_vm0, %v368_v52  ;;  %v787_v50 = vsel %vm760_vm1, %v784_v20, %v786_v43  ;;  %v392_v52 = vsel %vm284_vm2, %v387_v44, %v391_v45 }
  0xab   : > { %v878_v56 = vpop.f32.mrf.mxu2 }
  0xac   : > { %v989_v57 = vpop.f32.mrf.mxu3 }
  0xad   : > { %v5895_v58 = vadd.f32 %v989_v57, %v878_v56  ;;  %v5326_v56 = vld [vmem:[%s5794_s8 + $0x70] sm:$0xff] }
  0xae   : > { %v516_v59 = vpop.f32.mrf.mxu0  ;;  %v397_v0 = vshll.u32 %v5326_v56, 16 }
  0xaf   : > { %v5897_v62 = vadd.f32 %v663_v54, %v516_v59 }
  0xb0   : > { %v666_v63 = vpop.f32.mrf.mxu1 }
  0xb3   : > { %v880_v3 = vpop.f32.mrf.mxu2  ;;  %4747 = vmatmul.msk.bf16.gmra.mxu1 %vm445_vm0, %v5322_v35 }
  0xb4   : > { %v991_v4 = vpop.f32.mrf.mxu3 }
  0xb5   : > { %v5900_v5 = vadd.f32 %v991_v4, %v880_v3  ;;  %v788_v3 = vrot.slane %v5326_v56, 1 }
  0xb6   : > { %v519_v7 = vpop.f32.mrf.mxu0 }
  0xb7   : > { %v5904_v9 = vadd.f32 %v666_v63, %v519_v7  ;;  %v393_v63 = vshrl.u32 %v5325_v31, 16 }
  0xb8   : > { %4781 = vmatmul.msk.bf16.gmra.mxu2 %vm445_vm0, %v783_v6  ;;  %v668_v10 = vpop.f32.mrf.mxu1  ;;  %v399_v6 = vrot.slane %v397_v0, 1 }
  0xb9   : > { %4721 = vmatmul.msk.bf16.gmra.mxu0 %vm445_vm0, %v376_v8  ;;  %4807 = vmatmul.msk.bf16.gmra.mxu3 %vm445_vm0, %v376_v8  ;;  %v395_v4 = vor.u32 %v393_v63, %v391_v45  ;;  %v5328_v45 = vld [vmem:[%s5794_s8 + $0x80] sm:$0xff] }
  0xbb   : > { %v883_v12 = vpop.f32.mrf.mxu2 }
  0xbc   : > { %v994_v13 = vpop.f32.mrf.mxu3 }
  0xbd   : > { %v5910_v14 = vadd.f32 %v994_v13, %v883_v12  ;;  %v400_v13 = vsel %vm284_vm2, %v395_v4, %v399_v6 }
  0xbe   : > { %v521_v15 = vpop.f32.mrf.mxu0 }
  0xbf   : > { %v5912_v18 = vadd.f32 %v668_v10, %v521_v15 }
  0xc0   : > { %v671_v19 = vpop.f32.mrf.mxu1 }
  0xc3   : > { %v885_v23 = vpop.f32.mrf.mxu2  ;;  %4748 = vmatmul.msk.bf16.gmra.mxu1 %vm445_vm0, %v5323_v55 }
  0xc4   : > { %v996_v24 = vpop.f32.mrf.mxu3 }
  0xc5   : > { %v5915_v25 = vadd.f32 %v996_v24, %v885_v23  ;;  %v401_v23 = vshrl.u32 %v5326_v56, 16  ;;  %v405_v24 = vshll.u32 %v5327_v17, 16 }
  0xc6   : > { %v524_v27 = vpop.f32.mrf.mxu0 }
  0xc7   : > { %v5919_v29 = vadd.f32 %v671_v19, %v524_v27 }
  0xc8   : > { %4782 = vmatmul.msk.bf16.gmra.mxu2 %vm445_vm0, %v785_v26  ;;  %v673_v30 = vpop.f32.mrf.mxu1 }
  0xc9   : > { %4722 = vmatmul.msk.bf16.gmra.mxu0 %vm445_vm0, %v384_v28  ;;  %4808 = vmatmul.msk.bf16.gmra.mxu3 %vm445_vm0, %v384_v28  ;;  %v790_v28 = vrot.slane %v5327_v17, 1 }
  0xcb   : > { %v888_v32 = vpop.f32.mrf.mxu2  ;;  %v791_v37 = vsel %vm760_vm1, %v788_v3, %v790_v28 }
  0xcc   : > { %v999_v34 = vpop.f32.mrf.mxu3 }
  0xcd   : > { %v5925_v35 = vadd.f32 %v999_v34, %v888_v32 }
  0xce   : > { %v526_v36 = vpop.f32.mrf.mxu0 }
  0xcf   : > { %v5927_v40 = vadd.f32 %v673_v30, %v526_v36  ;;  %v403_v30 = vor.u32 %v401_v23, %v399_v6 }
  0xd0   : > { %v676_v41 = vpop.f32.mrf.mxu1 }
  0xd3   : > { %v890_v46 = vpop.f32.mrf.mxu2  ;;  %4749 = vmatmul.msk.bf16.gmra.mxu1 %vm445_vm0, %v5324_v11  ;;  %v789_v11 = vsel %vm760_vm1, %v786_v43, %v788_v3 }
  0xd4   : > { %v1001_v47 = vpop.f32.mrf.mxu3 }
  0xd5   : > { %v5930_v48 = vadd.f32 %v1001_v47, %v890_v46 }
  0xd6   : > { %v529_v51 = vpop.f32.mrf.mxu0 }
  0xd7   : > { %v5934_v54 = vadd.f32 %v676_v41, %v529_v51 }
  0xd8   : > { %4783 = vmatmul.msk.bf16.gmra.mxu2 %vm445_vm0, %v787_v50  ;;  %v678_v55 = vpop.f32.mrf.mxu1 }
  0xd9   : > { %4723 = vmatmul.msk.bf16.gmra.mxu0 %vm445_vm0, %v392_v52  ;;  %4809 = vmatmul.msk.bf16.gmra.mxu3 %vm445_vm0, %v392_v52  ;;  %v409_v52 = vshrl.u32 %v5327_v17, 16 }
  0xdb   : > { %v893_v57 = vpop.f32.mrf.mxu2 }
  0xdc   : > { %v1004_v59 = vpop.f32.mrf.mxu3 }
  0xdd   : > { %v5940_v60 = vadd.f32 %v1004_v59, %v893_v57  ;;  %v792_v59 = vrot.slane %v5328_v45, 1 }
  0xde   : > { %v531_v61 = vpop.f32.mrf.mxu0 }
  0xdf   : > { %v5942_v1 = vadd.f32 %v678_v55, %v531_v61  ;;  %v413_v55 = vshll.u32 %v5328_v45, 16  ;;  %v793_v4 = vsel %vm760_vm1, %v790_v28, %v792_v59 }
  0xe0   : > { %v681_v2 = vpop.f32.mrf.mxu1 }
  0xe1   : > { %v415_v63 = vrot.slane %v413_v55, 1  ;;  %v5358_v55 = vld [vmem:[%s7841_s1 + $0x58] sm:$0xff] }
  0xe2   : > { %2119 = vmatpush.bf16.msra.mxu0 %v5358_v55 }
  0xe3   : > { %v895_v7 = vpop.f32.mrf.mxu2  ;;  %4750 = vmatmul.msk.bf16.gmra.mxu1 %vm445_vm0, %v5325_v31  ;;  %v407_v31 = vrot.slane %v405_v24, 1 }
  0xe4   : > { %v1006_v8 = vpop.f32.mrf.mxu3 }
  0xe5   : > { %v5945_v10 = vadd.f32 %v1006_v8, %v895_v7  ;;  %v408_v41 = vsel %vm284_vm2, %v403_v30, %v407_v31  ;;  %v411_v61 = vor.u32 %v409_v52, %v407_v31  ;;  %v6002_v52 = vld [vmem:[%s5794_s8 + $0xc] sm:$0xf] }
  0xe6   : > { %v534_v12 = vpop.f32.mrf.mxu0 }
  0xe7   : > { %v5949_v15 = vadd.f32 %v681_v2, %v534_v12  ;;  %v416_v7 = vsel %vm284_vm2, %v411_v61, %v415_v63  ;;  %v5329_v12 = vld [vmem:[%s5794_s8 + $0x88] sm:$0xff] }
  0xe8   : > { %4784 = vmatmul.msk.bf16.gmra.mxu2 %vm445_vm0, %v789_v11  ;;  %v683_v16 = vpop.f32.mrf.mxu1  ;;  %v5368_v61 = vld [vmem:[%s7841_s1 + $0xa8] sm:$0xff] }
  0xe9   : > { %4724 = vmatmul.msk.bf16.gmra.mxu0 %vm445_vm0, %v400_v13  ;;  %4810 = vmatmul.msk.bf16.gmra.mxu3 %vm445_vm0, %v400_v13 }
  0xea   : > { %2336 = vmatpush.bf16.msra.mxu1 %v5368_v61 }
  0xeb   : > { %v898_v19 = vpop.f32.mrf.mxu2 }
  0xec   : > { %v1009_v20 = vpop.f32.mrf.mxu3 }
  0xed   : > { %v5955_v21 = vadd.f32 %v1009_v20, %v898_v19  ;;  %v417_v20 = vshrl.u32 %v5328_v45, 16 }
  0xee   : > { %v536_v22 = vpop.f32.mrf.mxu0 }
  0xef   : > { %v5957_v26 = vadd.f32 %v683_v16, %v536_v22  ;;  %v421_v22 = vshll.u32 %v5329_v12, 16  ;;  %v419_v28 = vor.u32 %v417_v20, %v415_v63  ;;  %v5370_v63 = vld [vmem:[%s7841_s1 + $0xb8] sm:$0xff] }
  0xf0   : > { %v686_v27 = vpop.f32.mrf.mxu1  ;;  %2488 = vmatpush.bf16.msra.mxu2 %v5370_v63 }
  0xf1   : > { %v423_v30 = vrot.slane %v421_v22, 1  ;;  %v6022_v22 = vld [vmem:[%s5794_s8 + $0x10] sm:$0xff] }
  0xf3   : > { %v900_v32 = vpop.f32.mrf.mxu2  ;;  %4751 = vmatmul.msk.bf16.gmra.mxu1 %vm445_vm0, %v5326_v56 }
  0xf4   : > { %v1011_v34 = vpop.f32.mrf.mxu3 }
  0xf5   : > { %v5960_v36 = vadd.f32 %v1011_v34, %v900_v32  ;;  %v185_v32 = vld [vmem:[%s5794_s8 + $0x90] sm:$0x1] }
  0xf6   : > { %v539_v39 = vpop.f32.mrf.mxu0 }
  0xf7   : > { %v5964_v43 = vadd.f32 %v686_v27, %v539_v39  ;;  %v794_v27 = vrot.slane %v5329_v12, 1 }
  0xf8   : > { %4785 = vmatmul.msk.bf16.gmra.mxu2 %vm445_vm0, %v791_v37  ;;  %v688_v44 = vpop.f32.mrf.mxu1 }
  0xf9   : > { %4725 = vmatmul.msk.bf16.gmra.mxu0 %vm445_vm0, %v408_v41  ;;  %4811 = vmatmul.msk.bf16.gmra.mxu3 %vm445_vm0, %v408_v41  ;;  %v795_v39 = vsel %vm760_vm1, %v792_v59, %v794_v27 }
  0xfb   : > { %v903_v46 = vpop.f32.mrf.mxu2 }
  0xfc   : > { %v1014_v47 = vpop.f32.mrf.mxu3 }
  0xfd   : > { %v5970_v50 = vadd.f32 %v1014_v47, %v903_v46  ;;  %v264_v46 = vunpack.c.l.b16 %v185_v32 }
  0xfe   : > { %v541_v51 = vpop.f32.mrf.mxu0 }
  0xff   : > { %v5972_v56 = vadd.f32 %v688_v44, %v541_v51  ;;  %v424_v44 = vsel %vm284_vm2, %v419_v28, %v423_v30 }
 0x100   : > { %v691_v57 = vpop.f32.mrf.mxu1 }
 0x103   : > { %v905_v0 = vpop.f32.mrf.mxu2  ;;  %4752 = vmatmul.msk.bf16.gmra.mxu1 %vm445_vm0, %v5327_v17 }
 0x104   : > { %v1016_v2 = vpop.f32.mrf.mxu3 }
 0x105   : > { %v5975_v3 = vadd.f32 %v1016_v2, %v905_v0 }
 0x106   : > { %v544_v6 = vpop.f32.mrf.mxu0 }
 0x107   : > { %v5979_v8 = vadd.f32 %v691_v57, %v544_v6  ;;  %v283_v57 = vpack.c.b16 %v264_v46, %v264_v46  ;;  %v1471_v46 = vshrl.u32 %v6022_v22, 16 }
 0x108   : > { %4786 = vmatmul.msk.bf16.gmra.mxu2 %vm445_vm0, %v793_v4  ;;  %v693_v11 = vpop.f32.mrf.mxu1  ;;  %v7843_v4 = vunpack.c.l.b16 %v6002_v52 }
 0x109   : > { %4726 = vmatmul.msk.bf16.gmra.mxu0 %vm445_vm0, %v416_v7  ;;  %4812 = vmatmul.msk.bf16.gmra.mxu3 %vm445_vm0, %v416_v7  ;;  %v5366_v7 = vld [vmem:[%s7841_s1 + $0x98] sm:$0xff]  ;;  %v796_v28 = vrot.slane %v283_v57, 1 }
 0x10a   : > { %2599 = vmatpush.bf16.msra.mxu3 %v5366_v7 }
 0x10b   : > { %v908_v13 = vpop.f32.mrf.mxu2  ;;  %v797_v55 = vsel %vm760_vm1, %v794_v27, %v796_v28 }
 0x10c   : > { %v1019_v16 = vpop.f32.mrf.mxu3 }
 0x10d   : > { %v5985_v17 = vadd.f32 %v1019_v16, %v908_v13  ;;  %v425_v13 = vshrl.u32 %v5329_v12, 16  ;;  %v429_v16 = vshll.u32 %v283_v57, 16 }
 0x10e   : > { %v546_v19 = vpop.f32.mrf.mxu0 }
 0x10f   : > { %v5987_v23 = vadd.f32 %v693_v11, %v546_v19  ;;  %v431_v32 = vrot.slane %v429_v16, 1 }
 0x110   : > { %v696_v24 = vpop.f32.mrf.mxu1 }
 0x113   : > { %v910_v31 = vpop.f32.mrf.mxu2  ;;  %4753 = vmatmul.msk.bf16.gmra.mxu1 %vm445_vm0, %v5328_v45  ;;  %v1074_v45 = vld [vmem:[%s5794_s8 + $0x8] sm:$0xe] }
 0x114   : > { %v1021_v34 = vpop.f32.mrf.mxu3  ;;  %v1153_v2 = vunpack.c.l.b16 %v1074_v45 }
 0x115   : > { %v5991_v37 = vadd.f32 %v1021_v34, %v910_v31  ;;  %v427_v31 = vor.u32 %v425_v13, %v423_v30 }
 0x116   : > { %v549_v41 = vpop.f32.mrf.mxu0 }
 0x117   : > { %v5995_v47 = vadd.f32 %v696_v24, %v549_v41  ;;  %v1190_v24 = vpack.c.b16 %v7843_v4, %v1153_v2  ;;  %v432_v61 = vsel %vm284_vm2, %v427_v31, %v431_v32 }
 0x118   : > { %4787 = vmatmul.msk.bf16.gmra.mxu2 %vm445_vm0, %v795_v39  ;;  %v698_v51 = vpop.f32.mrf.mxu1 }
 0x119   : > { %4727 = vmatmul.msk.bf16.gmra.mxu0 %vm445_vm0, %v424_v44  ;;  %4813 = vmatmul.msk.bf16.gmra.mxu3 %vm445_vm0, %v424_v44  ;;  %v1463_v41 = vshrl.u32 %v1190_v24, 16  ;;  %v1466_v44 = vshll.u32 %v1190_v24, 16 }
 0x11b   : > { %v913_v59 = vpop.f32.mrf.mxu2  ;;  %v1468_v63 = vrot.slane %v1466_v44, 2 }
 0x11c   : > { %v1024_v0 = vpop.f32.mrf.mxu3 }
 0x11d   : > { %v6014_v6 = vadd.f32 %v1024_v0, %v913_v59  ;;  %v1473_v0 = vrot.slane %v1471_v46, 1 }
 0x11e   : > { %v551_v11 = vpop.f32.mrf.mxu0 }
 0x11f   : > { %v6019_v19 = vadd.f32 %v698_v51, %v551_v11  ;;  %v1474_v51 = vshll.u32 %v6022_v22, 16 }
 0x120   : > { %v701_v20 = vpop.f32.mrf.mxu1 }
 0x121   : > { %v1476_v2 = vrot.slane %v1474_v51, 2 }
 0x123   : > { %v915_v34 = vpop.f32.mrf.mxu2  ;;  %4754 = vmatmul.msk.bf16.gmra.mxu1 %vm445_vm0, %v5329_v12  ;;  %v1465_v12 = vrot.slane %v1463_v41, 1  ;;  %v1477_v13 = vor.u32 %v1476_v2, %v1473_v0  ;;  %v1210_v41 = vrot.slane %v6022_v22, 1 }
 0x124   : > { %v1026_v39 = vpop.f32.mrf.mxu3 }
 0x125   : > { %v6029_v45 = vadd.f32 %v1026_v39, %v915_v34  ;;  %v1469_v27 = vor.u32 %v1468_v63, %v1465_v12  ;;  %v5339_v34 = vld [vmem:[%s5794_s8 + $0x18] sm:$0xff]  ;;  %v1209_v39 = vrot.slane %v1190_v24, 1 }
 0x126   : > { %v554_v59 = vpop.f32.mrf.mxu0  ;;  %v1480_v51 = vshrl.u32 %v5339_v34, 16 }
 0x127   : > { %v6033_v57 = vadd.f32 %v701_v20, %v554_v59  ;;  %v6043_v32 = vsel %vm1461_vm3, %v1469_v27, %v1477_v13 }
 0x128   : > { %4788 = vmatmul.msk.bf16.gmra.mxu2 %vm445_vm0, %v797_v55  ;;  %v703_v30 = vpop.f32.mrf.mxu1  ;;  %7861 = vst [vmem:[#allocation2_spill] sm:$0xff] %v6043_v32  ;;  %v1483_v55 = vshll.u32 %v5339_v34, 16  ;;  %v1482_v24 = vrot.slane %v1480_v51, 1 }
 0x129   : > { %4728 = vmatmul.msk.bf16.gmra.mxu0 %vm445_vm0, %v432_v61  ;;  %4814 = vmatmul.msk.bf16.gmra.mxu3 %vm445_vm0, %v432_v61 }
 0x12a   : > { %v1485_v63 = vrot.slane %v1483_v55, 2 }
 0x12b   : > { %v918_v7 = vpop.f32.mrf.mxu2 }
 0x12c   : > { %v1029_v11 = vpop.f32.mrf.mxu3 }
 0x12d   : > { %v6038_v16 = vadd.f32 %v1029_v11, %v918_v7  ;;  %v1486_v7 = vor.u32 %v1485_v63, %v1482_v24 }
 0x12e   : > { %v556_v20 = vpop.f32.mrf.mxu0 }
 0x12f   : > { %v6040_v28 = vadd.f32 %v703_v30, %v556_v20  ;;  %v6052_v30 = vsel %vm760_vm1, %v1209_v39, %v1210_v41  ;;  %v6067_v39 = vsel %vm1461_vm3, %v1477_v13, %v1486_v7 }
 0x130   : > { %v706_v31 = vpop.f32.mrf.mxu1  ;;  %7862 = vst [vmem:[#allocation3_spill] sm:$0xff] %v6052_v30 }
 0x131   : > { %7865 = vst [vmem:[#allocation6_spill] sm:$0xff] %v6067_v39 }
 0x133   : > { %v920_v44 = vpop.f32.mrf.mxu2  ;;  %4929 = vmatmul.msk.bf16.vlgmr.msrb.gmra.mxu1 %vm445_vm0, %v6043_v32 }
 0x134   : > { %v1031_v46 = vpop.f32.mrf.mxu3 }
 0x135   : > { %v6049_v59 = vadd.f32 %v1031_v46, %v920_v44  ;;  %v5340_v44 = vld [vmem:[%s5794_s8 + $0x20] sm:$0xff]  ;;  %v1212_v46 = vrot.slane %v5339_v34, 1 }
 0x136   : > { %v559_v61 = vpop.f32.mrf.mxu0  ;;  %v1492_v4 = vshll.u32 %v5340_v44, 16 }
 0x137   : > { %v6054_v12 = vadd.f32 %v706_v31, %v559_v61  ;;  %v1489_v61 = vshrl.u32 %v5340_v44, 16  ;;  %v6075_v63 = vsel %vm760_vm1, %v1210_v41, %v1212_v46 }
 0x138   : > { %4959 = vmatmul.msk.bf16.vlgmr.msrb.gmra.mxu2 %vm445_vm0, %v6043_v32  ;;  %v708_v22 = vpop.f32.mrf.mxu1  ;;  %7867 = vst [vmem:[#allocation8_spill] sm:$0xff] %v6075_v63 }
 0x139   : > { %4895 = vmatmul.msk.bf16.vlgmr.msrb.gmra.mxu0 %vm445_vm0, %v6052_v30  ;;  %4989 = vmatmul.msk.bf16.vlgmr.msrb.gmra.mxu3 %vm445_vm0, %v6043_v32  ;;  %v1491_v34 = vrot.slane %v1489_v61, 1  ;;  %v5341_v61 = vld [vmem:[%s5794_s8 + $0x28] sm:$0xff] }
 0x13b   : > { %v923_v0 = vpop.f32.mrf.mxu2 }
 0x13c   : > { %v1034_v2 = vpop.f32.mrf.mxu3 }
 0x13d   : > { %v6062_v11 = vadd.f32 %v1034_v2, %v923_v0  ;;  %v1494_v0 = vrot.slane %v1492_v4, 2  ;;  %v1214_v4 = vrot.slane %v5340_v44, 1 }
 0x13e   : > { %v561_v27 = vpop.f32.mrf.mxu0 }
 0x13f   : > { %7863 = vst [vmem:[#allocation4_spill] sm:$0xff] %v6062_v11  ;;  %v6064_v20 = vadd.f32 %v708_v22, %v561_v27 }
 0x140   : > { %v711_v31 = vpop.f32.mrf.mxu1 }
 0x141   : > { %7864 = vst [vmem:[#allocation5_spill] sm:$0xff] %v6064_v20  ;;  %v1501_v20 = vshll.u32 %v5341_v61, 16 }
 0x143   : > { %v925_v51 = vpop.f32.mrf.mxu2  ;;  %4930 = vmatmul.msk.bf16.gmra.mxu1 %vm445_vm0, %v6067_v39 }
 0x144   : > { %v1036_v55 = vpop.f32.mrf.mxu3 }
 0x145   : > { %v6072_v32 = vadd.f32 %v1036_v55, %v925_v51  ;;  %v1495_v51 = vor.u32 %v1494_v0, %v1491_v34  ;;  %v6098_v0 = vsel %vm760_vm1, %v1212_v46, %v1214_v4 }
 0x146   : > { %v564_v24 = vpop.f32.mrf.mxu0  ;;  %7873 = vst [vmem:[#allocation14_spill] sm:$0xff] %v6098_v0 }
 0x147   : > { %7866 = vst [vmem:[#allocation7_spill] sm:$0xff] %v6072_v32  ;;  %v6077_v22 = vadd.f32 %v711_v31, %v564_v24 }
 0x148   : > { %4960 = vmatmul.msk.bf16.gmra.mxu2 %vm445_vm0, %v6067_v39  ;;  %v713_v13 = vpop.f32.mrf.mxu1 }
 0x149   : > { %7868 = vst [vmem:[#allocation9_spill] sm:$0xff] %v6077_v22  ;;  %4896 = vmatmul.msk.bf16.gmra.mxu0 %vm445_vm0, %v6075_v63  ;;  %4990 = vmatmul.msk.bf16.gmra.mxu3 %vm445_vm0, %v6067_v39  ;;  %v6090_v22 = vsel %vm1461_vm3, %v1486_v7, %v1495_v51  ;;  %v1498_v39 = vshrl.u32 %v5341_v61, 16 }
 0x14a   : > { %7871 = vst [vmem:[#allocation12_spill] sm:$0xff] %v6090_v22 }
 0x14b   : > { %v928_v2 = vpop.f32.mrf.mxu2  ;;  %v1500_v44 = vrot.slane %v1498_v39, 1  ;;  %v5342_v39 = vld [vmem:[%s5794_s8 + $0x30] sm:$0xff] }
 0x14c   : > { %v1039_v27 = vpop.f32.mrf.mxu3 }
 0x14d   : > { %v6085_v41 = vadd.f32 %v1039_v27, %v928_v2  ;;  %v1503_v2 = vrot.slane %v1501_v20, 2  ;;  %v1216_v20 = vrot.slane %v5341_v61, 1 }
 0x14e   : > { %v566_v55 = vpop.f32.mrf.mxu0 }
 0x14f   : > { %7869 = vst [vmem:[#allocation10_spill] sm:$0xff] %v6085_v41  ;;  %v6087_v31 = vadd.f32 %v713_v13, %v566_v55  ;;  %v1504_v27 = vor.u32 %v1503_v2, %v1500_v44  ;;  %v6121_v2 = vsel %vm760_vm1, %v1214_v4, %v1216_v20 }
 0x150   : > { %v716_v24 = vpop.f32.mrf.mxu1  ;;  %7879 = vst [vmem:[#allocation20_spill] sm:$0xff] %v6121_v2 }
 0x151   : > { %7870 = vst [vmem:[#allocation11_spill] sm:$0xff] %v6087_v31  ;;  %v1510_v31 = vshll.u32 %v5342_v39, 16 }
 0x153   : > { %v930_v32 = vpop.f32.mrf.mxu2  ;;  %4931 = vmatmul.msk.bf16.gmra.mxu1 %vm445_vm0, %v6090_v22 }
 0x154   : > { %v1041_v63 = vpop.f32.mrf.mxu3 }
 0x155   : > { %v6095_v11 = vadd.f32 %v1041_v63, %v930_v32 }
 0x156   : > { %v569_v34 = vpop.f32.mrf.mxu0 }
 0x157   : > { %7872 = vst [vmem:[#allocation13_spill] sm:$0xff] %v6095_v11  ;;  %v6100_v13 = vadd.f32 %v716_v24, %v569_v34 }
 0x158   : > { %4961 = vmatmul.msk.bf16.gmra.mxu2 %vm445_vm0, %v6090_v22  ;;  %v718_v7 = vpop.f32.mrf.mxu1 }
 0x159   : > { %7874 = vst [vmem:[#allocation15_spill] sm:$0xff] %v6100_v13  ;;  %4897 = vmatmul.msk.bf16.gmra.mxu0 %vm445_vm0, %v6098_v0  ;;  %4991 = vmatmul.msk.bf16.gmra.mxu3 %vm445_vm0, %v6090_v22  ;;  %v6113_v13 = vsel %vm1461_vm3, %v1495_v51, %v1504_v27  ;;  %v1507_v22 = vshrl.u32 %v5342_v39, 16 }
 0x15a   : > { %7877 = vst [vmem:[#allocation18_spill] sm:$0xff] %v6113_v13 }
 0x15b   : > { %v933_v32 = vpop.f32.mrf.mxu2  ;;  %v1509_v61 = vrot.slane %v1507_v22, 1  ;;  %v5343_v22 = vld [vmem:[%s5794_s8 + $0x38] sm:$0xff] }
 0x15c   : > { %v1044_v63 = vpop.f32.mrf.mxu3 }
 0x15d   : > { %v6108_v46 = vadd.f32 %v1044_v63, %v933_v32  ;;  %v1512_v32 = vrot.slane %v1510_v31, 2  ;;  %v1218_v31 = vrot.slane %v5342_v39, 1 }
 0x15e   : > { %v571_v55 = vpop.f32.mrf.mxu0 }
 0x15f   : > { %7875 = vst [vmem:[#allocation16_spill] sm:$0xff] %v6108_v46  ;;  %v6110_v24 = vadd.f32 %v718_v7, %v571_v55  ;;  %v1513_v63 = vor.u32 %v1512_v32, %v1509_v61  ;;  %v6144_v32 = vsel %vm760_vm1, %v1216_v20, %v1218_v31 }
 0x160   : > { %v721_v34 = vpop.f32.mrf.mxu1  ;;  %7885 = vst [vmem:[#allocation26_spill] sm:$0xff] %v6144_v32 }
 0x161   : > { %7876 = vst [vmem:[#allocation17_spill] sm:$0xff] %v6110_v24  ;;  %v1519_v24 = vshll.u32 %v5343_v22, 16 }
 0x163   : > { %v935_v11 = vpop.f32.mrf.mxu2  ;;  %4932 = vmatmul.msk.bf16.gmra.mxu1 %vm445_vm0, %v6113_v13 }
 0x164   : > { %v1046_v0 = vpop.f32.mrf.mxu3 }
 0x165   : > { %v6118_v41 = vadd.f32 %v1046_v0, %v935_v11 }
 0x166   : > { %v574_v44 = vpop.f32.mrf.mxu0 }
 0x167   : > { %7878 = vst [vmem:[#allocation19_spill] sm:$0xff] %v6118_v41  ;;  %v6123_v7 = vadd.f32 %v721_v34, %v574_v44 }
 0x168   : > { %4962 = vmatmul.msk.bf16.gmra.mxu2 %vm445_vm0, %v6113_v13  ;;  %v723_v51 = vpop.f32.mrf.mxu1 }
 0x169   : > { %7880 = vst [vmem:[#allocation21_spill] sm:$0xff] %v6123_v7  ;;  %4898 = vmatmul.msk.bf16.gmra.mxu0 %vm445_vm0, %v6121_v2  ;;  %4992 = vmatmul.msk.bf16.gmra.mxu3 %vm445_vm0, %v6113_v13  ;;  %v6136_v7 = vsel %vm1461_vm3, %v1504_v27, %v1513_v63  ;;  %v1516_v13 = vshrl.u32 %v5343_v22, 16 }
 0x16a   : > { %7883 = vst [vmem:[#allocation24_spill] sm:$0xff] %v6136_v7 }
 0x16b   : > { %v938_v11 = vpop.f32.mrf.mxu2  ;;  %v1518_v39 = vrot.slane %v1516_v13, 1  ;;  %v5344_v13 = vld [vmem:[%s5794_s8 + $0x40] sm:$0xff] }
 0x16c   : > { %v1049_v0 = vpop.f32.mrf.mxu3 }
 0x16d   : > { %v6131_v4 = vadd.f32 %v1049_v0, %v938_v11  ;;  %v1521_v11 = vrot.slane %v1519_v24, 2  ;;  %v1220_v24 = vrot.slane %v5343_v22, 1 }
 0x16e   : > { %v576_v55 = vpop.f32.mrf.mxu0 }
 0x16f   : > { %7881 = vst [vmem:[#allocation22_spill] sm:$0xff] %v6131_v4  ;;  %v6133_v34 = vadd.f32 %v723_v51, %v576_v55  ;;  %v1522_v0 = vor.u32 %v1521_v11, %v1518_v39  ;;  %v6167_v11 = vsel %vm760_vm1, %v1218_v31, %v1220_v24 }
 0x170   : > { %v726_v44 = vpop.f32.mrf.mxu1  ;;  %7891 = vst [vmem:[#allocation32_spill] sm:$0xff] %v6167_v11 }
 0x171   : > { %7882 = vst [vmem:[#allocation23_spill] sm:$0xff] %v6133_v34  ;;  %v1528_v34 = vshll.u32 %v5344_v13, 16 }
 0x173   : > { %v940_v41 = vpop.f32.mrf.mxu2  ;;  %4933 = vmatmul.msk.bf16.gmra.mxu1 %vm445_vm0, %v6136_v7 }
 0x174   : > { %v1051_v2 = vpop.f32.mrf.mxu3 }
 0x175   : > { %v6141_v46 = vadd.f32 %v1051_v2, %v940_v41 }
 0x176   : > { %v579_v61 = vpop.f32.mrf.mxu0 }
 0x177   : > { %7884 = vst [vmem:[#allocation25_spill] sm:$0xff] %v6141_v46  ;;  %v6146_v51 = vadd.f32 %v726_v44, %v579_v61 }
 0x178   : > { %4963 = vmatmul.msk.bf16.gmra.mxu2 %vm445_vm0, %v6136_v7  ;;  %v728_v27 = vpop.f32.mrf.mxu1 }
 0x179   : > { %7886 = vst [vmem:[#allocation27_spill] sm:$0xff] %v6146_v51  ;;  %4899 = vmatmul.msk.bf16.gmra.mxu0 %vm445_vm0, %v6144_v32  ;;  %4993 = vmatmul.msk.bf16.gmra.mxu3 %vm445_vm0, %v6136_v7  ;;  %v6159_v51 = vsel %vm1461_vm3, %v1513_v63, %v1522_v0  ;;  %v1525_v7 = vshrl.u32 %v5344_v13, 16 }
 0x17a   : > { %7889 = vst [vmem:[#allocation30_spill] sm:$0xff] %v6159_v51 }
 0x17b   : > { %v943_v41 = vpop.f32.mrf.mxu2  ;;  %v1527_v22 = vrot.slane %v1525_v7, 1  ;;  %v6185_v7 = vld [vmem:[%s5794_s8 + $0x48] sm:$0xff] }
 0x17c   : > { %v1054_v2 = vpop.f32.mrf.mxu3 }
 0x17d   : > { %v6154_v20 = vadd.f32 %v1054_v2, %v943_v41  ;;  %v1530_v41 = vrot.slane %v1528_v34, 2  ;;  %v1222_v34 = vrot.slane %v5344_v13, 1 }
 0x17e   : > { %v581_v55 = vpop.f32.mrf.mxu0 }
 0x17f   : > { %7887 = vst [vmem:[#allocation28_spill] sm:$0xff] %v6154_v20  ;;  %v6156_v44 = vadd.f32 %v728_v27, %v581_v55  ;;  %v1531_v2 = vor.u32 %v1530_v41, %v1527_v22  ;;  %v1537_v22 = vshll.u32 %v6185_v7, 16 }
 0x180   : > { %v731_v61 = vpop.f32.mrf.mxu1 }
 0x181   : > { %7888 = vst [vmem:[#allocation29_spill] sm:$0xff] %v6156_v44 }
 0x183   : > { %v945_v46 = vpop.f32.mrf.mxu2  ;;  %4934 = vmatmul.msk.bf16.gmra.mxu1 %vm445_vm0, %v6159_v51 }
 0x184   : > { %v1056_v32 = vpop.f32.mrf.mxu3 }
 0x185   : > { %v6164_v4 = vadd.f32 %v1056_v32, %v945_v46 }
 0x186   : > { %v584_v39 = vpop.f32.mrf.mxu0 }
 0x187   : > { %7890 = vst [vmem:[#allocation31_spill] sm:$0xff] %v6164_v4  ;;  %v6169_v27 = vadd.f32 %v731_v61, %v584_v39 }
 0x188   : > { %4964 = vmatmul.msk.bf16.gmra.mxu2 %vm445_vm0, %v6159_v51  ;;  %v733_v63 = vpop.f32.mrf.mxu1 }
 0x189   : > { %7892 = vst [vmem:[#allocation33_spill] sm:$0xff] %v6169_v27  ;;  %4900 = vmatmul.msk.bf16.gmra.mxu0 %vm445_vm0, %v6167_v11  ;;  %4994 = vmatmul.msk.bf16.gmra.mxu3 %vm445_vm0, %v6159_v51  ;;  %v6182_v27 = vsel %vm1461_vm3, %v1522_v0, %v1531_v2  ;;  %v1534_v11 = vshrl.u32 %v6185_v7, 16 }
 0x18a   : > { %7895 = vst [vmem:[#allocation36_spill] sm:$0xff] %v6182_v27 }
 0x18b   : > { %v948_v46 = vpop.f32.mrf.mxu2 }
 0x18c   : > { %v1059_v32 = vpop.f32.mrf.mxu3 }
 0x18d   : > { %v6177_v31 = vadd.f32 %v1059_v32, %v948_v46  ;;  %v6194_v46 = vsel %vm760_vm1, %v1220_v24, %v1222_v34  ;;  %v1536_v32 = vrot.slane %v1534_v11, 1  ;;  %v6212_v11 = vld [vmem:[%s5794_s8 + $0x50] sm:$0xff] }
 0x18e   : > { %v586_v55 = vpop.f32.mrf.mxu0  ;;  %7897 = vst [vmem:[#allocation38_spill] sm:$0xff] %v6194_v46 }
 0x18f   : > { %7893 = vst [vmem:[#allocation34_spill] sm:$0xff] %v6177_v31  ;;  %v6179_v61 = vadd.f32 %v733_v63, %v586_v55  ;;  %v1539_v55 = vrot.slane %v1537_v22, 2  ;;  %v1224_v22 = vrot.slane %v6185_v7, 1 }
 0x190   : > { %v736_v39 = vpop.f32.mrf.mxu1 }
 0x191   : > { %7894 = vst [vmem:[#allocation35_spill] sm:$0xff] %v6179_v61 }
 0x193   : > { %v950_v4 = vpop.f32.mrf.mxu2  ;;  %4935 = vmatmul.msk.bf16.gmra.mxu1 %vm445_vm0, %v6182_v27 }
 0x194   : > { %v1061_v51 = vpop.f32.mrf.mxu3 }
 0x195   : > { %v6191_v41 = vadd.f32 %v1061_v51, %v950_v4 }
 0x196   : > { %v589_v63 = vpop.f32.mrf.mxu0 }
 0x197   : > { %7896 = vst [vmem:[#allocation37_spill] sm:$0xff] %v6191_v41  ;;  %v6196_v0 = vadd.f32 %v736_v39, %v589_v63  ;;  %v1540_v41 = vor.u32 %v1539_v55, %v1536_v32  ;;  %v1543_v32 = vshrl.u32 %v6212_v11, 16  ;;  %v1546_v55 = vshll.u32 %v6212_v11, 16 }
 0x198   : > { %4965 = vmatmul.msk.bf16.gmra.mxu2 %vm445_vm0, %v6182_v27  ;;  %v738_v13 = vpop.f32.mrf.mxu1 }
 0x199   : > { %7898 = vst [vmem:[#allocation39_spill] sm:$0xff] %v6196_v0  ;;  %4901 = vmatmul.msk.bf16.gmra.mxu0 %vm445_vm0, %v6194_v46  ;;  %4995 = vmatmul.msk.bf16.gmra.mxu3 %vm445_vm0, %v6182_v27  ;;  %v6209_v0 = vsel %vm1461_vm3, %v1531_v2, %v1540_v41 }
 0x19a   : > { %7901 = vst [vmem:[#allocation42_spill] sm:$0xff] %v6209_v0 }
 0x19b   : > { %v953_v4 = vpop.f32.mrf.mxu2 }
 0x19c   : > { %v1064_v51 = vpop.f32.mrf.mxu3 }
 0x19d   : > { %v6204_v24 = vadd.f32 %v1064_v51, %v953_v4  ;;  %v1545_v51 = vrot.slane %v1543_v32, 1  ;;  %v6240_v32 = vld [vmem:[%s5794_s8 + $0x58] sm:$0xff] }
 0x19e   : > { %v591_v61 = vpop.f32.mrf.mxu0 }
 0x19f   : > { %7899 = vst [vmem:[#allocation40_spill] sm:$0xff] %v6204_v24  ;;  %v6206_v39 = vadd.f32 %v738_v13, %v591_v61  ;;  %v6222_v13 = vsel %vm760_vm1, %v1222_v34, %v1224_v22 }
 0x1a0   : > { %v741_v63 = vpop.f32.mrf.mxu1  ;;  %7903 = vst [vmem:[#allocation44_spill] sm:$0xff] %v6222_v13 }
 0x1a1   : > { %7900 = vst [vmem:[#allocation41_spill] sm:$0xff] %v6206_v39  ;;  %v1548_v39 = vrot.slane %v1546_v55, 2  ;;  %v1226_v55 = vrot.slane %v6212_v11, 1 }
 0x1a3   : > { %v955_v46 = vpop.f32.mrf.mxu2  ;;  %4936 = vmatmul.msk.bf16.gmra.mxu1 %vm445_vm0, %v6209_v0 }
 0x1a4   : > { %v1066_v27 = vpop.f32.mrf.mxu3 }
 0x1a5   : > { %v6219_v4 = vadd.f32 %v1066_v27, %v955_v46 }
 0x1a6   : > { %v594_v61 = vpop.f32.mrf.mxu0 }
 0x1a7   : > { %7902 = vst [vmem:[#allocation43_spill] sm:$0xff] %v6219_v4  ;;  %v6224_v2 = vadd.f32 %v741_v63, %v594_v61  ;;  %v1549_v4 = vor.u32 %v1548_v39, %v1545_v51  ;;  %v5367_v39 = vld [vmem:[%s7841_s1 + $0xa0] sm:$0xff]  ;;  %v1552_v51 = vshrl.u32 %v6240_v32, 16 }
 0x1a8   : > { %4966 = vmatmul.msk.bf16.gmra.mxu2 %vm445_vm0, %v6209_v0  ;;  %v743_v7 = vpop.f32.mrf.mxu1  ;;  %2337 = vmatpush.bf16.msra.mxu1 %v5367_v39 }
 0x1a9   : > { %7904 = vst [vmem:[#allocation45_spill] sm:$0xff] %v6224_v2  ;;  %4902 = vmatmul.msk.bf16.gmra.mxu0 %vm445_vm0, %v6222_v13  ;;  %4996 = vmatmul.msk.bf16.gmra.mxu3 %vm445_vm0, %v6209_v0  ;;  %v6237_v2 = vsel %vm1461_vm3, %v1540_v41, %v1549_v4  ;;  %v5357_v0 = vld [vmem:[%s7841_s1 + $0x50] sm:$0xff]  ;;  %v1554_v44 = vrot.slane %v1552_v51, 1 }
 0x1aa   : > { %v5365_v41 = vld [vmem:[%s7841_s1 + $0x90] sm:$0xff]  ;;  %2120 = vmatpush.bf16.msra.mxu0 %v5357_v0 }
 0x1ab   : > { %v958_v27 = vpop.f32.mrf.mxu2  ;;  %2600 = vmatpush.bf16.msra.mxu3 %v5365_v41 }
 0x1ac   : > { %v1069_v46 = vpop.f32.mrf.mxu3 }
 0x1ad   : > { %v6232_v34 = vadd.f32 %v1069_v46, %v958_v27  ;;  %v1555_v27 = vshll.u32 %v6240_v32, 16 }
 0x1ae   : > { %v596_v24 = vpop.f32.mrf.mxu0 }
 0x1af   : > { %7905 = vst [vmem:[#allocation46_spill] sm:$0xff] %v6232_v34  ;;  %v6234_v63 = vadd.f32 %v743_v7, %v596_v24  ;;  %v5369_v24 = vld [vmem:[%s7841_s1 + $0xb0] sm:$0xff]  ;;  %v6262_v34 = vsel %vm760_vm1, %v1224_v22, %v1226_v55  ;;  %v1557_v20 = vrot.slane %v1555_v27, 2 }
 0x1b0   : > { %v1707_v61 = vpop.f32.mrf.mxu1  ;;  %2489 = vmatpush.bf16.msra.mxu2 %v5369_v24 }
 0x1b1   : > { %7906 = vst [vmem:[#allocation47_spill] sm:$0xff] %v6234_v63 }
 0x1b3   : > { %v960_v7 = vpop.f32.mrf.mxu2  ;;  %4937 = vmatmul.msk.bf16.gmra.mxu1 %vm445_vm0, %v6237_v2 }
 0x1b4   : > { %v1071_v11 = vpop.f32.mrf.mxu3 }
 0x1b5   : > { %v6259_v46 = vadd.f32 %v1071_v11, %v960_v7 }
 0x1b6   : > { %v1321_v63 = vpop.f32.mrf.mxu0 }
 0x1b7   : > { %v1411_v13 = vadd.f32 %v1321_v63, %v5874_v33  ;;  %v1558_v63 = vor.u32 %v1557_v20, %v1554_v44  ;;  %v1228_v20 = vrot.slane %v6240_v32, 1 }
 0x1b8   : > { %4967 = vmatmul.msk.bf16.gmra.mxu2 %vm445_vm0, %v6237_v2  ;;  %v1709_v31 = vpop.f32.mrf.mxu1 }
 0x1b9   : > { %v1797_v30 = vadd.f32 %v1707_v61, %v1411_v13  ;;  %4903 = vmatmul.msk.bf16.gmra.mxu0 %vm445_vm0, %v6262_v34  ;;  %4997 = vmatmul.msk.bf16.gmra.mxu3 %vm445_vm0, %v6237_v2  ;;  %v6284_v24 = vsel %vm1461_vm3, %v1549_v4, %v1558_v63  ;;  %v6302_v51 = vsel %vm760_vm1, %v1226_v55, %v1228_v20 }
 0x1bb   : > { %5416 = vtanh.f32 %v1797_v30  ;;  %v1859_v0 = vpop.f32.mrf.mxu2  ;;  %v6287_v30 = vld [vmem:[%s5794_s8 + $0x60] sm:$0xff] }
 0x1bc   : > { %v6273_v22 = vadd.f32 %v1859_v0, %v5880_v38  ;;  %v6275_v33 = vpop.f32.mrf.mxu3  ;;  %v1561_v4 = vshrl.u32 %v6287_v30, 16  ;;  %v1564_v11 = vshll.u32 %v6287_v30, 16 }
 0x1bd   : > { %7907 = vst [vmem:[#allocation48_spill] sm:$0xff] %v6275_v33 }
 0x1be   : > { %v1323_v39 = vpop.f32.mrf.mxu0  ;;  %v1563_v0 = vrot.slane %v1561_v4, 1 }
 0x1bf   : > { %v1412_v13 = vadd.f32 %v1323_v39, %v5882_v42 }
 0x1c0   : > { %v1712_v61 = vpop.f32.mrf.mxu1 }
 0x1c1   : > { %v5417_v38 = vpop.eup %5416  ;;  %v1798_v7 = vadd.f32 %v1709_v31, %v1412_v13 }
 0x1c2   : > { %3882 = vst.msk [vmem:[%s6280_s15] sm:$0xff] %vm445_vm0, %v5417_v38 }
 0x1c3   : > { %5418 = vtanh.f32 %v1798_v7  ;;  %v1861_v44 = vpop.f32.mrf.mxu2  ;;  %4938 = vmatmul.msk.bf16.gmra.mxu1 %vm445_vm0, %v6284_v24 }
 0x1c4   : > { %v6295_v42 = vadd.f32 %v1861_v44, %v5885_v49  ;;  %v6297_v41 = vpop.f32.mrf.mxu3  ;;  %v1566_v49 = vrot.slane %v1564_v11, 2 }
 0x1c5   : > { %7908 = vst [vmem:[#allocation49_spill] sm:$0xff] %v6297_v41 }
 0x1c6   : > { %v1326_v31 = vpop.f32.mrf.mxu0  ;;  %v1567_v7 = vor.u32 %v1566_v49, %v1563_v0 }
 0x1c7   : > { %v1413_v32 = vadd.f32 %v1326_v31, %v5889_v53  ;;  %v6323_v31 = vld [vmem:[%s5794_s8 + $0x68] sm:$0xff] }
 0x1c8   : > { %4968 = vmatmul.msk.bf16.gmra.mxu2 %vm445_vm0, %v6284_v24  ;;  %v1714_v27 = vpop.f32.mrf.mxu1  ;;  %v6320_v11 = vsel %vm1461_vm3, %v1558_v63, %v1567_v7  ;;  %v1570_v63 = vshrl.u32 %v6323_v31, 16  ;;  %v1573_v49 = vshll.u32 %v6323_v31, 16 }
 0x1c9   : > { %v5419_v39 = vpop.eup %5418  ;;  %v1799_v13 = vadd.f32 %v1712_v61, %v1413_v32  ;;  %4904 = vmatmul.msk.bf16.gmra.mxu0 %vm445_vm0, %v6302_v51  ;;  %4998 = vmatmul.msk.bf16.gmra.mxu3 %vm445_vm0, %v6284_v24 }
 0x1ca   : > { %3883 = vst.msk [vmem:[%s6280_s15 + $0x8] sm:$0xff] %vm445_vm0, %v5419_v39  ;;  %v1230_v39 = vrot.slane %v6287_v30, 1 }
 0x1cb   : > { %5420 = vtanh.f32 %v1799_v13  ;;  %v1864_v53 = vpop.f32.mrf.mxu2 }
 0x1cc   : > { %v6314_v55 = vadd.f32 %v1864_v53, %v5895_v58  ;;  %v6316_v38 = vpop.f32.mrf.mxu3  ;;  %v6338_v13 = vsel %vm760_vm1, %v1228_v20, %v1230_v39  ;;  %v1572_v53 = vrot.slane %v1570_v63, 1 }
 0x1cd   : > { %7909 = vst [vmem:[#allocation50_spill] sm:$0xff] %v6316_v38 }
 0x1ce   : > { %v1328_v44 = vpop.f32.mrf.mxu0 }
 0x1cf   : > { %v1414_v61 = vadd.f32 %v1328_v44, %v5897_v62 }
 0x1d0   : > { %v1717_v4 = vpop.f32.mrf.mxu1 }
 0x1d1   : > { %v5421_v32 = vpop.eup %5420  ;;  %v1800_v41 = vadd.f32 %v1714_v27, %v1414_v61 }
 0x1d2   : > { %3884 = vst.msk [vmem:[%s6280_s15 + $0x10] sm:$0xff] %vm445_vm0, %v5421_v32 }
 0x1d3   : > { %5422 = vtanh.f32 %v1800_v41  ;;  %v1866_v58 = vpop.f32.mrf.mxu2  ;;  %4939 = vmatmul.msk.bf16.gmra.mxu1 %vm445_vm0, %v6320_v11 }
 0x1d4   : > { %v6331_v62 = vadd.f32 %v1866_v58, %v5900_v5  ;;  %v6333_v0 = vpop.f32.mrf.mxu3  ;;  %v1575_v5 = vrot.slane %v1573_v49, 2 }
 0x1d5   : > { %7910 = vst [vmem:[#allocation51_spill] sm:$0xff] %v6333_v0 }
 0x1d6   : > { %v1331_v27 = vpop.f32.mrf.mxu0  ;;  %v1576_v58 = vor.u32 %v1575_v5, %v1572_v53 }
 0x1d7   : > { %v1415_v30 = vadd.f32 %v1331_v27, %v5904_v9 }
 0x1d8   : > { %4969 = vmatmul.msk.bf16.gmra.mxu2 %vm445_vm0, %v6320_v11  ;;  %v1719_v41 = vpop.f32.mrf.mxu1  ;;  %v6356_v27 = vsel %vm1461_vm3, %v1567_v7, %v1576_v58 }
 0x1d9   : > { %v5423_v44 = vpop.eup %5422  ;;  %v1801_v61 = vadd.f32 %v1717_v4, %v1415_v30  ;;  %4905 = vmatmul.msk.bf16.gmra.mxu0 %vm445_vm0, %v6338_v13  ;;  %4999 = vmatmul.msk.bf16.gmra.mxu3 %vm445_vm0, %v6320_v11  ;;  %v6359_v30 = vld [vmem:[%s5794_s8 + $0x70] sm:$0xff] }
 0x1da   : > { %3885 = vst.msk [vmem:[%s6280_s15 + $0x18] sm:$0xff] %vm445_vm0, %v5423_v44  ;;  %v1232_v44 = vrot.slane %v6323_v31, 1  ;;  %v1579_v7 = vshrl.u32 %v6359_v30, 16  ;;  %v1582_v5 = vshll.u32 %v6359_v30, 16 }
 0x1db   : > { %5424 = vtanh.f32 %v1801_v61  ;;  %v1869_v9 = vpop.f32.mrf.mxu2 }
 0x1dc   : > { %v6350_v20 = vadd.f32 %v1869_v9, %v5910_v14  ;;  %v6352_v32 = vpop.f32.mrf.mxu3  ;;  %v1581_v61 = vrot.slane %v1579_v7, 1 }
 0x1dd   : > { %7911 = vst [vmem:[#allocation52_spill] sm:$0xff] %v6352_v32 }
 0x1de   : > { %v1333_v63 = vpop.f32.mrf.mxu0 }
 0x1df   : > { %v1416_v4 = vadd.f32 %v1333_v63, %v5912_v18 }
 0x1e0   : > { %v1722_v49 = vpop.f32.mrf.mxu1 }
 0x1e1   : > { %v5425_v0 = vpop.eup %5424  ;;  %v1802_v38 = vadd.f32 %v1719_v41, %v1416_v4 }
 0x1e2   : > { %3886 = vst.msk [vmem:[%s6280_s15 + $0x20] sm:$0xff] %vm445_vm0, %v5425_v0  ;;  %v6374_v0 = vsel %vm760_vm1, %v1230_v39, %v1232_v44 }
 0x1e3   : > { %5426 = vtanh.f32 %v1802_v38  ;;  %v1871_v14 = vpop.f32.mrf.mxu2  ;;  %4940 = vmatmul.msk.bf16.gmra.mxu1 %vm445_vm0, %v6356_v27 }
 0x1e4   : > { %v6367_v18 = vadd.f32 %v1871_v14, %v5915_v25  ;;  %v6369_v53 = vpop.f32.mrf.mxu3  ;;  %v1584_v25 = vrot.slane %v1582_v5, 2 }
 0x1e5   : > { %7912 = vst [vmem:[#allocation53_spill] sm:$0xff] %v6369_v53 }
 0x1e6   : > { %v1336_v41 = vpop.f32.mrf.mxu0  ;;  %v1585_v14 = vor.u32 %v1584_v25, %v1581_v61 }
 0x1e7   : > { %v1417_v38 = vadd.f32 %v1336_v41, %v5919_v29 }
 0x1e8   : > { %4970 = vmatmul.msk.bf16.gmra.mxu2 %vm445_vm0, %v6356_v27  ;;  %v1724_v31 = vpop.f32.mrf.mxu1  ;;  %v6392_v41 = vsel %vm1461_vm3, %v1576_v58, %v1585_v14 }
 0x1e9   : > { %v5427_v9 = vpop.eup %5426  ;;  %v1803_v63 = vadd.f32 %v1722_v49, %v1417_v38  ;;  %4906 = vmatmul.msk.bf16.gmra.mxu0 %vm445_vm0, %v6374_v0  ;;  %5000 = vmatmul.msk.bf16.gmra.mxu3 %vm445_vm0, %v6356_v27  ;;  %v6395_v38 = vld [vmem:[%s5794_s8 + $0x78] sm:$0xff] }
 0x1ea   : > { %3887 = vst.msk [vmem:[%s6280_s15 + $0x28] sm:$0xff] %vm445_vm0, %v5427_v9  ;;  %v1234_v9 = vrot.slane %v6359_v30, 1  ;;  %v1588_v58 = vshrl.u32 %v6395_v38, 16  ;;  %v1591_v25 = vshll.u32 %v6395_v38, 16 }
 0x1eb   : > { %5428 = vtanh.f32 %v1803_v63  ;;  %v1874_v29 = vpop.f32.mrf.mxu2 }
 0x1ec   : > { %v6386_v39 = vadd.f32 %v1874_v29, %v5925_v35  ;;  %v6388_v4 = vpop.f32.mrf.mxu3  ;;  %v1590_v63 = vrot.slane %v1588_v58, 1 }
 0x1ed   : > { %7913 = vst [vmem:[#allocation54_spill] sm:$0xff] %v6388_v4 }
 0x1ee   : > { %v1338_v7 = vpop.f32.mrf.mxu0 }
 0x1ef   : > { %v1418_v49 = vadd.f32 %v1338_v7, %v5927_v40 }
 0x1f0   : > { %v1727_v5 = vpop.f32.mrf.mxu1 }
 0x1f1   : > { %v5429_v53 = vpop.eup %5428  ;;  %v1804_v32 = vadd.f32 %v1724_v31, %v1418_v49 }
 0x1f2   : > { %3888 = vst.msk [vmem:[%s6280_s15 + $0x30] sm:$0xff] %vm445_vm0, %v5429_v53  ;;  %v6410_v53 = vsel %vm760_vm1, %v1232_v44, %v1234_v9 }
 0x1f3   : > { %5430 = vtanh.f32 %v1804_v32  ;;  %v1876_v35 = vpop.f32.mrf.mxu2  ;;  %4941 = vmatmul.msk.bf16.gmra.mxu1 %vm445_vm0, %v6392_v41 }
 0x1f4   : > { %v6403_v40 = vadd.f32 %v1876_v35, %v5930_v48  ;;  %v6405_v61 = vpop.f32.mrf.mxu3  ;;  %v1593_v48 = vrot.slane %v1591_v25, 2 }
 0x1f5   : > { %7914 = vst [vmem:[#allocation55_spill] sm:$0xff] %v6405_v61 }
 0x1f6   : > { %v1341_v31 = vpop.f32.mrf.mxu0  ;;  %v1594_v35 = vor.u32 %v1593_v48, %v1590_v63 }
 0x1f7   : > { %v1419_v32 = vadd.f32 %v1341_v31, %v5934_v54 }
 0x1f8   : > { %4971 = vmatmul.msk.bf16.gmra.mxu2 %vm445_vm0, %v6392_v41  ;;  %v1729_v30 = vpop.f32.mrf.mxu1  ;;  %v6428_v31 = vsel %vm1461_vm3, %v1585_v14, %v1594_v35 }
 0x1f9   : > { %v5431_v29 = vpop.eup %5430  ;;  %v1805_v7 = vadd.f32 %v1727_v5, %v1419_v32  ;;  %4907 = vmatmul.msk.bf16.gmra.mxu0 %vm445_vm0, %v6410_v53  ;;  %5001 = vmatmul.msk.bf16.gmra.mxu3 %vm445_vm0, %v6392_v41  ;;  %v6431_v32 = vld [vmem:[%s5794_s8 + $0x80] sm:$0xff] }
 0x1fa   : > { %3889 = vst.msk [vmem:[%s6280_s15 + $0x38] sm:$0xff] %vm445_vm0, %v5431_v29  ;;  %v1236_v29 = vrot.slane %v6395_v38, 1  ;;  %v1597_v14 = vshrl.u32 %v6431_v32, 16  ;;  %v1600_v48 = vshll.u32 %v6431_v32, 16 }
 0x1fb   : > { %5432 = vtanh.f32 %v1805_v7  ;;  %v1879_v54 = vpop.f32.mrf.mxu2 }
 0x1fc   : > { %v6422_v44 = vadd.f32 %v1879_v54, %v5940_v60  ;;  %v6424_v49 = vpop.f32.mrf.mxu3  ;;  %v1599_v7 = vrot.slane %v1597_v14, 1 }
 0x1fd   : > { %7915 = vst [vmem:[#allocation56_spill] sm:$0xff] %v6424_v49 }
 0x1fe   : > { %v1343_v58 = vpop.f32.mrf.mxu0 }
 0x1ff   : > { %v1420_v5 = vadd.f32 %v1343_v58, %v5942_v1 }
 0x200   : > { %v1732_v25 = vpop.f32.mrf.mxu1 }
 0x201   : > { %v5433_v61 = vpop.eup %5432  ;;  %v1806_v4 = vadd.f32 %v1729_v30, %v1420_v5 }
 0x202   : > { %3890 = vst.msk [vmem:[%s6280_s15 + $0x40] sm:$0xff] %vm445_vm0, %v5433_v61  ;;  %v6446_v61 = vsel %vm760_vm1, %v1234_v9, %v1236_v29 }
 0x203   : > { %5434 = vtanh.f32 %v1806_v4  ;;  %v1881_v60 = vpop.f32.mrf.mxu2  ;;  %4942 = vmatmul.msk.bf16.gmra.mxu1 %vm445_vm0, %v6428_v31 }
 0x204   : > { %v6439_v1 = vadd.f32 %v1881_v60, %v5945_v10  ;;  %v6441_v63 = vpop.f32.mrf.mxu3  ;;  %v1602_v10 = vrot.slane %v1600_v48, 2 }
 0x205   : > { %7916 = vst [vmem:[#allocation57_spill] sm:$0xff] %v6441_v63 }
 0x206   : > { %v1346_v30 = vpop.f32.mrf.mxu0  ;;  %v1603_v60 = vor.u32 %v1602_v10, %v1599_v7 }
 0x207   : > { %v1421_v4 = vadd.f32 %v1346_v30, %v5949_v15 }
 0x208   : > { %4972 = vmatmul.msk.bf16.gmra.mxu2 %vm445_vm0, %v6428_v31  ;;  %v1734_v38 = vpop.f32.mrf.mxu1  ;;  %v6464_v30 = vsel %vm1461_vm3, %v1594_v35, %v1603_v60 }
 0x209   : > { %v5435_v54 = vpop.eup %5434  ;;  %v1807_v58 = vadd.f32 %v1732_v25, %v1421_v4  ;;  %4908 = vmatmul.msk.bf16.gmra.mxu0 %vm445_vm0, %v6446_v61  ;;  %5002 = vmatmul.msk.bf16.gmra.mxu3 %vm445_vm0, %v6428_v31  ;;  %v6467_v4 = vld [vmem:[%s5794_s8 + $0x88] sm:$0xff] }
 0x20a   : > { %3891 = vst.msk [vmem:[%s6280_s15 + $0x48] sm:$0xff] %vm445_vm0, %v5435_v54  ;;  %v1238_v54 = vrot.slane %v6431_v32, 1  ;;  %v1606_v35 = vshrl.u32 %v6467_v4, 16  ;;  %v1609_v10 = vshll.u32 %v6467_v4, 16 }
 0x20b   : > { %5436 = vtanh.f32 %v1807_v58  ;;  %v1884_v15 = vpop.f32.mrf.mxu2 }
 0x20c   : > { %v6458_v9 = vadd.f32 %v1884_v15, %v5955_v21  ;;  %v6460_v5 = vpop.f32.mrf.mxu3  ;;  %v1608_v58 = vrot.slane %v1606_v35, 1 }
 0x20d   : > { %7917 = vst [vmem:[#allocation58_spill] sm:$0xff] %v6460_v5 }
 0x20e   : > { %v1348_v14 = vpop.f32.mrf.mxu0 }
 0x20f   : > { %v1422_v25 = vadd.f32 %v1348_v14, %v5957_v26 }
 0x210   : > { %v1737_v48 = vpop.f32.mrf.mxu1 }
 0x211   : > { %v5437_v63 = vpop.eup %5436  ;;  %v1808_v49 = vadd.f32 %v1734_v38, %v1422_v25 }
 0x212   : > { %3892 = vst.msk [vmem:[%s6280_s15 + $0x50] sm:$0xff] %vm445_vm0, %v5437_v63  ;;  %v6482_v63 = vsel %vm760_vm1, %v1236_v29, %v1238_v54 }
 0x213   : > { %5438 = vtanh.f32 %v1808_v49  ;;  %v1886_v21 = vpop.f32.mrf.mxu2  ;;  %4943 = vmatmul.msk.bf16.gmra.mxu1 %vm445_vm0, %v6464_v30 }
 0x214   : > { %v6475_v26 = vadd.f32 %v1886_v21, %v5960_v36  ;;  %v6477_v7 = vpop.f32.mrf.mxu3  ;;  %v1611_v36 = vrot.slane %v1609_v10, 2 }
 0x215   : > { %7918 = vst [vmem:[#allocation59_spill] sm:$0xff] %v6477_v7 }
 0x216   : > { %v1351_v38 = vpop.f32.mrf.mxu0  ;;  %v1612_v21 = vor.u32 %v1611_v36, %v1608_v58 }
 0x217   : > { %v1423_v49 = vadd.f32 %v1351_v38, %v5964_v43 }
 0x218   : > { %4973 = vmatmul.msk.bf16.gmra.mxu2 %vm445_vm0, %v6464_v30  ;;  %v1739_v32 = vpop.f32.mrf.mxu1  ;;  %v6500_v38 = vsel %vm1461_vm3, %v1603_v60, %v1612_v21 }
 0x219   : > { %v5439_v15 = vpop.eup %5438  ;;  %v1809_v14 = vadd.f32 %v1737_v48, %v1423_v49  ;;  %4909 = vmatmul.msk.bf16.gmra.mxu0 %vm445_vm0, %v6482_v63  ;;  %5003 = vmatmul.msk.bf16.gmra.mxu3 %vm445_vm0, %v6464_v30  ;;  %v6503_v49 = vld [vmem:[%s5794_s8 + $0x90] sm:$0xff] }
 0x21a   : > { %3893 = vst.msk [vmem:[%s6280_s15 + $0x58] sm:$0xff] %vm445_vm0, %v5439_v15  ;;  %v1240_v15 = vrot.slane %v6467_v4, 1  ;;  %v1615_v58 = vshrl.u32 %v6503_v49, 16 }
 0x21b   : > { %5440 = vtanh.f32 %v1809_v14  ;;  %v1889_v43 = vpop.f32.mrf.mxu2 }
 0x21c   : > { %v6494_v29 = vadd.f32 %v1889_v43, %v5970_v50  ;;  %v6496_v25 = vpop.f32.mrf.mxu3  ;;  %v1617_v14 = vrot.slane %v1615_v58, 1 }
 0x21d   : > { %7919 = vst [vmem:[#allocation60_spill] sm:$0xff] %v6496_v25 }
 0x21e   : > { %v1353_v35 = vpop.f32.mrf.mxu0 }
 0x21f   : > { %v1424_v48 = vadd.f32 %v1353_v35, %v5972_v56 }
 0x220   : > { %v1742_v10 = vpop.f32.mrf.mxu1 }
 0x221   : > { %v5441_v7 = vpop.eup %5440  ;;  %v1810_v5 = vadd.f32 %v1739_v32, %v1424_v48  ;;  %v1618_v32 = vshll.u32 %v6503_v49, 16  ;;  %v1452_v48 = vld [vmem:[%s5794_s8 + $0x98] sm:$0x3] }
 0x222   : > { %3894 = vst.msk [vmem:[%s6280_s15 + $0x60] sm:$0xff] %vm445_vm0, %v5441_v7  ;;  %v6518_v7 = vsel %vm760_vm1, %v1238_v54, %v1240_v15 }
 0x223   : > { %5442 = vtanh.f32 %v1810_v5  ;;  %v1891_v50 = vpop.f32.mrf.mxu2  ;;  %4944 = vmatmul.msk.bf16.gmra.mxu1 %vm445_vm0, %v6500_v38 }
 0x224   : > { %v6511_v56 = vadd.f32 %v1891_v50, %v5975_v3  ;;  %v6513_v60 = vpop.f32.mrf.mxu3  ;;  %v1620_v3 = vrot.slane %v1618_v32, 2  ;;  %v1459_v32 = vunpack.c.l.b16 %v1452_v48 }
 0x225   : > { %7920 = vst [vmem:[#allocation61_spill] sm:$0xff] %v6513_v60 }
 0x226   : > { %v1356_v36 = vpop.f32.mrf.mxu0  ;;  %v1621_v58 = vor.u32 %v1620_v3, %v1617_v14  ;;  %v6539_v25 = vpack.c.b16 %v1459_v32, %v1459_v32  ;;  %v1110_v32 = vld [vmem:[%s5794_s8 + $0x98] sm:$0x1] }
 0x227   : > { %v1425_v5 = vadd.f32 %v1356_v36, %v5979_v8 }
 0x228   : > { %4974 = vmatmul.msk.bf16.gmra.mxu2 %vm445_vm0, %v6500_v38  ;;  %v1744_v4 = vpop.f32.mrf.mxu1  ;;  %v6537_v60 = vsel %vm1461_vm3, %v1612_v21, %v1621_v58  ;;  %7922 = vst [vmem:[#allocation63_spill] sm:$0xff] %v6539_v25  ;;  %v1624_v14 = vshrl.u32 %v6539_v25, 16  ;;  %v1627_v3 = vshll.u32 %v6539_v25, 16 }
 0x229   : > { %v5443_v43 = vpop.eup %5442  ;;  %v1811_v35 = vadd.f32 %v1742_v10, %v1425_v5  ;;  %4910 = vmatmul.msk.bf16.gmra.mxu0 %vm445_vm0, %v6518_v7  ;;  %5004 = vmatmul.msk.bf16.gmra.mxu3 %vm445_vm0, %v6500_v38 }
 0x22a   : > { %3895 = vst.msk [vmem:[%s6280_s15 + $0x68] sm:$0xff] %vm445_vm0, %v5443_v43 }
 0x22b   : > { %5444 = vtanh.f32 %v1811_v35  ;;  %v1894_v8 = vpop.f32.mrf.mxu2 }
 0x22c   : > { %v6531_v54 = vadd.f32 %v1894_v8, %v5985_v17  ;;  %v6533_v50 = vpop.f32.mrf.mxu3  ;;  %v1242_v17 = vrot.slane %v6503_v49, 1 }
 0x22d   : > { %7921 = vst [vmem:[#allocation62_spill] sm:$0xff] %v6533_v50 }
 0x22e   : > { %v1358_v10 = vpop.f32.mrf.mxu0  ;;  %v6554_v48 = vsel %vm760_vm1, %v1240_v15, %v1242_v17 }
 0x22f   : > { %v1426_v36 = vadd.f32 %v1358_v10, %v5987_v23 }
 0x230   : > { %v1747_v5 = vpop.f32.mrf.mxu1 }
 0x231   : > { %v5445_v43 = vpop.eup %5444  ;;  %v1812_v35 = vadd.f32 %v1744_v4, %v1426_v36  ;;  %v1629_v36 = vrot.slane %v1627_v3, 2 }
 0x232   : > { %3896 = vst.msk [vmem:[%s6280_s15 + $0x70] sm:$0xff] %vm445_vm0, %v5445_v43 }
 0x233   : > { %5446 = vtanh.f32 %v1812_v35  ;;  %v1896_v8 = vpop.f32.mrf.mxu2  ;;  %4945 = vmatmul.msk.bf16.gmra.mxu1 %vm445_vm0, %v6537_v60 }
 0x234   : > { %v6547_v23 = vadd.f32 %v1896_v8, %v5991_v37  ;;  %v6549_v21 = vpop.f32.mrf.mxu3  ;;  %v1626_v37 = vrot.slane %v1624_v14, 1 }
 0x235   : > { %7923 = vst [vmem:[#allocation64_spill] sm:$0xff] %v6549_v21 }
 0x236   : > { %v1361_v4 = vpop.f32.mrf.mxu0  ;;  %v1630_v3 = vor.u32 %v1629_v36, %v1626_v37  ;;  %v5391_v37 = vld [vmem:[%s7841_s1 + $0xd8] sm:$0xff] }
 0x237   : > { %v1427_v49 = vadd.f32 %v1361_v4, %v5995_v47  ;;  %v1189_v47 = vunpack.c.l.b16 %v1110_v32  ;;  %3317 = vmatpush.bf16.msrb.mxu1 %v5391_v37 }
 0x238   : > { %4975 = vmatmul.msk.bf16.gmra.mxu2 %vm445_vm0, %v6537_v60  ;;  %v1749_v10 = vpop.f32.mrf.mxu1  ;;  %v6573_v50 = vsel %vm1461_vm3, %v1621_v58, %v1630_v3  ;;  %v7926_v3 = vunpack.c.l.b16 %v6002_v52 }
 0x239   : > { %v5447_v43 = vpop.eup %5446  ;;  %v1813_v35 = vadd.f32 %v1747_v5, %v1427_v49  ;;  %4911 = vmatmul.msk.bf16.gmra.mxu0 %vm445_vm0, %v6554_v48  ;;  %5005 = vmatmul.msk.bf16.gmra.mxu3 %vm445_vm0, %v6537_v60  ;;  %v1208_v4 = vpack.c.b16 %v1189_v47, %v1189_v47 }
 0x23a   : > { %3897 = vst.msk [vmem:[%s6280_s15 + $0x78] sm:$0xff] %vm445_vm0, %v5447_v43  ;;  %v2217_v43 = vld [vmem:[%s5794_s8 + $0x8] sm:$0xc] }
 0x23b   : > { %5448 = vtanh.f32 %v1813_v35  ;;  %v1899_v15 = vpop.f32.mrf.mxu2  ;;  %v1244_v32 = vrot.slane %v1208_v4, 1  ;;  %v2224_v35 = vunpack.c.l.b16 %v2217_v43 }
 0x23c   : > { %v6567_v8 = vadd.f32 %v1899_v15, %v6014_v6  ;;  %v6569_v14 = vpop.f32.mrf.mxu3  ;;  %v5389_v6 = vld [vmem:[%s7841_s1 + $0xc8] sm:$0xff] }
 0x23d   : > { %7924 = vst [vmem:[#allocation65_spill] sm:$0xff] %v6569_v14  ;;  %2936 = vmatpush.bf16.msrb.mxu0 %v5389_v6  ;;  %v6598_v47 = vsel %vm760_vm1, %v1242_v17, %v1244_v32  ;;  %v5704_v32 = vld [vmem:[%s5794_s8 + $0x10] sm:$0xff] }
 0x23e   : > { %v1363_v5 = vpop.f32.mrf.mxu0  ;;  %v2228_v6 = vrot.slane %v5704_v32, 2 }
 0x23f   : > { %v1428_v49 = vadd.f32 %v1363_v5, %v6019_v19  ;;  %v5393_v19 = vld [vmem:[%s7841_s1 + $0xe8] sm:$0xff]  ;;  %v2225_v5 = vpack.c.b16 %v7926_v3, %v2224_v35 }
 0x240   : > { %v1752_v21 = vpop.f32.mrf.mxu1  ;;  %3469 = vmatpush.bf16.msrb.mxu2 %v5393_v19 }
 0x241   : > { %v5449_v33 = vpop.eup %5448  ;;  %v1814_v25 = vadd.f32 %v1749_v10, %v1428_v49  ;;  %v2227_v52 = vrot.slane %v2225_v5, 2 }
 0x242   : > { %3898 = vst.msk [vmem:[%s6280_s15 + $0x80] sm:$0xff] %vm445_vm0, %v5449_v33  ;;  %v5395_v33 = vld [vmem:[%s7841_s1 + $0xf8] sm:$0xff] }
 0x243   : > { %5450 = vtanh.f32 %v1814_v25  ;;  %v1901_v58 = vpop.f32.mrf.mxu2  ;;  %4946 = vmatmul.msk.bf16.gmra.mxu1 %vm445_vm0, %v6573_v50  ;;  %3717 = vmatpush.bf16.msrb.mxu3 %v5395_v33 }
 0x244   : > { %v6593_v10 = vadd.f32 %v1901_v58, %v6029_v45  ;;  %v6595_v36 = vpop.f32.mrf.mxu3  ;;  %v2229_v58 = vsel %vm2226_vm4, %v2227_v52, %v2228_v6  ;;  %v7931_v52 = vld [vmem:[#allocation4_spill] sm:$0xff] }
 0x245   : > { %7925 = vst [vmem:[#allocation66_spill] sm:$0xff] %v6595_v36 }
 0x246   : > { %v1366_v25 = vpop.f32.mrf.mxu0 }
 0x247   : > { %v1429_v15 = vadd.f32 %v1366_v25, %v6033_v57 }
 0x248   : > { %4976 = vmatmul.msk.bf16.gmra.mxu2 %vm445_vm0, %v6573_v50  ;;  %v1754_v45 = vpop.f32.mrf.mxu1 }
 0x249   : > { %v5451_v4 = vpop.eup %5450  ;;  %v1815_v49 = vadd.f32 %v1752_v21, %v1429_v15  ;;  %4912 = vmatmul.msk.bf16.gmra.mxu0 %vm445_vm0, %v6598_v47  ;;  %5006 = vmatmul.msk.bf16.gmra.mxu3 %vm445_vm0, %v6573_v50 }
 0x24a   : > { %3899 = vst.msk [vmem:[%s6280_s15 + $0x88] sm:$0xff] %vm445_vm0, %v5451_v4 }
 0x24b   : > { %5452 = vtanh.f32 %v1815_v49  ;;  %v1904_v57 = vpop.f32.mrf.mxu2  ;;  %v7929_v49 = vld [vmem:[#allocation3_spill] sm:$0xff] }
 0x24c   : > { %v6612_v17 = vadd.f32 %v1904_v57, %v6038_v16  ;;  %v6614_v43 = vpop.f32.mrf.mxu3  ;;  %v7930_v57 = vld [vmem:[#allocation2_spill] sm:$0xff] }
 0x24d   : > { %7927 = vst [vmem:[#allocation67_spill] sm:$0xff] %v6614_v43 }
 0x24e   : > { %v1368_v21 = vpop.f32.mrf.mxu0 }
 0x24f   : > { %v1430_v37 = vadd.f32 %v1368_v21, %v6040_v28  ;;  %v5705_v21 = vld [vmem:[%s5794_s8 + $0x18] sm:$0xff] }
 0x250   : > { %v1757_v19 = vpop.f32.mrf.mxu1 }
 0x251   : > { %v5453_v33 = vpop.eup %5452  ;;  %v1816_v35 = vadd.f32 %v1754_v45, %v1430_v37  ;;  %v2230_v37 = vrot.slane %v5705_v21, 2 }
 0x252   : > { %3900 = vst.msk [vmem:[%s6280_s15 + $0x90] sm:$0xff] %vm445_vm0, %v5453_v33 }
 0x253   : > { %5454 = vtanh.f32 %v1816_v35  ;;  %v1906_v16 = vpop.f32.mrf.mxu2  ;;  %5049 = vmatmul.msk.bf16.vlgmr.msra.gmra.mxu1 %vm445_vm0, %v2229_v58 }
 0x254   : > { %v6623_v25 = vadd.f32 %v1906_v16, %v6049_v59  ;;  %v6625_v15 = vpop.f32.mrf.mxu3  ;;  %v2231_v16 = vsel %vm2226_vm4, %v2228_v6, %v2230_v37 }
 0x255   : > { %7928 = vst [vmem:[#allocation68_spill] sm:$0xff] %v6625_v15 }
 0x256   : > { %v1371_v3 = vpop.f32.mrf.mxu0 }
 0x257   : > { %v1431_v28 = vadd.f32 %v1371_v3, %v6054_v12 }
 0x258   : > { %5079 = vmatmul.msk.bf16.vlgmr.msra.gmra.mxu2 %vm445_vm0, %v2229_v58  ;;  %v1759_v5 = vpop.f32.mrf.mxu1 }
 0x259   : > { %v5455_v4 = vpop.eup %5454  ;;  %v1817_v45 = vadd.f32 %v1757_v19, %v1431_v28  ;;  %5015 = vmatmul.msk.bf16.vlgmr.msra.gmra.mxu0 %vm445_vm0, %v7929_v49  ;;  %5105 = vmatmul.msk.bf16.vlgmr.msra.gmra.mxu3 %vm445_vm0, %v7930_v57  ;;  %v7933_v19 = vld [vmem:[#allocation5_spill] sm:$0xff] }
 0x25a   : > { %3901 = vst.msk [vmem:[%s6280_s15 + $0x98] sm:$0xff] %vm445_vm0, %v5455_v4 }
 0x25b   : > { %5456 = vtanh.f32 %v1817_v45  ;;  %v1909_v59 = vpop.f32.mrf.mxu2  ;;  %v7934_v45 = vld [vmem:[#allocation7_spill] sm:$0xff] }
 0x25c   : > { %v6636_v32 = vadd.f32 %v1909_v59, %v7931_v52  ;;  %v6638_v12 = vpop.f32.mrf.mxu3  ;;  %v7936_v52 = vld [vmem:[#allocation9_spill] sm:$0xff] }
 0x25d   : > { %7932 = vst [vmem:[#allocation3_spill] sm:$0xff] %v6638_v12 }
 0x25e   : > { %v1373_v58 = vpop.f32.mrf.mxu0 }
 0x25f   : > { %v1432_v33 = vadd.f32 %v1373_v58, %v7933_v19  ;;  %v7937_v19 = vld [vmem:[#allocation8_spill] sm:$0xff] }
 0x260   : > { %v1762_v35 = vpop.f32.mrf.mxu1 }
 0x261   : > { %v5457_v3 = vpop.eup %5456  ;;  %v1818_v28 = vadd.f32 %v1759_v5, %v1432_v33  ;;  %v7938_v33 = vld [vmem:[#allocation6_spill] sm:$0xff] }
 0x262   : > { %3902 = vst.msk [vmem:[%s6280_s15 + $0xa0] sm:$0xff] %vm445_vm0, %v5457_v3 }
 0x263   : > { %5458 = vtanh.f32 %v1818_v28  ;;  %v1911_v4 = vpop.f32.mrf.mxu2  ;;  %5050 = vmatmul.msk.bf16.gmra.mxu1 %vm445_vm0, %v2231_v16  ;;  %v7939_v28 = vld [vmem:[#allocation10_spill] sm:$0xff] }
 0x264   : > { %v6647_v49 = vadd.f32 %v1911_v4, %v7934_v45  ;;  %v6649_v57 = vpop.f32.mrf.mxu3 }
 0x265   : > { %7935 = vst [vmem:[#allocation2_spill] sm:$0xff] %v6649_v57 }
 0x266   : > { %v1376_v59 = vpop.f32.mrf.mxu0 }
 0x267   : > { %v1433_v21 = vadd.f32 %v1376_v59, %v7936_v52 }
 0x268   : > { %5080 = vmatmul.msk.bf16.gmra.mxu2 %vm445_vm0, %v2231_v16  ;;  %v1764_v6 = vpop.f32.mrf.mxu1  ;;  %v5706_v16 = vld [vmem:[%s5794_s8 + $0x20] sm:$0xff] }
 0x269   : > { %v5459_v58 = vpop.eup %5458  ;;  %v1819_v5 = vadd.f32 %v1762_v35, %v1433_v21  ;;  %5016 = vmatmul.msk.bf16.gmra.mxu0 %vm445_vm0, %v7937_v19  ;;  %5106 = vmatmul.msk.bf16.gmra.mxu3 %vm445_vm0, %v7938_v33  ;;  %v2232_v59 = vrot.slane %v5706_v16, 2  ;;  %v7941_v35 = vld [vmem:[#allocation11_spill] sm:$0xff] }
 0x26a   : > { %3903 = vst.msk [vmem:[%s6280_s15 + $0xa8] sm:$0xff] %vm445_vm0, %v5459_v58 }
 0x26b   : > { %5460 = vtanh.f32 %v1819_v5  ;;  %v1914_v3 = vpop.f32.mrf.mxu2  ;;  %v2233_v19 = vsel %vm2226_vm4, %v2230_v37, %v2232_v59  ;;  %v7942_v5 = vld [vmem:[#allocation13_spill] sm:$0xff] }
 0x26c   : > { %v6660_v4 = vadd.f32 %v1914_v3, %v7939_v28  ;;  %v6662_v45 = vpop.f32.mrf.mxu3 }
 0x26d   : > { %7940 = vst [vmem:[#allocation4_spill] sm:$0xff] %v6662_v45 }
 0x26e   : > { %v1378_v52 = vpop.f32.mrf.mxu0 }
 0x26f   : > { %v1434_v21 = vadd.f32 %v1378_v52, %v7941_v35  ;;  %v7944_v52 = vld [vmem:[#allocation15_spill] sm:$0xff] }
 0x270   : > { %v1767_v57 = vpop.f32.mrf.mxu1 }
 0x271   : > { %v5461_v12 = vpop.eup %5460  ;;  %v1820_v33 = vadd.f32 %v1764_v6, %v1434_v21  ;;  %v7945_v21 = vld [vmem:[#allocation14_spill] sm:$0xff] }
 0x272   : > { %3904 = vst.msk [vmem:[%s6280_s15 + $0xb0] sm:$0xff] %vm445_vm0, %v5461_v12  ;;  %v7946_v12 = vld [vmem:[#allocation12_spill] sm:$0xff] }
 0x273   : > { %5462 = vtanh.f32 %v1820_v33  ;;  %v1916_v58 = vpop.f32.mrf.mxu2  ;;  %5051 = vmatmul.msk.bf16.gmra.mxu1 %vm445_vm0, %v2233_v19 }
 0x274   : > { %v6671_v3 = vadd.f32 %v1916_v58, %v7942_v5  ;;  %v6673_v28 = vpop.f32.mrf.mxu3  ;;  %v7947_v58 = vld [vmem:[#allocation16_spill] sm:$0xff] }
 0x275   : > { %7943 = vst [vmem:[#allocation5_spill] sm:$0xff] %v6673_v28 }
 0x276   : > { %v1381_v16 = vpop.f32.mrf.mxu0 }
 0x277   : > { %v1435_v35 = vadd.f32 %v1381_v16, %v7944_v52 }
 0x278   : > { %5081 = vmatmul.msk.bf16.gmra.mxu2 %vm445_vm0, %v2233_v19  ;;  %v1769_v37 = vpop.f32.mrf.mxu1  ;;  %v5707_v19 = vld [vmem:[%s5794_s8 + $0x28] sm:$0xff] }
 0x279   : > { %v5463_v45 = vpop.eup %5462  ;;  %v1821_v6 = vadd.f32 %v1767_v57, %v1435_v35  ;;  %5017 = vmatmul.msk.bf16.gmra.mxu0 %vm445_vm0, %v7945_v21  ;;  %5107 = vmatmul.msk.bf16.gmra.mxu3 %vm445_vm0, %v7946_v12  ;;  %v2234_v52 = vrot.slane %v5707_v19, 2  ;;  %v7949_v57 = vld [vmem:[#allocation17_spill] sm:$0xff] }
 0x27a   : > { %3905 = vst.msk [vmem:[%s6280_s15 + $0xb8] sm:$0xff] %vm445_vm0, %v5463_v45 }
 0x27b   : > { %5464 = vtanh.f32 %v1821_v6  ;;  %v1919_v33 = vpop.f32.mrf.mxu2  ;;  %v2235_v21 = vsel %vm2226_vm4, %v2232_v59, %v2234_v52  ;;  %v7950_v6 = vld [vmem:[#allocation19_spill] sm:$0xff] }
 0x27c   : > { %v6684_v5 = vadd.f32 %v1919_v33, %v7947_v58  ;;  %v6686_v16 = vpop.f32.mrf.mxu3 }
 0x27d   : > { %7948 = vst [vmem:[#allocation7_spill] sm:$0xff] %v6686_v16 }
 0x27e   : > { %v1383_v28 = vpop.f32.mrf.mxu0 }
 0x27f   : > { %v1436_v35 = vadd.f32 %v1383_v28, %v7949_v57  ;;  %v7952_v28 = vld [vmem:[#allocation21_spill] sm:$0xff] }
 0x280   : > { %v1772_v15 = vpop.f32.mrf.mxu1 }
 0x281   : > { %v5465_v43 = vpop.eup %5464  ;;  %v1822_v12 = vadd.f32 %v1769_v37, %v1436_v35  ;;  %v7953_v35 = vld [vmem:[#allocation20_spill] sm:$0xff] }
 0x282   : > { %3906 = vst.msk [vmem:[%s6280_s15 + $0xc0] sm:$0xff] %vm445_vm0, %v5465_v43  ;;  %v7954_v43 = vld [vmem:[#allocation18_spill] sm:$0xff] }
 0x283   : > { %5466 = vtanh.f32 %v1822_v12  ;;  %v1921_v45 = vpop.f32.mrf.mxu2  ;;  %5052 = vmatmul.msk.bf16.gmra.mxu1 %vm445_vm0, %v2235_v21 }
 0x284   : > { %v6695_v33 = vadd.f32 %v1921_v45, %v7950_v6  ;;  %v6697_v58 = vpop.f32.mrf.mxu3  ;;  %v7955_v45 = vld [vmem:[#allocation22_spill] sm:$0xff] }
 0x285   : > { %7951 = vst [vmem:[#allocation9_spill] sm:$0xff] %v6697_v58 }
 0x286   : > { %v1386_v19 = vpop.f32.mrf.mxu0 }
 0x287   : > { %v1437_v57 = vadd.f32 %v1386_v19, %v7952_v28 }
 0x288   : > { %5082 = vmatmul.msk.bf16.gmra.mxu2 %vm445_vm0, %v2235_v21  ;;  %v1774_v59 = vpop.f32.mrf.mxu1  ;;  %v5708_v21 = vld [vmem:[%s5794_s8 + $0x30] sm:$0xff] }
 0x289   : > { %v5467_v16 = vpop.eup %5466  ;;  %v1823_v37 = vadd.f32 %v1772_v15, %v1437_v57  ;;  %5018 = vmatmul.msk.bf16.gmra.mxu0 %vm445_vm0, %v7953_v35  ;;  %5108 = vmatmul.msk.bf16.gmra.mxu3 %vm445_vm0, %v7954_v43  ;;  %v2236_v28 = vrot.slane %v5708_v21, 2  ;;  %v7958_v15 = vld [vmem:[#allocation23_spill] sm:$0xff] }
 0x28a   : > { %3907 = vst.msk [vmem:[%s6280_s15 + $0xc8] sm:$0xff] %vm445_vm0, %v5467_v16 }
 0x28b   : > { %5468 = vtanh.f32 %v1823_v37  ;;  %v1924_v12 = vpop.f32.mrf.mxu2  ;;  %v2237_v35 = vsel %vm2226_vm4, %v2234_v52, %v2236_v28  ;;  %v7959_v37 = vld [vmem:[#allocation25_spill] sm:$0xff] }
 0x28c   : > { %v6708_v6 = vadd.f32 %v1924_v12, %v7955_v45  ;;  %v6710_v19 = vpop.f32.mrf.mxu3 }
 0x28d   : > { %7957 = vst [vmem:[#allocation6_spill] sm:$0xff] %v6710_v19 }
 0x28e   : > { %7956 = vst [vmem:[#allocation8_spill] sm:$0xff] %v6708_v6  ;;  %v1388_v58 = vpop.f32.mrf.mxu0 }
 0x28f   : > { %v1438_v57 = vadd.f32 %v1388_v58, %v7958_v15  ;;  %v7962_v58 = vld [vmem:[#allocation27_spill] sm:$0xff] }
 0x290   : > { %v1777_v36 = vpop.f32.mrf.mxu1 }
 0x291   : > { %v5469_v14 = vpop.eup %5468  ;;  %v1824_v43 = vadd.f32 %v1774_v59, %v1438_v57  ;;  %v7963_v57 = vld [vmem:[#allocation26_spill] sm:$0xff] }
 0x292   : > { %3908 = vst.msk [vmem:[%s6280_s15 + $0xd0] sm:$0xff] %vm445_vm0, %v5469_v14  ;;  %v7964_v14 = vld [vmem:[#allocation24_spill] sm:$0xff] }
 0x293   : > { %5470 = vtanh.f32 %v1824_v43  ;;  %v1926_v16 = vpop.f32.mrf.mxu2  ;;  %5053 = vmatmul.msk.bf16.gmra.mxu1 %vm445_vm0, %v2237_v35 }
 0x294   : > { %v6719_v12 = vadd.f32 %v1926_v16, %v7959_v37  ;;  %v6721_v45 = vpop.f32.mrf.mxu3  ;;  %v7965_v16 = vld [vmem:[#allocation28_spill] sm:$0xff] }
 0x295   : > { %7961 = vst [vmem:[#allocation11_spill] sm:$0xff] %v6721_v45 }
 0x296   : > { %7960 = vst [vmem:[#allocation10_spill] sm:$0xff] %v6719_v12  ;;  %v1391_v21 = vpop.f32.mrf.mxu0 }
 0x297   : > { %v1439_v15 = vadd.f32 %v1391_v21, %v7962_v58 }
 0x298   : > { %5083 = vmatmul.msk.bf16.gmra.mxu2 %vm445_vm0, %v2237_v35  ;;  %v1779_v52 = vpop.f32.mrf.mxu1  ;;  %v5709_v35 = vld [vmem:[%s5794_s8 + $0x38] sm:$0xff] }
 0x299   : > { %v5471_v19 = vpop.eup %5470  ;;  %v1825_v59 = vadd.f32 %v1777_v36, %v1439_v15  ;;  %5019 = vmatmul.msk.bf16.gmra.mxu0 %vm445_vm0, %v7963_v57  ;;  %5109 = vmatmul.msk.bf16.gmra.mxu3 %vm445_vm0, %v7964_v14  ;;  %v2238_v58 = vrot.slane %v5709_v35, 2  ;;  %v7968_v36 = vld [vmem:[#allocation29_spill] sm:$0xff] }
 0x29a   : > { %3909 = vst.msk [vmem:[%s6280_s15 + $0xd8] sm:$0xff] %vm445_vm0, %v5471_v19 }
 0x29b   : > { %5472 = vtanh.f32 %v1825_v59  ;;  %v1929_v43 = vpop.f32.mrf.mxu2  ;;  %v2239_v57 = vsel %vm2226_vm4, %v2236_v28, %v2238_v58  ;;  %v7969_v59 = vld [vmem:[#allocation31_spill] sm:$0xff] }
 0x29c   : > { %v6732_v37 = vadd.f32 %v1929_v43, %v7965_v16  ;;  %v6734_v21 = vpop.f32.mrf.mxu3 }
 0x29d   : > { %7967 = vst [vmem:[#allocation15_spill] sm:$0xff] %v6734_v21 }
 0x29e   : > { %7966 = vst [vmem:[#allocation13_spill] sm:$0xff] %v6732_v37  ;;  %v1393_v45 = vpop.f32.mrf.mxu0 }
 0x29f   : > { %v1440_v15 = vadd.f32 %v1393_v45, %v7968_v36  ;;  %v7972_v45 = vld [vmem:[#allocation33_spill] sm:$0xff] }
 0x2a0   : > { %v1782_v12 = vpop.f32.mrf.mxu1 }
 0x2a1   : > { %v5473_v6 = vpop.eup %5472  ;;  %v1826_v14 = vadd.f32 %v1779_v52, %v1440_v15  ;;  %v7973_v15 = vld [vmem:[#allocation32_spill] sm:$0xff] }
 0x2a2   : > { %3910 = vst.msk [vmem:[%s6280_s15 + $0xe0] sm:$0xff] %vm445_vm0, %v5473_v6  ;;  %v7974_v6 = vld [vmem:[#allocation30_spill] sm:$0xff] }
 0x2a3   : > { %5474 = vtanh.f32 %v1826_v14  ;;  %v1931_v19 = vpop.f32.mrf.mxu2  ;;  %5054 = vmatmul.msk.bf16.gmra.mxu1 %vm445_vm0, %v2239_v57 }
 0x2a4   : > { %v6743_v43 = vadd.f32 %v1931_v19, %v7969_v59  ;;  %v6745_v16 = vpop.f32.mrf.mxu3  ;;  %v7975_v19 = vld [vmem:[#allocation34_spill] sm:$0xff] }
 0x2a5   : > { %7971 = vst [vmem:[#allocation12_spill] sm:$0xff] %v6745_v16 }
 0x2a6   : > { %7970 = vst [vmem:[#allocation14_spill] sm:$0xff] %v6743_v43  ;;  %v1396_v35 = vpop.f32.mrf.mxu0 }
 0x2a7   : > { %v1441_v36 = vadd.f32 %v1396_v35, %v7972_v45 }
 0x2a8   : > { %5084 = vmatmul.msk.bf16.gmra.mxu2 %vm445_vm0, %v2239_v57  ;;  %v1784_v28 = vpop.f32.mrf.mxu1  ;;  %v5710_v57 = vld [vmem:[%s5794_s8 + $0x40] sm:$0xff] }
 0x2a9   : > { %v5475_v21 = vpop.eup %5474  ;;  %v1827_v52 = vadd.f32 %v1782_v12, %v1441_v36  ;;  %5020 = vmatmul.msk.bf16.gmra.mxu0 %vm445_vm0, %v7973_v15  ;;  %5110 = vmatmul.msk.bf16.gmra.mxu3 %vm445_vm0, %v7974_v6  ;;  %v2240_v45 = vrot.slane %v5710_v57, 2  ;;  %v7978_v12 = vld [vmem:[#allocation35_spill] sm:$0xff] }
 0x2aa   : > { %3911 = vst.msk [vmem:[%s6280_s15 + $0xe8] sm:$0xff] %vm445_vm0, %v5475_v21 }
 0x2ab   : > { %5476 = vtanh.f32 %v1827_v52  ;;  %v1934_v14 = vpop.f32.mrf.mxu2  ;;  %v2241_v15 = vsel %vm2226_vm4, %v2238_v58, %v2240_v45  ;;  %v7979_v52 = vld [vmem:[#allocation37_spill] sm:$0xff] }
 0x2ac   : > { %v6756_v59 = vadd.f32 %v1934_v14, %v7975_v19  ;;  %v6758_v35 = vpop.f32.mrf.mxu3 }
 0x2ad   : > { %7977 = vst [vmem:[#allocation17_spill] sm:$0xff] %v6758_v35 }
 0x2ae   : > { %7976 = vst [vmem:[#allocation16_spill] sm:$0xff] %v6756_v59  ;;  %v1398_v16 = vpop.f32.mrf.mxu0 }
 0x2af   : > { %v1442_v36 = vadd.f32 %v1398_v16, %v7978_v12  ;;  %v7982_v16 = vld [vmem:[#allocation39_spill] sm:$0xff] }
 0x2b0   : > { %v1787_v43 = vpop.f32.mrf.mxu1 }
 0x2b1   : > { %v5477_v37 = vpop.eup %5476  ;;  %v1828_v6 = vadd.f32 %v1784_v28, %v1442_v36  ;;  %v7983_v36 = vld [vmem:[#allocation38_spill] sm:$0xff] }
 0x2b2   : > { %3912 = vst.msk [vmem:[%s6280_s15 + $0xf0] sm:$0xff] %vm445_vm0, %v5477_v37  ;;  %v7984_v37 = vld [vmem:[#allocation36_spill] sm:$0xff] }
 0x2b3   : > { %5478 = vtanh.f32 %v1828_v6  ;;  %v1936_v21 = vpop.f32.mrf.mxu2  ;;  %5055 = vmatmul.msk.bf16.gmra.mxu1 %vm445_vm0, %v2241_v15 }
 0x2b4   : > { %v6767_v14 = vadd.f32 %v1936_v21, %v7979_v52  ;;  %v6769_v19 = vpop.f32.mrf.mxu3  ;;  %v7985_v21 = vld [vmem:[#allocation40_spill] sm:$0xff] }
 0x2b5   : > { %7981 = vst [vmem:[#allocation21_spill] sm:$0xff] %v6769_v19 }
 0x2b6   : > { %7980 = vst [vmem:[#allocation19_spill] sm:$0xff] %v6767_v14  ;;  %v1401_v57 = vpop.f32.mrf.mxu0 }
 0x2b7   : > { %v1443_v12 = vadd.f32 %v1401_v57, %v7982_v16 }
 0x2b8   : > { %5085 = vmatmul.msk.bf16.gmra.mxu2 %vm445_vm0, %v2241_v15  ;;  %v1789_v58 = vpop.f32.mrf.mxu1  ;;  %v5711_v15 = vld [vmem:[%s5794_s8 + $0x48] sm:$0xff] }
 0x2b9   : > { %v5479_v35 = vpop.eup %5478  ;;  %v1829_v28 = vadd.f32 %v1787_v43, %v1443_v12  ;;  %5021 = vmatmul.msk.bf16.gmra.mxu0 %vm445_vm0, %v7983_v36  ;;  %5111 = vmatmul.msk.bf16.gmra.mxu3 %vm445_vm0, %v7984_v37  ;;  %v2242_v16 = vrot.slane %v5711_v15, 2  ;;  %v7987_v43 = vld [vmem:[#allocation41_spill] sm:$0xff] }
 0x2ba   : > { %3913 = vst.msk [vmem:[%s6280_s15 + $0xf8] sm:$0xff] %vm445_vm0, %v5479_v35 }
 0x2bb   : > { %5480 = vtanh.f32 %v1829_v28  ;;  %v1939_v6 = vpop.f32.mrf.mxu2  ;;  %v2243_v36 = vsel %vm2226_vm4, %v2240_v45, %v2242_v16  ;;  %v7988_v28 = vld [vmem:[#allocation43_spill] sm:$0xff] }
 0x2bc   : > { %v6780_v52 = vadd.f32 %v1939_v6, %v7985_v21  ;;  %v6782_v57 = vpop.f32.mrf.mxu3 }
 0x2bd   : > { %7986 = vst [vmem:[#allocation20_spill] sm:$0xff] %v6782_v57  ;;  %v7991_v57 = vld [vmem:[#allocation45_spill] sm:$0xff] }
 0x2be   : > { %v1403_v19 = vpop.f32.mrf.mxu0 }
 0x2bf   : > { %v1444_v12 = vadd.f32 %v1403_v19, %v7987_v43 }
 0x2c0   : > { %v1792_v14 = vpop.f32.mrf.mxu1 }
 0x2c1   : > { %v5481_v59 = vpop.eup %5480  ;;  %v1830_v37 = vadd.f32 %v1789_v58, %v1444_v12  ;;  %v7992_v12 = vld [vmem:[#allocation44_spill] sm:$0xff] }
 0x2c2   : > { %3914 = vst.msk [vmem:[%s6280_s15 + $0x100] sm:$0xff] %vm445_vm0, %v5481_v59  ;;  %v7993_v59 = vld [vmem:[#allocation42_spill] sm:$0xff] }
 0x2c3   : > { %5482 = vtanh.f32 %v1830_v37  ;;  %v1941_v35 = vpop.f32.mrf.mxu2  ;;  %5056 = vmatmul.msk.bf16.gmra.mxu1 %vm445_vm0, %v2243_v36 }
 0x2c4   : > { %v6791_v6 = vadd.f32 %v1941_v35, %v7988_v28  ;;  %v6793_v21 = vpop.f32.mrf.mxu3  ;;  %v5388_v35 = vld [vmem:[%s7841_s1 + $0xc0] sm:$0xff] }
 0x2c5   : > { %7990 = vst [vmem:[#allocation22_spill] sm:$0xff] %v6793_v21  ;;  %2937 = vmatpush.bf16.msrb.mxu0 %v5388_v35 }
 0x2c6   : > { %7989 = vst [vmem:[#allocation18_spill] sm:$0xff] %v6791_v6  ;;  %v1406_v15 = vpop.f32.mrf.mxu0 }
 0x2c7   : > { %v1445_v19 = vadd.f32 %v1406_v15, %v7991_v57  ;;  %v5390_v57 = vld [vmem:[%s7841_s1 + $0xd0] sm:$0xff] }
 0x2c8   : > { %5086 = vmatmul.msk.bf16.gmra.mxu2 %vm445_vm0, %v2243_v36  ;;  %v1794_v45 = vpop.f32.mrf.mxu1  ;;  %v7994_v36 = vld [vmem:[#allocation46_spill] sm:$0xff]  ;;  %3318 = vmatpush.bf16.msrb.mxu1 %v5390_v57 }
 0x2c9   : > { %v5483_v43 = vpop.eup %5482  ;;  %v1831_v58 = vadd.f32 %v1792_v14, %v1445_v19  ;;  %5022 = vmatmul.msk.bf16.gmra.mxu0 %vm445_vm0, %v7992_v12  ;;  %5112 = vmatmul.msk.bf16.gmra.mxu3 %vm445_vm0, %v7993_v59  ;;  %v5392_v14 = vld [vmem:[%s7841_s1 + $0xe0] sm:$0xff]  ;;  %v5712_v19 = vld [vmem:[%s5794_s8 + $0x50] sm:$0xff]  ;;  %v7997_v59 = vld [vmem:[#allocation47_spill] sm:$0xff] }
 0x2ca   : > { %3915 = vst.msk [vmem:[%s6280_s15 + $0x108] sm:$0xff] %vm445_vm0, %v5483_v43  ;;  %v2244_v43 = vrot.slane %v5712_v19, 2  ;;  %3470 = vmatpush.bf16.msrb.mxu2 %v5392_v14 }
 0x2cb   : > { %5484 = vtanh.f32 %v1831_v58  ;;  %v1944_v37 = vpop.f32.mrf.mxu2  ;;  %v5394_v58 = vld [vmem:[%s7841_s1 + $0xf0] sm:$0xff] }
 0x2cc   : > { %v6813_v28 = vadd.f32 %v1944_v37, %v7994_v36  ;;  %v6815_v15 = vpop.f32.mrf.mxu3  ;;  %3718 = vmatpush.bf16.msrb.mxu3 %v5394_v58  ;;  %v2245_v37 = vsel %vm2226_vm4, %v2242_v16, %v2244_v43 }
 0x2cd   : > { %7996 = vst [vmem:[#allocation25_spill] sm:$0xff] %v6815_v15 }
 0x2ce   : > { %7995 = vst [vmem:[#allocation23_spill] sm:$0xff] %v6813_v28  ;;  %v1408_v12 = vpop.f32.mrf.mxu0 }
 0x2cf   : > { %v1446_v21 = vadd.f32 %v1408_v12, %v7997_v59 }
 0x2d0   : > { %v2339_v6 = vpop.f32.mrf.mxu1 }
 0x2d1   : > { %v5485_v36 = vpop.eup %5484  ;;  %v1832_v28 = vadd.f32 %v1794_v45, %v1446_v21  ;;  %v2429_v15 = vadd.f32 %v2339_v6, %v6273_v22 }
 0x2d2   : > { %3916 = vst.msk [vmem:[%s6280_s15 + $0x110] sm:$0xff] %vm445_vm0, %v5485_v36 }
 0x2d3   : > { %5486 = vtanh.f32 %v1832_v28  ;;  %v1946_v35 = vpop.f32.mrf.mxu2  ;;  %5057 = vmatmul.msk.bf16.gmra.mxu1 %vm445_vm0, %v2245_v37  ;;  %v5713_v28 = vld [vmem:[%s5794_s8 + $0x58] sm:$0xff] }
 0x2d4   : > { %5488 = vtanh.f32 %v2429_v15  ;;  %v6828_v57 = vadd.f32 %v1946_v35, %v6259_v46  ;;  %v6830_v14 = vpop.f32.mrf.mxu3  ;;  %v2246_v15 = vrot.slane %v5713_v28, 2 }
 0x2d5   : > { %7998 = vst [vmem:[#allocation27_spill] sm:$0xff] %v6830_v14 }
 0x2d6   : > { %v6832_v19 = vpop.f32.mrf.mxu0 }
 0x2d8   : > { %5087 = vmatmul.msk.bf16.gmra.mxu2 %vm445_vm0, %v2245_v37  ;;  %v2341_v16 = vpop.f32.mrf.mxu1 }
 0x2d9   : > { %v5487_v22 = vpop.eup %5486  ;;  %5023 = vmatmul.msk.bf16.gmra.mxu0 %vm445_vm0, %v6262_v34  ;;  %v2430_v6 = vadd.f32 %v2341_v16, %v6295_v42  ;;  %5113 = vmatmul.msk.bf16.gmra.mxu3 %vm445_vm0, %v6237_v2  ;;  %v2247_v42 = vsel %vm2226_vm4, %v2244_v43, %v2246_v15 }
 0x2da   : > { %v5489_v21 = vpop.eup %5488  ;;  %3917 = vst.msk [vmem:[%s6280_s15 + $0x118] sm:$0xff] %vm445_vm0, %v5487_v22 }
 0x2db   : > { %5490 = vtanh.f32 %v2430_v6  ;;  %v2491_v46 = vpop.f32.mrf.mxu2  ;;  %3990 = vrot.lane.b32.xlu0 %v5489_v21, %s5729_s3 }
 0x2dc   : > { %v2602_v45 = vpop.f32.mrf.mxu3 }
 0x2dd   : > { %v6844_v58 = vadd.f32 %v2602_v45, %v2491_v46  ;;  %v5714_v46 = vld [vmem:[%s5794_s8 + $0x60] sm:$0xff] }
 0x2de   : > { %v6846_v12 = vpop.f32.mrf.mxu0  ;;  %v2248_v45 = vrot.slane %v5714_v46, 2 }
 0x2e0   : > { %v2344_v34 = vpop.f32.mrf.mxu1 }
 0x2e1   : > { %v5491_v59 = vpop.eup %5490  ;;  %v2431_v2 = vadd.f32 %v2344_v34, %v6314_v55 }
 0x2e3   : > { %5492 = vtanh.f32 %v2431_v2  ;;  %v2493_v37 = vpop.f32.mrf.mxu2  ;;  %3992 = vrot.lane.b32.xlu0 %v5491_v59, %s5729_s3  ;;  %5058 = vmatmul.msk.bf16.gmra.mxu1 %vm445_vm0, %v2247_v42  ;;  %v2249_v59 = vsel %vm2226_vm4, %v2246_v15, %v2248_v45 }
 0x2e4   : > { %v2604_v36 = vpop.f32.mrf.mxu3 }
 0x2e5   : > { %v6852_v35 = vadd.f32 %v2604_v36, %v2493_v37 }
 0x2e6   : > { %v6854_v16 = vpop.f32.mrf.mxu0 }
 0x2e8   : > { %5088 = vmatmul.msk.bf16.gmra.mxu2 %vm445_vm0, %v2247_v42  ;;  %v2346_v22 = vpop.f32.mrf.mxu1 }
 0x2e9   : > { %v5493_v6 = vpop.eup %5492  ;;  %5024 = vmatmul.msk.bf16.gmra.mxu0 %vm445_vm0, %v6302_v51  ;;  %v2432_v55 = vadd.f32 %v2346_v22, %v6331_v62  ;;  %5114 = vmatmul.msk.bf16.gmra.mxu3 %vm445_vm0, %v6284_v24 }
 0x2ea   : > { %3994 = vrot.lane.b32.xlu1 %v5493_v6, %s5729_s3 }
 0x2eb   : > { %5494 = vtanh.f32 %v2432_v55  ;;  %v2496_v43 = vpop.f32.mrf.mxu2 }
 0x2ec   : > { %v2607_v21 = vpop.f32.mrf.mxu3 }
 0x2ed   : > { %v6864_v28 = vadd.f32 %v2607_v21, %v2496_v43  ;;  %v5715_v43 = vld [vmem:[%s5794_s8 + $0x68] sm:$0xff] }
 0x2ee   : > { %v6866_v34 = vpop.f32.mrf.mxu0  ;;  %v2250_v21 = vrot.slane %v5715_v43, 2 }
 0x2f0   : > { %v2349_v42 = vpop.f32.mrf.mxu1 }
 0x2f1   : > { %v5495_v51 = vpop.eup %5494  ;;  %v2433_v62 = vadd.f32 %v2349_v42, %v6350_v20 }
 0x2f2   : > { %3996 = vrot.lane.b32.xlu1 %v5495_v51, %s5729_s3  ;;  %v2251_v51 = vsel %vm2226_vm4, %v2248_v45, %v2250_v21 }
 0x2f3   : > { %5496 = vtanh.f32 %v2433_v62  ;;  %v2498_v24 = vpop.f32.mrf.mxu2  ;;  %5059 = vmatmul.msk.bf16.gmra.mxu1 %vm445_vm0, %v2249_v59 }
 0x2f4   : > { %v2609_v2 = vpop.f32.mrf.mxu3 }
 0x2f5   : > { %v6872_v37 = vadd.f32 %v2609_v2, %v2498_v24 }
 0x2f6   : > { %v6874_v36 = vpop.f32.mrf.mxu0 }
 0x2f8   : > { %5089 = vmatmul.msk.bf16.gmra.mxu2 %vm445_vm0, %v2249_v59  ;;  %v2351_v22 = vpop.f32.mrf.mxu1 }
 0x2f9   : > { %v5497_v6 = vpop.eup %5496  ;;  %5025 = vmatmul.msk.bf16.gmra.mxu0 %vm445_vm0, %v6338_v13  ;;  %v2434_v20 = vadd.f32 %v2351_v22, %v6367_v18  ;;  %5115 = vmatmul.msk.bf16.gmra.mxu3 %vm445_vm0, %v6320_v11 }
 0x2fa   : > { %3998 = vrot.lane.b32.xlu2 %v5497_v6, %s5729_s3 }
 0x2fb   : > { %5498 = vtanh.f32 %v2434_v20  ;;  %v2501_v15 = vpop.f32.mrf.mxu2 }
 0x2fc   : > { %v2612_v55 = vpop.f32.mrf.mxu3 }
 0x2fd   : > { %v6884_v46 = vadd.f32 %v2612_v55, %v2501_v15  ;;  %v5716_v15 = vld [vmem:[%s5794_s8 + $0x70] sm:$0xff] }
 0x2fe   : > { %v6886_v42 = vpop.f32.mrf.mxu0  ;;  %v2252_v55 = vrot.slane %v5716_v15, 2 }
 0x300   : > { %v2354_v59 = vpop.f32.mrf.mxu1 }
 0x301   : > { %v5499_v13 = vpop.eup %5498  ;;  %v2435_v18 = vadd.f32 %v2354_v59, %v6386_v39 }
 0x302   : > { %4000 = vrot.lane.b32.xlu2 %v5499_v13, %s5729_s3  ;;  %v2253_v13 = vsel %vm2226_vm4, %v2250_v21, %v2252_v55 }
 0x303   : > { %5500 = vtanh.f32 %v2435_v18  ;;  %v2503_v11 = vpop.f32.mrf.mxu2  ;;  %5060 = vmatmul.msk.bf16.gmra.mxu1 %vm445_vm0, %v2251_v51 }
 0x304   : > { %v2614_v62 = vpop.f32.mrf.mxu3 }
 0x305   : > { %v6892_v24 = vadd.f32 %v2614_v62, %v2503_v11 }
 0x306   : > { %v6894_v2 = vpop.f32.mrf.mxu0 }
 0x308   : > { %5090 = vmatmul.msk.bf16.gmra.mxu2 %vm445_vm0, %v2251_v51  ;;  %v2356_v22 = vpop.f32.mrf.mxu1 }
 0x309   : > { %v5501_v6 = vpop.eup %5500  ;;  %5026 = vmatmul.msk.bf16.gmra.mxu0 %vm445_vm0, %v6374_v0  ;;  %v2436_v39 = vadd.f32 %v2356_v22, %v6403_v40  ;;  %5116 = vmatmul.msk.bf16.gmra.mxu3 %vm445_vm0, %v6356_v27 }
 0x30a   : > { %4002 = vrot.lane.b32.xlu0 %v5501_v6, %s5729_s3 }
 0x30b   : > { %5502 = vtanh.f32 %v2436_v39  ;;  %v2506_v45 = vpop.f32.mrf.mxu2 }
 0x30c   : > { %v2617_v20 = vpop.f32.mrf.mxu3 }
 0x30d   : > { %v6904_v43 = vadd.f32 %v2617_v20, %v2506_v45  ;;  %v5717_v45 = vld [vmem:[%s5794_s8 + $0x78] sm:$0xff] }
 0x30e   : > { %v6906_v59 = vpop.f32.mrf.mxu0  ;;  %v2254_v20 = vrot.slane %v5717_v45, 2 }
 0x310   : > { %v2359_v51 = vpop.f32.mrf.mxu1 }
 0x311   : > { %v5503_v0 = vpop.eup %5502  ;;  %v2437_v40 = vadd.f32 %v2359_v51, %v6422_v44 }
 0x312   : > { %4004 = vrot.lane.b32.xlu1 %v5503_v0, %s5729_s3  ;;  %v2255_v0 = vsel %vm2226_vm4, %v2252_v55, %v2254_v20 }
 0x313   : > { %5504 = vtanh.f32 %v2437_v40  ;;  %v2508_v27 = vpop.f32.mrf.mxu2  ;;  %5061 = vmatmul.msk.bf16.gmra.mxu1 %vm445_vm0, %v2253_v13 }
 0x314   : > { %v2619_v18 = vpop.f32.mrf.mxu3 }
 0x315   : > { %v6912_v11 = vadd.f32 %v2619_v18, %v2508_v27 }
 0x316   : > { %v6914_v62 = vpop.f32.mrf.mxu0 }
 0x318   : > { %5091 = vmatmul.msk.bf16.gmra.mxu2 %vm445_vm0, %v2253_v13  ;;  %v2361_v22 = vpop.f32.mrf.mxu1 }
 0x319   : > { %v5505_v6 = vpop.eup %5504  ;;  %5027 = vmatmul.msk.bf16.gmra.mxu0 %vm445_vm0, %v6410_v53  ;;  %v2438_v44 = vadd.f32 %v2361_v22, %v6439_v1  ;;  %5117 = vmatmul.msk.bf16.gmra.mxu3 %vm445_vm0, %v6392_v41 }
 0x31a   : > { %4006 = vrot.lane.b32.xlu2 %v5505_v6, %s5729_s3 }
 0x31b   : > { %5506 = vtanh.f32 %v2438_v44  ;;  %v2511_v21 = vpop.f32.mrf.mxu2 }
 0x31c   : > { %v2622_v39 = vpop.f32.mrf.mxu3 }
 0x31d   : > { %v6924_v15 = vadd.f32 %v2622_v39, %v2511_v21  ;;  %v5718_v21 = vld [vmem:[%s5794_s8 + $0x80] sm:$0xff] }
 0x31e   : > { %v6926_v51 = vpop.f32.mrf.mxu0  ;;  %v2256_v39 = vrot.slane %v5718_v21, 2 }
 0x320   : > { %v2364_v13 = vpop.f32.mrf.mxu1 }
 0x321   : > { %v5507_v53 = vpop.eup %5506  ;;  %v2439_v1 = vadd.f32 %v2364_v13, %v6458_v9 }
 0x322   : > { %4008 = vrot.lane.b32.xlu0 %v5507_v53, %s5729_s3  ;;  %v2257_v53 = vsel %vm2226_vm4, %v2254_v20, %v2256_v39 }
 0x323   : > { %5508 = vtanh.f32 %v2439_v1  ;;  %v2513_v41 = vpop.f32.mrf.mxu2  ;;  %5062 = vmatmul.msk.bf16.gmra.mxu1 %vm445_vm0, %v2255_v0 }
 0x324   : > { %v2624_v40 = vpop.f32.mrf.mxu3 }
 0x325   : > { %v6932_v27 = vadd.f32 %v2624_v40, %v2513_v41 }
 0x326   : > { %v6934_v18 = vpop.f32.mrf.mxu0 }
 0x328   : > { %5092 = vmatmul.msk.bf16.gmra.mxu2 %vm445_vm0, %v2255_v0  ;;  %v2366_v22 = vpop.f32.mrf.mxu1 }
 0x329   : > { %v5509_v6 = vpop.eup %5508  ;;  %5028 = vmatmul.msk.bf16.gmra.mxu0 %vm445_vm0, %v6446_v61  ;;  %v2440_v9 = vadd.f32 %v2366_v22, %v6475_v26  ;;  %5118 = vmatmul.msk.bf16.gmra.mxu3 %vm445_vm0, %v6428_v31 }
 0x32a   : > { %4010 = vrot.lane.b32.xlu1 %v5509_v6, %s5729_s3 }
 0x32b   : > { %5510 = vtanh.f32 %v2440_v9  ;;  %v2516_v55 = vpop.f32.mrf.mxu2 }
 0x32c   : > { %v2627_v44 = vpop.f32.mrf.mxu3 }
 0x32d   : > { %v6944_v45 = vadd.f32 %v2627_v44, %v2516_v55  ;;  %v5719_v55 = vld [vmem:[%s5794_s8 + $0x88] sm:$0xff] }
 0x32e   : > { %v6946_v13 = vpop.f32.mrf.mxu0  ;;  %v2258_v44 = vrot.slane %v5719_v55, 2 }
 0x330   : > { %v2369_v0 = vpop.f32.mrf.mxu1 }
 0x331   : > { %v5511_v61 = vpop.eup %5510  ;;  %v2441_v26 = vadd.f32 %v2369_v0, %v6494_v29 }
 0x332   : > { %4012 = vrot.lane.b32.xlu2 %v5511_v61, %s5729_s3  ;;  %v2259_v61 = vsel %vm2226_vm4, %v2256_v39, %v2258_v44 }
 0x333   : > { %5512 = vtanh.f32 %v2441_v26  ;;  %v2518_v31 = vpop.f32.mrf.mxu2  ;;  %5063 = vmatmul.msk.bf16.gmra.mxu1 %vm445_vm0, %v2257_v53 }
 0x334   : > { %v2629_v1 = vpop.f32.mrf.mxu3 }
 0x335   : > { %v6952_v41 = vadd.f32 %v2629_v1, %v2518_v31 }
 0x336   : > { %v6954_v40 = vpop.f32.mrf.mxu0 }
 0x338   : > { %5093 = vmatmul.msk.bf16.gmra.mxu2 %vm445_vm0, %v2257_v53  ;;  %v2371_v22 = vpop.f32.mrf.mxu1 }
 0x339   : > { %v5513_v6 = vpop.eup %5512  ;;  %5029 = vmatmul.msk.bf16.gmra.mxu0 %vm445_vm0, %v6482_v63  ;;  %v2442_v29 = vadd.f32 %v2371_v22, %v6511_v56  ;;  %5119 = vmatmul.msk.bf16.gmra.mxu3 %vm445_vm0, %v6464_v30 }
 0x33a   : > { %4014 = vrot.lane.b32.xlu0 %v5513_v6, %s5729_s3 }
 0x33b   : > { %5514 = vtanh.f32 %v2442_v29  ;;  %v2521_v20 = vpop.f32.mrf.mxu2 }
 0x33c   : > { %v2632_v9 = vpop.f32.mrf.mxu3 }
 0x33d   : > { %v6964_v21 = vadd.f32 %v2632_v9, %v2521_v20  ;;  %v5720_v20 = vld [vmem:[%s5794_s8 + $0x90] sm:$0xff] }
 0x33e   : > { %v6966_v0 = vpop.f32.mrf.mxu0  ;;  %v2260_v9 = vrot.slane %v5720_v20, 2  ;;  %v2693_v20 = vld [vmem:[%s5794_s8 + $0x14] sm:$0xf] }
 0x340   : > { %v2374_v53 = vpop.f32.mrf.mxu1 }
 0x341   : > { %v5515_v63 = vpop.eup %5514  ;;  %v2443_v56 = vadd.f32 %v2374_v53, %v6531_v54 }
 0x342   : > { %4016 = vrot.lane.b32.xlu1 %v5515_v63, %s5729_s3 }
 0x343   : > { %5516 = vtanh.f32 %v2443_v56  ;;  %v2523_v30 = vpop.f32.mrf.mxu2  ;;  %5064 = vmatmul.msk.bf16.gmra.mxu1 %vm445_vm0, %v2259_v61 }
 0x344   : > { %v2634_v26 = vpop.f32.mrf.mxu3 }
 0x345   : > { %v6972_v31 = vadd.f32 %v2634_v26, %v2523_v30 }
 0x346   : > { %v6974_v1 = vpop.f32.mrf.mxu0 }
 0x348   : > { %5094 = vmatmul.msk.bf16.gmra.mxu2 %vm445_vm0, %v2259_v61  ;;  %v2376_v22 = vpop.f32.mrf.mxu1 }
 0x349   : > { %v5517_v39 = vpop.eup %5516  ;;  %5030 = vmatmul.msk.bf16.gmra.mxu0 %vm445_vm0, %v6518_v7  ;;  %v2444_v54 = vadd.f32 %v2376_v22, %v6547_v23  ;;  %5120 = vmatmul.msk.bf16.gmra.mxu3 %vm445_vm0, %v6500_v38  ;;  %v2261_v38 = vsel %vm2226_vm4, %v2258_v44, %v2260_v9 }
 0x34a   : > { %4018 = vrot.lane.b32.xlu2 %v5517_v39, %s5729_s3 }
 0x34b   : > { %5518 = vtanh.f32 %v2444_v54  ;;  %v2526_v6 = vpop.f32.mrf.mxu2 }
 0x34c   : > { %v2637_v29 = vpop.f32.mrf.mxu3 }
 0x34d   : > { %v6984_v55 = vadd.f32 %v2637_v29, %v2526_v6  ;;  %v3991_v53 = vpop.permute.xlu0 %3990  ;;  %v2692_v29 = vld [vmem:[%s5794_s8 + $0x10] sm:$0xc] }
 0x34e   : > { %4099 = vst.msk [vmem:[%s6280_s15] sm:$0xff] %vm4098_vm5, %v3991_v53  ;;  %v6988_v7 = vpop.f32.mrf.mxu0 }
 0x350   : > { %v2379_v23 = vpop.f32.mrf.mxu1 }
 0x351   : > { %v5519_v61 = vpop.eup %5518  ;;  %v2445_v63 = vadd.f32 %v2379_v23, %v6567_v8 }
 0x352   : > { %4020 = vrot.lane.b32.xlu0 %v5519_v61, %s5729_s3  ;;  %v7999_v61 = vld [vmem:[#allocation63_spill] sm:$0xff] }
 0x353   : > { %5520 = vtanh.f32 %v2445_v63  ;;  %v2528_v56 = vpop.f32.mrf.mxu2  ;;  %5065 = vmatmul.msk.bf16.gmra.mxu1 %vm445_vm0, %v2261_v38  ;;  %v2262_v63 = vrot.slane %v7999_v61, 2 }
 0x354   : > { %v2639_v30 = vpop.f32.mrf.mxu3  ;;  %v3999_v26 = vpop.permute.xlu2 %3998 }
 0x355   : > { %v6994_v22 = vadd.f32 %v2639_v30, %v2528_v56  ;;  %4103 = vst.msk [vmem:[%s6280_s15 + $0x20] sm:$0xff] %vm4098_vm5, %v3999_v26  ;;  %v3993_v39 = vpop.permute.xlu0 %3992  ;;  %v2771_v56 = vunpack.c.l.b16 %v2692_v29  ;;  %v2772_v30 = vunpack.c.l.b16 %v2693_v20 }
 0x356   : > { %4100 = vst.msk [vmem:[%s6280_s15 + $0x8] sm:$0xff] %vm4098_vm5, %v3993_v39  ;;  %v7000_v44 = vpop.f32.mrf.mxu0  ;;  %v2263_v39 = vsel %vm2226_vm4, %v2260_v9, %v2262_v63 }
 0x358   : > { %5095 = vmatmul.msk.bf16.gmra.mxu2 %vm445_vm0, %v2261_v38  ;;  %v2381_v8 = vpop.f32.mrf.mxu1 }
 0x359   : > { %v5521_v54 = vpop.eup %5520  ;;  %5031 = vmatmul.msk.bf16.gmra.mxu0 %vm445_vm0, %v6554_v48  ;;  %v2446_v6 = vadd.f32 %v2381_v8, %v6593_v10  ;;  %5121 = vmatmul.msk.bf16.gmra.mxu3 %vm445_vm0, %v6537_v60  ;;  %v7022_v8 = vld [vmem:[%s5794_s8 + $0x18] sm:$0xff] }
 0x35a   : > { %4022 = vrot.lane.b32.xlu1 %v5521_v54, %s5729_s3  ;;  %v2808_v54 = vpack.c.b16 %v2772_v30, %v2771_v56  ;;  %v3084_v61 = vshrl.u32 %v7022_v8, 16  ;;  %v3087_v9 = vshll.u32 %v7022_v8, 16 }
 0x35b   : > { %5522 = vtanh.f32 %v2446_v6  ;;  %v2531_v53 = vpop.f32.mrf.mxu2 }
 0x35c   : > { %v2642_v23 = vpop.f32.mrf.mxu3  ;;  %v4001_v38 = vpop.permute.xlu2 %4000  ;;  %v3086_v14 = vrot.slane %v3084_v61, 2 }
 0x35d   : > { %v7012_v48 = vadd.f32 %v2642_v23, %v2531_v53  ;;  %4104 = vst.msk [vmem:[%s6280_s15 + $0x28] sm:$0xff] %vm4098_vm5, %v4001_v38  ;;  %v3995_v10 = vpop.permute.xlu1 %3994  ;;  %v3076_v23 = vshrl.u32 %v2808_v54, 16  ;;  %v3079_v38 = vshll.u32 %v2808_v54, 16 }
 0x35e   : > { %4101 = vst.msk [vmem:[%s6280_s15 + $0x10] sm:$0xff] %vm4098_vm5, %v3995_v10  ;;  %v7018_v60 = vpop.f32.mrf.mxu0 }
 0x35f   : > { %8000 = vst [vmem:[#allocation26_spill] sm:$0xff] %v7012_v48 }
 0x360   : > { %8001 = vst [vmem:[#allocation24_spill] sm:$0xff] %v7018_v60  ;;  %v2384_v26 = vpop.f32.mrf.mxu1  ;;  %v3089_v60 = vrot.slane %v3087_v9, 3 }
 0x361   : > { %v5523_v6 = vpop.eup %5522  ;;  %v2447_v29 = vadd.f32 %v2384_v26, %v6612_v17  ;;  %v3598_v17 = vld [vmem:[%s5794_s8 + $0x10] sm:$0x8] }
 0x362   : > { %4024 = vrot.lane.b32.xlu2 %v5523_v6, %s5729_s3  ;;  %v3078_v6 = vrot.slane %v3076_v23, 2 }
 0x363   : > { %5524 = vtanh.f32 %v2447_v29  ;;  %v2533_v20 = vpop.f32.mrf.mxu2  ;;  %5066 = vmatmul.msk.bf16.gmra.mxu1 %vm445_vm0, %v2263_v39  ;;  %v3081_v29 = vrot.slane %v3079_v38, 3  ;;  %v3090_v38 = vor.u32 %v3089_v60, %v3086_v14  ;;  %v2828_v14 = vrot.slane %v7022_v8, 2 }
 0x364   : > { %v2644_v53 = vpop.f32.mrf.mxu3 }
 0x365   : > { %v7029_v63 = vadd.f32 %v2644_v53, %v2533_v20  ;;  %v3997_v56 = vpop.permute.xlu1 %3996  ;;  %v3605_v53 = vunpack.c.l.b16 %v3598_v17  ;;  %v3082_v23 = vor.u32 %v3081_v29, %v3078_v6  ;;  %v2827_v17 = vrot.slane %v2808_v54, 2 }
 0x366   : > { %4102 = vst.msk [vmem:[%s6280_s15 + $0x18] sm:$0xff] %vm4098_vm5, %v3997_v56  ;;  %v7033_v10 = vpop.f32.mrf.mxu0  ;;  %v3609_v6 = vrot.slane %v7022_v8, 3 }
 0x367   : > { %8002 = vst [vmem:[#allocation28_spill] sm:$0xff] %v7033_v10 }
 0x368   : > { %5096 = vmatmul.msk.bf16.gmra.mxu2 %vm445_vm0, %v2263_v39  ;;  %v2386_v26 = vpop.f32.mrf.mxu1 }
 0x369   : > { %v5525_v48 = vpop.eup %5524  ;;  %5032 = vmatmul.msk.bf16.gmra.mxu0 %vm445_vm0, %v6598_v47  ;;  %v2448_v20 = vadd.f32 %v2386_v26, %v6623_v25  ;;  %5122 = vmatmul.msk.bf16.gmra.mxu3 %vm445_vm0, %v6573_v50  ;;  %v3606_v47 = vpack.c.b16 %v2772_v30, %v3605_v53  ;;  %v3091_v25 = vsel %vm3074_vm6, %v3082_v23, %v3090_v38  ;;  %v7049_v26 = vld [vmem:[%s5794_s8 + $0x20] sm:$0xff] }
 0x36a   : > { %4026 = vrot.lane.b32.xlu0 %v5525_v48, %s5729_s3  ;;  %v3093_v53 = vshrl.u32 %v7049_v26, 16 }
 0x36b   : > { %5526 = vtanh.f32 %v2448_v20  ;;  %v2536_v39 = vpop.f32.mrf.mxu2  ;;  %v3608_v60 = vrot.slane %v3606_v47, 3 }
 0x36c   : > { %v2647_v56 = vpop.f32.mrf.mxu3  ;;  %v3095_v23 = vrot.slane %v3093_v53, 2 }
 0x36d   : > { %v7043_v61 = vadd.f32 %v2647_v56, %v2536_v39  ;;  %v3096_v39 = vshll.u32 %v7049_v26, 16  ;;  %v3610_v8 = vsel %vm3607_vm7, %v3608_v60, %v3609_v6 }
 0x36e   : > { %v7045_v9 = vpop.f32.mrf.mxu0 }
 0x36f   : > { %v3098_v47 = vrot.slane %v3096_v39, 3  ;;  %v7079_v39 = vld [vmem:[%s5794_s8 + $0x28] sm:$0xff] }
 0x370   : > { %v2389_v10 = vpop.f32.mrf.mxu1 }
 0x371   : > { %v5527_v50 = vpop.eup %5526  ;;  %v2449_v48 = vadd.f32 %v2389_v10, %v6636_v32  ;;  %v2829_v10 = vsel %vm2226_vm4, %v2827_v17, %v2828_v14 }
 0x372   : > { %4028 = vrot.lane.b32.xlu1 %v5527_v50, %s5729_s3 }
 0x373   : > { %5528 = vtanh.f32 %v2449_v48  ;;  %v2538_v29 = vpop.f32.mrf.mxu2  ;;  %5233 = vmatmul.msk.bf16.vlgmr.msrb.gmra.mxu1 %vm445_vm0, %v3091_v25 }
 0x374   : > { %v2649_v30 = vpop.f32.mrf.mxu3  ;;  %v4007_v20 = vpop.permute.xlu2 %4006 }
 0x375   : > { %v7058_v32 = vadd.f32 %v2649_v30, %v2538_v29  ;;  %4107 = vst.msk [vmem:[%s6280_s15 + $0x40] sm:$0xff] %vm4098_vm5, %v4007_v20  ;;  %v3099_v30 = vor.u32 %v3098_v47, %v3095_v23  ;;  %v3611_v23 = vrot.slane %v7049_v26, 3 }
 0x376   : > { %v7062_v54 = vpop.f32.mrf.mxu0 }
 0x378   : > { %5263 = vmatmul.msk.bf16.vlgmr.msrb.gmra.mxu2 %vm445_vm0, %v3091_v25  ;;  %v2391_v56 = vpop.f32.mrf.mxu1 }
 0x379   : > { %v5529_v50 = vpop.eup %5528  ;;  %v2450_v48 = vadd.f32 %v2391_v56, %v6647_v49  ;;  %5203 = vmatmul.msk.bf16.vlgmr.msrb.gmra.mxu0 %vm445_vm0, %v2829_v10  ;;  %5293 = vmatmul.msk.bf16.vlgmr.msrb.gmra.mxu3 %vm445_vm0, %v3610_v8  ;;  %v3100_v49 = vsel %vm3074_vm6, %v3090_v38, %v3099_v30  ;;  %v2830_v56 = vrot.slane %v7049_v26, 2  ;;  %v3105_v38 = vshll.u32 %v7079_v39, 16 }
 0x37a   : > { %4030 = vrot.lane.b32.xlu2 %v5529_v50, %s5729_s3  ;;  %v3612_v26 = vsel %vm3607_vm7, %v3609_v6, %v3611_v23 }
 0x37b   : > { %5530 = vtanh.f32 %v2450_v48  ;;  %v2541_v17 = vpop.f32.mrf.mxu2 }
 0x37c   : > { %v2652_v29 = vpop.f32.mrf.mxu3  ;;  %v4003_v60 = vpop.permute.xlu0 %4002 }
 0x37d   : > { %v7071_v20 = vadd.f32 %v2652_v29, %v2541_v17  ;;  %4105 = vst.msk [vmem:[%s6280_s15 + $0x30] sm:$0xff] %vm4098_vm5, %v4003_v60  ;;  %v3102_v17 = vshrl.u32 %v7079_v39, 16  ;;  %v2831_v60 = vsel %vm2226_vm4, %v2828_v14, %v2830_v56 }
 0x37e   : > { %v7075_v25 = vpop.f32.mrf.mxu0 }
 0x37f   : > { %8003 = vst [vmem:[#allocation29_spill] sm:$0xff] %v7071_v20 }
 0x380   : > { %8004 = vst [vmem:[#allocation31_spill] sm:$0xff] %v7075_v25  ;;  %v2394_v53 = vpop.f32.mrf.mxu1 }
 0x381   : > { %v5531_v10 = vpop.eup %5530  ;;  %v2451_v8 = vadd.f32 %v2394_v53, %v6660_v4 }
 0x382   : > { %4032 = vrot.lane.b32.xlu0 %v5531_v10, %s5729_s3  ;;  %v3104_v10 = vrot.slane %v3102_v17, 2 }
 0x383   : > { %5532 = vtanh.f32 %v2451_v8  ;;  %v2543_v47 = vpop.f32.mrf.mxu2  ;;  %5234 = vmatmul.msk.bf16.gmra.mxu1 %vm445_vm0, %v3100_v49  ;;  %v3107_v8 = vrot.slane %v3105_v38, 3  ;;  %v7109_v38 = vld [vmem:[%s5794_s8 + $0x30] sm:$0xff] }
 0x384   : > { %v2654_v50 = vpop.f32.mrf.mxu3  ;;  %v4005_v48 = vpop.permute.xlu1 %4004 }
 0x385   : > { %v7088_v29 = vadd.f32 %v2654_v50, %v2543_v47  ;;  %4106 = vst.msk [vmem:[%s6280_s15 + $0x38] sm:$0xff] %vm4098_vm5, %v4005_v48  ;;  %v3108_v50 = vor.u32 %v3107_v8, %v3104_v10 }
 0x386   : > { %v7092_v4 = vpop.f32.mrf.mxu0 }
 0x388   : > { %5264 = vmatmul.msk.bf16.gmra.mxu2 %vm445_vm0, %v3100_v49  ;;  %v2396_v53 = vpop.f32.mrf.mxu1 }
 0x389   : > { %v5533_v25 = vpop.eup %5532  ;;  %v2452_v20 = vadd.f32 %v2396_v53, %v6671_v3  ;;  %5204 = vmatmul.msk.bf16.gmra.mxu0 %vm445_vm0, %v2831_v60  ;;  %5294 = vmatmul.msk.bf16.gmra.mxu3 %vm445_vm0, %v3612_v26  ;;  %v3109_v3 = vsel %vm3074_vm6, %v3099_v30, %v3108_v50  ;;  %v3613_v26 = vrot.slane %v7079_v39, 3  ;;  %v3114_v30 = vshll.u32 %v7109_v38, 16 }
 0x38a   : > { %4034 = vrot.lane.b32.xlu1 %v5533_v25, %s5729_s3 }
 0x38b   : > { %5534 = vtanh.f32 %v2452_v20  ;;  %v2546_v14 = vpop.f32.mrf.mxu2  ;;  %v2832_v20 = vrot.slane %v7079_v39, 2  ;;  %v3614_v39 = vsel %vm3607_vm7, %v3611_v23, %v3613_v26 }
 0x38c   : > { %v2657_v47 = vpop.f32.mrf.mxu3  ;;  %v4013_v6 = vpop.permute.xlu2 %4012 }
 0x38d   : > { %v7101_v48 = vadd.f32 %v2657_v47, %v2546_v14  ;;  %4110 = vst.msk [vmem:[%s6280_s15 + $0x58] sm:$0xff] %vm4098_vm5, %v4013_v6  ;;  %v3111_v14 = vshrl.u32 %v7109_v38, 16  ;;  %v2833_v6 = vsel %vm2226_vm4, %v2830_v56, %v2832_v20 }
 0x38e   : > { %v7105_v49 = vpop.f32.mrf.mxu0 }
 0x38f   : > { %8005 = vst [vmem:[#allocation33_spill] sm:$0xff] %v7101_v48 }
 0x390   : > { %8006 = vst [vmem:[#allocation32_spill] sm:$0xff] %v7105_v49  ;;  %v2399_v17 = vpop.f32.mrf.mxu1 }
 0x391   : > { %v5535_v60 = vpop.eup %5534  ;;  %v2453_v25 = vadd.f32 %v2399_v17, %v6684_v5 }
 0x392   : > { %4036 = vrot.lane.b32.xlu2 %v5535_v60, %s5729_s3  ;;  %v3113_v60 = vrot.slane %v3111_v14, 2 }
 0x393   : > { %5536 = vtanh.f32 %v2453_v25  ;;  %v2548_v53 = vpop.f32.mrf.mxu2  ;;  %5235 = vmatmul.msk.bf16.gmra.mxu1 %vm445_vm0, %v3109_v3  ;;  %v3116_v25 = vrot.slane %v3114_v30, 3  ;;  %v7139_v30 = vld [vmem:[%s5794_s8 + $0x38] sm:$0xff] }
 0x394   : > { %v2659_v10 = vpop.f32.mrf.mxu3  ;;  %v4009_v8 = vpop.permute.xlu0 %4008 }
 0x395   : > { %v7118_v47 = vadd.f32 %v2659_v10, %v2548_v53  ;;  %4108 = vst.msk [vmem:[%s6280_s15 + $0x48] sm:$0xff] %vm4098_vm5, %v4009_v8  ;;  %v3117_v10 = vor.u32 %v3116_v25, %v3113_v60 }
 0x396   : > { %v7122_v5 = vpop.f32.mrf.mxu0 }
 0x397   : > { %8007 = vst [vmem:[#allocation30_spill] sm:$0xff] %v7118_v47 }
 0x398   : > { %8008 = vst [vmem:[#allocation34_spill] sm:$0xff] %v7122_v5  ;;  %5265 = vmatmul.msk.bf16.gmra.mxu2 %vm445_vm0, %v3109_v3  ;;  %v2401_v17 = vpop.f32.mrf.mxu1  ;;  %v8014_v5 = vld [vmem:[#allocation10_spill] sm:$0xff] }
 0x399   : > { %v5537_v49 = vpop.eup %5536  ;;  %v2454_v48 = vadd.f32 %v2401_v17, %v6695_v33  ;;  %5205 = vmatmul.msk.bf16.gmra.mxu0 %vm445_vm0, %v2833_v6  ;;  %5295 = vmatmul.msk.bf16.gmra.mxu3 %vm445_vm0, %v3614_v39  ;;  %v3118_v33 = vsel %vm3074_vm6, %v3108_v50, %v3117_v10  ;;  %v8011_v39 = vld [vmem:[#allocation8_spill] sm:$0xff]  ;;  %v3615_v17 = vrot.slane %v7109_v38, 3  ;;  %v3123_v50 = vshll.u32 %v7139_v30, 16 }
 0x39a   : > { %4038 = vrot.lane.b32.xlu0 %v5537_v49, %s5729_s3 }
 0x39b   : > { %5538 = vtanh.f32 %v2454_v48  ;;  %v2551_v56 = vpop.f32.mrf.mxu2  ;;  %v2834_v48 = vrot.slane %v7109_v38, 2  ;;  %v3616_v38 = vsel %vm3607_vm7, %v3613_v26, %v3615_v17 }
 0x39c   : > { %v2662_v53 = vpop.f32.mrf.mxu3  ;;  %v4011_v23 = vpop.permute.xlu1 %4010 }
 0x39d   : > { %v7131_v8 = vadd.f32 %v2662_v53, %v2551_v56  ;;  %4109 = vst.msk [vmem:[%s6280_s15 + $0x50] sm:$0xff] %vm4098_vm5, %v4011_v23  ;;  %v3120_v53 = vshrl.u32 %v7139_v30, 16 }
 0x39e   : > { %v7135_v3 = vpop.f32.mrf.mxu0 }
 0x39f   : > { %8009 = vst [vmem:[#allocation35_spill] sm:$0xff] %v7131_v8 }
 0x3a0   : > { %8010 = vst [vmem:[#allocation37_spill] sm:$0xff] %v7135_v3  ;;  %v2404_v14 = vpop.f32.mrf.mxu1  ;;  %v3125_v3 = vrot.slane %v3123_v50, 3  ;;  %v7169_v50 = vld [vmem:[%s5794_s8 + $0x40] sm:$0xff] }
 0x3a1   : > { %v5539_v6 = vpop.eup %5538  ;;  %v2455_v49 = vadd.f32 %v2404_v14, %v8011_v39 }
 0x3a2   : > { %4040 = vrot.lane.b32.xlu1 %v5539_v6, %s5729_s3  ;;  %v2835_v6 = vsel %vm2226_vm4, %v2832_v20, %v2834_v48 }
 0x3a3   : > { %5540 = vtanh.f32 %v2455_v49  ;;  %v2553_v60 = vpop.f32.mrf.mxu2  ;;  %5236 = vmatmul.msk.bf16.gmra.mxu1 %vm445_vm0, %v3118_v33  ;;  %v3122_v49 = vrot.slane %v3120_v53, 2 }
 0x3a4   : > { %v2664_v25 = vpop.f32.mrf.mxu3  ;;  %v4019_v56 = vpop.permute.xlu2 %4018 }
 0x3a5   : > { %v7148_v23 = vadd.f32 %v2664_v25, %v2553_v60  ;;  %4113 = vst.msk [vmem:[%s6280_s15 + $0x70] sm:$0xff] %vm4098_vm5, %v4019_v56  ;;  %v3126_v25 = vor.u32 %v3125_v3, %v3122_v49  ;;  %v3617_v3 = vrot.slane %v7139_v30, 3 }
 0x3a6   : > { %v7152_v14 = vpop.f32.mrf.mxu0 }
 0x3a7   : > { %8012 = vst [vmem:[#allocation39_spill] sm:$0xff] %v7148_v23 }
 0x3a8   : > { %8013 = vst [vmem:[#allocation38_spill] sm:$0xff] %v7152_v14  ;;  %5266 = vmatmul.msk.bf16.gmra.mxu2 %vm445_vm0, %v3118_v33  ;;  %v2406_v39 = vpop.f32.mrf.mxu1  ;;  %v8020_v14 = vld [vmem:[#allocation14_spill] sm:$0xff] }
 0x3a9   : > { %v5541_v8 = vpop.eup %5540  ;;  %v2456_v47 = vadd.f32 %v2406_v39, %v8014_v5  ;;  %5206 = vmatmul.msk.bf16.gmra.mxu0 %vm445_vm0, %v2835_v6  ;;  %5296 = vmatmul.msk.bf16.gmra.mxu3 %vm445_vm0, %v3616_v38  ;;  %v3127_v5 = vsel %vm3074_vm6, %v3117_v10, %v3126_v25  ;;  %v8017_v38 = vld [vmem:[#allocation13_spill] sm:$0xff]  ;;  %v3132_v10 = vshll.u32 %v7169_v50, 16 }
 0x3aa   : > { %4042 = vrot.lane.b32.xlu2 %v5541_v8, %s5729_s3 }
 0x3ab   : > { %5542 = vtanh.f32 %v2456_v47  ;;  %v2556_v20 = vpop.f32.mrf.mxu2  ;;  %v2836_v47 = vrot.slane %v7139_v30, 2  ;;  %v3618_v30 = vsel %vm3607_vm7, %v3615_v17, %v3617_v3 }
 0x3ac   : > { %v2667_v60 = vpop.f32.mrf.mxu3  ;;  %v4015_v26 = vpop.permute.xlu0 %4014 }
 0x3ad   : > { %v7161_v56 = vadd.f32 %v2667_v60, %v2556_v20  ;;  %4111 = vst.msk [vmem:[%s6280_s15 + $0x60] sm:$0xff] %vm4098_vm5, %v4015_v26  ;;  %v3129_v60 = vshrl.u32 %v7169_v50, 16 }
 0x3ae   : > { %v7165_v33 = vpop.f32.mrf.mxu0 }
 0x3af   : > { %8015 = vst [vmem:[#allocation36_spill] sm:$0xff] %v7161_v56 }
 0x3b0   : > { %8016 = vst [vmem:[#allocation40_spill] sm:$0xff] %v7165_v33  ;;  %v2409_v53 = vpop.f32.mrf.mxu1  ;;  %v3134_v33 = vrot.slane %v3132_v10, 3  ;;  %v7199_v10 = vld [vmem:[%s5794_s8 + $0x48] sm:$0xff] }
 0x3b1   : > { %v5543_v6 = vpop.eup %5542  ;;  %v2457_v8 = vadd.f32 %v2409_v53, %v8017_v38 }
 0x3b2   : > { %4044 = vrot.lane.b32.xlu0 %v5543_v6, %s5729_s3  ;;  %v2837_v6 = vsel %vm2226_vm4, %v2834_v48, %v2836_v47 }
 0x3b3   : > { %5544 = vtanh.f32 %v2457_v8  ;;  %v2558_v39 = vpop.f32.mrf.mxu2  ;;  %5237 = vmatmul.msk.bf16.gmra.mxu1 %vm445_vm0, %v3127_v5  ;;  %v3131_v8 = vrot.slane %v3129_v60, 2 }
 0x3b4   : > { %v2669_v49 = vpop.f32.mrf.mxu3  ;;  %v4017_v20 = vpop.permute.xlu1 %4016 }
 0x3b5   : > { %v7178_v26 = vadd.f32 %v2669_v49, %v2558_v39  ;;  %4112 = vst.msk [vmem:[%s6280_s15 + $0x68] sm:$0xff] %vm4098_vm5, %v4017_v20  ;;  %v3135_v49 = vor.u32 %v3134_v33, %v3131_v8  ;;  %v3619_v33 = vrot.slane %v7169_v50, 3 }
 0x3b6   : > { %v7182_v53 = vpop.f32.mrf.mxu0 }
 0x3b7   : > { %8018 = vst [vmem:[#allocation41_spill] sm:$0xff] %v7178_v26 }
 0x3b8   : > { %8019 = vst [vmem:[#allocation43_spill] sm:$0xff] %v7182_v53  ;;  %5267 = vmatmul.msk.bf16.gmra.mxu2 %vm445_vm0, %v3127_v5  ;;  %v2411_v38 = vpop.f32.mrf.mxu1  ;;  %v8026_v53 = vld [vmem:[#allocation19_spill] sm:$0xff] }
 0x3b9   : > { %v5545_v56 = vpop.eup %5544  ;;  %v2458_v23 = vadd.f32 %v2411_v38, %v8020_v14  ;;  %5207 = vmatmul.msk.bf16.gmra.mxu0 %vm445_vm0, %v2837_v6  ;;  %5297 = vmatmul.msk.bf16.gmra.mxu3 %vm445_vm0, %v3618_v30  ;;  %v3136_v14 = vsel %vm3074_vm6, %v3126_v25, %v3135_v49  ;;  %v8023_v30 = vld [vmem:[#allocation16_spill] sm:$0xff]  ;;  %v3141_v25 = vshll.u32 %v7199_v10, 16 }
 0x3ba   : > { %4046 = vrot.lane.b32.xlu1 %v5545_v56, %s5729_s3 }
 0x3bb   : > { %5546 = vtanh.f32 %v2458_v23  ;;  %v2561_v48 = vpop.f32.mrf.mxu2  ;;  %v2838_v23 = vrot.slane %v7169_v50, 2  ;;  %v3620_v50 = vsel %vm3607_vm7, %v3617_v3, %v3619_v33 }
 0x3bc   : > { %v2672_v39 = vpop.f32.mrf.mxu3  ;;  %v4025_v17 = vpop.permute.xlu2 %4024 }
 0x3bd   : > { %v7191_v20 = vadd.f32 %v2672_v39, %v2561_v48  ;;  %4116 = vst.msk [vmem:[%s6280_s15 + $0x88] sm:$0xff] %vm4098_vm5, %v4025_v17  ;;  %v3138_v39 = vshrl.u32 %v7199_v10, 16 }
 0x3be   : > { %v7195_v5 = vpop.f32.mrf.mxu0 }
 0x3bf   : > { %8021 = vst [vmem:[#allocation45_spill] sm:$0xff] %v7191_v20 }
 0x3c0   : > { %8022 = vst [vmem:[#allocation44_spill] sm:$0xff] %v7195_v5  ;;  %v2414_v60 = vpop.f32.mrf.mxu1  ;;  %v3143_v5 = vrot.slane %v3141_v25, 3  ;;  %v7229_v25 = vld [vmem:[%s5794_s8 + $0x50] sm:$0xff] }
 0x3c1   : > { %v5547_v6 = vpop.eup %5546  ;;  %v2459_v56 = vadd.f32 %v2414_v60, %v8023_v30 }
 0x3c2   : > { %4048 = vrot.lane.b32.xlu2 %v5547_v6, %s5729_s3  ;;  %v2839_v6 = vsel %vm2226_vm4, %v2836_v47, %v2838_v23 }
 0x3c3   : > { %5548 = vtanh.f32 %v2459_v56  ;;  %v2563_v38 = vpop.f32.mrf.mxu2  ;;  %5238 = vmatmul.msk.bf16.gmra.mxu1 %vm445_vm0, %v3136_v14  ;;  %v3140_v56 = vrot.slane %v3138_v39, 2 }
 0x3c4   : > { %v2674_v8 = vpop.f32.mrf.mxu3  ;;  %v4021_v48 = vpop.permute.xlu0 %4020 }
 0x3c5   : > { %v7208_v17 = vadd.f32 %v2674_v8, %v2563_v38  ;;  %4114 = vst.msk [vmem:[%s6280_s15 + $0x78] sm:$0xff] %vm4098_vm5, %v4021_v48  ;;  %v3144_v8 = vor.u32 %v3143_v5, %v3140_v56  ;;  %v3621_v5 = vrot.slane %v7199_v10, 3 }
 0x3c6   : > { %v7212_v60 = vpop.f32.mrf.mxu0 }
 0x3c7   : > { %8024 = vst [vmem:[#allocation42_spill] sm:$0xff] %v7208_v17 }
 0x3c8   : > { %8025 = vst [vmem:[#allocation46_spill] sm:$0xff] %v7212_v60  ;;  %5268 = vmatmul.msk.bf16.gmra.mxu2 %vm445_vm0, %v3136_v14  ;;  %v2416_v30 = vpop.f32.mrf.mxu1 }
 0x3c9   : > { %v5549_v20 = vpop.eup %5548  ;;  %v2460_v26 = vadd.f32 %v2416_v30, %v8026_v53  ;;  %5208 = vmatmul.msk.bf16.gmra.mxu0 %vm445_vm0, %v2839_v6  ;;  %5298 = vmatmul.msk.bf16.gmra.mxu3 %vm445_vm0, %v3620_v50  ;;  %v3145_v53 = vsel %vm3074_vm6, %v3135_v49, %v3144_v8  ;;  %v3150_v49 = vshll.u32 %v7229_v25, 16 }
 0x3ca   : > { %4050 = vrot.lane.b32.xlu0 %v5549_v20, %s5729_s3 }
 0x3cb   : > { %5550 = vtanh.f32 %v2460_v26  ;;  %v2566_v47 = vpop.f32.mrf.mxu2  ;;  %v2840_v26 = vrot.slane %v7199_v10, 2  ;;  %v3622_v10 = vsel %vm3607_vm7, %v3619_v33, %v3621_v5 }
 0x3cc   : > { %v2677_v38 = vpop.f32.mrf.mxu3  ;;  %v4023_v3 = vpop.permute.xlu1 %4022 }
 0x3cd   : > { %v7221_v48 = vadd.f32 %v2677_v38, %v2566_v47  ;;  %4115 = vst.msk [vmem:[%s6280_s15 + $0x80] sm:$0xff] %vm4098_vm5, %v4023_v3  ;;  %v3147_v47 = vshrl.u32 %v7229_v25, 16  ;;  %v2841_v3 = vsel %vm2226_vm4, %v2838_v23, %v2840_v26 }
 0x3ce   : > { %v7225_v14 = vpop.f32.mrf.mxu0 }
 0x3cf   : > { %8027 = vst [vmem:[#allocation47_spill] sm:$0xff] %v7221_v48  ;;  %v8031_v48 = vld [vmem:[#allocation18_spill] sm:$0xff] }
 0x3d0   : > { %8028 = vst [vmem:[#allocation63_spill] sm:$0xff] %v7225_v14  ;;  %v2419_v39 = vpop.f32.mrf.mxu1 }
 0x3d1   : > { %v5551_v6 = vpop.eup %5550  ;;  %v2461_v20 = vadd.f32 %v2419_v39, %v6780_v52 }
 0x3d2   : > { %4052 = vrot.lane.b32.xlu1 %v5551_v6, %s5729_s3  ;;  %v3149_v6 = vrot.slane %v3147_v47, 2 }
 0x3d3   : > { %5552 = vtanh.f32 %v2461_v20  ;;  %v2568_v50 = vpop.f32.mrf.mxu2  ;;  %5239 = vmatmul.msk.bf16.gmra.mxu1 %vm445_vm0, %v3145_v53  ;;  %v3152_v20 = vrot.slane %v3150_v49, 3  ;;  %v7259_v49 = vld [vmem:[%s5794_s8 + $0x58] sm:$0xff] }
 0x3d4   : > { %v2679_v30 = vpop.f32.mrf.mxu3  ;;  %v4031_v56 = vpop.permute.xlu2 %4030 }
 0x3d5   : > { %v7238_v38 = vadd.f32 %v2679_v30, %v2568_v50  ;;  %4119 = vst.msk [vmem:[%s6280_s15 + $0xa0] sm:$0xff] %vm4098_vm5, %v4031_v56  ;;  %v3153_v30 = vor.u32 %v3152_v20, %v3149_v6 }
 0x3d6   : > { %v7242_v52 = vpop.f32.mrf.mxu0 }
 0x3d7   : > { %8029 = vst [vmem:[#allocation8_spill] sm:$0xff] %v7238_v38 }
 0x3d8   : > { %8030 = vst [vmem:[#allocation10_spill] sm:$0xff] %v7242_v52  ;;  %5269 = vmatmul.msk.bf16.gmra.mxu2 %vm445_vm0, %v3145_v53  ;;  %v2421_v39 = vpop.f32.mrf.mxu1 }
 0x3d9   : > { %v5553_v14 = vpop.eup %5552  ;;  %v2462_v60 = vadd.f32 %v2421_v39, %v8031_v48  ;;  %5209 = vmatmul.msk.bf16.gmra.mxu0 %vm445_vm0, %v2841_v3  ;;  %5299 = vmatmul.msk.bf16.gmra.mxu3 %vm445_vm0, %v3622_v10  ;;  %v3154_v48 = vsel %vm3074_vm6, %v3144_v8, %v3153_v30  ;;  %v8034_v10 = vld [vmem:[#allocation23_spill] sm:$0xff]  ;;  %v3623_v39 = vrot.slane %v7229_v25, 3  ;;  %v3159_v8 = vshll.u32 %v7259_v49, 16 }
 0x3da   : > { %4054 = vrot.lane.b32.xlu2 %v5553_v14, %s5729_s3 }
 0x3db   : > { %5554 = vtanh.f32 %v2462_v60  ;;  %v2571_v23 = vpop.f32.mrf.mxu2  ;;  %v2842_v60 = vrot.slane %v7229_v25, 2  ;;  %v3624_v25 = vsel %vm3607_vm7, %v3621_v5, %v3623_v39 }
 0x3dc   : > { %v2682_v50 = vpop.f32.mrf.mxu3  ;;  %v4027_v33 = vpop.permute.xlu0 %4026 }
 0x3dd   : > { %v7251_v56 = vadd.f32 %v2682_v50, %v2571_v23  ;;  %4117 = vst.msk [vmem:[%s6280_s15 + $0x90] sm:$0xff] %vm4098_vm5, %v4027_v33  ;;  %v3156_v50 = vshrl.u32 %v7259_v49, 16 }
 0x3de   : > { %v7255_v53 = vpop.f32.mrf.mxu0 }
 0x3df   : > { %8032 = vst [vmem:[#allocation13_spill] sm:$0xff] %v7251_v56 }
 0x3e0   : > { %8033 = vst [vmem:[#allocation14_spill] sm:$0xff] %v7255_v53  ;;  %v2424_v47 = vpop.f32.mrf.mxu1  ;;  %v3161_v53 = vrot.slane %v3159_v8, 3  ;;  %v7289_v8 = vld [vmem:[%s5794_s8 + $0x60] sm:$0xff] }
 0x3e1   : > { %v5555_v3 = vpop.eup %5554  ;;  %v2463_v14 = vadd.f32 %v2424_v47, %v8034_v10 }
 0x3e2   : > { %4056 = vrot.lane.b32.xlu0 %v5555_v3, %s5729_s3  ;;  %v2843_v3 = vsel %vm2226_vm4, %v2840_v26, %v2842_v60 }
 0x3e3   : > { %5556 = vtanh.f32 %v2463_v14  ;;  %v2573_v6 = vpop.f32.mrf.mxu2  ;;  %5240 = vmatmul.msk.bf16.gmra.mxu1 %vm445_vm0, %v3154_v48  ;;  %v3158_v14 = vrot.slane %v3156_v50, 2 }
 0x3e4   : > { %v2684_v20 = vpop.f32.mrf.mxu3  ;;  %v4029_v23 = vpop.permute.xlu1 %4028 }
 0x3e5   : > { %v7268_v33 = vadd.f32 %v2684_v20, %v2573_v6  ;;  %4118 = vst.msk [vmem:[%s6280_s15 + $0x98] sm:$0xff] %vm4098_vm5, %v4029_v23  ;;  %v3162_v20 = vor.u32 %v3161_v53, %v3158_v14  ;;  %v3165_v14 = vshrl.u32 %v7289_v8, 16 }
 0x3e6   : > { %v7272_v47 = vpop.f32.mrf.mxu0 }
 0x3e7   : > { %8035 = vst [vmem:[#allocation16_spill] sm:$0xff] %v7268_v33  ;;  %v3167_v33 = vrot.slane %v3165_v14, 2 }
 0x3e8   : > { %8036 = vst [vmem:[#allocation19_spill] sm:$0xff] %v7272_v47  ;;  %5270 = vmatmul.msk.bf16.gmra.mxu2 %vm445_vm0, %v3154_v48  ;;  %v2426_v10 = vpop.f32.mrf.mxu1 }
 0x3e9   : > { %v5557_v56 = vpop.eup %5556  ;;  %v2464_v52 = vadd.f32 %v2426_v10, %v6828_v57  ;;  %5210 = vmatmul.msk.bf16.gmra.mxu0 %vm445_vm0, %v2843_v3  ;;  %5300 = vmatmul.msk.bf16.gmra.mxu3 %vm445_vm0, %v3624_v25  ;;  %v3163_v57 = vsel %vm3074_vm6, %v3153_v30, %v3162_v20 }
 0x3ea   : > { %4058 = vrot.lane.b32.xlu1 %v5557_v56, %s5729_s3  ;;  %v3625_v56 = vrot.slane %v7259_v49, 3 }
 0x3eb   : > { %5558 = vtanh.f32 %v2464_v52  ;;  %v2576_v26 = vpop.f32.mrf.mxu2  ;;  %v2844_v52 = vrot.slane %v7259_v49, 2 }
 0x3ec   : > { %v2687_v6 = vpop.f32.mrf.mxu3  ;;  %v4037_v5 = vpop.permute.xlu2 %4036  ;;  %v3626_v49 = vsel %vm3607_vm7, %v3623_v39, %v3625_v56 }
 0x3ed   : > { %v7281_v23 = vadd.f32 %v2687_v6, %v2576_v26  ;;  %4122 = vst.msk [vmem:[%s6280_s15 + $0xb8] sm:$0xff] %vm4098_vm5, %v4037_v5  ;;  %v3168_v26 = vshll.u32 %v7289_v8, 16  ;;  %v8039_v6 = vld [vmem:[#allocation48_spill] sm:$0xff] }
 0x3ee   : > { %v7285_v48 = vpop.f32.mrf.mxu0  ;;  %v2123_v30 = vadd.f32 %v6832_v19, %v8039_v6 }
 0x3ef   : > { %8037 = vst [vmem:[#allocation18_spill] sm:$0xff] %v7281_v23  ;;  %v3170_v38 = vrot.slane %v3168_v26, 3  ;;  %v7315_v26 = vld [vmem:[%s5794_s8 + $0x68] sm:$0xff] }
 0x3f0   : > { %8038 = vst [vmem:[#allocation23_spill] sm:$0xff] %v7285_v48  ;;  %v3320_v50 = vpop.f32.mrf.mxu1  ;;  %v2845_v48 = vsel %vm2226_vm4, %v2842_v60, %v2844_v52 }
 0x3f1   : > { %v5559_v3 = vpop.eup %5558  ;;  %v3171_v39 = vor.u32 %v3170_v38, %v3167_v33 }
 0x3f2   : > { %4060 = vrot.lane.b32.xlu2 %v5559_v3, %s5729_s3 }
 0x3f3   : > { %v2578_v53 = vpop.f32.mrf.mxu2  ;;  %5241 = vmatmul.msk.bf16.gmra.mxu1 %vm445_vm0, %v3163_v57 }
 0x3f4   : > { %v2689_v25 = vpop.f32.mrf.mxu3  ;;  %v4033_v10 = vpop.permute.xlu0 %4032 }
 0x3f5   : > { %v7299_v5 = vadd.f32 %v2689_v25, %v2578_v53  ;;  %4120 = vst.msk [vmem:[%s6280_s15 + $0xa8] sm:$0xff] %vm4098_vm5, %v4033_v10  ;;  %v8040_v10 = vld [vmem:[#allocation49_spill] sm:$0xff] }
 0x3f6   : > { %v2939_v3 = vpop.f32.mrf.mxu0  ;;  %v2125_v6 = vadd.f32 %v6846_v12, %v8040_v10  ;;  %v3627_v12 = vrot.slane %v7289_v8, 3 }
 0x3f7   : > { %v3029_v23 = vadd.f32 %v2939_v3, %v2123_v30 }
 0x3f8   : > { %5271 = vmatmul.msk.bf16.gmra.mxu2 %vm445_vm0, %v3163_v57  ;;  %v3322_v47 = vpop.f32.mrf.mxu1 }
 0x3f9   : > { %v3410_v17 = vadd.f32 %v3320_v50, %v3029_v23  ;;  %5211 = vmatmul.msk.bf16.gmra.mxu0 %vm445_vm0, %v2845_v48  ;;  %5301 = vmatmul.msk.bf16.gmra.mxu3 %vm445_vm0, %v3626_v49  ;;  %v3172_v48 = vsel %vm3074_vm6, %v3162_v20, %v3171_v39  ;;  %v3174_v49 = vshrl.u32 %v7315_v26, 16 }
 0x3fb   : > { %5560 = vtanh.f32 %v3410_v17  ;;  %v3472_v19 = vpop.f32.mrf.mxu2 }
 0x3fc   : > { %v3562_v53 = vadd.f32 %v3472_v19, %v6844_v58  ;;  %v3720_v60 = vpop.f32.mrf.mxu3  ;;  %v4035_v25 = vpop.permute.xlu1 %4034  ;;  %v2846_v58 = vrot.slane %v7289_v8, 2  ;;  %v8041_v19 = vld [vmem:[#allocation50_spill] sm:$0xff] }
 0x3fd   : > { %4121 = vst.msk [vmem:[%s6280_s15 + $0xb0] sm:$0xff] %vm4098_vm5, %v4035_v25 }
 0x3fe   : > { %v3810_v57 = vadd.f32 %v3720_v60, %v3562_v53  ;;  %v2941_v14 = vpop.f32.mrf.mxu0  ;;  %v2128_v53 = vadd.f32 %v6854_v16, %v8041_v19  ;;  %v2847_v10 = vsel %vm2226_vm4, %v2844_v52, %v2846_v58 }
 0x3ff   : > { %v3030_v23 = vadd.f32 %v2941_v14, %v2125_v6 }
 0x400   : > { %v3325_v50 = vpop.f32.mrf.mxu1  ;;  %5562 = vtanh.f32 %v3810_v57 }
 0x401   : > { %v5561_v17 = vpop.eup %5560  ;;  %v3411_v30 = vadd.f32 %v3322_v47, %v3030_v23  ;;  %v3177_v47 = vshll.u32 %v7315_v26, 16  ;;  %v3176_v23 = vrot.slane %v3174_v49, 2 }
 0x402   : > { %4207 = vrot.lane.b32.xlu0 %v5561_v17, %s5730_s4 }
 0x403   : > { %5564 = vtanh.f32 %v3411_v30  ;;  %v3474_v38 = vpop.f32.mrf.mxu2  ;;  %5242 = vmatmul.msk.bf16.gmra.mxu1 %vm445_vm0, %v3172_v48  ;;  %v3179_v17 = vrot.slane %v3177_v47, 3 }
 0x404   : > { %v3563_v33 = vadd.f32 %v3474_v38, %v6852_v35  ;;  %v3722_v20 = vpop.f32.mrf.mxu3  ;;  %v4043_v3 = vpop.permute.xlu2 %4042  ;;  %v3628_v35 = vsel %vm3607_vm7, %v3625_v56, %v3627_v12 }
 0x405   : > { %4125 = vst.msk [vmem:[%s6280_s15 + $0xd0] sm:$0xff] %vm4098_vm5, %v4043_v3 }
 0x406   : > { %v3811_v60 = vadd.f32 %v3722_v20, %v3563_v33  ;;  %v2944_v25 = vpop.f32.mrf.mxu0  ;;  %v5563_v57 = vpop.eup %5562  ;;  %v3180_v33 = vor.u32 %v3179_v17, %v3176_v23  ;;  %v8042_v20 = vld [vmem:[#allocation51_spill] sm:$0xff] }
 0x407   : > { %v3031_v6 = vadd.f32 %v2944_v25, %v2128_v53  ;;  %v7346_v25 = vld [vmem:[%s5794_s8 + $0x70] sm:$0xff] }
 0x408   : > { %5272 = vmatmul.msk.bf16.gmra.mxu2 %vm445_vm0, %v3172_v48  ;;  %v3327_v14 = vpop.f32.mrf.mxu1  ;;  %5566 = vtanh.f32 %v3811_v60  ;;  %v3181_v60 = vsel %vm3074_vm6, %v3171_v39, %v3180_v33  ;;  %v3183_v17 = vshrl.u32 %v7346_v25, 16 }
 0x409   : > { %v5565_v16 = vpop.eup %5564  ;;  %v3412_v30 = vadd.f32 %v3325_v50, %v3031_v6  ;;  %5212 = vmatmul.msk.bf16.gmra.mxu0 %vm445_vm0, %v2847_v10  ;;  %5302 = vmatmul.msk.bf16.gmra.mxu3 %vm445_vm0, %v3628_v35  ;;  %v2130_v50 = vadd.f32 %v6866_v34, %v8042_v20  ;;  %v2848_v34 = vrot.slane %v7315_v26, 2  ;;  %v3629_v35 = vrot.slane %v7315_v26, 3 }
 0x40a   : > { %4209 = vrot.lane.b32.xlu1 %v5565_v16, %s5730_s4  ;;  %4424 = vrot.lane.b32.xlu0 %v5563_v57, %s5731_s5  ;;  %v8043_v16 = vld [vmem:[#allocation52_spill] sm:$0xff] }
 0x40b   : > { %5568 = vtanh.f32 %v3412_v30  ;;  %v3477_v52 = vpop.f32.mrf.mxu2  ;;  %v2133_v30 = vadd.f32 %v6874_v36, %v8043_v16 }
 0x40c   : > { %v3564_v56 = vadd.f32 %v3477_v52, %v6864_v28  ;;  %v3725_v48 = vpop.f32.mrf.mxu3  ;;  %v4039_v38 = vpop.permute.xlu0 %4038 }
 0x40d   : > { %4123 = vst.msk [vmem:[%s6280_s15 + $0xc0] sm:$0xff] %vm4098_vm5, %v4039_v38 }
 0x40e   : > { %v3812_v3 = vadd.f32 %v3725_v48, %v3564_v56  ;;  %v2946_v49 = vpop.f32.mrf.mxu0  ;;  %v5567_v19 = vpop.eup %5566  ;;  %v2849_v48 = vsel %vm2226_vm4, %v2846_v58, %v2848_v34 }
 0x40f   : > { %v3032_v47 = vadd.f32 %v2946_v49, %v2130_v50  ;;  %v3185_v50 = vrot.slane %v3183_v17, 2 }
 0x410   : > { %v3330_v53 = vpop.f32.mrf.mxu1  ;;  %5570 = vtanh.f32 %v3812_v3 }
 0x411   : > { %v5569_v10 = vpop.eup %5568  ;;  %v3413_v28 = vadd.f32 %v3327_v14, %v3032_v47  ;;  %v3186_v14 = vshll.u32 %v7346_v25, 16 }
 0x412   : > { %4211 = vrot.lane.b32.xlu2 %v5569_v10, %s5730_s4  ;;  %4426 = vrot.lane.b32.xlu1 %v5567_v19, %s5731_s5  ;;  %v8044_v10 = vld [vmem:[#allocation53_spill] sm:$0xff] }
 0x413   : > { %5572 = vtanh.f32 %v3413_v28  ;;  %v3479_v6 = vpop.f32.mrf.mxu2  ;;  %5243 = vmatmul.msk.bf16.gmra.mxu1 %vm445_vm0, %v3181_v60  ;;  %v3188_v3 = vrot.slane %v3186_v14, 3  ;;  %v7382_v14 = vld [vmem:[%s5794_s8 + $0x78] sm:$0xff] }
 0x414   : > { %v3565_v39 = vadd.f32 %v3479_v6, %v6872_v37  ;;  %v3727_v57 = vpop.f32.mrf.mxu3  ;;  %v4041_v23 = vpop.permute.xlu1 %4040  ;;  %v3630_v37 = vsel %vm3607_vm7, %v3627_v12, %v3629_v35 }
 0x415   : > { %4124 = vst.msk [vmem:[%s6280_s15 + $0xc8] sm:$0xff] %vm4098_vm5, %v4041_v23 }
 0x416   : > { %v3813_v52 = vadd.f32 %v3727_v57, %v3565_v39  ;;  %v2949_v56 = vpop.f32.mrf.mxu0  ;;  %v5571_v20 = vpop.eup %5570 }
 0x417   : > { %v3033_v38 = vadd.f32 %v2949_v56, %v2133_v30  ;;  %v3631_v30 = vrot.slane %v7346_v25, 3 }
 0x418   : > { %5273 = vmatmul.msk.bf16.gmra.mxu2 %vm445_vm0, %v3181_v60  ;;  %v3332_v36 = vpop.f32.mrf.mxu1  ;;  %5574 = vtanh.f32 %v3813_v52  ;;  %v3189_v60 = vor.u32 %v3188_v3, %v3185_v50 }
 0x419   : > { %v5573_v49 = vpop.eup %5572  ;;  %v3414_v47 = vadd.f32 %v3330_v53, %v3033_v38  ;;  %5213 = vmatmul.msk.bf16.gmra.mxu0 %vm445_vm0, %v2849_v48  ;;  %5303 = vmatmul.msk.bf16.gmra.mxu3 %vm445_vm0, %v3630_v37  ;;  %v2135_v53 = vadd.f32 %v6886_v42, %v8044_v10  ;;  %v2850_v42 = vrot.slane %v7346_v25, 2  ;;  %v3192_v37 = vshrl.u32 %v7382_v14, 16 }
 0x41a   : > { %4428 = vrot.lane.b32.xlu2 %v5571_v20, %s5731_s5  ;;  %4213 = vrot.lane.b32.xlu0 %v5573_v49, %s5730_s4  ;;  %v3190_v17 = vsel %vm3074_vm6, %v3180_v33, %v3189_v60  ;;  %v3195_v38 = vshll.u32 %v7382_v14, 16  ;;  %v8045_v20 = vld [vmem:[#allocation54_spill] sm:$0xff] }
 0x41b   : > { %5576 = vtanh.f32 %v3414_v47  ;;  %v3482_v8 = vpop.f32.mrf.mxu2  ;;  %v2851_v49 = vsel %vm2226_vm4, %v2848_v34, %v2850_v42 }
 0x41c   : > { %v3566_v58 = vadd.f32 %v3482_v8, %v6884_v46  ;;  %v3730_v12 = vpop.f32.mrf.mxu3  ;;  %v4049_v19 = vpop.permute.xlu2 %4048 }
 0x41d   : > { %4128 = vst.msk [vmem:[%s6280_s15 + $0xe8] sm:$0xff] %vm4098_vm5, %v4049_v19 }
 0x41e   : > { %v3814_v28 = vadd.f32 %v3730_v12, %v3566_v58  ;;  %v2951_v6 = vpop.f32.mrf.mxu0  ;;  %v5575_v57 = vpop.eup %5574  ;;  %v3194_v58 = vrot.slane %v3192_v37, 2  ;;  %v3197_v12 = vrot.slane %v3195_v38, 3 }
 0x41f   : > { %v3034_v39 = vadd.f32 %v2951_v6, %v2135_v53  ;;  %v8046_v6 = vld [vmem:[#allocation55_spill] sm:$0xff] }
 0x420   : > { %v3335_v23 = vpop.f32.mrf.mxu1  ;;  %5578 = vtanh.f32 %v3814_v28  ;;  %v3198_v28 = vor.u32 %v3197_v12, %v3194_v58 }
 0x421   : > { %v5577_v16 = vpop.eup %5576  ;;  %v3415_v46 = vadd.f32 %v3332_v36, %v3034_v39  ;;  %v2138_v36 = vadd.f32 %v6894_v2, %v8045_v20  ;;  %v2140_v39 = vadd.f32 %v6906_v59, %v8046_v6  ;;  %v2852_v59 = vrot.slane %v7382_v14, 2 }
 0x422   : > { %4215 = vrot.lane.b32.xlu1 %v5577_v16, %s5730_s4  ;;  %4430 = vrot.lane.b32.xlu0 %v5575_v57, %s5731_s5 }
 0x423   : > { %5580 = vtanh.f32 %v3415_v46  ;;  %v3484_v52 = vpop.f32.mrf.mxu2  ;;  %5244 = vmatmul.msk.bf16.gmra.mxu1 %vm445_vm0, %v3190_v17 }
 0x424   : > { %v3567_v33 = vadd.f32 %v3484_v52, %v6892_v24  ;;  %v3732_v56 = vpop.f32.mrf.mxu3  ;;  %v4045_v48 = vpop.permute.xlu0 %4044  ;;  %v3632_v24 = vsel %vm3607_vm7, %v3629_v35, %v3631_v30  ;;  %v3199_v52 = vsel %vm3074_vm6, %v3189_v60, %v3198_v28 }
 0x425   : > { %4126 = vst.msk [vmem:[%s6280_s15 + $0xd8] sm:$0xff] %vm4098_vm5, %v4045_v48  ;;  %v3633_v48 = vrot.slane %v7382_v14, 3 }
 0x426   : > { %v3815_v50 = vadd.f32 %v3732_v56, %v3567_v33  ;;  %v2954_v3 = vpop.f32.mrf.mxu0  ;;  %v5579_v8 = vpop.eup %5578  ;;  %v7418_v33 = vld [vmem:[%s5794_s8 + $0x80] sm:$0xff] }
 0x427   : > { %v3035_v47 = vadd.f32 %v2954_v3, %v2138_v36  ;;  %v3201_v36 = vshrl.u32 %v7418_v33, 16  ;;  %v8047_v3 = vld [vmem:[#allocation56_spill] sm:$0xff] }
 0x428   : > { %5274 = vmatmul.msk.bf16.gmra.mxu2 %vm445_vm0, %v3190_v17  ;;  %v3337_v2 = vpop.f32.mrf.mxu1  ;;  %5582 = vtanh.f32 %v3815_v50  ;;  %v3204_v50 = vshll.u32 %v7418_v33, 16 }
 0x429   : > { %v5581_v19 = vpop.eup %5580  ;;  %v3416_v10 = vadd.f32 %v3335_v23, %v3035_v47  ;;  %5214 = vmatmul.msk.bf16.gmra.mxu0 %vm445_vm0, %v2851_v49  ;;  %5304 = vmatmul.msk.bf16.gmra.mxu3 %vm445_vm0, %v3632_v24  ;;  %v2143_v49 = vadd.f32 %v6914_v62, %v8047_v3  ;;  %v3203_v12 = vrot.slane %v3201_v36, 2 }
 0x42a   : > { %4217 = vrot.lane.b32.xlu2 %v5581_v19, %s5730_s4  ;;  %4432 = vrot.lane.b32.xlu1 %v5579_v8, %s5731_s5  ;;  %v2853_v8 = vsel %vm2226_vm4, %v2850_v42, %v2852_v59  ;;  %v3206_v19 = vrot.slane %v3204_v50, 3  ;;  %v8049_v50 = vld [vmem:[#allocation58_spill] sm:$0xff] }
 0x42b   : > { %5584 = vtanh.f32 %v3416_v10  ;;  %v3487_v26 = vpop.f32.mrf.mxu2  ;;  %v2148_v3 = vadd.f32 %v6934_v18, %v8049_v50 }
 0x42c   : > { %v3568_v34 = vadd.f32 %v3487_v26, %v6904_v43  ;;  %v3735_v35 = vpop.f32.mrf.mxu3  ;;  %v4047_v53 = vpop.permute.xlu1 %4046 }
 0x42d   : > { %4127 = vst.msk [vmem:[%s6280_s15 + $0xe0] sm:$0xff] %vm4098_vm5, %v4047_v53  ;;  %v8048_v53 = vld [vmem:[#allocation57_spill] sm:$0xff] }
 0x42e   : > { %v3816_v57 = vadd.f32 %v3735_v35, %v3568_v34  ;;  %v2956_v23 = vpop.f32.mrf.mxu0  ;;  %v5583_v16 = vpop.eup %5582  ;;  %v3207_v35 = vor.u32 %v3206_v19, %v3203_v12  ;;  %v2145_v6 = vadd.f32 %v6926_v51, %v8048_v53  ;;  %v2854_v51 = vrot.slane %v7418_v33, 2 }
 0x42f   : > { %v3036_v17 = vadd.f32 %v2956_v23, %v2140_v39 }
 0x430   : > { %v3340_v46 = vpop.f32.mrf.mxu1  ;;  %5586 = vtanh.f32 %v3816_v57 }
 0x431   : > { %v5585_v56 = vpop.eup %5584  ;;  %v3417_v43 = vadd.f32 %v3337_v2, %v3036_v17 }
 0x432   : > { %4434 = vrot.lane.b32.xlu2 %v5583_v16, %s5731_s5  ;;  %4219 = vrot.lane.b32.xlu0 %v5585_v56, %s5730_s4 }
 0x433   : > { %5588 = vtanh.f32 %v3417_v43  ;;  %v3489_v37 = vpop.f32.mrf.mxu2  ;;  %5245 = vmatmul.msk.bf16.gmra.mxu1 %vm445_vm0, %v3199_v52  ;;  %v3635_v43 = vrot.slane %v7418_v33, 3 }
 0x434   : > { %v3569_v60 = vadd.f32 %v3489_v37, %v6912_v11  ;;  %v3737_v38 = vpop.f32.mrf.mxu3  ;;  %v4055_v20 = vpop.permute.xlu2 %4054  ;;  %v3634_v11 = vsel %vm3607_vm7, %v3631_v30, %v3633_v48 }
 0x435   : > { %4131 = vst.msk [vmem:[%s6280_s15 + $0x100] sm:$0xff] %vm4098_vm5, %v4055_v20 }
 0x436   : > { %v3817_v24 = vadd.f32 %v3737_v38, %v3569_v60  ;;  %v2959_v47 = vpop.f32.mrf.mxu0  ;;  %v5587_v58 = vpop.eup %5586 }
 0x437   : > { %v3037_v2 = vadd.f32 %v2959_v47, %v2143_v49  ;;  %v2855_v47 = vsel %vm2226_vm4, %v2852_v59, %v2854_v51 }
 0x438   : > { %5275 = vmatmul.msk.bf16.gmra.mxu2 %vm445_vm0, %v3199_v52  ;;  %v3342_v62 = vpop.f32.mrf.mxu1  ;;  %5590 = vtanh.f32 %v3817_v24  ;;  %v7454_v52 = vld [vmem:[%s5794_s8 + $0x88] sm:$0xff] }
 0x439   : > { %v5589_v10 = vpop.eup %5588  ;;  %v3418_v26 = vadd.f32 %v3340_v46, %v3037_v2  ;;  %5215 = vmatmul.msk.bf16.gmra.mxu0 %vm445_vm0, %v2853_v8  ;;  %5305 = vmatmul.msk.bf16.gmra.mxu3 %vm445_vm0, %v3634_v11  ;;  %v3208_v46 = vsel %vm3074_vm6, %v3198_v28, %v3207_v35  ;;  %v3210_v20 = vshrl.u32 %v7454_v52, 16  ;;  %v3213_v36 = vshll.u32 %v7454_v52, 16 }
 0x43a   : > { %4221 = vrot.lane.b32.xlu1 %v5589_v10, %s5730_s4  ;;  %4436 = vrot.lane.b32.xlu0 %v5587_v58, %s5731_s5 }
 0x43b   : > { %5592 = vtanh.f32 %v3418_v26  ;;  %v3492_v25 = vpop.f32.mrf.mxu2  ;;  %v3212_v2 = vrot.slane %v3210_v20, 2  ;;  %v3215_v58 = vrot.slane %v3213_v36, 3  ;;  %v8050_v26 = vld [vmem:[#allocation59_spill] sm:$0xff] }
 0x43c   : > { %v3570_v42 = vadd.f32 %v3492_v25, %v6924_v15  ;;  %v3740_v30 = vpop.f32.mrf.mxu3  ;;  %v4051_v34 = vpop.permute.xlu0 %4050  ;;  %v2150_v25 = vadd.f32 %v6946_v13, %v8050_v26  ;;  %v2856_v13 = vrot.slane %v7454_v52, 2 }
 0x43d   : > { %4129 = vst.msk [vmem:[%s6280_s15 + $0xf0] sm:$0xff] %vm4098_vm5, %v4051_v34  ;;  %v3216_v10 = vor.u32 %v3215_v58, %v3212_v2 }
 0x43e   : > { %v3818_v39 = vadd.f32 %v3740_v30, %v3570_v42  ;;  %v2961_v57 = vpop.f32.mrf.mxu0  ;;  %v5591_v17 = vpop.eup %5590 }
 0x43f   : > { %v3038_v23 = vadd.f32 %v2961_v57, %v2145_v6  ;;  %v7490_v57 = vld [vmem:[%s5794_s8 + $0x90] sm:$0xff] }
 0x440   : > { %v3345_v16 = vpop.f32.mrf.mxu1  ;;  %5594 = vtanh.f32 %v3818_v39  ;;  %v3217_v39 = vsel %vm3074_vm6, %v3207_v35, %v3216_v10 }
 0x441   : > { %v5593_v56 = vpop.eup %5592  ;;  %v3419_v15 = vadd.f32 %v3342_v62, %v3038_v23 }
 0x442   : > { %4223 = vrot.lane.b32.xlu2 %v5593_v56, %s5730_s4  ;;  %4438 = vrot.lane.b32.xlu1 %v5591_v17, %s5731_s5  ;;  %v3637_v17 = vrot.slane %v7454_v52, 3  ;;  %v2857_v52 = vsel %vm2226_vm4, %v2854_v51, %v2856_v13 }
 0x443   : > { %5596 = vtanh.f32 %v3419_v15  ;;  %v3494_v37 = vpop.f32.mrf.mxu2  ;;  %5246 = vmatmul.msk.bf16.gmra.mxu1 %vm445_vm0, %v3208_v46  ;;  %v3219_v15 = vshrl.u32 %v7490_v57, 16 }
 0x444   : > { %v3571_v28 = vadd.f32 %v3494_v37, %v6932_v27  ;;  %v3742_v60 = vpop.f32.mrf.mxu3  ;;  %v4053_v38 = vpop.permute.xlu1 %4052  ;;  %v3636_v27 = vsel %vm3607_vm7, %v3633_v48, %v3635_v43  ;;  %v3222_v37 = vshll.u32 %v7490_v57, 16 }
 0x445   : > { %4130 = vst.msk [vmem:[%s6280_s15 + $0xf8] sm:$0xff] %vm4098_vm5, %v4053_v38 }
 0x446   : > { %v3819_v49 = vadd.f32 %v3742_v60, %v3571_v28  ;;  %v2964_v24 = vpop.f32.mrf.mxu0  ;;  %v5595_v11 = vpop.eup %5594  ;;  %v8051_v28 = vld [vmem:[#allocation60_spill] sm:$0xff] }
 0x447   : > { %v3039_v8 = vadd.f32 %v2964_v24, %v2148_v3  ;;  %v2153_v60 = vadd.f32 %v6954_v40, %v8051_v28  ;;  %v3224_v40 = vrot.slane %v3222_v37, 3 }
 0x448   : > { %5276 = vmatmul.msk.bf16.gmra.mxu2 %vm445_vm0, %v3208_v46  ;;  %v3347_v18 = vpop.f32.mrf.mxu1  ;;  %5598 = vtanh.f32 %v3819_v49  ;;  %v3221_v49 = vrot.slane %v3219_v15, 2 }
 0x449   : > { %v5597_v62 = vpop.eup %5596  ;;  %v3420_v12 = vadd.f32 %v3345_v16, %v3039_v8  ;;  %5216 = vmatmul.msk.bf16.gmra.mxu0 %vm445_vm0, %v2855_v47  ;;  %5306 = vmatmul.msk.bf16.gmra.mxu3 %vm445_vm0, %v3636_v27 }
 0x44a   : > { %4440 = vrot.lane.b32.xlu2 %v5595_v11, %s5731_s5  ;;  %4225 = vrot.lane.b32.xlu0 %v5597_v62, %s5730_s4  ;;  %v3225_v8 = vor.u32 %v3224_v40, %v3221_v49  ;;  %v8052_v11 = vld [vmem:[#allocation61_spill] sm:$0xff] }
 0x44b   : > { %5600 = vtanh.f32 %v3420_v12  ;;  %v3497_v14 = vpop.f32.mrf.mxu2 }
 0x44c   : > { %v3572_v59 = vadd.f32 %v3497_v14, %v6944_v45  ;;  %v3745_v48 = vpop.f32.mrf.mxu3  ;;  %v4061_v19 = vpop.permute.xlu2 %4060 }
 0x44d   : > { %4134 = vst.msk [vmem:[%s6280_s15 + $0x118] sm:$0xff] %vm4098_vm5, %v4061_v19 }
 0x44e   : > { %v3820_v42 = vadd.f32 %v3745_v48, %v3572_v59  ;;  %v2966_v30 = vpop.f32.mrf.mxu0  ;;  %v5599_v53 = vpop.eup %5598  ;;  %v3226_v59 = vsel %vm3074_vm6, %v3216_v10, %v3225_v8  ;;  %v7522_v48 = vld [vmem:[%s5794_s8 + $0x98] sm:$0xff] }
 0x44f   : > { %v3040_v34 = vadd.f32 %v2966_v30, %v2150_v25  ;;  %v3228_v30 = vshrl.u32 %v7522_v48, 16 }
 0x450   : > { %v3350_v6 = vpop.f32.mrf.mxu1  ;;  %5602 = vtanh.f32 %v3820_v42 }
 0x451   : > { %v5601_v23 = vpop.eup %5600  ;;  %v3421_v45 = vadd.f32 %v3347_v18, %v3040_v34  ;;  %v2155_v18 = vadd.f32 %v6966_v0, %v8052_v11  ;;  %v3639_v0 = vrot.slane %v7490_v57, 3  ;;  %v3231_v34 = vshll.u32 %v7522_v48, 16 }
 0x452   : > { %4227 = vrot.lane.b32.xlu1 %v5601_v23, %s5730_s4  ;;  %4442 = vrot.lane.b32.xlu0 %v5599_v53, %s5731_s5  ;;  %v8053_v53 = vld [vmem:[#allocation62_spill] sm:$0xff] }
 0x453   : > { %5604 = vtanh.f32 %v3421_v45  ;;  %v3499_v16 = vpop.f32.mrf.mxu2  ;;  %5247 = vmatmul.msk.bf16.gmra.mxu1 %vm445_vm0, %v3217_v39  ;;  %v3233_v15 = vrot.slane %v3231_v34, 3 }
 0x454   : > { %v3573_v35 = vadd.f32 %v3499_v16, %v6952_v41  ;;  %v3747_v46 = vpop.f32.mrf.mxu3  ;;  %v4057_v56 = vpop.permute.xlu0 %4056  ;;  %v3638_v41 = vsel %vm3607_vm7, %v3635_v43, %v3637_v17  ;;  %v3640_v16 = vsel %vm3607_vm7, %v3637_v17, %v3639_v0 }
 0x455   : > { %4132 = vst.msk [vmem:[%s6280_s15 + $0x108] sm:$0xff] %vm4098_vm5, %v4057_v56  ;;  %v3230_v56 = vrot.slane %v3228_v30, 2 }
 0x456   : > { %v3821_v38 = vadd.f32 %v3747_v46, %v3573_v35  ;;  %v2969_v20 = vpop.f32.mrf.mxu0  ;;  %v5603_v50 = vpop.eup %5602 }
 0x457   : > { %v3041_v36 = vadd.f32 %v2969_v20, %v2153_v60  ;;  %v7547_v20 = vor.u32 %v3233_v15, %v3230_v56 }
 0x458   : > { %5277 = vmatmul.msk.bf16.gmra.mxu2 %vm445_vm0, %v3217_v39  ;;  %v3352_v3 = vpop.f32.mrf.mxu1  ;;  %5606 = vtanh.f32 %v3821_v38 }
 0x459   : > { %v5605_v24 = vpop.eup %5604  ;;  %v3422_v47 = vadd.f32 %v3350_v6, %v3041_v36  ;;  %5217 = vmatmul.msk.bf16.gmra.mxu0 %vm445_vm0, %v2857_v52  ;;  %5307 = vmatmul.msk.bf16.gmra.mxu3 %vm445_vm0, %v3638_v41  ;;  %v2158_v6 = vadd.f32 %v6974_v1, %v8053_v53  ;;  %v3065_v1 = vld [vmem:[%s5794_s8 + $0xa0] sm:$0x7]  ;;  %v8054_v41 = vld [vmem:[#allocation64_spill] sm:$0xff] }
 0x45a   : > { %4229 = vrot.lane.b32.xlu2 %v5605_v24, %s5730_s4  ;;  %4444 = vrot.lane.b32.xlu1 %v5603_v50, %s5731_s5  ;;  %v3072_v52 = vunpack.c.l.b16 %v3065_v1  ;;  %v2160_v36 = vadd.f32 %v6988_v7, %v8054_v41  ;;  %v2860_v7 = vrot.slane %v7522_v48, 2 }
 0x45b   : > { %5608 = vtanh.f32 %v3422_v47  ;;  %v3502_v33 = vpop.f32.mrf.mxu2  ;;  %v3235_v47 = vsel %vm3074_vm6, %v3225_v8, %v7547_v20 }
 0x45c   : > { %v3574_v51 = vadd.f32 %v3502_v33, %v6964_v21  ;;  %v3750_v43 = vpop.f32.mrf.mxu3  ;;  %v4059_v27 = vpop.permute.xlu1 %4058  ;;  %v2858_v21 = vrot.slane %v7490_v57, 2  ;;  %v7555_v33 = vpack.c.b16 %v3072_v52, %v3072_v52 }
 0x45d   : > { %4133 = vst.msk [vmem:[%s6280_s15 + $0x110] sm:$0xff] %vm4098_vm5, %v4059_v27 }
 0x45e   : > { %v3822_v2 = vadd.f32 %v3750_v43, %v3574_v51  ;;  %v2971_v58 = vpop.f32.mrf.mxu0  ;;  %v5607_v12 = vpop.eup %5606  ;;  %v2859_v45 = vsel %vm2226_vm4, %v2856_v13, %v2858_v21  ;;  %v3641_v43 = vrot.slane %v7522_v48, 3 }
 0x45f   : > { %v3042_v62 = vadd.f32 %v2971_v58, %v2155_v18  ;;  %v3240_v58 = vshll.u32 %v7555_v33, 16 }
 0x460   : > { %v3355_v14 = vpop.f32.mrf.mxu1  ;;  %5610 = vtanh.f32 %v3822_v2  ;;  %v3237_v2 = vshrl.u32 %v7555_v33, 16 }
 0x461   : > { %v5609_v19 = vpop.eup %5608  ;;  %v3423_v26 = vadd.f32 %v3352_v3, %v3042_v62  ;;  %v8055_v62 = vld [vmem:[#allocation65_spill] sm:$0xff]  ;;  %v3242_v34 = vrot.slane %v3240_v58, 3 }
 0x462   : > { %4446 = vrot.lane.b32.xlu2 %v5607_v12, %s5731_s5  ;;  %4231 = vrot.lane.b32.xlu0 %v5609_v19, %s5730_s4  ;;  %v2163_v12 = vadd.f32 %v7000_v44, %v8055_v62  ;;  %v3239_v30 = vrot.slane %v3237_v2, 2 }
 0x463   : > { %5612 = vtanh.f32 %v3423_v26  ;;  %v3504_v25 = vpop.f32.mrf.mxu2  ;;  %5248 = vmatmul.msk.bf16.gmra.mxu1 %vm445_vm0, %v3226_v59  ;;  %v3642_v26 = vsel %vm3607_vm7, %v3639_v0, %v3641_v43  ;;  %v8056_v0 = vld [vmem:[#allocation26_spill] sm:$0xff] }
 0x464   : > { %v3575_v42 = vadd.f32 %v3504_v25, %v6972_v31  ;;  %v3752_v10 = vpop.f32.mrf.mxu3  ;;  %v2728_v25 = vld [vmem:[%s5794_s8 + $0xa0] sm:$0x3] }
 0x465   : > { %v2807_v57 = vunpack.c.l.b16 %v2728_v25 }
 0x466   : > { %v3823_v39 = vadd.f32 %v3752_v10, %v3575_v42  ;;  %v2974_v23 = vpop.f32.mrf.mxu0  ;;  %v5611_v35 = vpop.eup %5610 }
 0x467   : > { %v3043_v31 = vadd.f32 %v2974_v23, %v2158_v6 }
 0x468   : > { %5278 = vmatmul.msk.bf16.gmra.mxu2 %vm445_vm0, %v3226_v59  ;;  %v3357_v46 = vpop.f32.mrf.mxu1  ;;  %5614 = vtanh.f32 %v3823_v39 }
 0x469   : > { %v5613_v37 = vpop.eup %5612  ;;  %v3424_v28 = vadd.f32 %v3355_v14, %v3043_v31  ;;  %5218 = vmatmul.msk.bf16.gmra.mxu0 %vm445_vm0, %v2859_v45  ;;  %5308 = vmatmul.msk.bf16.gmra.mxu3 %vm445_vm0, %v3640_v16  ;;  %v3243_v16 = vor.u32 %v3242_v34, %v3239_v30  ;;  %v8057_v31 = vld [vmem:[#allocation66_spill] sm:$0xff] }
 0x46a   : > { %4233 = vrot.lane.b32.xlu1 %v5613_v37, %s5730_s4  ;;  %4448 = vrot.lane.b32.xlu0 %v5611_v35, %s5731_s5  ;;  %v8058_v35 = vld [vmem:[#allocation24_spill] sm:$0xff] }
 0x46b   : > { %5616 = vtanh.f32 %v3424_v28  ;;  %v3507_v13 = vpop.f32.mrf.mxu2  ;;  %v2826_v28 = vpack.c.b16 %v2807_v57, %v2807_v57 }
 0x46c   : > { %v3576_v17 = vadd.f32 %v3507_v13, %v6984_v55  ;;  %v3755_v60 = vpop.f32.mrf.mxu3  ;;  %v4212_v38 = vpop.permute.xlu2 %4211 }
 0x46d   : > { %4318 = vst.msk [vmem:[%s6280_s15 + $0x10] sm:$0xff] %vm4315_vm8, %v4212_v38  ;;  %v2862_v41 = vrot.slane %v2826_v28, 2 }
 0x46e   : > { %v3824_v50 = vadd.f32 %v3755_v60, %v3576_v17  ;;  %v2976_v3 = vpop.f32.mrf.mxu0  ;;  %v5615_v40 = vpop.eup %5614  ;;  %v3244_v60 = vsel %vm3074_vm6, %v7547_v20, %v3243_v16  ;;  %v8059_v20 = vld [vmem:[#allocation67_spill] sm:$0xff] }
 0x46f   : > { %v3044_v49 = vadd.f32 %v2976_v3, %v2160_v36  ;;  %v3643_v36 = vrot.slane %v7555_v33, 3  ;;  %v2863_v33 = vsel %vm2226_vm4, %v2860_v7, %v2862_v41 }
 0x470   : > { %v3360_v24 = vpop.f32.mrf.mxu1  ;;  %5618 = vtanh.f32 %v3824_v50 }
 0x471   : > { %v5617_v55 = vpop.eup %5616  ;;  %v3425_v51 = vadd.f32 %v3357_v46, %v3044_v49  ;;  %v2165_v46 = vadd.f32 %v8058_v35, %v8057_v31 }
 0x472   : > { %4235 = vrot.lane.b32.xlu2 %v5617_v55, %s5730_s4  ;;  %4450 = vrot.lane.b32.xlu1 %v5615_v40, %s5731_s5 }
 0x473   : > { %5620 = vtanh.f32 %v3425_v51  ;;  %v3509_v27 = vpop.f32.mrf.mxu2  ;;  %5249 = vmatmul.msk.bf16.gmra.mxu1 %vm445_vm0, %v3235_v47 }
 0x474   : > { %v3577_v8 = vadd.f32 %v3509_v27, %v6994_v22  ;;  %v3757_v11 = vpop.f32.mrf.mxu3  ;;  %v4429_v18 = vpop.permute.xlu2 %4428  ;;  %v2861_v22 = vsel %vm2226_vm4, %v2858_v21, %v2860_v7 }
 0x475   : > { %4535 = vst.msk [vmem:[%s6280_s15 + $0x10] sm:$0xff] %vm4532_vm9, %v4429_v18  ;;  %v4208_v14 = vpop.permute.xlu0 %4207 }
 0x476   : > { %v3825_v59 = vadd.f32 %v3757_v11, %v3577_v8  ;;  %4316 = vst.msk [vmem:[%s6280_s15] sm:$0xff] %vm4315_vm8, %v4208_v14  ;;  %v2979_v19 = vpop.f32.mrf.mxu0  ;;  %v5619_v42 = vpop.eup %5618 }
 0x477   : > { %v3045_v44 = vadd.f32 %v2979_v19, %v2163_v12  ;;  %v8061_v12 = vld [vmem:[#allocation68_spill] sm:$0xff] }
 0x478   : > { %5279 = vmatmul.msk.bf16.gmra.mxu2 %vm445_vm0, %v3235_v47  ;;  %v3362_v10 = vpop.f32.mrf.mxu1  ;;  %5622 = vtanh.f32 %v3825_v59  ;;  %v2170_v14 = vadd.f32 %v7045_v9, %v8061_v12 }
 0x479   : > { %v5621_v53 = vpop.eup %5620  ;;  %v3426_v6 = vadd.f32 %v3360_v24, %v3045_v44  ;;  %5219 = vmatmul.msk.bf16.gmra.mxu0 %vm445_vm0, %v2861_v22  ;;  %5309 = vmatmul.msk.bf16.gmra.mxu3 %vm445_vm0, %v3642_v26  ;;  %v8060_v24 = vld [vmem:[#allocation28_spill] sm:$0xff] }
 0x47a   : > { %4452 = vrot.lane.b32.xlu2 %v5619_v42, %s5731_s5  ;;  %4237 = vrot.lane.b32.xlu0 %v5621_v53, %s5730_s4  ;;  %v2168_v47 = vadd.f32 %v8060_v24, %v8059_v20  ;;  %v8062_v53 = vld [vmem:[#allocation3_spill] sm:$0xff]  ;;  %v8066_v20 = vld [vmem:[#allocation4_spill] sm:$0xff] }
 0x47b   : > { %5624 = vtanh.f32 %v3426_v6  ;;  %v3512_v21 = vpop.f32.mrf.mxu2  ;;  %v2173_v6 = vadd.f32 %v7062_v54, %v8062_v53  ;;  %v8063_v54 = vld [vmem:[#allocation29_spill] sm:$0xff]  ;;  %v2178_v24 = vadd.f32 %v7092_v4, %v8066_v20  ;;  %v8077_v20 = vld [vmem:[#allocation6_spill] sm:$0xff] }
 0x47c   : > { %v3578_v39 = vadd.f32 %v3512_v21, %v8056_v0  ;;  %v3760_v23 = vpop.f32.mrf.mxu3  ;;  %v4210_v45 = vpop.permute.xlu1 %4209  ;;  %v8067_v4 = vld [vmem:[#allocation33_spill] sm:$0xff] }
 0x47d   : > { %4317 = vst.msk [vmem:[%s6280_s15 + $0x8] sm:$0xff] %vm4315_vm8, %v4210_v45  ;;  %v4425_v56 = vpop.permute.xlu0 %4424 }
 0x47e   : > { %v3826_v15 = vadd.f32 %v3760_v23, %v3578_v39  ;;  %4533 = vst.msk [vmem:[%s6280_s15] sm:$0xff] %vm4532_vm9, %v4425_v56  ;;  %v2981_v37 = vpop.f32.mrf.mxu0  ;;  %v5623_v13 = vpop.eup %5622 }
 0x47f   : > { %v3046_v1 = vadd.f32 %v2981_v37, %v2165_v46  ;;  %v8065_v37 = vld [vmem:[#allocation31_spill] sm:$0xff] }
 0x480   : > { %v3365_v17 = vpop.f32.mrf.mxu1  ;;  %5626 = vtanh.f32 %v3826_v15  ;;  %v8064_v15 = vld [vmem:[#allocation2_spill] sm:$0xff] }
 0x481   : > { %v5625_v38 = vpop.eup %5624  ;;  %v3427_v52 = vadd.f32 %v3362_v10, %v3046_v1  ;;  %v2175_v28 = vadd.f32 %v8065_v37, %v8064_v15  ;;  %v8075_v15 = vld [vmem:[#allocation37_spill] sm:$0xff] }
 0x482   : > { %4239 = vrot.lane.b32.xlu1 %v5625_v38, %s5730_s4  ;;  %4454 = vrot.lane.b32.xlu0 %v5623_v13, %s5731_s5 }
 0x483   : > { %5628 = vtanh.f32 %v3427_v52  ;;  %v3514_v50 = vpop.f32.mrf.mxu2  ;;  %5250 = vmatmul.msk.bf16.gmra.mxu1 %vm445_vm0, %v3244_v60 }
 0x484   : > { %v3579_v3 = vadd.f32 %v3514_v50, %v7029_v63  ;;  %v3762_v49 = vpop.f32.mrf.mxu3  ;;  %v4218_v40 = vpop.permute.xlu2 %4217  ;;  %v3644_v63 = vsel %vm3607_vm7, %v3641_v43, %v3643_v36 }
 0x485   : > { %4321 = vst.msk [vmem:[%s6280_s15 + $0x28] sm:$0xff] %vm4315_vm8, %v4218_v40  ;;  %v4427_v55 = vpop.permute.xlu1 %4426 }
 0x486   : > { %v3827_v51 = vadd.f32 %v3762_v49, %v3579_v3  ;;  %4534 = vst.msk [vmem:[%s6280_s15 + $0x8] sm:$0xff] %vm4532_vm9, %v4427_v55  ;;  %v2984_v27 = vpop.f32.mrf.mxu0  ;;  %v5627_v11 = vpop.eup %5626 }
 0x487   : > { %v3047_v8 = vadd.f32 %v2984_v27, %v2168_v47 }
 0x488   : > { %5280 = vmatmul.msk.bf16.gmra.mxu2 %vm445_vm0, %v3244_v60  ;;  %v3367_v18 = vpop.f32.mrf.mxu1  ;;  %5630 = vtanh.f32 %v3827_v51 }
 0x489   : > { %v5629_v2 = vpop.eup %5628  ;;  %v3428_v58 = vadd.f32 %v3365_v17, %v3047_v8  ;;  %5220 = vmatmul.msk.bf16.gmra.mxu0 %vm445_vm0, %v2863_v33  ;;  %5310 = vmatmul.msk.bf16.gmra.mxu3 %vm445_vm0, %v3644_v63 }
 0x48a   : > { %4241 = vrot.lane.b32.xlu2 %v5629_v2, %s5730_s4  ;;  %4456 = vrot.lane.b32.xlu1 %v5627_v11, %s5731_s5 }
 0x48b   : > { %5632 = vtanh.f32 %v3428_v58  ;;  %v3517_v48 = vpop.f32.mrf.mxu2 }
 0x48c   : > { %v3580_v7 = vadd.f32 %v3517_v48, %v7043_v61  ;;  %v3765_v43 = vpop.f32.mrf.mxu3  ;;  %v4435_v62 = vpop.permute.xlu2 %4434  ;;  %v8068_v48 = vld [vmem:[#allocation5_spill] sm:$0xff] }
 0x48d   : > { %4538 = vst.msk [vmem:[%s6280_s15 + $0x28] sm:$0xff] %vm4532_vm9, %v4435_v62  ;;  %v4214_v59 = vpop.permute.xlu0 %4213 }
 0x48e   : > { %v3828_v19 = vadd.f32 %v3765_v43, %v3580_v7  ;;  %4319 = vst.msk [vmem:[%s6280_s15 + $0x18] sm:$0xff] %vm4315_vm8, %v4214_v59  ;;  %v2986_v22 = vpop.f32.mrf.mxu0  ;;  %v5631_v44 = vpop.eup %5630  ;;  %v8069_v7 = vld [vmem:[#allocation32_spill] sm:$0xff] }
 0x48f   : > { %v3048_v26 = vadd.f32 %v2986_v22, %v2170_v14  ;;  %v2180_v43 = vadd.f32 %v8069_v7, %v8068_v48  ;;  %v8080_v7 = vld [vmem:[#allocation11_spill] sm:$0xff] }
 0x490   : > { %v3370_v25 = vpop.f32.mrf.mxu1  ;;  %5634 = vtanh.f32 %v3828_v19 }
 0x491   : > { %v5633_v42 = vpop.eup %5632  ;;  %v3429_v10 = vadd.f32 %v3367_v18, %v3048_v26 }
 0x492   : > { %4458 = vrot.lane.b32.xlu2 %v5631_v44, %s5731_s5  ;;  %4243 = vrot.lane.b32.xlu0 %v5633_v42, %s5730_s4  ;;  %v8070_v42 = vld [vmem:[#allocation30_spill] sm:$0xff] }
 0x493   : > { %5636 = vtanh.f32 %v3429_v10  ;;  %v3519_v61 = vpop.f32.mrf.mxu2 }
 0x494   : > { %v3581_v9 = vadd.f32 %v3519_v61, %v7058_v32  ;;  %v3767_v30 = vpop.f32.mrf.mxu3  ;;  %v4216_v34 = vpop.permute.xlu1 %4215 }
 0x495   : > { %4320 = vst.msk [vmem:[%s6280_s15 + $0x20] sm:$0xff] %vm4315_vm8, %v4216_v34  ;;  %v4431_v57 = vpop.permute.xlu0 %4430  ;;  %v8072_v34 = vld [vmem:[#allocation34_spill] sm:$0xff] }
 0x496   : > { %v3829_v21 = vadd.f32 %v3767_v30, %v3581_v9  ;;  %4536 = vst.msk [vmem:[%s6280_s15 + $0x18] sm:$0xff] %vm4532_vm9, %v4431_v57  ;;  %v2989_v0 = vpop.f32.mrf.mxu0  ;;  %v5635_v23 = vpop.eup %5634  ;;  %v8071_v30 = vld [vmem:[#allocation7_spill] sm:$0xff] }
 0x497   : > { %v3049_v39 = vadd.f32 %v2989_v0, %v2173_v6  ;;  %v2183_v53 = vadd.f32 %v8072_v34, %v8071_v30  ;;  %v8083_v34 = vld [vmem:[#allocation15_spill] sm:$0xff] }
 0x498   : > { %v3372_v45 = vpop.f32.mrf.mxu1  ;;  %5638 = vtanh.f32 %v3829_v21 }
 0x499   : > { %v5637_v16 = vpop.eup %5636  ;;  %v3430_v31 = vadd.f32 %v3370_v25, %v3049_v39 }
 0x49a   : > { %4245 = vrot.lane.b32.xlu1 %v5637_v16, %s5730_s4  ;;  %4460 = vrot.lane.b32.xlu0 %v5635_v23, %s5731_s5 }
 0x49b   : > { %5640 = vtanh.f32 %v3430_v31  ;;  %v3522_v32 = vpop.f32.mrf.mxu2 }
 0x49c   : > { %v3582_v35 = vadd.f32 %v3522_v32, %v8063_v54  ;;  %v3770_v46 = vpop.f32.mrf.mxu3  ;;  %v4224_v56 = vpop.permute.xlu2 %4223  ;;  %v8073_v32 = vld [vmem:[#allocation35_spill] sm:$0xff] }
 0x49d   : > { %4324 = vst.msk [vmem:[%s6280_s15 + $0x40] sm:$0xff] %vm4315_vm8, %v4224_v56  ;;  %v4433_v1 = vpop.permute.xlu1 %4432  ;;  %v8074_v56 = vld [vmem:[#allocation9_spill] sm:$0xff] }
 0x49e   : > { %v3830_v13 = vadd.f32 %v3770_v46, %v3582_v35  ;;  %4537 = vst.msk [vmem:[%s6280_s15 + $0x20] sm:$0xff] %vm4532_vm9, %v4433_v1  ;;  %v2991_v17 = vpop.f32.mrf.mxu0  ;;  %v5639_v38 = vpop.eup %5638  ;;  %v2185_v37 = vadd.f32 %v8075_v15, %v8074_v56  ;;  %v8086_v15 = vld [vmem:[#allocation12_spill] sm:$0xff] }
 0x49f   : > { %v3050_v60 = vadd.f32 %v2991_v17, %v2175_v28 }
 0x4a0   : > { %v3375_v52 = vpop.f32.mrf.mxu1  ;;  %5642 = vtanh.f32 %v3830_v13 }
 0x4a1   : > { %v5641_v41 = vpop.eup %5640  ;;  %v3431_v36 = vadd.f32 %v3372_v45, %v3050_v60 }
 0x4a2   : > { %4247 = vrot.lane.b32.xlu2 %v5641_v41, %s5730_s4  ;;  %4462 = vrot.lane.b32.xlu1 %v5639_v38, %s5731_s5 }
 0x4a3   : > { %5644 = vtanh.f32 %v3431_v36  ;;  %v3524_v50 = vpop.f32.mrf.mxu2 }
 0x4a4   : > { %v3583_v3 = vadd.f32 %v3524_v50, %v7088_v29  ;;  %v3772_v49 = vpop.f32.mrf.mxu3  ;;  %v4441_v40 = vpop.permute.xlu2 %4440  ;;  %v8076_v50 = vld [vmem:[#allocation39_spill] sm:$0xff] }
 0x4a5   : > { %4541 = vst.msk [vmem:[%s6280_s15 + $0x40] sm:$0xff] %vm4532_vm9, %v4441_v40  ;;  %v4220_v47 = vpop.permute.xlu0 %4219 }
 0x4a6   : > { %v3831_v55 = vadd.f32 %v3772_v49, %v3583_v3  ;;  %4322 = vst.msk [vmem:[%s6280_s15 + $0x30] sm:$0xff] %vm4315_vm8, %v4220_v47  ;;  %v2994_v51 = vpop.f32.mrf.mxu0  ;;  %v5643_v33 = vpop.eup %5642 }
 0x4a7   : > { %v3051_v27 = vadd.f32 %v2994_v51, %v2178_v24  ;;  %v8078_v24 = vld [vmem:[#allocation38_spill] sm:$0xff] }
 0x4a8   : > { %v3377_v63 = vpop.f32.mrf.mxu1  ;;  %5646 = vtanh.f32 %v3831_v55  ;;  %v2188_v47 = vadd.f32 %v8078_v24, %v8077_v20  ;;  %v8089_v24 = vld [vmem:[#allocation17_spill] sm:$0xff] }
 0x4a9   : > { %v5645_v8 = vpop.eup %5644  ;;  %v3432_v11 = vadd.f32 %v3375_v52, %v3051_v27 }
 0x4aa   : > { %4464 = vrot.lane.b32.xlu2 %v5643_v33, %s5731_s5  ;;  %4249 = vrot.lane.b32.xlu0 %v5645_v8, %s5730_s4 }
 0x4ab   : > { %5648 = vtanh.f32 %v3432_v11  ;;  %v3527_v29 = vpop.f32.mrf.mxu2 }
 0x4ac   : > { %v3584_v18 = vadd.f32 %v3527_v29, %v8067_v4  ;;  %v3775_v2 = vpop.f32.mrf.mxu3  ;;  %v4222_v58 = vpop.permute.xlu1 %4221 }
 0x4ad   : > { %4323 = vst.msk [vmem:[%s6280_s15 + $0x38] sm:$0xff] %vm4315_vm8, %v4222_v58  ;;  %v4437_v62 = vpop.permute.xlu0 %4436 }
 0x4ae   : > { %v3832_v12 = vadd.f32 %v3775_v2, %v3584_v18  ;;  %4539 = vst.msk [vmem:[%s6280_s15 + $0x30] sm:$0xff] %vm4532_vm9, %v4437_v62  ;;  %v2996_v14 = vpop.f32.mrf.mxu0  ;;  %v5647_v19 = vpop.eup %5646  ;;  %v8079_v18 = vld [vmem:[#allocation36_spill] sm:$0xff] }
 0x4af   : > { %v3052_v59 = vadd.f32 %v2996_v14, %v2180_v43  ;;  %v8081_v43 = vld [vmem:[#allocation40_spill] sm:$0xff] }
 0x4b0   : > { %v3380_v22 = vpop.f32.mrf.mxu1  ;;  %5650 = vtanh.f32 %v3832_v12  ;;  %v2190_v62 = vadd.f32 %v8081_v43, %v8080_v7  ;;  %v8092_v43 = vld [vmem:[#allocation21_spill] sm:$0xff] }
 0x4b1   : > { %v5649_v26 = vpop.eup %5648  ;;  %v3433_v44 = vadd.f32 %v3377_v63, %v3052_v59 }
 0x4b2   : > { %4251 = vrot.lane.b32.xlu1 %v5649_v26, %s5730_s4  ;;  %4466 = vrot.lane.b32.xlu0 %v5647_v19, %s5731_s5 }
 0x4b3   : > { %5652 = vtanh.f32 %v3433_v44  ;;  %v3529_v25 = vpop.f32.mrf.mxu2 }
 0x4b4   : > { %v3585_v10 = vadd.f32 %v3529_v25, %v8070_v42  ;;  %v3777_v61 = vpop.f32.mrf.mxu3  ;;  %v4230_v9 = vpop.permute.xlu2 %4229 }
 0x4b5   : > { %4327 = vst.msk [vmem:[%s6280_s15 + $0x58] sm:$0xff] %vm4315_vm8, %v4230_v9  ;;  %v4439_v6 = vpop.permute.xlu1 %4438 }
 0x4b6   : > { %v3833_v57 = vadd.f32 %v3777_v61, %v3585_v10  ;;  %4540 = vst.msk [vmem:[%s6280_s15 + $0x38] sm:$0xff] %vm4532_vm9, %v4439_v6  ;;  %v2999_v21 = vpop.f32.mrf.mxu0  ;;  %v5651_v39 = vpop.eup %5650  ;;  %v8082_v10 = vld [vmem:[#allocation41_spill] sm:$0xff] }
 0x4b7   : > { %v3053_v0 = vadd.f32 %v2999_v21, %v2183_v53  ;;  %v8084_v53 = vld [vmem:[#allocation43_spill] sm:$0xff] }
 0x4b8   : > { %v3382_v23 = vpop.f32.mrf.mxu1  ;;  %5654 = vtanh.f32 %v3833_v57  ;;  %v2193_v6 = vadd.f32 %v8084_v53, %v8083_v34  ;;  %v8095_v53 = vld [vmem:[#allocation20_spill] sm:$0xff] }
 0x4b9   : > { %v5653_v45 = vpop.eup %5652  ;;  %v3434_v16 = vadd.f32 %v3380_v22, %v3053_v0 }
 0x4ba   : > { %4253 = vrot.lane.b32.xlu2 %v5653_v45, %s5730_s4  ;;  %4468 = vrot.lane.b32.xlu1 %v5651_v39, %s5731_s5 }
 0x4bb   : > { %5656 = vtanh.f32 %v3434_v16  ;;  %v3532_v31 = vpop.f32.mrf.mxu2 }
 0x4bc   : > { %v3586_v54 = vadd.f32 %v3532_v31, %v8073_v32  ;;  %v3780_v35 = vpop.f32.mrf.mxu3  ;;  %v4447_v46 = vpop.permute.xlu2 %4446 }
 0x4bd   : > { %4544 = vst.msk [vmem:[%s6280_s15 + $0x58] sm:$0xff] %vm4532_vm9, %v4447_v46  ;;  %v4226_v28 = vpop.permute.xlu0 %4225 }
 0x4be   : > { %v3834_v1 = vadd.f32 %v3780_v35, %v3586_v54  ;;  %4325 = vst.msk [vmem:[%s6280_s15 + $0x48] sm:$0xff] %vm4315_vm8, %v4226_v28  ;;  %v3001_v13 = vpop.f32.mrf.mxu0  ;;  %v5655_v60 = vpop.eup %5654  ;;  %v8085_v54 = vld [vmem:[#allocation45_spill] sm:$0xff] }
 0x4bf   : > { %v3054_v17 = vadd.f32 %v3001_v13, %v2185_v37  ;;  %v8087_v37 = vld [vmem:[#allocation44_spill] sm:$0xff] }
 0x4c0   : > { %v3385_v38 = vpop.f32.mrf.mxu1  ;;  %5658 = vtanh.f32 %v3834_v1  ;;  %v2195_v28 = vadd.f32 %v8087_v37, %v8086_v15  ;;  %v8098_v37 = vld [vmem:[#allocation22_spill] sm:$0xff] }
 0x4c1   : > { %v5657_v52 = vpop.eup %5656  ;;  %v3435_v41 = vadd.f32 %v3382_v23, %v3054_v17 }
 0x4c2   : > { %4470 = vrot.lane.b32.xlu2 %v5655_v60, %s5731_s5  ;;  %4255 = vrot.lane.b32.xlu0 %v5657_v52, %s5730_s4 }
 0x4c3   : > { %5660 = vtanh.f32 %v3435_v41  ;;  %v3534_v36 = vpop.f32.mrf.mxu2 }
 0x4c4   : > { %v3587_v3 = vadd.f32 %v3534_v36, %v8076_v50  ;;  %v3782_v49 = vpop.f32.mrf.mxu3  ;;  %v4228_v40 = vpop.permute.xlu1 %4227 }
 0x4c5   : > { %4326 = vst.msk [vmem:[%s6280_s15 + $0x50] sm:$0xff] %vm4315_vm8, %v4228_v40  ;;  %v4443_v55 = vpop.permute.xlu0 %4442 }
 0x4c6   : > { %v3835_v51 = vadd.f32 %v3782_v49, %v3587_v3  ;;  %4542 = vst.msk [vmem:[%s6280_s15 + $0x48] sm:$0xff] %vm4532_vm9, %v4443_v55  ;;  %v3004_v27 = vpop.f32.mrf.mxu0  ;;  %v5659_v63 = vpop.eup %5658  ;;  %v8088_v3 = vld [vmem:[#allocation42_spill] sm:$0xff] }
 0x4c7   : > { %v3055_v33 = vadd.f32 %v3004_v27, %v2188_v47  ;;  %v8090_v47 = vld [vmem:[#allocation46_spill] sm:$0xff] }
 0x4c8   : > { %v3387_v8 = vpop.f32.mrf.mxu1  ;;  %5662 = vtanh.f32 %v3835_v51  ;;  %v2198_v55 = vadd.f32 %v8090_v47, %v8089_v24  ;;  %v8101_v24 = vld [vmem:[#allocation25_spill] sm:$0xff]  ;;  %v8102_v47 = vld [vmem:[#allocation19_spill] sm:$0xff] }
 0x4c9   : > { %v5661_v11 = vpop.eup %5660  ;;  %v3436_v29 = vadd.f32 %v3385_v38, %v3055_v33 }
 0x4ca   : > { %4257 = vrot.lane.b32.xlu1 %v5661_v11, %s5730_s4  ;;  %4472 = vrot.lane.b32.xlu0 %v5659_v63, %s5731_s5 }
 0x4cb   : > { %5664 = vtanh.f32 %v3436_v29  ;;  %v3537_v4 = vpop.f32.mrf.mxu2 }
 0x4cc   : > { %v3588_v2 = vadd.f32 %v3537_v4, %v8079_v18  ;;  %v3785_v58 = vpop.f32.mrf.mxu3  ;;  %v4236_v48 = vpop.permute.xlu2 %4235 }
 0x4cd   : > { %4330 = vst.msk [vmem:[%s6280_s15 + $0x70] sm:$0xff] %vm4315_vm8, %v4236_v48  ;;  %v4445_v12 = vpop.permute.xlu1 %4444 }
 0x4ce   : > { %v3836_v14 = vadd.f32 %v3785_v58, %v3588_v2  ;;  %4543 = vst.msk [vmem:[%s6280_s15 + $0x50] sm:$0xff] %vm4532_vm9, %v4445_v12  ;;  %v3006_v59 = vpop.f32.mrf.mxu0  ;;  %v5663_v22 = vpop.eup %5662  ;;  %v8091_v2 = vld [vmem:[#allocation47_spill] sm:$0xff] }
 0x4cf   : > { %v3056_v19 = vadd.f32 %v3006_v59, %v2190_v62  ;;  %v8093_v62 = vld [vmem:[#allocation63_spill] sm:$0xff] }
 0x4d0   : > { %v3390_v26 = vpop.f32.mrf.mxu1  ;;  %5666 = vtanh.f32 %v3836_v14  ;;  %v2200_v12 = vadd.f32 %v8093_v62, %v8092_v43  ;;  %v8104_v43 = vld [vmem:[#allocation27_spill] sm:$0xff] }
 0x4d1   : > { %v5665_v44 = vpop.eup %5664  ;;  %v3437_v25 = vadd.f32 %v3387_v8, %v3056_v19  ;;  %v8105_v62 = vld [vmem:[#allocation23_spill] sm:$0xff] }
 0x4d2   : > { %4259 = vrot.lane.b32.xlu2 %v5665_v44, %s5730_s4  ;;  %4474 = vrot.lane.b32.xlu1 %v5663_v22, %s5731_s5 }
 0x4d3   : > { %5668 = vtanh.f32 %v3437_v25  ;;  %v3539_v42 = vpop.f32.mrf.mxu2 }
 0x4d4   : > { %v3589_v61 = vadd.f32 %v3539_v42, %v8082_v10  ;;  %v3787_v9 = vpop.f32.mrf.mxu3  ;;  %v4453_v30 = vpop.permute.xlu2 %4452 }
 0x4d5   : > { %4547 = vst.msk [vmem:[%s6280_s15 + $0x70] sm:$0xff] %vm4532_vm9, %v4453_v30  ;;  %v4232_v57 = vpop.permute.xlu0 %4231 }
 0x4d6   : > { %v3837_v21 = vadd.f32 %v3787_v9, %v3589_v61  ;;  %4328 = vst.msk [vmem:[%s6280_s15 + $0x60] sm:$0xff] %vm4315_vm8, %v4232_v57  ;;  %v3009_v0 = vpop.f32.mrf.mxu0  ;;  %v5667_v23 = vpop.eup %5666  ;;  %v8094_v61 = vld [vmem:[#allocation8_spill] sm:$0xff] }
 0x4d7   : > { %v3057_v39 = vadd.f32 %v3009_v0, %v2193_v6  ;;  %v8096_v6 = vld [vmem:[#allocation10_spill] sm:$0xff] }
 0x4d8   : > { %v3392_v45 = vpop.f32.mrf.mxu1  ;;  %5670 = vtanh.f32 %v3837_v21  ;;  %v2203_v57 = vadd.f32 %v8096_v6, %v8095_v53 }
 0x4d9   : > { %v5669_v16 = vpop.eup %5668  ;;  %v3438_v31 = vadd.f32 %v3390_v26, %v3057_v39 }
 0x4da   : > { %4476 = vrot.lane.b32.xlu2 %v5667_v23, %s5731_s5  ;;  %4261 = vrot.lane.b32.xlu0 %v5669_v16, %s5730_s4 }
 0x4db   : > { %5672 = vtanh.f32 %v3438_v31  ;;  %v3542_v32 = vpop.f32.mrf.mxu2 }
 0x4dc   : > { %v3590_v35 = vadd.f32 %v3542_v32, %v8085_v54  ;;  %v3790_v46 = vpop.f32.mrf.mxu3  ;;  %v4234_v56 = vpop.permute.xlu1 %4233 }
 0x4dd   : > { %4329 = vst.msk [vmem:[%s6280_s15 + $0x68] sm:$0xff] %vm4315_vm8, %v4234_v56  ;;  %v4449_v1 = vpop.permute.xlu0 %4448 }
 0x4de   : > { %v3838_v13 = vadd.f32 %v3790_v46, %v3590_v35  ;;  %4545 = vst.msk [vmem:[%s6280_s15 + $0x60] sm:$0xff] %vm4532_vm9, %v4449_v1  ;;  %v3011_v17 = vpop.f32.mrf.mxu0  ;;  %v5671_v38 = vpop.eup %5670  ;;  %v8097_v35 = vld [vmem:[#allocation13_spill] sm:$0xff] }
 0x4df   : > { %v3058_v60 = vadd.f32 %v3011_v17, %v2195_v28  ;;  %v8099_v28 = vld [vmem:[#allocation14_spill] sm:$0xff] }
 0x4e0   : > { %v3395_v52 = vpop.f32.mrf.mxu1  ;;  %5674 = vtanh.f32 %v3838_v13  ;;  %v2205_v1 = vadd.f32 %v8099_v28, %v8098_v37 }
 0x4e1   : > { %v5673_v41 = vpop.eup %5672  ;;  %v3439_v36 = vadd.f32 %v3392_v45, %v3058_v60 }
 0x4e2   : > { %4263 = vrot.lane.b32.xlu1 %v5673_v41, %s5730_s4  ;;  %4478 = vrot.lane.b32.xlu0 %v5671_v38, %s5731_s5 }
 0x4e3   : > { %5676 = vtanh.f32 %v3439_v36  ;;  %v3544_v50 = vpop.f32.mrf.mxu2 }
 0x4e4   : > { %v3591_v49 = vadd.f32 %v3544_v50, %v8088_v3  ;;  %v3792_v40 = vpop.f32.mrf.mxu3  ;;  %v4242_v20 = vpop.permute.xlu2 %4241  ;;  %v8100_v3 = vld [vmem:[#allocation16_spill] sm:$0xff] }
 0x4e5   : > { %4333 = vst.msk [vmem:[%s6280_s15 + $0x88] sm:$0xff] %vm4315_vm8, %v4242_v20  ;;  %v4451_v51 = vpop.permute.xlu1 %4450 }
 0x4e6   : > { %v3839_v27 = vadd.f32 %v3792_v40, %v3591_v49  ;;  %4546 = vst.msk [vmem:[%s6280_s15 + $0x68] sm:$0xff] %vm4532_vm9, %v4451_v51  ;;  %v3014_v33 = vpop.f32.mrf.mxu0  ;;  %v5675_v8 = vpop.eup %5674 }
 0x4e7   : > { %v3059_v63 = vadd.f32 %v3014_v33, %v2198_v55  ;;  %v2208_v55 = vadd.f32 %v8102_v47, %v8101_v24 }
 0x4e8   : > { %v3397_v11 = vpop.f32.mrf.mxu1  ;;  %5678 = vtanh.f32 %v3839_v27 }
 0x4e9   : > { %v5677_v29 = vpop.eup %5676  ;;  %v3440_v4 = vadd.f32 %v3395_v52, %v3059_v63 }
 0x4ea   : > { %4265 = vrot.lane.b32.xlu2 %v5677_v29, %s5730_s4  ;;  %4480 = vrot.lane.b32.xlu1 %v5675_v8, %s5731_s5 }
 0x4eb   : > { %5680 = vtanh.f32 %v3440_v4  ;;  %v3547_v18 = vpop.f32.mrf.mxu2 }
 0x4ec   : > { %v3592_v58 = vadd.f32 %v3547_v18, %v8091_v2  ;;  %v3795_v48 = vpop.f32.mrf.mxu3  ;;  %v4459_v7 = vpop.permute.xlu2 %4458  ;;  %v8103_v2 = vld [vmem:[#allocation18_spill] sm:$0xff] }
 0x4ed   : > { %4550 = vst.msk [vmem:[%s6280_s15 + $0x88] sm:$0xff] %vm4532_vm9, %v4459_v7  ;;  %v4238_v14 = vpop.permute.xlu0 %4237 }
 0x4ee   : > { %v3840_v59 = vadd.f32 %v3795_v48, %v3592_v58  ;;  %4331 = vst.msk [vmem:[%s6280_s15 + $0x78] sm:$0xff] %vm4315_vm8, %v4238_v14  ;;  %v3016_v19 = vpop.f32.mrf.mxu0  ;;  %v5679_v26 = vpop.eup %5678 }
 0x4ef   : > { %v3060_v22 = vadd.f32 %v3016_v19, %v2200_v12  ;;  %v2210_v12 = vadd.f32 %v8105_v62, %v8104_v43 }
 0x4f0   : > { %v3400_v42 = vpop.f32.mrf.mxu1  ;;  %5682 = vtanh.f32 %v3840_v59 }
 0x4f1   : > { %v5681_v44 = vpop.eup %5680  ;;  %v3441_v25 = vadd.f32 %v3397_v11, %v3060_v22 }
 0x4f2   : > { %4482 = vrot.lane.b32.xlu2 %v5679_v26, %s5731_s5  ;;  %4267 = vrot.lane.b32.xlu0 %v5681_v44, %s5730_s4 }
 0x4f3   : > { %5684 = vtanh.f32 %v3441_v25  ;;  %v3549_v10 = vpop.f32.mrf.mxu2 }
 0x4f4   : > { %v3593_v9 = vadd.f32 %v3549_v10, %v8094_v61  ;;  %v3797_v30 = vpop.f32.mrf.mxu3  ;;  %v4240_v34 = vpop.permute.xlu1 %4239 }
 0x4f5   : > { %4332 = vst.msk [vmem:[%s6280_s15 + $0x80] sm:$0xff] %vm4315_vm8, %v4240_v34  ;;  %v4455_v21 = vpop.permute.xlu0 %4454 }
 0x4f6   : > { %v3841_v0 = vadd.f32 %v3797_v30, %v3593_v9  ;;  %4548 = vst.msk [vmem:[%s6280_s15 + $0x78] sm:$0xff] %vm4532_vm9, %v4455_v21  ;;  %v3019_v39 = vpop.f32.mrf.mxu0  ;;  %v5683_v45 = vpop.eup %5682 }
 0x4f7   : > { %v3061_v23 = vadd.f32 %v3019_v39, %v2203_v57 }
 0x4f8   : > { %5686 = vtanh.f32 %v3841_v0  ;;  %v3402_v32 = vpop.f32.mrf.mxu1 }
 0x4f9   : > { %v5685_v16 = vpop.eup %5684  ;;  %v3442_v31 = vadd.f32 %v3400_v42, %v3061_v23 }
 0x4fa   : > { %4269 = vrot.lane.b32.xlu1 %v5685_v16, %s5730_s4  ;;  %4484 = vrot.lane.b32.xlu0 %v5683_v45, %s5731_s5 }
 0x4fb   : > { %5688 = vtanh.f32 %v3442_v31  ;;  %v3552_v54 = vpop.f32.mrf.mxu2 }
 0x4fc   : > { %v3594_v46 = vadd.f32 %v3552_v54, %v8097_v35  ;;  %v3800_v56 = vpop.f32.mrf.mxu3  ;;  %v4248_v15 = vpop.permute.xlu2 %4247 }
 0x4fd   : > { %4336 = vst.msk [vmem:[%s6280_s15 + $0xa0] sm:$0xff] %vm4315_vm8, %v4248_v15  ;;  %v4457_v13 = vpop.permute.xlu1 %4456 }
 0x4fe   : > { %v3842_v17 = vadd.f32 %v3800_v56, %v3594_v46  ;;  %4549 = vst.msk [vmem:[%s6280_s15 + $0x80] sm:$0xff] %vm4532_vm9, %v4457_v13  ;;  %v3021_v60 = vpop.f32.mrf.mxu0  ;;  %v5687_v52 = vpop.eup %5686 }
 0x4ff   : > { %v3062_v38 = vadd.f32 %v3021_v60, %v2205_v1 }
 0x500   : > { %5690 = vtanh.f32 %v3842_v17  ;;  %v3405_v27 = vpop.f32.mrf.mxu1 }
 0x501   : > { %v5689_v41 = vpop.eup %5688  ;;  %v3443_v36 = vadd.f32 %v3402_v32, %v3062_v38 }
 0x502   : > { %4271 = vrot.lane.b32.xlu2 %v5689_v41, %s5730_s4  ;;  %4486 = vrot.lane.b32.xlu1 %v5687_v52, %s5731_s5 }
 0x503   : > { %5692 = vtanh.f32 %v3443_v36  ;;  %v3554_v50 = vpop.f32.mrf.mxu2 }
 0x504   : > { %v3595_v49 = vadd.f32 %v3554_v50, %v8100_v3  ;;  %v3802_v40 = vpop.f32.mrf.mxu3  ;;  %v4465_v20 = vpop.permute.xlu2 %4464 }
 0x505   : > { %4553 = vst.msk [vmem:[%s6280_s15 + $0xa0] sm:$0xff] %vm4532_vm9, %v4465_v20  ;;  %v4244_v51 = vpop.permute.xlu0 %4243 }
 0x506   : > { %v3843_v33 = vadd.f32 %v3802_v40, %v3595_v49  ;;  %4334 = vst.msk [vmem:[%s6280_s15 + $0x90] sm:$0xff] %vm4315_vm8, %v4244_v51  ;;  %v3024_v63 = vpop.f32.mrf.mxu0  ;;  %v5691_v11 = vpop.eup %5690 }
 0x507   : > { %v3063_v8 = vadd.f32 %v3024_v63, %v2208_v55 }
 0x508   : > { %5694 = vtanh.f32 %v3843_v33  ;;  %v3407_v44 = vpop.f32.mrf.mxu1 }
 0x509   : > { %v5693_v29 = vpop.eup %5692  ;;  %v3444_v4 = vadd.f32 %v3405_v27, %v3063_v8 }
 0x50a   : > { %4488 = vrot.lane.b32.xlu2 %v5691_v11, %s5731_s5  ;;  %4273 = vrot.lane.b32.xlu0 %v5693_v29, %s5730_s4 }
 0x50b   : > { %5696 = vtanh.f32 %v3444_v4  ;;  %v3557_v18 = vpop.f32.mrf.mxu2 }
 0x50c   : > { %v3596_v58 = vadd.f32 %v3557_v18, %v8103_v2  ;;  %v3805_v48 = vpop.f32.mrf.mxu3  ;;  %v4246_v7 = vpop.permute.xlu1 %4245 }
 0x50d   : > { %4335 = vst.msk [vmem:[%s6280_s15 + $0x98] sm:$0xff] %vm4315_vm8, %v4246_v7  ;;  %v4461_v14 = vpop.permute.xlu0 %4460 }
 0x50e   : > { %v3844_v59 = vadd.f32 %v3805_v48, %v3596_v58  ;;  %4551 = vst.msk [vmem:[%s6280_s15 + $0x90] sm:$0xff] %vm4532_vm9, %v4461_v14  ;;  %v3026_v19 = vpop.f32.mrf.mxu0  ;;  %v5695_v26 = vpop.eup %5694 }
 0x50f   : > { %v3064_v22 = vadd.f32 %v3026_v19, %v2210_v12 }
 0x510   : > { %5698 = vtanh.f32 %v3844_v59 }
 0x511   : > { %v5697_v25 = vpop.eup %5696  ;;  %v3445_v42 = vadd.f32 %v3407_v44, %v3064_v22 }
 0x512   : > { %4275 = vrot.lane.b32.xlu1 %v5697_v25, %s5730_s4  ;;  %4490 = vrot.lane.b32.xlu0 %v5695_v26, %s5731_s5 }
 0x513   : > { %5700 = vtanh.f32 %v3445_v42  ;;  %v3559_v10 = vpop.f32.mrf.mxu2 }
 0x514   : > { %v3597_v61 = vadd.f32 %v3559_v10, %v7299_v5  ;;  %v3807_v9 = vpop.f32.mrf.mxu3  ;;  %v4254_v30 = vpop.permute.xlu2 %4253 }
 0x515   : > { %4339 = vst.msk [vmem:[%s6280_s15 + $0xb8] sm:$0xff] %vm4315_vm8, %v4254_v30  ;;  %v4463_v34 = vpop.permute.xlu1 %4462 }
 0x516   : > { %4552 = vst.msk [vmem:[%s6280_s15 + $0x98] sm:$0xff] %vm4532_vm9, %v4463_v34  ;;  %v3845_v53 = vadd.f32 %v3807_v9, %v3597_v61  ;;  %v5699_v6 = vpop.eup %5698 }
 0x518   : > { %5702 = vtanh.f32 %v3845_v53 }
 0x519   : > { %v5701_v57 = vpop.eup %5700 }
 0x51a   : > { %4277 = vrot.lane.b32.xlu2 %v5701_v57, %s5730_s4  ;;  %4492 = vrot.lane.b32.xlu1 %v5699_v6, %s5731_s5 }
 0x51c   : > { %v4471_v5 = vpop.permute.xlu2 %4470  ;;  %v4250_v21 = vpop.permute.xlu0 %4249 }
 0x51d   : > { %4556 = vst.msk [vmem:[%s6280_s15 + $0xb8] sm:$0xff] %vm4532_vm9, %v4471_v5 }
 0x51e   : > { %4337 = vst.msk [vmem:[%s6280_s15 + $0xa8] sm:$0xff] %vm4315_vm8, %v4250_v21  ;;  %v5703_v0 = vpop.eup %5702 }
 0x522   : > { %4494 = vrot.lane.b32.xlu2 %v5703_v0, %s5731_s5 }
 0x524   : > { %v4252_v39 = vpop.permute.xlu1 %4251  ;;  %v4467_v23 = vpop.permute.xlu0 %4466 }
 0x525   : > { %4338 = vst.msk [vmem:[%s6280_s15 + $0xb0] sm:$0xff] %vm4315_vm8, %v4252_v39 }
 0x526   : > { %4554 = vst.msk [vmem:[%s6280_s15 + $0xa8] sm:$0xff] %vm4532_vm9, %v4467_v23 }
 0x52c   : > { %v4260_v45 = vpop.permute.xlu2 %4259  ;;  %v4469_v16 = vpop.permute.xlu1 %4468 }
 0x52d   : > { %4342 = vst.msk [vmem:[%s6280_s15 + $0xd0] sm:$0xff] %vm4315_vm8, %v4260_v45 }
 0x52e   : > { %4555 = vst.msk [vmem:[%s6280_s15 + $0xb0] sm:$0xff] %vm4532_vm9, %v4469_v16 }
 0x534   : > { %v4477_v31 = vpop.permute.xlu2 %4476  ;;  %v4256_v32 = vpop.permute.xlu0 %4255 }
 0x535   : > { %4559 = vst.msk [vmem:[%s6280_s15 + $0xd0] sm:$0xff] %vm4532_vm9, %v4477_v31 }
 0x536   : > { %4340 = vst.msk [vmem:[%s6280_s15 + $0xc0] sm:$0xff] %vm4315_vm8, %v4256_v32 }
 0x53c   : > { %v4258_v54 = vpop.permute.xlu1 %4257  ;;  %v4473_v35 = vpop.permute.xlu0 %4472 }
 0x53d   : > { %4341 = vst.msk [vmem:[%s6280_s15 + $0xc8] sm:$0xff] %vm4315_vm8, %v4258_v54 }
 0x53e   : > { %4557 = vst.msk [vmem:[%s6280_s15 + $0xc0] sm:$0xff] %vm4532_vm9, %v4473_v35 }
 0x544   : > { %v4266_v46 = vpop.permute.xlu2 %4265  ;;  %v4475_v56 = vpop.permute.xlu1 %4474 }
 0x545   : > { %4345 = vst.msk [vmem:[%s6280_s15 + $0xe8] sm:$0xff] %vm4315_vm8, %v4266_v46 }
 0x546   : > { %4558 = vst.msk [vmem:[%s6280_s15 + $0xc8] sm:$0xff] %vm4532_vm9, %v4475_v56 }
 0x54c   : > { %v4483_v15 = vpop.permute.xlu2 %4482  ;;  %v4262_v37 = vpop.permute.xlu0 %4261 }
 0x54d   : > { %4562 = vst.msk [vmem:[%s6280_s15 + $0xe8] sm:$0xff] %vm4532_vm9, %v4483_v15 }
 0x54e   : > { %4343 = vst.msk [vmem:[%s6280_s15 + $0xd8] sm:$0xff] %vm4315_vm8, %v4262_v37 }
 0x554   : > { %v4264_v28 = vpop.permute.xlu1 %4263  ;;  %v4479_v1 = vpop.permute.xlu0 %4478 }
 0x555   : > { %4344 = vst.msk [vmem:[%s6280_s15 + $0xe0] sm:$0xff] %vm4315_vm8, %v4264_v28 }
 0x556   : > { %4560 = vst.msk [vmem:[%s6280_s15 + $0xd8] sm:$0xff] %vm4532_vm9, %v4479_v1 }
 0x55c   : > { %v4272_v13 = vpop.permute.xlu2 %4271  ;;  %v4481_v17 = vpop.permute.xlu1 %4480 }
 0x55d   : > { %4348 = vst.msk [vmem:[%s6280_s15 + $0x100] sm:$0xff] %vm4315_vm8, %v4272_v13 }
 0x55e   : > { %4561 = vst.msk [vmem:[%s6280_s15 + $0xe0] sm:$0xff] %vm4532_vm9, %v4481_v17 }
 0x564   : > { %v4489_v60 = vpop.permute.xlu2 %4488  ;;  %v4268_v38 = vpop.permute.xlu0 %4267 }
 0x565   : > { %4565 = vst.msk [vmem:[%s6280_s15 + $0x100] sm:$0xff] %vm4532_vm9, %v4489_v60 }
 0x566   : > { %4346 = vst.msk [vmem:[%s6280_s15 + $0xf0] sm:$0xff] %vm4315_vm8, %v4268_v38 }
 0x56c   : > { %v4270_v52 = vpop.permute.xlu1 %4269  ;;  %v4485_v41 = vpop.permute.xlu0 %4484 }
 0x56d   : > { %4347 = vst.msk [vmem:[%s6280_s15 + $0xf8] sm:$0xff] %vm4315_vm8, %v4270_v52 }
 0x56e   : > { %4563 = vst.msk [vmem:[%s6280_s15 + $0xf0] sm:$0xff] %vm4532_vm9, %v4485_v41 }
 0x574   : > { %v4278_v36 = vpop.permute.xlu2 %4277  ;;  %v4487_v50 = vpop.permute.xlu1 %4486 }
 0x575   : > { %4351 = vst.msk [vmem:[%s6280_s15 + $0x118] sm:$0xff] %vm4315_vm8, %v4278_v36 }
 0x576   : > { %4564 = vst.msk [vmem:[%s6280_s15 + $0xf8] sm:$0xff] %vm4532_vm9, %v4487_v50 }
 0x57c   : > { %v4495_v3 = vpop.permute.xlu2 %4494  ;;  %v4274_v49 = vpop.permute.xlu0 %4273 }
 0x57d   : > { %4568 = vst.msk [vmem:[%s6280_s15 + $0x118] sm:$0xff] %vm4532_vm9, %v4495_v3 }
 0x57e   : > { %4349 = vst.msk [vmem:[%s6280_s15 + $0x108] sm:$0xff] %vm4315_vm8, %v4274_v49 }
 0x584   : > { %v4276_v40 = vpop.permute.xlu1 %4275  ;;  %v4491_v20 = vpop.permute.xlu0 %4490 }
 0x585   : > { %4350 = vst.msk [vmem:[%s6280_s15 + $0x110] sm:$0xff] %vm4315_vm8, %v4276_v40 }
 0x586   : > { %4566 = vst.msk [vmem:[%s6280_s15 + $0x108] sm:$0xff] %vm4532_vm9, %v4491_v20 }
 0x58c   : > { %v4493_v24 = vpop.permute.xlu1 %4492 }
 0x58d   : > { %4567 = vst.msk [vmem:[%s6280_s15 + $0x110] sm:$0xff] %vm4532_vm9, %v4493_v24 }
 0x58e PF: > { %s12_s9 = sadd.s32 1, %s5727_s9  }
 0x58f   : > { %p9_p4 = scmp.ge.s32.totalorder %s12_s9, 4  }
 0x591   :  { %11 = sbr.rel (!%p9_p4) target bundleno = 1 (0x1), region = 73 }

</bundles_post_ra>
